<compile_context>
chip_gen: v7x
topology: tpu7x:2x2x1
jax: 0.10.0
libtpu: 0.0.40
codegen_flags: <defaults>
</compile_context>

<pallas_src>
import functools
import math

import jax
import jax.numpy as jnp
from jax.experimental import pallas as pl
from jax.experimental.pallas import tpu as pltpu

LANE = 128
_VMEM_LIMIT = 32 * 1024 * 1024


def _round_up(x, m):
    return ((x + m - 1) // m) * m


def _pick_bt(n):
    for bt in (8, 4, 2, 1):
        if n % bt == 0:
            return bt
    return 1


def _conv_geo(h, w, first):
    """Static geometry for one ConvBase block on the flattened spatial grid."""
    hd, wd = (h - 3) // 2 + 1, (w - 3) // 2 + 1
    wp = w if first else w + 4                      # im2col grid has no width padding
    r_max = 2 * (hd - 1) + 2
    rows = _round_up(max(h * wp, r_max * wp + 2 * wd + 1), 8)
    lin = rows if first else _round_up(rows + 4 * wp + 4, 8)
    return dict(h=h, w=w, wp=wp, hd=hd, wd=wd, rows=rows, lin=lin,
                taps=(1 if first else 25))


# ----------------------------- Pallas kernels -----------------------------

def _conv_pool_kernel(x_ref, w_ref, b_ref, o_ref, y_scr, hrow_scr, *,
                      bt, taps, wp, rows, hd, wd, out_stride, out_base,
                      zero_out, chunk):
    """Fused 5x5 conv (K-folded or 25 taps) + 3x3/s2 max-pool + bias + ReLU.

    x_ref : (bt, lin, K)        bf16   flattened spatially-padded input slab
    w_ref : (taps, K, coutp)    bf16
    b_ref : (1, coutp)          f32
    o_ref : (bt, out_rows, coutp) bf16 (next block's flattened layout, or NHWC flat)
    y_scr : (rows, coutp)       f32    conv output on the flattened grid
    hrow_scr : (seg_pad, coutp) f32    one horizontally+vertically pooled row
    """
    if zero_out:
        o_ref[...] = jnp.zeros_like(o_ref)          # exact conv zero-padding for next block
    bias = b_ref[...]                               # (1, coutp), hoisted
    seg = 2 * wd - 1
    offs = [0] if taps == 1 else [(t // 5) * wp + (t % 5) for t in range(25)]

    for b in range(bt):
        # ---- conv: register-chunked accumulation of the shifted MXU taps ----
        for c0 in range(0, rows, chunk):
            cr = min(chunk, rows - c0)
            acc = None
            for t, off in enumerate(offs):
                a = x_ref[b, c0 + off:c0 + off + cr, :]
                d = jnp.dot(a, w_ref[t], preferred_element_type=jnp.float32)
                acc = d if acc is None else acc + d
            y_scr[c0:c0 + cr, :] = acc              # one store per chunk

        # ---- 3x3 stride-2 max pool: h-max of 3 shifts, v-max of 3 rows,
        #      one stride-2 subsample per output row; bias + ReLU after pool ----
        for i in range(hd):
            vmax = None
            for pi in range(3):
                base = (2 * i + pi) * wp
                hmax = jnp.maximum(
                    jnp.maximum(y_scr[base:base + seg, :],
                                y_scr[base + 1:base + 1 + seg, :]),
                    y_scr[base + 2:base + 2 + seg, :])
                vmax = hmax if vmax is None else jnp.maximum(vmax, hmax)
            hrow_scr[0:seg, :] = vmax
            row = hrow_scr[pl.ds(0, wd, stride=2), :]
            o0 = out_base + i * out_stride
            o_ref[b, o0:o0 + wd, :] = jnp.maximum(row + bias, 0.0).astype(o_ref.dtype)


def _fc_fused_kernel(*refs, n_layers, final_relu):
    """Fused stack of Linear (+ReLU) layers.  refs = (x, w1, b1, ..., wN, bN, out)."""
    x_ref = refs[0]
    o_ref = refs[-1]
    h = x_ref[...]                                  # bf16 batch tile
    for li in range(n_layers):
        w_ref = refs[1 + 2 * li]
        b_ref = refs[2 + 2 * li]
        y = jnp.dot(h, w_ref[...], preferred_element_type=jnp.float32) + b_ref[...]
        if li < n_layers - 1 or final_relu:
            y = jnp.maximum(y, 0.0)
        if li < n_layers - 1:
            h = y.astype(jnp.bfloat16)
        else:
            o_ref[...] = y


# ----------------------------- wrappers -----------------------------

def conv_block_pallas(x, layer, geo, *, out_rows, out_stride, out_base, zero_out, bt):
    n = x.shape[0]
    taps, kdim, coutp = layer["w"].shape
    assert x.shape[1] == geo["lin"] and x.shape[2] == kdim
    chunk = 128 if taps == 1 else 64
    seg_pad = _round_up(2 * geo["wd"] - 1, 8)
    kernel = functools.partial(
        _conv_pool_kernel, bt=bt, taps=taps, wp=geo["wp"], rows=geo["rows"],
        hd=geo["hd"], wd=geo["wd"], out_stride=out_stride, out_base=out_base,
        zero_out=zero_out, chunk=chunk)
    return pl.pallas_call(
        kernel,
        out_shape=jax.ShapeDtypeStruct((n, out_rows, coutp), jnp.bfloat16),
        grid=(n // bt,),
        in_specs=[
            pl.BlockSpec((bt, geo["lin"], kdim), lambda i: (i, 0, 0)),
            pl.BlockSpec(layer["w"].shape, lambda i: (0, 0, 0)),
            pl.BlockSpec(layer["b"].shape, lambda i: (0, 0)),
        ],
        out_specs=pl.BlockSpec((bt, out_rows, coutp), lambda i: (i, 0, 0)),
        scratch_shapes=[pltpu.VMEM((geo["rows"], coutp), jnp.float32),
                        pltpu.VMEM((seg_pad, coutp), jnp.float32)],
        compiler_params=pltpu.CompilerParams(
            dimension_semantics=("parallel",),
            vmem_limit_bytes=_VMEM_LIMIT),
    )(x, layer["w"], layer["b"])


def fc_stack_pallas(x, layers, final_relu=False):
    """Fused FC stack, gridded over batch row tiles; weights stay VMEM-resident."""
    n, din = x.shape
    dinp = layers[0]["w"].shape[0]
    if dinp != din:
        x = jnp.pad(x, ((0, 0), (0, dinp - din)))
    doutp = layers[-1]["w"].shape[1]

    np_ = _round_up(n, 8)
    tile_m = min(np_, 128)
    np_ = _round_up(np_, tile_m)
    if np_ != n:
        x = jnp.pad(x, ((0, np_ - n), (0, 0)))
    x = x.astype(jnp.bfloat16)

    args = [x]
    in_specs = [pl.BlockSpec((tile_m, dinp), lambda i: (i, 0))]
    for layer in layers:
        args += [layer["w"], layer["b"]]
        in_specs += [pl.BlockSpec(layer["w"].shape, lambda i: (0, 0)),
                     pl.BlockSpec(layer["b"].shape, lambda i: (0, 0))]

    kernel = functools.partial(_fc_fused_kernel,
                               n_layers=len(layers), final_relu=final_relu)
    out = pl.pallas_call(
        kernel,
        out_shape=jax.ShapeDtypeStruct((np_, doutp), jnp.float32),
        grid=(np_ // tile_m,),
        in_specs=in_specs,
        out_specs=pl.BlockSpec((tile_m, doutp), lambda i: (i, 0)),
        compiler_params=pltpu.CompilerParams(
            dimension_semantics=("parallel",),
            vmem_limit_bytes=_VMEM_LIMIT),
    )(*args)
    return out[:n]


# ----------------------------- XLA glue (layout only) -----------------------------

def _im2col_first(x_nchw, geo, kdim):
    """Layer-1 im2col: (N,3,H,W) -> (N, rows, kdim) bf16 with K = 25*cin (pad to 128)."""
    n = x_nchw.shape[0]
    h, w = geo["h"], geo["w"]
    x = jnp.transpose(x_nchw, (0, 2, 3, 1)).astype(jnp.float32)
    xp = jnp.pad(x, ((0, 0), (2, 2), (2, 2), (0, 0)))
    cols = [xp[:, ky:ky + h, kx:kx + w, :] for ky in range(5) for kx in range(5)]
    col = jnp.concatenate(cols, axis=-1).reshape(n, h * w, 25 * x.shape[-1])
    col = jnp.pad(col, ((0, 0), (0, geo["rows"] - h * w), (0, kdim - col.shape[-1])))
    return col.astype(jnp.bfloat16)


def _next_layout_to_nchw(act, geo, cout):
    """Early-exit helper: recover NCHW f32 from a block's flattened-padded input slab."""
    n, _, cp = act.shape
    h, w, wp = geo["h"], geo["w"], geo["wp"]
    x = act[:, :(h + 4) * wp, :].reshape(n, h + 4, wp, cp)[:, 2:2 + h, 2:2 + w, :cout]
    return jnp.transpose(x, (0, 3, 1, 2)).astype(jnp.float32)


# ----------------------------- model setup -----------------------------

def init_params(key, num_classes=10, conv_depth=3, fc_depth=3):
    """Synthetic params with the same shapes / init scheme as ConvFCDepthBase."""
    params = {"conv": [], "fc": []}
    chans = [(3, 32)]
    dim = 32
    for _ in range(conv_depth - 1):
        chans.append((dim, dim * 2))
        dim *= 2
    keys = jax.random.split(key, conv_depth + fc_depth)
    k = 0
    for cin, cout in chans:
        nfan = 5 * 5 * cout                          # module uses k*k*out_channels
        w = jax.random.normal(keys[k], (cout, cin, 5, 5), jnp.float32) * math.sqrt(2.0 / nfan)
        b = jnp.zeros((cout,), jnp.float32)          # module zeroes conv biases
        params["conv"].append((w, b))
        k += 1
    fc_dims = [(1152, 1000)] + [(1000, 1000)] * (fc_depth - 2) + [(1000, num_classes)]
    for din, dout in fc_dims:
        bound = 1.0 / math.sqrt(din)                 # nn.Linear default init
        kw, kb = jax.random.split(keys[k])
        w = jax.random.uniform(kw, (dout, din), jnp.float32, -bound, bound)
        b = jax.random.uniform(kb, (dout,), jnp.float32, -bound, bound)
        params["fc"].append((w, b))
        k += 1
    return params


def prepare_params(params, in_channels=3, in_hw=32):
    """Convert PyTorch-layout params into lane-dense bf16 kernel operands."""
    kp = {"conv": [], "fc": [], "geo": []}

    h = w = in_hw
    for li in range(len(params["conv"])):
        g = _conv_geo(h, w, first=(li == 0))
        kp["geo"].append(g)
        h, w = g["hd"], g["wd"]

    for li, (w_oihw, b) in enumerate(params["conv"]):
        cout, cin, kh, kw = w_oihw.shape
        coutp = _round_up(cout, LANE)
        if li == 0:
            # fold all taps into the contraction dim (im2col layer): K = kh*kw*cin -> 128
            wc = jnp.transpose(w_oihw, (2, 3, 1, 0)).reshape(kh * kw * cin, cout)
            kdim = _round_up(kh * kw * cin, LANE)
            wc = jnp.pad(wc, ((0, kdim - kh * kw * cin), (0, coutp - cout)))
            w_k = wc.reshape(1, kdim, coutp)
        else:
            cinp = kp["conv"][li - 1]["w"].shape[2]          # previous coutp
            w_taps = jnp.transpose(w_oihw, (2, 3, 1, 0)).reshape(kh * kw, cin, cout)
            w_k = jnp.pad(w_taps, ((0, 0), (0, cinp - cin), (0, coutp - cout)))
        kp["conv"].append({
            "w": w_k.astype(jnp.bfloat16),
            "b": jnp.pad(b, (0, coutp - cout)).reshape(1, coutp).astype(jnp.float32),
            "cout": cout,
        })

    glast = kp["geo"][-1]
    c_last = kp["conv"][-1]["cout"]
    coutp_last = kp["conv"][-1]["w"].shape[2]
    hd, wd = glast["hd"], glast["wd"]

    for li, (w_oi, bv) in enumerate(params["fc"]):
        dout, din = w_oi.shape
        doutp = _round_up(dout, LANE)
        if li == 0:
            # fold the PyTorch NCHW flatten into fc0's rows (NHWC + padded channels)
            assert din == c_last * hd * wd
            wt = jnp.transpose(w_oi).reshape(c_last, hd, wd, dout).transpose(1, 2, 0, 3)
            wt = jnp.pad(wt, ((0, 0), (0, 0), (0, coutp_last - c_last), (0, doutp - dout)))
            w_p = wt.reshape(hd * wd * coutp_last, doutp)
            if w_p.shape[0] % LANE:
                w_p = jnp.pad(w_p, ((0, _round_up(w_p.shape[0], LANE) - w_p.shape[0]), (0, 0)))
        else:
            dinp = _round_up(din, LANE)
            w_p = jnp.pad(jnp.transpose(w_oi), ((0, dinp - din), (0, doutp - dout)))
        kp["fc"].append({
            "w": w_p.astype(jnp.bfloat16),
            "b": jnp.pad(bv, (0, doutp - dout)).reshape(1, doutp).astype(jnp.float32),
            "dout": dout,
        })
    return kp


def convfc_forward(kparams, x_nchw, N=-1):
    """Mirror ConvFCDepthBase.forward (NCHW input, optional early exit at depth N)."""
    conv_layers, fc_layers, geos = kparams["conv"], kparams["fc"], kparams["geo"]
    n = x_nchw.shape[0]
    bt = _pick_bt(n)
    nconv = len(conv_layers)
    depth = 0
    act = None

    for li, layer in enumerate(conv_layers):
        if depth == N:
            if li == 0:
                return x_nchw
            return _next_layout_to_nchw(act, geos[li], conv_layers[li - 1]["cout"])
        depth += 1
        if li == 0:
            act = _im2col_first(x_nchw, geos[0], layer["w"].shape[1])
        if li == nconv - 1:                                   # last block -> NHWC flat slab
            out_rows = geos[li]["hd"] * geos[li]["wd"]
            out_stride, out_base, zero_out = geos[li]["wd"], 0, False
        else:                                                 # emit next block's layout
            ng = geos[li + 1]
            out_rows = ng["lin"]
            out_stride, out_base, zero_out = ng["wp"], 2 * ng["wp"] + 2, True
        act = conv_block_pallas(act, layer, geos[li], out_rows=out_rows,
                                out_stride=out_stride, out_base=out_base,
                                zero_out=zero_out, bt=bt)

    glast = geos[-1]
    clast = conv_layers[-1]
    coutp = clast["w"].shape[2]
    if depth == N:
        # PyTorch NCHW flatten (only materialized on this early-exit path)
        xi = act.reshape(n, glast["hd"], glast["wd"], coutp)[..., :clast["cout"]]
        return jnp.transpose(xi, (0, 3, 1, 2)).reshape(n, -1).astype(jnp.float32)

    x_fc = act.reshape(n, glast["hd"] * glast["wd"] * coutp)  # contiguous, flatten folded in fc0
    nfc = len(fc_layers)
    k_apply = nfc if (N < 0 or N - depth >= nfc) else (N - depth)
    layers = fc_layers[:k_apply]
    y = fc_stack_pallas(x_fc, layers, final_relu=(k_apply < nfc))
    return y[:, :layers[-1]["dout"]]


if __name__ == "__main__":
    key = jax.random.PRNGKey(0)
    pkey, xkey = jax.random.split(key)
    params = init_params(pkey, num_classes=10, conv_depth=3, fc_depth=3)
    kparams = prepare_params(params, in_channels=3, in_hw=32)
    # 3x32x32 input (CIFAR-like) so the flattened conv output is 128*3*3 = 1152.
    x = jax.random.normal(xkey, (2, 3, 32, 32), jnp.float32)   # NCHW like PyTorch
    out = convfc_forward(kparams, x)
    out = jax.block_until_ready(out)
    assert out.shape == (2, 10) and out.dtype == jnp.float32
    assert bool(jnp.all(jnp.isfinite(out)))
    print("KERNEL_OK")
</pallas_src>

<mosaic_0001>
module attributes {stable_mosaic.version = 11 : i64} {
  func.func @_conv_pool_kernel(%arg0: i32, %arg1: memref<2x1024x128xbf16, #tpu.memory_space<vmem>>, %arg2: memref<1x128x128xbf16, #tpu.memory_space<vmem>>, %arg3: memref<1x128xf32, #tpu.memory_space<vmem>>, %arg4: memref<2x368x128xbf16, #tpu.memory_space<vmem>>, %arg5: memref<1024x128xf32, #tpu.memory_space<vmem>>, %arg6: memref<32x128xf32, #tpu.memory_space<vmem>>) attributes {dimension_semantics = [#tpu.dimension_semantics<parallel>], iteration_bounds = array<i64: 1>, scalar_prefetch = 0 : i64, scratch_operands = 2 : i64, tpu.core_type = #tpu.core_type<tc>, window_params = [{transform_indices = @transform_0, window_bounds = array<i64: 2, 1024, 128>}, {pipeline_mode = #tpu.pipeline_mode<synchronous>, transform_indices = @transform_1, window_bounds = array<i64: 1, 128, 128>}, {pipeline_mode = #tpu.pipeline_mode<synchronous>, transform_indices = @transform_2, window_bounds = array<i64: 1, 128>}, {transform_indices = @transform_3, window_bounds = array<i64: 2, 368, 128>}]} {
    %cst = arith.constant 0.000000e+00 : bf16
    %0 = vector.broadcast %cst : bf16 to vector<2x368x128xbf16>
    %c0 = arith.constant 0 : index
    %c0_0 = arith.constant 0 : index
    %c0_1 = arith.constant 0 : index
    %1 = vector.load %arg4[%c0, %c0_0, %c0_1] : memref<2x368x128xbf16, #tpu.memory_space<vmem>>, vector<2x368x128xbf16>
    tpu.vector_store %arg4[%c0, %c0_0, %c0_1], %0 {strides = array<i32>} : memref<2x368x128xbf16, #tpu.memory_space<vmem>>, vector<2x368x128xbf16>,
    %c0_2 = arith.constant 0 : index
    %c0_3 = arith.constant 0 : index
    %2 = vector.load %arg3[%c0_2, %c0_3] : memref<1x128xf32, #tpu.memory_space<vmem>>, vector<1x128xf32>
    %c0_4 = arith.constant 0 : index
    %c0_5 = arith.constant 0 : index
    %c0_6 = arith.constant 0 : index
    %3 = vector.load %arg1[%c0_4, %c0_5, %c0_6] : memref<2x1024x128xbf16, #tpu.memory_space<vmem>>, vector<1x128x128xbf16>
    %4 = vector.shape_cast %3 : vector<1x128x128xbf16> to vector<128x128xbf16>
    %c0_7 = arith.constant 0 : index
    %c0_8 = arith.constant 0 : index
    %c0_9 = arith.constant 0 : index
    %5 = vector.load %arg2[%c0_7, %c0_8, %c0_9] : memref<1x128x128xbf16, #tpu.memory_space<vmem>>, vector<1x128x128xbf16>
    %6 = vector.shape_cast %5 : vector<1x128x128xbf16> to vector<128x128xbf16>
    %cst_10 = arith.constant dense<0.000000e+00> : vector<128x128xf32>
    %7 = tpu.matmul %4, %6, %cst_10 {dimension_numbers = #tpu.dot_dimension_numbers<[1], [0], [0], [1], [0, 0, 1, 1], [], []>} : vector<128x128xbf16>, vector<128x128xbf16>, vector<128x128xf32> -> vector<128x128xf32>
    %c0_11 = arith.constant 0 : index
    %c0_12 = arith.constant 0 : index
    %8 = vector.load %arg5[%c0_11, %c0_12] : memref<1024x128xf32, #tpu.memory_space<vmem>>, vector<128x128xf32>
    tpu.vector_store %arg5[%c0_11, %c0_12], %7 {strides = array<i32>} : memref<1024x128xf32, #tpu.memory_space<vmem>>, vector<128x128xf32>,
    %c0_13 = arith.constant 0 : index
    %c128 = arith.constant 128 : index
    %c0_14 = arith.constant 0 : index
    %9 = vector.load %arg1[%c0_13, %c128, %c0_14] : memref<2x1024x128xbf16, #tpu.memory_space<vmem>>, vector<1x128x128xbf16>
    %10 = vector.shape_cast %9 : vector<1x128x128xbf16> to vector<128x128xbf16>
    %c0_15 = arith.constant 0 : index
    %c0_16 = arith.constant 0 : index
    %c0_17 = arith.constant 0 : index
    %11 = vector.load %arg2[%c0_15, %c0_16, %c0_17] : memref<1x128x128xbf16, #tpu.memory_space<vmem>>, vector<1x128x128xbf16>
    %12 = vector.shape_cast %11 : vector<1x128x128xbf16> to vector<128x128xbf16>
    %cst_18 = arith.constant dense<0.000000e+00> : vector<128x128xf32>
    %13 = tpu.matmul %10, %12, %cst_18 {dimension_numbers = #tpu.dot_dimension_numbers<[1], [0], [0], [1], [0, 0, 1, 1], [], []>} : vector<128x128xbf16>, vector<128x128xbf16>, vector<128x128xf32> -> vector<128x128xf32>
    %c128_19 = arith.constant 128 : index
    %c0_20 = arith.constant 0 : index
    %14 = vector.load %arg5[%c128_19, %c0_20] : memref<1024x128xf32, #tpu.memory_space<vmem>>, vector<128x128xf32>
    tpu.vector_store %arg5[%c128_19, %c0_20], %13 {strides = array<i32>} : memref<1024x128xf32, #tpu.memory_space<vmem>>, vector<128x128xf32>,
    %c0_21 = arith.constant 0 : index
    %c256 = arith.constant 256 : index
    %c0_22 = arith.constant 0 : index
    %15 = vector.load %arg1[%c0_21, %c256, %c0_22] : memref<2x1024x128xbf16, #tpu.memory_space<vmem>>, vector<1x128x128xbf16>
    %16 = vector.shape_cast %15 : vector<1x128x128xbf16> to vector<128x128xbf16>
    %c0_23 = arith.constant 0 : index
    %c0_24 = arith.constant 0 : index
    %c0_25 = arith.constant 0 : index
    %17 = vector.load %arg2[%c0_23, %c0_24, %c0_25] : memref<1x128x128xbf16, #tpu.memory_space<vmem>>, vector<1x128x128xbf16>
    %18 = vector.shape_cast %17 : vector<1x128x128xbf16> to vector<128x128xbf16>
    %cst_26 = arith.constant dense<0.000000e+00> : vector<128x128xf32>
    %19 = tpu.matmul %16, %18, %cst_26 {dimension_numbers = #tpu.dot_dimension_numbers<[1], [0], [0], [1], [0, 0, 1, 1], [], []>} : vector<128x128xbf16>, vector<128x128xbf16>, vector<128x128xf32> -> vector<128x128xf32>
    %c256_27 = arith.constant 256 : index
    %c0_28 = arith.constant 0 : index
    %20 = vector.load %arg5[%c256_27, %c0_28] : memref<1024x128xf32, #tpu.memory_space<vmem>>, vector<128x128xf32>
    tpu.vector_store %arg5[%c256_27, %c0_28], %19 {strides = array<i32>} : memref<1024x128xf32, #tpu.memory_space<vmem>>, vector<128x128xf32>,
    %c0_29 = arith.constant 0 : index
    %c384 = arith.constant 384 : index
    %c0_30 = arith.constant 0 : index
    %21 = vector.load %arg1[%c0_29, %c384, %c0_30] : memref<2x1024x128xbf16, #tpu.memory_space<vmem>>, vector<1x128x128xbf16>
    %22 = vector.shape_cast %21 : vector<1x128x128xbf16> to vector<128x128xbf16>
    %c0_31 = arith.constant 0 : index
    %c0_32 = arith.constant 0 : index
    %c0_33 = arith.constant 0 : index
    %23 = vector.load %arg2[%c0_31, %c0_32, %c0_33] : memref<1x128x128xbf16, #tpu.memory_space<vmem>>, vector<1x128x128xbf16>
    %24 = vector.shape_cast %23 : vector<1x128x128xbf16> to vector<128x128xbf16>
    %cst_34 = arith.constant dense<0.000000e+00> : vector<128x128xf32>
    %25 = tpu.matmul %22, %24, %cst_34 {dimension_numbers = #tpu.dot_dimension_numbers<[1], [0], [0], [1], [0, 0, 1, 1], [], []>} : vector<128x128xbf16>, vector<128x128xbf16>, vector<128x128xf32> -> vector<128x128xf32>
    %c384_35 = arith.constant 384 : index
    %c0_36 = arith.constant 0 : index
    %26 = vector.load %arg5[%c384_35, %c0_36] : memref<1024x128xf32, #tpu.memory_space<vmem>>, vector<128x128xf32>
    tpu.vector_store %arg5[%c384_35, %c0_36], %25 {strides = array<i32>} : memref<1024x128xf32, #tpu.memory_space<vmem>>, vector<128x128xf32>,
    %c0_37 = arith.constant 0 : index
    %c512 = arith.constant 512 : index
    %c0_38 = arith.constant 0 : index
    %27 = vector.load %arg1[%c0_37, %c512, %c0_38] : memref<2x1024x128xbf16, #tpu.memory_space<vmem>>, vector<1x128x128xbf16>
    %28 = vector.shape_cast %27 : vector<1x128x128xbf16> to vector<128x128xbf16>
    %c0_39 = arith.constant 0 : index
    %c0_40 = arith.constant 0 : index
    %c0_41 = arith.constant 0 : index
    %29 = vector.load %arg2[%c0_39, %c0_40, %c0_41] : memref<1x128x128xbf16, #tpu.memory_space<vmem>>, vector<1x128x128xbf16>
    %30 = vector.shape_cast %29 : vector<1x128x128xbf16> to vector<128x128xbf16>
    %cst_42 = arith.constant dense<0.000000e+00> : vector<128x128xf32>
    %31 = tpu.matmul %28, %30, %cst_42 {dimension_numbers = #tpu.dot_dimension_numbers<[1], [0], [0], [1], [0, 0, 1, 1], [], []>} : vector<128x128xbf16>, vector<128x128xbf16>, vector<128x128xf32> -> vector<128x128xf32>
    %c512_43 = arith.constant 512 : index
    %c0_44 = arith.constant 0 : index
    %32 = vector.load %arg5[%c512_43, %c0_44] : memref<1024x128xf32, #tpu.memory_space<vmem>>, vector<128x128xf32>
    tpu.vector_store %arg5[%c512_43, %c0_44], %31 {strides = array<i32>} : memref<1024x128xf32, #tpu.memory_space<vmem>>, vector<128x128xf32>,
    %c0_45 = arith.constant 0 : index
    %c640 = arith.constant 640 : index
    %c0_46 = arith.constant 0 : index
    %33 = vector.load %arg1[%c0_45, %c640, %c0_46] : memref<2x1024x128xbf16, #tpu.memory_space<vmem>>, vector<1x128x128xbf16>
    %34 = vector.shape_cast %33 : vector<1x128x128xbf16> to vector<128x128xbf16>
    %c0_47 = arith.constant 0 : index
    %c0_48 = arith.constant 0 : index
    %c0_49 = arith.constant 0 : index
    %35 = vector.load %arg2[%c0_47, %c0_48, %c0_49] : memref<1x128x128xbf16, #tpu.memory_space<vmem>>, vector<1x128x128xbf16>
    %36 = vector.shape_cast %35 : vector<1x128x128xbf16> to vector<128x128xbf16>
    %cst_50 = arith.constant dense<0.000000e+00> : vector<128x128xf32>
    %37 = tpu.matmul %34, %36, %cst_50 {dimension_numbers = #tpu.dot_dimension_numbers<[1], [0], [0], [1], [0, 0, 1, 1], [], []>} : vector<128x128xbf16>, vector<128x128xbf16>, vector<128x128xf32> -> vector<128x128xf32>
    %c640_51 = arith.constant 640 : index
    %c0_52 = arith.constant 0 : index
    %38 = vector.load %arg5[%c640_51, %c0_52] : memref<1024x128xf32, #tpu.memory_space<vmem>>, vector<128x128xf32>
    tpu.vector_store %arg5[%c640_51, %c0_52], %37 {strides = array<i32>} : memref<1024x128xf32, #tpu.memory_space<vmem>>, vector<128x128xf32>,
    %c0_53 = arith.constant 0 : index
    %c768 = arith.constant 768 : index
    %c0_54 = arith.constant 0 : index
    %39 = vector.load %arg1[%c0_53, %c768, %c0_54] : memref<2x1024x128xbf16, #tpu.memory_space<vmem>>, vector<1x128x128xbf16>
    %40 = vector.shape_cast %39 : vector<1x128x128xbf16> to vector<128x128xbf16>
    %c0_55 = arith.constant 0 : index
    %c0_56 = arith.constant 0 : index
    %c0_57 = arith.constant 0 : index
    %41 = vector.load %arg2[%c0_55, %c0_56, %c0_57] : memref<1x128x128xbf16, #tpu.memory_space<vmem>>, vector<1x128x128xbf16>
    %42 = vector.shape_cast %41 : vector<1x128x128xbf16> to vector<128x128xbf16>
    %cst_58 = arith.constant dense<0.000000e+00> : vector<128x128xf32>
    %43 = tpu.matmul %40, %42, %cst_58 {dimension_numbers = #tpu.dot_dimension_numbers<[1], [0], [0], [1], [0, 0, 1, 1], [], []>} : vector<128x128xbf16>, vector<128x128xbf16>, vector<128x128xf32> -> vector<128x128xf32>
    %c768_59 = arith.constant 768 : index
    %c0_60 = arith.constant 0 : index
    %44 = vector.load %arg5[%c768_59, %c0_60] : memref<1024x128xf32, #tpu.memory_space<vmem>>, vector<128x128xf32>
    tpu.vector_store %arg5[%c768_59, %c0_60], %43 {strides = array<i32>} : memref<1024x128xf32, #tpu.memory_space<vmem>>, vector<128x128xf32>,
    %c0_61 = arith.constant 0 : index
    %c896 = arith.constant 896 : index
    %c0_62 = arith.constant 0 : index
    %45 = vector.load %arg1[%c0_61, %c896, %c0_62] : memref<2x1024x128xbf16, #tpu.memory_space<vmem>>, vector<1x128x128xbf16>
    %46 = vector.shape_cast %45 : vector<1x128x128xbf16> to vector<128x128xbf16>
    %c0_63 = arith.constant 0 : index
    %c0_64 = arith.constant 0 : index
    %c0_65 = arith.constant 0 : index
    %47 = vector.load %arg2[%c0_63, %c0_64, %c0_65] : memref<1x128x128xbf16, #tpu.memory_space<vmem>>, vector<1x128x128xbf16>
    %48 = vector.shape_cast %47 : vector<1x128x128xbf16> to vector<128x128xbf16>
    %cst_66 = arith.constant dense<0.000000e+00> : vector<128x128xf32>
    %49 = tpu.matmul %46, %48, %cst_66 {dimension_numbers = #tpu.dot_dimension_numbers<[1], [0], [0], [1], [0, 0, 1, 1], [], []>} : vector<128x128xbf16>, vector<128x128xbf16>, vector<128x128xf32> -> vector<128x128xf32>
    %c896_67 = arith.constant 896 : index
    %c0_68 = arith.constant 0 : index
    %50 = vector.load %arg5[%c896_67, %c0_68] : memref<1024x128xf32, #tpu.memory_space<vmem>>, vector<128x128xf32>
    tpu.vector_store %arg5[%c896_67, %c0_68], %49 {strides = array<i32>} : memref<1024x128xf32, #tpu.memory_space<vmem>>, vector<128x128xf32>,
    %c0_69 = arith.constant 0 : index
    %c0_70 = arith.constant 0 : index
    %51 = vector.load %arg5[%c0_69, %c0_70] : memref<1024x128xf32, #tpu.memory_space<vmem>>, vector<29x128xf32>
    %c1 = arith.constant 1 : index
    %c0_71 = arith.constant 0 : index
    %52 = vector.load %arg5[%c1, %c0_71] : memref<1024x128xf32, #tpu.memory_space<vmem>>, vector<29x128xf32>
    %53 = arith.maximumf %51, %52 : vector<29x128xf32>
    %c2 = arith.constant 2 : index
    %c0_72 = arith.constant 0 : index
    %54 = vector.load %arg5[%c2, %c0_72] : memref<1024x128xf32, #tpu.memory_space<vmem>>, vector<29x128xf32>
    %55 = arith.maximumf %53, %54 : vector<29x128xf32>
    %c32 = arith.constant 32 : index
    %c0_73 = arith.constant 0 : index
    %56 = vector.load %arg5[%c32, %c0_73] : memref<1024x128xf32, #tpu.memory_space<vmem>>, vector<29x128xf32>
    %c33 = arith.constant 33 : index
    %c0_74 = arith.constant 0 : index
    %57 = vector.load %arg5[%c33, %c0_74] : memref<1024x128xf32, #tpu.memory_space<vmem>>, vector<29x128xf32>
    %58 = arith.maximumf %56, %57 : vector<29x128xf32>
    %c34 = arith.constant 34 : index
    %c0_75 = arith.constant 0 : index
    %59 = vector.load %arg5[%c34, %c0_75] : memref<1024x128xf32, #tpu.memory_space<vmem>>, vector<29x128xf32>
    %60 = arith.maximumf %58, %59 : vector<29x128xf32>
    %61 = arith.maximumf %55, %60 : vector<29x128xf32>
    %c64 = arith.constant 64 : index
    %c0_76 = arith.constant 0 : index
    %62 = vector.load %arg5[%c64, %c0_76] : memref<1024x128xf32, #tpu.memory_space<vmem>>, vector<29x128xf32>
    %c65 = arith.constant 65 : index
    %c0_77 = arith.constant 0 : index
    %63 = vector.load %arg5[%c65, %c0_77] : memref<1024x128xf32, #tpu.memory_space<vmem>>, vector<29x128xf32>
    %64 = arith.maximumf %62, %63 : vector<29x128xf32>
    %c66 = arith.constant 66 : index
    %c0_78 = arith.constant 0 : index
    %65 = vector.load %arg5[%c66, %c0_78] : memref<1024x128xf32, #tpu.memory_space<vmem>>, vector<29x128xf32>
    %66 = arith.maximumf %64, %65 : vector<29x128xf32>
    %67 = arith.maximumf %61, %66 : vector<29x128xf32>
    %c0_79 = arith.constant 0 : index
    %c0_80 = arith.constant 0 : index
    %68 = vector.load %arg6[%c0_79, %c0_80] : memref<32x128xf32, #tpu.memory_space<vmem>>, vector<29x128xf32>
    tpu.vector_store %arg6[%c0_79, %c0_80], %67 {strides = array<i32>} : memref<32x128xf32, #tpu.memory_space<vmem>>, vector<29x128xf32>,
    %c0_81 = arith.constant 0 : index
    %c0_82 = arith.constant 0 : index
    %69 = tpu.strided_load %arg6[%c0_81, %c0_82] {strides = array<i32: 2, 1>} : memref<32x128xf32, #tpu.memory_space<vmem>>, vector<15x128xf32>
    %70 = vector.broadcast %2 : vector<1x128xf32> to vector<15x128xf32>
    %71 = arith.addf %69, %70 : vector<15x128xf32>
    %cst_83 = arith.constant 0.000000e+00 : f32
    %72 = vector.broadcast %cst_83 : f32 to vector<15x128xf32>
    %73 = arith.maximumf %71, %72 : vector<15x128xf32>
    %74 = arith.truncf %73 : vector<15x128xf32> to vector<15x128xbf16>
    %c0_84 = arith.constant 0 : index
    %c40 = arith.constant 40 : index
    %c0_85 = arith.constant 0 : index
    %75 = vector.load %arg4[%c0_84, %c40, %c0_85] : memref<2x368x128xbf16, #tpu.memory_space<vmem>>, vector<1x15x128xbf16>
    %76 = vector.shape_cast %75 : vector<1x15x128xbf16> to vector<15x128xbf16>
    %77 = vector.shape_cast %74 : vector<15x128xbf16> to vector<1x15x128xbf16>
    tpu.vector_store %arg4[%c0_84, %c40, %c0_85], %77 {strides = array<i32>} : memref<2x368x128xbf16, #tpu.memory_space<vmem>>, vector<1x15x128xbf16>,
    %c64_86 = arith.constant 64 : index
    %c0_87 = arith.constant 0 : index
    %78 = vector.load %arg5[%c64_86, %c0_87] : memref<1024x128xf32, #tpu.memory_space<vmem>>, vector<29x128xf32>
    %c65_88 = arith.constant 65 : index
    %c0_89 = arith.constant 0 : index
    %79 = vector.load %arg5[%c65_88, %c0_89] : memref<1024x128xf32, #tpu.memory_space<vmem>>, vector<29x128xf32>
    %80 = arith.maximumf %78, %79 : vector<29x128xf32>
    %c66_90 = arith.constant 66 : index
    %c0_91 = arith.constant 0 : index
    %81 = vector.load %arg5[%c66_90, %c0_91] : memref<1024x128xf32, #tpu.memory_space<vmem>>, vector<29x128xf32>
    %82 = arith.maximumf %80, %81 : vector<29x128xf32>
    %c96 = arith.constant 96 : index
    %c0_92 = arith.constant 0 : index
    %83 = vector.load %arg5[%c96, %c0_92] : memref<1024x128xf32, #tpu.memory_space<vmem>>, vector<29x128xf32>
    %c97 = arith.constant 97 : index
    %c0_93 = arith.constant 0 : index
    %84 = vector.load %arg5[%c97, %c0_93] : memref<1024x128xf32, #tpu.memory_space<vmem>>, vector<29x128xf32>
    %85 = arith.maximumf %83, %84 : vector<29x128xf32>
    %c98 = arith.constant 98 : index
    %c0_94 = arith.constant 0 : index
    %86 = vector.load %arg5[%c98, %c0_94] : memref<1024x128xf32, #tpu.memory_space<vmem>>, vector<29x128xf32>
    %87 = arith.maximumf %85, %86 : vector<29x128xf32>
    %88 = arith.maximumf %82, %87 : vector<29x128xf32>
    %c128_95 = arith.constant 128 : index
    %c0_96 = arith.constant 0 : index
    %89 = vector.load %arg5[%c128_95, %c0_96] : memref<1024x128xf32, #tpu.memory_space<vmem>>, vector<29x128xf32>
    %c129 = arith.constant 129 : index
    %c0_97 = arith.constant 0 : index
    %90 = vector.load %arg5[%c129, %c0_97] : memref<1024x128xf32, #tpu.memory_space<vmem>>, vector<29x128xf32>
    %91 = arith.maximumf %89, %90 : vector<29x128xf32>
    %c130 = arith.constant 130 : index
    %c0_98 = arith.constant 0 : index
    %92 = vector.load %arg5[%c130, %c0_98] : memref<1024x128xf32, #tpu.memory_space<vmem>>, vector<29x128xf32>
    %93 = arith.maximumf %91, %92 : vector<29x128xf32>
    %94 = arith.maximumf %88, %93 : vector<29x128xf32>
    %c0_99 = arith.constant 0 : index
    %c0_100 = arith.constant 0 : index
    %95 = vector.load %arg6[%c0_99, %c0_100] : memref<32x128xf32, #tpu.memory_space<vmem>>, vector<29x128xf32>
    tpu.vector_store %arg6[%c0_99, %c0_100], %94 {strides = array<i32>} : memref<32x128xf32, #tpu.memory_space<vmem>>, vector<29x128xf32>,
    %c0_101 = arith.constant 0 : index
    %c0_102 = arith.constant 0 : index
    %96 = tpu.strided_load %arg6[%c0_101, %c0_102] {strides = array<i32: 2, 1>} : memref<32x128xf32, #tpu.memory_space<vmem>>, vector<15x128xf32>
    %97 = vector.broadcast %2 : vector<1x128xf32> to vector<15x128xf32>
    %98 = arith.addf %96, %97 : vector<15x128xf32>
    %cst_103 = arith.constant 0.000000e+00 : f32
    %99 = vector.broadcast %cst_103 : f32 to vector<15x128xf32>
    %100 = arith.maximumf %98, %99 : vector<15x128xf32>
    %101 = arith.truncf %100 : vector<15x128xf32> to vector<15x128xbf16>
    %c0_104 = arith.constant 0 : index
    %c59 = arith.constant 59 : index
    %c0_105 = arith.constant 0 : index
    %102 = vector.load %arg4[%c0_104, %c59, %c0_105] : memref<2x368x128xbf16, #tpu.memory_space<vmem>>, vector<1x15x128xbf16>
    %103 = vector.shape_cast %102 : vector<1x15x128xbf16> to vector<15x128xbf16>
    %104 = vector.shape_cast %101 : vector<15x128xbf16> to vector<1x15x128xbf16>
    tpu.vector_store %arg4[%c0_104, %c59, %c0_105], %104 {strides = array<i32>} : memref<2x368x128xbf16, #tpu.memory_space<vmem>>, vector<1x15x128xbf16>,
    %c128_106 = arith.constant 128 : index
    %c0_107 = arith.constant 0 : index
    %105 = vector.load %arg5[%c128_106, %c0_107] : memref<1024x128xf32, #tpu.memory_space<vmem>>, vector<29x128xf32>
    %c129_108 = arith.constant 129 : index
    %c0_109 = arith.constant 0 : index
    %106 = vector.load %arg5[%c129_108, %c0_109] : memref<1024x128xf32, #tpu.memory_space<vmem>>, vector<29x128xf32>
    %107 = arith.maximumf %105, %106 : vector<29x128xf32>
    %c130_110 = arith.constant 130 : index
    %c0_111 = arith.constant 0 : index
    %108 = vector.load %arg5[%c130_110, %c0_111] : memref<1024x128xf32, #tpu.memory_space<vmem>>, vector<29x128xf32>
    %109 = arith.maximumf %107, %108 : vector<29x128xf32>
    %c160 = arith.constant 160 : index
    %c0_112 = arith.constant 0 : index
    %110 = vector.load %arg5[%c160, %c0_112] : memref<1024x128xf32, #tpu.memory_space<vmem>>, vector<29x128xf32>
    %c161 = arith.constant 161 : index
    %c0_113 = arith.constant 0 : index
    %111 = vector.load %arg5[%c161, %c0_113] : memref<1024x128xf32, #tpu.memory_space<vmem>>, vector<29x128xf32>
    %112 = arith.maximumf %110, %111 : vector<29x128xf32>
    %c162 = arith.constant 162 : index
    %c0_114 = arith.constant 0 : index
    %113 = vector.load %arg5[%c162, %c0_114] : memref<1024x128xf32, #tpu.memory_space<vmem>>, vector<29x128xf32>
    %114 = arith.maximumf %112, %113 : vector<29x128xf32>
    %115 = arith.maximumf %109, %114 : vector<29x128xf32>
    %c192 = arith.constant 192 : index
    %c0_115 = arith.constant 0 : index
    %116 = vector.load %arg5[%c192, %c0_115] : memref<1024x128xf32, #tpu.memory_space<vmem>>, vector<29x128xf32>
    %c193 = arith.constant 193 : index
    %c0_116 = arith.constant 0 : index
    %117 = vector.load %arg5[%c193, %c0_116] : memref<1024x128xf32, #tpu.memory_space<vmem>>, vector<29x128xf32>
    %118 = arith.maximumf %116, %117 : vector<29x128xf32>
    %c194 = arith.constant 194 : index
    %c0_117 = arith.constant 0 : index
    %119 = vector.load %arg5[%c194, %c0_117] : memref<1024x128xf32, #tpu.memory_space<vmem>>, vector<29x128xf32>
    %120 = arith.maximumf %118, %119 : vector<29x128xf32>
    %121 = arith.maximumf %115, %120 : vector<29x128xf32>
    %c0_118 = arith.constant 0 : index
    %c0_119 = arith.constant 0 : index
    %122 = vector.load %arg6[%c0_118, %c0_119] : memref<32x128xf32, #tpu.memory_space<vmem>>, vector<29x128xf32>
    tpu.vector_store %arg6[%c0_118, %c0_119], %121 {strides = array<i32>} : memref<32x128xf32, #tpu.memory_space<vmem>>, vector<29x128xf32>,
    %c0_120 = arith.constant 0 : index
    %c0_121 = arith.constant 0 : index
    %123 = tpu.strided_load %arg6[%c0_120, %c0_121] {strides = array<i32: 2, 1>} : memref<32x128xf32, #tpu.memory_space<vmem>>, vector<15x128xf32>
    %124 = vector.broadcast %2 : vector<1x128xf32> to vector<15x128xf32>
    %125 = arith.addf %123, %124 : vector<15x128xf32>
    %cst_122 = arith.constant 0.000000e+00 : f32
    %126 = vector.broadcast %cst_122 : f32 to vector<15x128xf32>
    %127 = arith.maximumf %125, %126 : vector<15x128xf32>
    %128 = arith.truncf %127 : vector<15x128xf32> to vector<15x128xbf16>
    %c0_123 = arith.constant 0 : index
    %c78 = arith.constant 78 : index
    %c0_124 = arith.constant 0 : index
    %129 = vector.load %arg4[%c0_123, %c78, %c0_124] : memref<2x368x128xbf16, #tpu.memory_space<vmem>>, vector<1x15x128xbf16>
    %130 = vector.shape_cast %129 : vector<1x15x128xbf16> to vector<15x128xbf16>
    %131 = vector.shape_cast %128 : vector<15x128xbf16> to vector<1x15x128xbf16>
    tpu.vector_store %arg4[%c0_123, %c78, %c0_124], %131 {strides = array<i32>} : memref<2x368x128xbf16, #tpu.memory_space<vmem>>, vector<1x15x128xbf16>,
    %c192_125 = arith.constant 192 : index
    %c0_126 = arith.constant 0 : index
    %132 = vector.load %arg5[%c192_125, %c0_126] : memref<1024x128xf32, #tpu.memory_space<vmem>>, vector<29x128xf32>
    %c193_127 = arith.constant 193 : index
    %c0_128 = arith.constant 0 : index
    %133 = vector.load %arg5[%c193_127, %c0_128] : memref<1024x128xf32, #tpu.memory_space<vmem>>, vector<29x128xf32>
    %134 = arith.maximumf %132, %133 : vector<29x128xf32>
    %c194_129 = arith.constant 194 : index
    %c0_130 = arith.constant 0 : index
    %135 = vector.load %arg5[%c194_129, %c0_130] : memref<1024x128xf32, #tpu.memory_space<vmem>>, vector<29x128xf32>
    %136 = arith.maximumf %134, %135 : vector<29x128xf32>
    %c224 = arith.constant 224 : index
    %c0_131 = arith.constant 0 : index
    %137 = vector.load %arg5[%c224, %c0_131] : memref<1024x128xf32, #tpu.memory_space<vmem>>, vector<29x128xf32>
    %c225 = arith.constant 225 : index
    %c0_132 = arith.constant 0 : index
    %138 = vector.load %arg5[%c225, %c0_132] : memref<1024x128xf32, #tpu.memory_space<vmem>>, vector<29x128xf32>
    %139 = arith.maximumf %137, %138 : vector<29x128xf32>
    %c226 = arith.constant 226 : index
    %c0_133 = arith.constant 0 : index
    %140 = vector.load %arg5[%c226, %c0_133] : memref<1024x128xf32, #tpu.memory_space<vmem>>, vector<29x128xf32>
    %141 = arith.maximumf %139, %140 : vector<29x128xf32>
    %142 = arith.maximumf %136, %141 : vector<29x128xf32>
    %c256_134 = arith.constant 256 : index
    %c0_135 = arith.constant 0 : index
    %143 = vector.load %arg5[%c256_134, %c0_135] : memref<1024x128xf32, #tpu.memory_space<vmem>>, vector<29x128xf32>
    %c257 = arith.constant 257 : index
    %c0_136 = arith.constant 0 : index
    %144 = vector.load %arg5[%c257, %c0_136] : memref<1024x128xf32, #tpu.memory_space<vmem>>, vector<29x128xf32>
    %145 = arith.maximumf %143, %144 : vector<29x128xf32>
    %c258 = arith.constant 258 : index
    %c0_137 = arith.constant 0 : index
    %146 = vector.load %arg5[%c258, %c0_137] : memref<1024x128xf32, #tpu.memory_space<vmem>>, vector<29x128xf32>
    %147 = arith.maximumf %145, %146 : vector<29x128xf32>
    %148 = arith.maximumf %142, %147 : vector<29x128xf32>
    %c0_138 = arith.constant 0 : index
    %c0_139 = arith.constant 0 : index
    %149 = vector.load %arg6[%c0_138, %c0_139] : memref<32x128xf32, #tpu.memory_space<vmem>>, vector<29x128xf32>
    tpu.vector_store %arg6[%c0_138, %c0_139], %148 {strides = array<i32>} : memref<32x128xf32, #tpu.memory_space<vmem>>, vector<29x128xf32>,
    %c0_140 = arith.constant 0 : index
    %c0_141 = arith.constant 0 : index
    %150 = tpu.strided_load %arg6[%c0_140, %c0_141] {strides = array<i32: 2, 1>} : memref<32x128xf32, #tpu.memory_space<vmem>>, vector<15x128xf32>
    %151 = vector.broadcast %2 : vector<1x128xf32> to vector<15x128xf32>
    %152 = arith.addf %150, %151 : vector<15x128xf32>
    %cst_142 = arith.constant 0.000000e+00 : f32
    %153 = vector.broadcast %cst_142 : f32 to vector<15x128xf32>
    %154 = arith.maximumf %152, %153 : vector<15x128xf32>
    %155 = arith.truncf %154 : vector<15x128xf32> to vector<15x128xbf16>
    %c0_143 = arith.constant 0 : index
    %c97_144 = arith.constant 97 : index
    %c0_145 = arith.constant 0 : index
    %156 = vector.load %arg4[%c0_143, %c97_144, %c0_145] : memref<2x368x128xbf16, #tpu.memory_space<vmem>>, vector<1x15x128xbf16>
    %157 = vector.shape_cast %156 : vector<1x15x128xbf16> to vector<15x128xbf16>
    %158 = vector.shape_cast %155 : vector<15x128xbf16> to vector<1x15x128xbf16>
    tpu.vector_store %arg4[%c0_143, %c97_144, %c0_145], %158 {strides = array<i32>} : memref<2x368x128xbf16, #tpu.memory_space<vmem>>, vector<1x15x128xbf16>,
    %c256_146 = arith.constant 256 : index
    %c0_147 = arith.constant 0 : index
    %159 = vector.load %arg5[%c256_146, %c0_147] : memref<1024x128xf32, #tpu.memory_space<vmem>>, vector<29x128xf32>
    %c257_148 = arith.constant 257 : index
    %c0_149 = arith.constant 0 : index
    %160 = vector.load %arg5[%c257_148, %c0_149] : memref<1024x128xf32, #tpu.memory_space<vmem>>, vector<29x128xf32>
    %161 = arith.maximumf %159, %160 : vector<29x128xf32>
    %c258_150 = arith.constant 258 : index
    %c0_151 = arith.constant 0 : index
    %162 = vector.load %arg5[%c258_150, %c0_151] : memref<1024x128xf32, #tpu.memory_space<vmem>>, vector<29x128xf32>
    %163 = arith.maximumf %161, %162 : vector<29x128xf32>
    %c288 = arith.constant 288 : index
    %c0_152 = arith.constant 0 : index
    %164 = vector.load %arg5[%c288, %c0_152] : memref<1024x128xf32, #tpu.memory_space<vmem>>, vector<29x128xf32>
    %c289 = arith.constant 289 : index
    %c0_153 = arith.constant 0 : index
    %165 = vector.load %arg5[%c289, %c0_153] : memref<1024x128xf32, #tpu.memory_space<vmem>>, vector<29x128xf32>
    %166 = arith.maximumf %164, %165 : vector<29x128xf32>
    %c290 = arith.constant 290 : index
    %c0_154 = arith.constant 0 : index
    %167 = vector.load %arg5[%c290, %c0_154] : memref<1024x128xf32, #tpu.memory_space<vmem>>, vector<29x128xf32>
    %168 = arith.maximumf %166, %167 : vector<29x128xf32>
    %169 = arith.maximumf %163, %168 : vector<29x128xf32>
    %c320 = arith.constant 320 : index
    %c0_155 = arith.constant 0 : index
    %170 = vector.load %arg5[%c320, %c0_155] : memref<1024x128xf32, #tpu.memory_space<vmem>>, vector<29x128xf32>
    %c321 = arith.constant 321 : index
    %c0_156 = arith.constant 0 : index
    %171 = vector.load %arg5[%c321, %c0_156] : memref<1024x128xf32, #tpu.memory_space<vmem>>, vector<29x128xf32>
    %172 = arith.maximumf %170, %171 : vector<29x128xf32>
    %c322 = arith.constant 322 : index
    %c0_157 = arith.constant 0 : index
    %173 = vector.load %arg5[%c322, %c0_157] : memref<1024x128xf32, #tpu.memory_space<vmem>>, vector<29x128xf32>
    %174 = arith.maximumf %172, %173 : vector<29x128xf32>
    %175 = arith.maximumf %169, %174 : vector<29x128xf32>
    %c0_158 = arith.constant 0 : index
    %c0_159 = arith.constant 0 : index
    %176 = vector.load %arg6[%c0_158, %c0_159] : memref<32x128xf32, #tpu.memory_space<vmem>>, vector<29x128xf32>
    tpu.vector_store %arg6[%c0_158, %c0_159], %175 {strides = array<i32>} : memref<32x128xf32, #tpu.memory_space<vmem>>, vector<29x128xf32>,
    %c0_160 = arith.constant 0 : index
    %c0_161 = arith.constant 0 : index
    %177 = tpu.strided_load %arg6[%c0_160, %c0_161] {strides = array<i32: 2, 1>} : memref<32x128xf32, #tpu.memory_space<vmem>>, vector<15x128xf32>
    %178 = vector.broadcast %2 : vector<1x128xf32> to vector<15x128xf32>
    %179 = arith.addf %177, %178 : vector<15x128xf32>
    %cst_162 = arith.constant 0.000000e+00 : f32
    %180 = vector.broadcast %cst_162 : f32 to vector<15x128xf32>
    %181 = arith.maximumf %179, %180 : vector<15x128xf32>
    %182 = arith.truncf %181 : vector<15x128xf32> to vector<15x128xbf16>
    %c0_163 = arith.constant 0 : index
    %c116 = arith.constant 116 : index
    %c0_164 = arith.constant 0 : index
    %183 = vector.load %arg4[%c0_163, %c116, %c0_164] : memref<2x368x128xbf16, #tpu.memory_space<vmem>>, vector<1x15x128xbf16>
    %184 = vector.shape_cast %183 : vector<1x15x128xbf16> to vector<15x128xbf16>
    %185 = vector.shape_cast %182 : vector<15x128xbf16> to vector<1x15x128xbf16>
    tpu.vector_store %arg4[%c0_163, %c116, %c0_164], %185 {strides = array<i32>} : memref<2x368x128xbf16, #tpu.memory_space<vmem>>, vector<1x15x128xbf16>,
    %c320_165 = arith.constant 320 : index
    %c0_166 = arith.constant 0 : index
    %186 = vector.load %arg5[%c320_165, %c0_166] : memref<1024x128xf32, #tpu.memory_space<vmem>>, vector<29x128xf32>
    %c321_167 = arith.constant 321 : index
    %c0_168 = arith.constant 0 : index
    %187 = vector.load %arg5[%c321_167, %c0_168] : memref<1024x128xf32, #tpu.memory_space<vmem>>, vector<29x128xf32>
    %188 = arith.maximumf %186, %187 : vector<29x128xf32>
    %c322_169 = arith.constant 322 : index
    %c0_170 = arith.constant 0 : index
    %189 = vector.load %arg5[%c322_169, %c0_170] : memref<1024x128xf32, #tpu.memory_space<vmem>>, vector<29x128xf32>
    %190 = arith.maximumf %188, %189 : vector<29x128xf32>
    %c352 = arith.constant 352 : index
    %c0_171 = arith.constant 0 : index
    %191 = vector.load %arg5[%c352, %c0_171] : memref<1024x128xf32, #tpu.memory_space<vmem>>, vector<29x128xf32>
    %c353 = arith.constant 353 : index
    %c0_172 = arith.constant 0 : index
    %192 = vector.load %arg5[%c353, %c0_172] : memref<1024x128xf32, #tpu.memory_space<vmem>>, vector<29x128xf32>
    %193 = arith.maximumf %191, %192 : vector<29x128xf32>
    %c354 = arith.constant 354 : index
    %c0_173 = arith.constant 0 : index
    %194 = vector.load %arg5[%c354, %c0_173] : memref<1024x128xf32, #tpu.memory_space<vmem>>, vector<29x128xf32>
    %195 = arith.maximumf %193, %194 : vector<29x128xf32>
    %196 = arith.maximumf %190, %195 : vector<29x128xf32>
    %c384_174 = arith.constant 384 : index
    %c0_175 = arith.constant 0 : index
    %197 = vector.load %arg5[%c384_174, %c0_175] : memref<1024x128xf32, #tpu.memory_space<vmem>>, vector<29x128xf32>
    %c385 = arith.constant 385 : index
    %c0_176 = arith.constant 0 : index
    %198 = vector.load %arg5[%c385, %c0_176] : memref<1024x128xf32, #tpu.memory_space<vmem>>, vector<29x128xf32>
    %199 = arith.maximumf %197, %198 : vector<29x128xf32>
    %c386 = arith.constant 386 : index
    %c0_177 = arith.constant 0 : index
    %200 = vector.load %arg5[%c386, %c0_177] : memref<1024x128xf32, #tpu.memory_space<vmem>>, vector<29x128xf32>
    %201 = arith.maximumf %199, %200 : vector<29x128xf32>
    %202 = arith.maximumf %196, %201 : vector<29x128xf32>
    %c0_178 = arith.constant 0 : index
    %c0_179 = arith.constant 0 : index
    %203 = vector.load %arg6[%c0_178, %c0_179] : memref<32x128xf32, #tpu.memory_space<vmem>>, vector<29x128xf32>
    tpu.vector_store %arg6[%c0_178, %c0_179], %202 {strides = array<i32>} : memref<32x128xf32, #tpu.memory_space<vmem>>, vector<29x128xf32>,
    %c0_180 = arith.constant 0 : index
    %c0_181 = arith.constant 0 : index
    %204 = tpu.strided_load %arg6[%c0_180, %c0_181] {strides = array<i32: 2, 1>} : memref<32x128xf32, #tpu.memory_space<vmem>>, vector<15x128xf32>
    %205 = vector.broadcast %2 : vector<1x128xf32> to vector<15x128xf32>
    %206 = arith.addf %204, %205 : vector<15x128xf32>
    %cst_182 = arith.constant 0.000000e+00 : f32
    %207 = vector.broadcast %cst_182 : f32 to vector<15x128xf32>
    %208 = arith.maximumf %206, %207 : vector<15x128xf32>
    %209 = arith.truncf %208 : vector<15x128xf32> to vector<15x128xbf16>
    %c0_183 = arith.constant 0 : index
    %c135 = arith.constant 135 : index
    %c0_184 = arith.constant 0 : index
    %210 = vector.load %arg4[%c0_183, %c135, %c0_184] : memref<2x368x128xbf16, #tpu.memory_space<vmem>>, vector<1x15x128xbf16>
    %211 = vector.shape_cast %210 : vector<1x15x128xbf16> to vector<15x128xbf16>
    %212 = vector.shape_cast %209 : vector<15x128xbf16> to vector<1x15x128xbf16>
    tpu.vector_store %arg4[%c0_183, %c135, %c0_184], %212 {strides = array<i32>} : memref<2x368x128xbf16, #tpu.memory_space<vmem>>, vector<1x15x128xbf16>,
    %c384_185 = arith.constant 384 : index
    %c0_186 = arith.constant 0 : index
    %213 = vector.load %arg5[%c384_185, %c0_186] : memref<1024x128xf32, #tpu.memory_space<vmem>>, vector<29x128xf32>
    %c385_187 = arith.constant 385 : index
    %c0_188 = arith.constant 0 : index
    %214 = vector.load %arg5[%c385_187, %c0_188] : memref<1024x128xf32, #tpu.memory_space<vmem>>, vector<29x128xf32>
    %215 = arith.maximumf %213, %214 : vector<29x128xf32>
    %c386_189 = arith.constant 386 : index
    %c0_190 = arith.constant 0 : index
    %216 = vector.load %arg5[%c386_189, %c0_190] : memref<1024x128xf32, #tpu.memory_space<vmem>>, vector<29x128xf32>
    %217 = arith.maximumf %215, %216 : vector<29x128xf32>
    %c416 = arith.constant 416 : index
    %c0_191 = arith.constant 0 : index
    %218 = vector.load %arg5[%c416, %c0_191] : memref<1024x128xf32, #tpu.memory_space<vmem>>, vector<29x128xf32>
    %c417 = arith.constant 417 : index
    %c0_192 = arith.constant 0 : index
    %219 = vector.load %arg5[%c417, %c0_192] : memref<1024x128xf32, #tpu.memory_space<vmem>>, vector<29x128xf32>
    %220 = arith.maximumf %218, %219 : vector<29x128xf32>
    %c418 = arith.constant 418 : index
    %c0_193 = arith.constant 0 : index
    %221 = vector.load %arg5[%c418, %c0_193] : memref<1024x128xf32, #tpu.memory_space<vmem>>, vector<29x128xf32>
    %222 = arith.maximumf %220, %221 : vector<29x128xf32>
    %223 = arith.maximumf %217, %222 : vector<29x128xf32>
    %c448 = arith.constant 448 : index
    %c0_194 = arith.constant 0 : index
    %224 = vector.load %arg5[%c448, %c0_194] : memref<1024x128xf32, #tpu.memory_space<vmem>>, vector<29x128xf32>
    %c449 = arith.constant 449 : index
    %c0_195 = arith.constant 0 : index
    %225 = vector.load %arg5[%c449, %c0_195] : memref<1024x128xf32, #tpu.memory_space<vmem>>, vector<29x128xf32>
    %226 = arith.maximumf %224, %225 : vector<29x128xf32>
    %c450 = arith.constant 450 : index
    %c0_196 = arith.constant 0 : index
    %227 = vector.load %arg5[%c450, %c0_196] : memref<1024x128xf32, #tpu.memory_space<vmem>>, vector<29x128xf32>
    %228 = arith.maximumf %226, %227 : vector<29x128xf32>
    %229 = arith.maximumf %223, %228 : vector<29x128xf32>
    %c0_197 = arith.constant 0 : index
    %c0_198 = arith.constant 0 : index
    %230 = vector.load %arg6[%c0_197, %c0_198] : memref<32x128xf32, #tpu.memory_space<vmem>>, vector<29x128xf32>
    tpu.vector_store %arg6[%c0_197, %c0_198], %229 {strides = array<i32>} : memref<32x128xf32, #tpu.memory_space<vmem>>, vector<29x128xf32>,
    %c0_199 = arith.constant 0 : index
    %c0_200 = arith.constant 0 : index
    %231 = tpu.strided_load %arg6[%c0_199, %c0_200] {strides = array<i32: 2, 1>} : memref<32x128xf32, #tpu.memory_space<vmem>>, vector<15x128xf32>
    %232 = vector.broadcast %2 : vector<1x128xf32> to vector<15x128xf32>
    %233 = arith.addf %231, %232 : vector<15x128xf32>
    %cst_201 = arith.constant 0.000000e+00 : f32
    %234 = vector.broadcast %cst_201 : f32 to vector<15x128xf32>
    %235 = arith.maximumf %233, %234 : vector<15x128xf32>
    %236 = arith.truncf %235 : vector<15x128xf32> to vector<15x128xbf16>
    %c0_202 = arith.constant 0 : index
    %c154 = arith.constant 154 : index
    %c0_203 = arith.constant 0 : index
    %237 = vector.load %arg4[%c0_202, %c154, %c0_203] : memref<2x368x128xbf16, #tpu.memory_space<vmem>>, vector<1x15x128xbf16>
    %238 = vector.shape_cast %237 : vector<1x15x128xbf16> to vector<15x128xbf16>
    %239 = vector.shape_cast %236 : vector<15x128xbf16> to vector<1x15x128xbf16>
    tpu.vector_store %arg4[%c0_202, %c154, %c0_203], %239 {strides = array<i32>} : memref<2x368x128xbf16, #tpu.memory_space<vmem>>, vector<1x15x128xbf16>,
    %c448_204 = arith.constant 448 : index
    %c0_205 = arith.constant 0 : index
    %240 = vector.load %arg5[%c448_204, %c0_205] : memref<1024x128xf32, #tpu.memory_space<vmem>>, vector<29x128xf32>
    %c449_206 = arith.constant 449 : index
    %c0_207 = arith.constant 0 : index
    %241 = vector.load %arg5[%c449_206, %c0_207] : memref<1024x128xf32, #tpu.memory_space<vmem>>, vector<29x128xf32>
    %242 = arith.maximumf %240, %241 : vector<29x128xf32>
    %c450_208 = arith.constant 450 : index
    %c0_209 = arith.constant 0 : index
    %243 = vector.load %arg5[%c450_208, %c0_209] : memref<1024x128xf32, #tpu.memory_space<vmem>>, vector<29x128xf32>
    %244 = arith.maximumf %242, %243 : vector<29x128xf32>
    %c480 = arith.constant 480 : index
    %c0_210 = arith.constant 0 : index
    %245 = vector.load %arg5[%c480, %c0_210] : memref<1024x128xf32, #tpu.memory_space<vmem>>, vector<29x128xf32>
    %c481 = arith.constant 481 : index
    %c0_211 = arith.constant 0 : index
    %246 = vector.load %arg5[%c481, %c0_211] : memref<1024x128xf32, #tpu.memory_space<vmem>>, vector<29x128xf32>
    %247 = arith.maximumf %245, %246 : vector<29x128xf32>
    %c482 = arith.constant 482 : index
    %c0_212 = arith.constant 0 : index
    %248 = vector.load %arg5[%c482, %c0_212] : memref<1024x128xf32, #tpu.memory_space<vmem>>, vector<29x128xf32>
    %249 = arith.maximumf %247, %248 : vector<29x128xf32>
    %250 = arith.maximumf %244, %249 : vector<29x128xf32>
    %c512_213 = arith.constant 512 : index
    %c0_214 = arith.constant 0 : index
    %251 = vector.load %arg5[%c512_213, %c0_214] : memref<1024x128xf32, #tpu.memory_space<vmem>>, vector<29x128xf32>
    %c513 = arith.constant 513 : index
    %c0_215 = arith.constant 0 : index
    %252 = vector.load %arg5[%c513, %c0_215] : memref<1024x128xf32, #tpu.memory_space<vmem>>, vector<29x128xf32>
    %253 = arith.maximumf %251, %252 : vector<29x128xf32>
    %c514 = arith.constant 514 : index
    %c0_216 = arith.constant 0 : index
    %254 = vector.load %arg5[%c514, %c0_216] : memref<1024x128xf32, #tpu.memory_space<vmem>>, vector<29x128xf32>
    %255 = arith.maximumf %253, %254 : vector<29x128xf32>
    %256 = arith.maximumf %250, %255 : vector<29x128xf32>
    %c0_217 = arith.constant 0 : index
    %c0_218 = arith.constant 0 : index
    %257 = vector.load %arg6[%c0_217, %c0_218] : memref<32x128xf32, #tpu.memory_space<vmem>>, vector<29x128xf32>
    tpu.vector_store %arg6[%c0_217, %c0_218], %256 {strides = array<i32>} : memref<32x128xf32, #tpu.memory_space<vmem>>, vector<29x128xf32>,
    %c0_219 = arith.constant 0 : index
    %c0_220 = arith.constant 0 : index
    %258 = tpu.strided_load %arg6[%c0_219, %c0_220] {strides = array<i32: 2, 1>} : memref<32x128xf32, #tpu.memory_space<vmem>>, vector<15x128xf32>
    %259 = vector.broadcast %2 : vector<1x128xf32> to vector<15x128xf32>
    %260 = arith.addf %258, %259 : vector<15x128xf32>
    %cst_221 = arith.constant 0.000000e+00 : f32
    %261 = vector.broadcast %cst_221 : f32 to vector<15x128xf32>
    %262 = arith.maximumf %260, %261 : vector<15x128xf32>
    %263 = arith.truncf %262 : vector<15x128xf32> to vector<15x128xbf16>
    %c0_222 = arith.constant 0 : index
    %c173 = arith.constant 173 : index
    %c0_223 = arith.constant 0 : index
    %264 = vector.load %arg4[%c0_222, %c173, %c0_223] : memref<2x368x128xbf16, #tpu.memory_space<vmem>>, vector<1x15x128xbf16>
    %265 = vector.shape_cast %264 : vector<1x15x128xbf16> to vector<15x128xbf16>
    %266 = vector.shape_cast %263 : vector<15x128xbf16> to vector<1x15x128xbf16>
    tpu.vector_store %arg4[%c0_222, %c173, %c0_223], %266 {strides = array<i32>} : memref<2x368x128xbf16, #tpu.memory_space<vmem>>, vector<1x15x128xbf16>,
    %c512_224 = arith.constant 512 : index
    %c0_225 = arith.constant 0 : index
    %267 = vector.load %arg5[%c512_224, %c0_225] : memref<1024x128xf32, #tpu.memory_space<vmem>>, vector<29x128xf32>
    %c513_226 = arith.constant 513 : index
    %c0_227 = arith.constant 0 : index
    %268 = vector.load %arg5[%c513_226, %c0_227] : memref<1024x128xf32, #tpu.memory_space<vmem>>, vector<29x128xf32>
    %269 = arith.maximumf %267, %268 : vector<29x128xf32>
    %c514_228 = arith.constant 514 : index
    %c0_229 = arith.constant 0 : index
    %270 = vector.load %arg5[%c514_228, %c0_229] : memref<1024x128xf32, #tpu.memory_space<vmem>>, vector<29x128xf32>
    %271 = arith.maximumf %269, %270 : vector<29x128xf32>
    %c544 = arith.constant 544 : index
    %c0_230 = arith.constant 0 : index
    %272 = vector.load %arg5[%c544, %c0_230] : memref<1024x128xf32, #tpu.memory_space<vmem>>, vector<29x128xf32>
    %c545 = arith.constant 545 : index
    %c0_231 = arith.constant 0 : index
    %273 = vector.load %arg5[%c545, %c0_231] : memref<1024x128xf32, #tpu.memory_space<vmem>>, vector<29x128xf32>
    %274 = arith.maximumf %272, %273 : vector<29x128xf32>
    %c546 = arith.constant 546 : index
    %c0_232 = arith.constant 0 : index
    %275 = vector.load %arg5[%c546, %c0_232] : memref<1024x128xf32, #tpu.memory_space<vmem>>, vector<29x128xf32>
    %276 = arith.maximumf %274, %275 : vector<29x128xf32>
    %277 = arith.maximumf %271, %276 : vector<29x128xf32>
    %c576 = arith.constant 576 : index
    %c0_233 = arith.constant 0 : index
    %278 = vector.load %arg5[%c576, %c0_233] : memref<1024x128xf32, #tpu.memory_space<vmem>>, vector<29x128xf32>
    %c577 = arith.constant 577 : index
    %c0_234 = arith.constant 0 : index
    %279 = vector.load %arg5[%c577, %c0_234] : memref<1024x128xf32, #tpu.memory_space<vmem>>, vector<29x128xf32>
    %280 = arith.maximumf %278, %279 : vector<29x128xf32>
    %c578 = arith.constant 578 : index
    %c0_235 = arith.constant 0 : index
    %281 = vector.load %arg5[%c578, %c0_235] : memref<1024x128xf32, #tpu.memory_space<vmem>>, vector<29x128xf32>
    %282 = arith.maximumf %280, %281 : vector<29x128xf32>
    %283 = arith.maximumf %277, %282 : vector<29x128xf32>
    %c0_236 = arith.constant 0 : index
    %c0_237 = arith.constant 0 : index
    %284 = vector.load %arg6[%c0_236, %c0_237] : memref<32x128xf32, #tpu.memory_space<vmem>>, vector<29x128xf32>
    tpu.vector_store %arg6[%c0_236, %c0_237], %283 {strides = array<i32>} : memref<32x128xf32, #tpu.memory_space<vmem>>, vector<29x128xf32>,
    %c0_238 = arith.constant 0 : index
    %c0_239 = arith.constant 0 : index
    %285 = tpu.strided_load %arg6[%c0_238, %c0_239] {strides = array<i32: 2, 1>} : memref<32x128xf32, #tpu.memory_space<vmem>>, vector<15x128xf32>
    %286 = vector.broadcast %2 : vector<1x128xf32> to vector<15x128xf32>
    %287 = arith.addf %285, %286 : vector<15x128xf32>
    %cst_240 = arith.constant 0.000000e+00 : f32
    %288 = vector.broadcast %cst_240 : f32 to vector<15x128xf32>
    %289 = arith.maximumf %287, %288 : vector<15x128xf32>
    %290 = arith.truncf %289 : vector<15x128xf32> to vector<15x128xbf16>
    %c0_241 = arith.constant 0 : index
    %c192_242 = arith.constant 192 : index
    %c0_243 = arith.constant 0 : index
    %291 = vector.load %arg4[%c0_241, %c192_242, %c0_243] : memref<2x368x128xbf16, #tpu.memory_space<vmem>>, vector<1x15x128xbf16>
    %292 = vector.shape_cast %291 : vector<1x15x128xbf16> to vector<15x128xbf16>
    %293 = vector.shape_cast %290 : vector<15x128xbf16> to vector<1x15x128xbf16>
    tpu.vector_store %arg4[%c0_241, %c192_242, %c0_243], %293 {strides = array<i32>} : memref<2x368x128xbf16, #tpu.memory_space<vmem>>, vector<1x15x128xbf16>,
    %c576_244 = arith.constant 576 : index
    %c0_245 = arith.constant 0 : index
    %294 = vector.load %arg5[%c576_244, %c0_245] : memref<1024x128xf32, #tpu.memory_space<vmem>>, vector<29x128xf32>
    %c577_246 = arith.constant 577 : index
    %c0_247 = arith.constant 0 : index
    %295 = vector.load %arg5[%c577_246, %c0_247] : memref<1024x128xf32, #tpu.memory_space<vmem>>, vector<29x128xf32>
    %296 = arith.maximumf %294, %295 : vector<29x128xf32>
    %c578_248 = arith.constant 578 : index
    %c0_249 = arith.constant 0 : index
    %297 = vector.load %arg5[%c578_248, %c0_249] : memref<1024x128xf32, #tpu.memory_space<vmem>>, vector<29x128xf32>
    %298 = arith.maximumf %296, %297 : vector<29x128xf32>
    %c608 = arith.constant 608 : index
    %c0_250 = arith.constant 0 : index
    %299 = vector.load %arg5[%c608, %c0_250] : memref<1024x128xf32, #tpu.memory_space<vmem>>, vector<29x128xf32>
    %c609 = arith.constant 609 : index
    %c0_251 = arith.constant 0 : index
    %300 = vector.load %arg5[%c609, %c0_251] : memref<1024x128xf32, #tpu.memory_space<vmem>>, vector<29x128xf32>
    %301 = arith.maximumf %299, %300 : vector<29x128xf32>
    %c610 = arith.constant 610 : index
    %c0_252 = arith.constant 0 : index
    %302 = vector.load %arg5[%c610, %c0_252] : memref<1024x128xf32, #tpu.memory_space<vmem>>, vector<29x128xf32>
    %303 = arith.maximumf %301, %302 : vector<29x128xf32>
    %304 = arith.maximumf %298, %303 : vector<29x128xf32>
    %c640_253 = arith.constant 640 : index
    %c0_254 = arith.constant 0 : index
    %305 = vector.load %arg5[%c640_253, %c0_254] : memref<1024x128xf32, #tpu.memory_space<vmem>>, vector<29x128xf32>
    %c641 = arith.constant 641 : index
    %c0_255 = arith.constant 0 : index
    %306 = vector.load %arg5[%c641, %c0_255] : memref<1024x128xf32, #tpu.memory_space<vmem>>, vector<29x128xf32>
    %307 = arith.maximumf %305, %306 : vector<29x128xf32>
    %c642 = arith.constant 642 : index
    %c0_256 = arith.constant 0 : index
    %308 = vector.load %arg5[%c642, %c0_256] : memref<1024x128xf32, #tpu.memory_space<vmem>>, vector<29x128xf32>
    %309 = arith.maximumf %307, %308 : vector<29x128xf32>
    %310 = arith.maximumf %304, %309 : vector<29x128xf32>
    %c0_257 = arith.constant 0 : index
    %c0_258 = arith.constant 0 : index
    %311 = vector.load %arg6[%c0_257, %c0_258] : memref<32x128xf32, #tpu.memory_space<vmem>>, vector<29x128xf32>
    tpu.vector_store %arg6[%c0_257, %c0_258], %310 {strides = array<i32>} : memref<32x128xf32, #tpu.memory_space<vmem>>, vector<29x128xf32>,
    %c0_259 = arith.constant 0 : index
    %c0_260 = arith.constant 0 : index
    %312 = tpu.strided_load %arg6[%c0_259, %c0_260] {strides = array<i32: 2, 1>} : memref<32x128xf32, #tpu.memory_space<vmem>>, vector<15x128xf32>
    %313 = vector.broadcast %2 : vector<1x128xf32> to vector<15x128xf32>
    %314 = arith.addf %312, %313 : vector<15x128xf32>
    %cst_261 = arith.constant 0.000000e+00 : f32
    %315 = vector.broadcast %cst_261 : f32 to vector<15x128xf32>
    %316 = arith.maximumf %314, %315 : vector<15x128xf32>
    %317 = arith.truncf %316 : vector<15x128xf32> to vector<15x128xbf16>
    %c0_262 = arith.constant 0 : index
    %c211 = arith.constant 211 : index
    %c0_263 = arith.constant 0 : index
    %318 = vector.load %arg4[%c0_262, %c211, %c0_263] : memref<2x368x128xbf16, #tpu.memory_space<vmem>>, vector<1x15x128xbf16>
    %319 = vector.shape_cast %318 : vector<1x15x128xbf16> to vector<15x128xbf16>
    %320 = vector.shape_cast %317 : vector<15x128xbf16> to vector<1x15x128xbf16>
    tpu.vector_store %arg4[%c0_262, %c211, %c0_263], %320 {strides = array<i32>} : memref<2x368x128xbf16, #tpu.memory_space<vmem>>, vector<1x15x128xbf16>,
    %c640_264 = arith.constant 640 : index
    %c0_265 = arith.constant 0 : index
    %321 = vector.load %arg5[%c640_264, %c0_265] : memref<1024x128xf32, #tpu.memory_space<vmem>>, vector<29x128xf32>
    %c641_266 = arith.constant 641 : index
    %c0_267 = arith.constant 0 : index
    %322 = vector.load %arg5[%c641_266, %c0_267] : memref<1024x128xf32, #tpu.memory_space<vmem>>, vector<29x128xf32>
    %323 = arith.maximumf %321, %322 : vector<29x128xf32>
    %c642_268 = arith.constant 642 : index
    %c0_269 = arith.constant 0 : index
    %324 = vector.load %arg5[%c642_268, %c0_269] : memref<1024x128xf32, #tpu.memory_space<vmem>>, vector<29x128xf32>
    %325 = arith.maximumf %323, %324 : vector<29x128xf32>
    %c672 = arith.constant 672 : index
    %c0_270 = arith.constant 0 : index
    %326 = vector.load %arg5[%c672, %c0_270] : memref<1024x128xf32, #tpu.memory_space<vmem>>, vector<29x128xf32>
    %c673 = arith.constant 673 : index
    %c0_271 = arith.constant 0 : index
    %327 = vector.load %arg5[%c673, %c0_271] : memref<1024x128xf32, #tpu.memory_space<vmem>>, vector<29x128xf32>
    %328 = arith.maximumf %326, %327 : vector<29x128xf32>
    %c674 = arith.constant 674 : index
    %c0_272 = arith.constant 0 : index
    %329 = vector.load %arg5[%c674, %c0_272] : memref<1024x128xf32, #tpu.memory_space<vmem>>, vector<29x128xf32>
    %330 = arith.maximumf %328, %329 : vector<29x128xf32>
    %331 = arith.maximumf %325, %330 : vector<29x128xf32>
    %c704 = arith.constant 704 : index
    %c0_273 = arith.constant 0 : index
    %332 = vector.load %arg5[%c704, %c0_273] : memref<1024x128xf32, #tpu.memory_space<vmem>>, vector<29x128xf32>
    %c705 = arith.constant 705 : index
    %c0_274 = arith.constant 0 : index
    %333 = vector.load %arg5[%c705, %c0_274] : memref<1024x128xf32, #tpu.memory_space<vmem>>, vector<29x128xf32>
    %334 = arith.maximumf %332, %333 : vector<29x128xf32>
    %c706 = arith.constant 706 : index
    %c0_275 = arith.constant 0 : index
    %335 = vector.load %arg5[%c706, %c0_275] : memref<1024x128xf32, #tpu.memory_space<vmem>>, vector<29x128xf32>
    %336 = arith.maximumf %334, %335 : vector<29x128xf32>
    %337 = arith.maximumf %331, %336 : vector<29x128xf32>
    %c0_276 = arith.constant 0 : index
    %c0_277 = arith.constant 0 : index
    %338 = vector.load %arg6[%c0_276, %c0_277] : memref<32x128xf32, #tpu.memory_space<vmem>>, vector<29x128xf32>
    tpu.vector_store %arg6[%c0_276, %c0_277], %337 {strides = array<i32>} : memref<32x128xf32, #tpu.memory_space<vmem>>, vector<29x128xf32>,
    %c0_278 = arith.constant 0 : index
    %c0_279 = arith.constant 0 : index
    %339 = tpu.strided_load %arg6[%c0_278, %c0_279] {strides = array<i32: 2, 1>} : memref<32x128xf32, #tpu.memory_space<vmem>>, vector<15x128xf32>
    %340 = vector.broadcast %2 : vector<1x128xf32> to vector<15x128xf32>
    %341 = arith.addf %339, %340 : vector<15x128xf32>
    %cst_280 = arith.constant 0.000000e+00 : f32
    %342 = vector.broadcast %cst_280 : f32 to vector<15x128xf32>
    %343 = arith.maximumf %341, %342 : vector<15x128xf32>
    %344 = arith.truncf %343 : vector<15x128xf32> to vector<15x128xbf16>
    %c0_281 = arith.constant 0 : index
    %c230 = arith.constant 230 : index
    %c0_282 = arith.constant 0 : index
    %345 = vector.load %arg4[%c0_281, %c230, %c0_282] : memref<2x368x128xbf16, #tpu.memory_space<vmem>>, vector<1x15x128xbf16>
    %346 = vector.shape_cast %345 : vector<1x15x128xbf16> to vector<15x128xbf16>
    %347 = vector.shape_cast %344 : vector<15x128xbf16> to vector<1x15x128xbf16>
    tpu.vector_store %arg4[%c0_281, %c230, %c0_282], %347 {strides = array<i32>} : memref<2x368x128xbf16, #tpu.memory_space<vmem>>, vector<1x15x128xbf16>,
    %c704_283 = arith.constant 704 : index
    %c0_284 = arith.constant 0 : index
    %348 = vector.load %arg5[%c704_283, %c0_284] : memref<1024x128xf32, #tpu.memory_space<vmem>>, vector<29x128xf32>
    %c705_285 = arith.constant 705 : index
    %c0_286 = arith.constant 0 : index
    %349 = vector.load %arg5[%c705_285, %c0_286] : memref<1024x128xf32, #tpu.memory_space<vmem>>, vector<29x128xf32>
    %350 = arith.maximumf %348, %349 : vector<29x128xf32>
    %c706_287 = arith.constant 706 : index
    %c0_288 = arith.constant 0 : index
    %351 = vector.load %arg5[%c706_287, %c0_288] : memref<1024x128xf32, #tpu.memory_space<vmem>>, vector<29x128xf32>
    %352 = arith.maximumf %350, %351 : vector<29x128xf32>
    %c736 = arith.constant 736 : index
    %c0_289 = arith.constant 0 : index
    %353 = vector.load %arg5[%c736, %c0_289] : memref<1024x128xf32, #tpu.memory_space<vmem>>, vector<29x128xf32>
    %c737 = arith.constant 737 : index
    %c0_290 = arith.constant 0 : index
    %354 = vector.load %arg5[%c737, %c0_290] : memref<1024x128xf32, #tpu.memory_space<vmem>>, vector<29x128xf32>
    %355 = arith.maximumf %353, %354 : vector<29x128xf32>
    %c738 = arith.constant 738 : index
    %c0_291 = arith.constant 0 : index
    %356 = vector.load %arg5[%c738, %c0_291] : memref<1024x128xf32, #tpu.memory_space<vmem>>, vector<29x128xf32>
    %357 = arith.maximumf %355, %356 : vector<29x128xf32>
    %358 = arith.maximumf %352, %357 : vector<29x128xf32>
    %c768_292 = arith.constant 768 : index
    %c0_293 = arith.constant 0 : index
    %359 = vector.load %arg5[%c768_292, %c0_293] : memref<1024x128xf32, #tpu.memory_space<vmem>>, vector<29x128xf32>
    %c769 = arith.constant 769 : index
    %c0_294 = arith.constant 0 : index
    %360 = vector.load %arg5[%c769, %c0_294] : memref<1024x128xf32, #tpu.memory_space<vmem>>, vector<29x128xf32>
    %361 = arith.maximumf %359, %360 : vector<29x128xf32>
    %c770 = arith.constant 770 : index
    %c0_295 = arith.constant 0 : index
    %362 = vector.load %arg5[%c770, %c0_295] : memref<1024x128xf32, #tpu.memory_space<vmem>>, vector<29x128xf32>
    %363 = arith.maximumf %361, %362 : vector<29x128xf32>
    %364 = arith.maximumf %358, %363 : vector<29x128xf32>
    %c0_296 = arith.constant 0 : index
    %c0_297 = arith.constant 0 : index
    %365 = vector.load %arg6[%c0_296, %c0_297] : memref<32x128xf32, #tpu.memory_space<vmem>>, vector<29x128xf32>
    tpu.vector_store %arg6[%c0_296, %c0_297], %364 {strides = array<i32>} : memref<32x128xf32, #tpu.memory_space<vmem>>, vector<29x128xf32>,
    %c0_298 = arith.constant 0 : index
    %c0_299 = arith.constant 0 : index
    %366 = tpu.strided_load %arg6[%c0_298, %c0_299] {strides = array<i32: 2, 1>} : memref<32x128xf32, #tpu.memory_space<vmem>>, vector<15x128xf32>
    %367 = vector.broadcast %2 : vector<1x128xf32> to vector<15x128xf32>
    %368 = arith.addf %366, %367 : vector<15x128xf32>
    %cst_300 = arith.constant 0.000000e+00 : f32
    %369 = vector.broadcast %cst_300 : f32 to vector<15x128xf32>
    %370 = arith.maximumf %368, %369 : vector<15x128xf32>
    %371 = arith.truncf %370 : vector<15x128xf32> to vector<15x128xbf16>
    %c0_301 = arith.constant 0 : index
    %c249 = arith.constant 249 : index
    %c0_302 = arith.constant 0 : index
    %372 = vector.load %arg4[%c0_301, %c249, %c0_302] : memref<2x368x128xbf16, #tpu.memory_space<vmem>>, vector<1x15x128xbf16>
    %373 = vector.shape_cast %372 : vector<1x15x128xbf16> to vector<15x128xbf16>
    %374 = vector.shape_cast %371 : vector<15x128xbf16> to vector<1x15x128xbf16>
    tpu.vector_store %arg4[%c0_301, %c249, %c0_302], %374 {strides = array<i32>} : memref<2x368x128xbf16, #tpu.memory_space<vmem>>, vector<1x15x128xbf16>,
    %c768_303 = arith.constant 768 : index
    %c0_304 = arith.constant 0 : index
    %375 = vector.load %arg5[%c768_303, %c0_304] : memref<1024x128xf32, #tpu.memory_space<vmem>>, vector<29x128xf32>
    %c769_305 = arith.constant 769 : index
    %c0_306 = arith.constant 0 : index
    %376 = vector.load %arg5[%c769_305, %c0_306] : memref<1024x128xf32, #tpu.memory_space<vmem>>, vector<29x128xf32>
    %377 = arith.maximumf %375, %376 : vector<29x128xf32>
    %c770_307 = arith.constant 770 : index
    %c0_308 = arith.constant 0 : index
    %378 = vector.load %arg5[%c770_307, %c0_308] : memref<1024x128xf32, #tpu.memory_space<vmem>>, vector<29x128xf32>
    %379 = arith.maximumf %377, %378 : vector<29x128xf32>
    %c800 = arith.constant 800 : index
    %c0_309 = arith.constant 0 : index
    %380 = vector.load %arg5[%c800, %c0_309] : memref<1024x128xf32, #tpu.memory_space<vmem>>, vector<29x128xf32>
    %c801 = arith.constant 801 : index
    %c0_310 = arith.constant 0 : index
    %381 = vector.load %arg5[%c801, %c0_310] : memref<1024x128xf32, #tpu.memory_space<vmem>>, vector<29x128xf32>
    %382 = arith.maximumf %380, %381 : vector<29x128xf32>
    %c802 = arith.constant 802 : index
    %c0_311 = arith.constant 0 : index
    %383 = vector.load %arg5[%c802, %c0_311] : memref<1024x128xf32, #tpu.memory_space<vmem>>, vector<29x128xf32>
    %384 = arith.maximumf %382, %383 : vector<29x128xf32>
    %385 = arith.maximumf %379, %384 : vector<29x128xf32>
    %c832 = arith.constant 832 : index
    %c0_312 = arith.constant 0 : index
    %386 = vector.load %arg5[%c832, %c0_312] : memref<1024x128xf32, #tpu.memory_space<vmem>>, vector<29x128xf32>
    %c833 = arith.constant 833 : index
    %c0_313 = arith.constant 0 : index
    %387 = vector.load %arg5[%c833, %c0_313] : memref<1024x128xf32, #tpu.memory_space<vmem>>, vector<29x128xf32>
    %388 = arith.maximumf %386, %387 : vector<29x128xf32>
    %c834 = arith.constant 834 : index
    %c0_314 = arith.constant 0 : index
    %389 = vector.load %arg5[%c834, %c0_314] : memref<1024x128xf32, #tpu.memory_space<vmem>>, vector<29x128xf32>
    %390 = arith.maximumf %388, %389 : vector<29x128xf32>
    %391 = arith.maximumf %385, %390 : vector<29x128xf32>
    %c0_315 = arith.constant 0 : index
    %c0_316 = arith.constant 0 : index
    %392 = vector.load %arg6[%c0_315, %c0_316] : memref<32x128xf32, #tpu.memory_space<vmem>>, vector<29x128xf32>
    tpu.vector_store %arg6[%c0_315, %c0_316], %391 {strides = array<i32>} : memref<32x128xf32, #tpu.memory_space<vmem>>, vector<29x128xf32>,
    %c0_317 = arith.constant 0 : index
    %c0_318 = arith.constant 0 : index
    %393 = tpu.strided_load %arg6[%c0_317, %c0_318] {strides = array<i32: 2, 1>} : memref<32x128xf32, #tpu.memory_space<vmem>>, vector<15x128xf32>
    %394 = vector.broadcast %2 : vector<1x128xf32> to vector<15x128xf32>
    %395 = arith.addf %393, %394 : vector<15x128xf32>
    %cst_319 = arith.constant 0.000000e+00 : f32
    %396 = vector.broadcast %cst_319 : f32 to vector<15x128xf32>
    %397 = arith.maximumf %395, %396 : vector<15x128xf32>
    %398 = arith.truncf %397 : vector<15x128xf32> to vector<15x128xbf16>
    %c0_320 = arith.constant 0 : index
    %c268 = arith.constant 268 : index
    %c0_321 = arith.constant 0 : index
    %399 = vector.load %arg4[%c0_320, %c268, %c0_321] : memref<2x368x128xbf16, #tpu.memory_space<vmem>>, vector<1x15x128xbf16>
    %400 = vector.shape_cast %399 : vector<1x15x128xbf16> to vector<15x128xbf16>
    %401 = vector.shape_cast %398 : vector<15x128xbf16> to vector<1x15x128xbf16>
    tpu.vector_store %arg4[%c0_320, %c268, %c0_321], %401 {strides = array<i32>} : memref<2x368x128xbf16, #tpu.memory_space<vmem>>, vector<1x15x128xbf16>,
    %c832_322 = arith.constant 832 : index
    %c0_323 = arith.constant 0 : index
    %402 = vector.load %arg5[%c832_322, %c0_323] : memref<1024x128xf32, #tpu.memory_space<vmem>>, vector<29x128xf32>
    %c833_324 = arith.constant 833 : index
    %c0_325 = arith.constant 0 : index
    %403 = vector.load %arg5[%c833_324, %c0_325] : memref<1024x128xf32, #tpu.memory_space<vmem>>, vector<29x128xf32>
    %404 = arith.maximumf %402, %403 : vector<29x128xf32>
    %c834_326 = arith.constant 834 : index
    %c0_327 = arith.constant 0 : index
    %405 = vector.load %arg5[%c834_326, %c0_327] : memref<1024x128xf32, #tpu.memory_space<vmem>>, vector<29x128xf32>
    %406 = arith.maximumf %404, %405 : vector<29x128xf32>
    %c864 = arith.constant 864 : index
    %c0_328 = arith.constant 0 : index
    %407 = vector.load %arg5[%c864, %c0_328] : memref<1024x128xf32, #tpu.memory_space<vmem>>, vector<29x128xf32>
    %c865 = arith.constant 865 : index
    %c0_329 = arith.constant 0 : index
    %408 = vector.load %arg5[%c865, %c0_329] : memref<1024x128xf32, #tpu.memory_space<vmem>>, vector<29x128xf32>
    %409 = arith.maximumf %407, %408 : vector<29x128xf32>
    %c866 = arith.constant 866 : index
    %c0_330 = arith.constant 0 : index
    %410 = vector.load %arg5[%c866, %c0_330] : memref<1024x128xf32, #tpu.memory_space<vmem>>, vector<29x128xf32>
    %411 = arith.maximumf %409, %410 : vector<29x128xf32>
    %412 = arith.maximumf %406, %411 : vector<29x128xf32>
    %c896_331 = arith.constant 896 : index
    %c0_332 = arith.constant 0 : index
    %413 = vector.load %arg5[%c896_331, %c0_332] : memref<1024x128xf32, #tpu.memory_space<vmem>>, vector<29x128xf32>
    %c897 = arith.constant 897 : index
    %c0_333 = arith.constant 0 : index
    %414 = vector.load %arg5[%c897, %c0_333] : memref<1024x128xf32, #tpu.memory_space<vmem>>, vector<29x128xf32>
    %415 = arith.maximumf %413, %414 : vector<29x128xf32>
    %c898 = arith.constant 898 : index
    %c0_334 = arith.constant 0 : index
    %416 = vector.load %arg5[%c898, %c0_334] : memref<1024x128xf32, #tpu.memory_space<vmem>>, vector<29x128xf32>
    %417 = arith.maximumf %415, %416 : vector<29x128xf32>
    %418 = arith.maximumf %412, %417 : vector<29x128xf32>
    %c0_335 = arith.constant 0 : index
    %c0_336 = arith.constant 0 : index
    %419 = vector.load %arg6[%c0_335, %c0_336] : memref<32x128xf32, #tpu.memory_space<vmem>>, vector<29x128xf32>
    tpu.vector_store %arg6[%c0_335, %c0_336], %418 {strides = array<i32>} : memref<32x128xf32, #tpu.memory_space<vmem>>, vector<29x128xf32>,
    %c0_337 = arith.constant 0 : index
    %c0_338 = arith.constant 0 : index
    %420 = tpu.strided_load %arg6[%c0_337, %c0_338] {strides = array<i32: 2, 1>} : memref<32x128xf32, #tpu.memory_space<vmem>>, vector<15x128xf32>
    %421 = vector.broadcast %2 : vector<1x128xf32> to vector<15x128xf32>
    %422 = arith.addf %420, %421 : vector<15x128xf32>
    %cst_339 = arith.constant 0.000000e+00 : f32
    %423 = vector.broadcast %cst_339 : f32 to vector<15x128xf32>
    %424 = arith.maximumf %422, %423 : vector<15x128xf32>
    %425 = arith.truncf %424 : vector<15x128xf32> to vector<15x128xbf16>
    %c0_340 = arith.constant 0 : index
    %c287 = arith.constant 287 : index
    %c0_341 = arith.constant 0 : index
    %426 = vector.load %arg4[%c0_340, %c287, %c0_341] : memref<2x368x128xbf16, #tpu.memory_space<vmem>>, vector<1x15x128xbf16>
    %427 = vector.shape_cast %426 : vector<1x15x128xbf16> to vector<15x128xbf16>
    %428 = vector.shape_cast %425 : vector<15x128xbf16> to vector<1x15x128xbf16>
    tpu.vector_store %arg4[%c0_340, %c287, %c0_341], %428 {strides = array<i32>} : memref<2x368x128xbf16, #tpu.memory_space<vmem>>, vector<1x15x128xbf16>,
    %c896_342 = arith.constant 896 : index
    %c0_343 = arith.constant 0 : index
    %429 = vector.load %arg5[%c896_342, %c0_343] : memref<1024x128xf32, #tpu.memory_space<vmem>>, vector<29x128xf32>
    %c897_344 = arith.constant 897 : index
    %c0_345 = arith.constant 0 : index
    %430 = vector.load %arg5[%c897_344, %c0_345] : memref<1024x128xf32, #tpu.memory_space<vmem>>, vector<29x128xf32>
    %431 = arith.maximumf %429, %430 : vector<29x128xf32>
    %c898_346 = arith.constant 898 : index
    %c0_347 = arith.constant 0 : index
    %432 = vector.load %arg5[%c898_346, %c0_347] : memref<1024x128xf32, #tpu.memory_space<vmem>>, vector<29x128xf32>
    %433 = arith.maximumf %431, %432 : vector<29x128xf32>
    %c928 = arith.constant 928 : index
    %c0_348 = arith.constant 0 : index
    %434 = vector.load %arg5[%c928, %c0_348] : memref<1024x128xf32, #tpu.memory_space<vmem>>, vector<29x128xf32>
    %c929 = arith.constant 929 : index
    %c0_349 = arith.constant 0 : index
    %435 = vector.load %arg5[%c929, %c0_349] : memref<1024x128xf32, #tpu.memory_space<vmem>>, vector<29x128xf32>
    %436 = arith.maximumf %434, %435 : vector<29x128xf32>
    %c930 = arith.constant 930 : index
    %c0_350 = arith.constant 0 : index
    %437 = vector.load %arg5[%c930, %c0_350] : memref<1024x128xf32, #tpu.memory_space<vmem>>, vector<29x128xf32>
    %438 = arith.maximumf %436, %437 : vector<29x128xf32>
    %439 = arith.maximumf %433, %438 : vector<29x128xf32>
    %c960 = arith.constant 960 : index
    %c0_351 = arith.constant 0 : index
    %440 = vector.load %arg5[%c960, %c0_351] : memref<1024x128xf32, #tpu.memory_space<vmem>>, vector<29x128xf32>
    %c961 = arith.constant 961 : index
    %c0_352 = arith.constant 0 : index
    %441 = vector.load %arg5[%c961, %c0_352] : memref<1024x128xf32, #tpu.memory_space<vmem>>, vector<29x128xf32>
    %442 = arith.maximumf %440, %441 : vector<29x128xf32>
    %c962 = arith.constant 962 : index
    %c0_353 = arith.constant 0 : index
    %443 = vector.load %arg5[%c962, %c0_353] : memref<1024x128xf32, #tpu.memory_space<vmem>>, vector<29x128xf32>
    %444 = arith.maximumf %442, %443 : vector<29x128xf32>
    %445 = arith.maximumf %439, %444 : vector<29x128xf32>
    %c0_354 = arith.constant 0 : index
    %c0_355 = arith.constant 0 : index
    %446 = vector.load %arg6[%c0_354, %c0_355] : memref<32x128xf32, #tpu.memory_space<vmem>>, vector<29x128xf32>
    tpu.vector_store %arg6[%c0_354, %c0_355], %445 {strides = array<i32>} : memref<32x128xf32, #tpu.memory_space<vmem>>, vector<29x128xf32>,
    %c0_356 = arith.constant 0 : index
    %c0_357 = arith.constant 0 : index
    %447 = tpu.strided_load %arg6[%c0_356, %c0_357] {strides = array<i32: 2, 1>} : memref<32x128xf32, #tpu.memory_space<vmem>>, vector<15x128xf32>
    %448 = vector.broadcast %2 : vector<1x128xf32> to vector<15x128xf32>
    %449 = arith.addf %447, %448 : vector<15x128xf32>
    %cst_358 = arith.constant 0.000000e+00 : f32
    %450 = vector.broadcast %cst_358 : f32 to vector<15x128xf32>
    %451 = arith.maximumf %449, %450 : vector<15x128xf32>
    %452 = arith.truncf %451 : vector<15x128xf32> to vector<15x128xbf16>
    %c0_359 = arith.constant 0 : index
    %c306 = arith.constant 306 : index
    %c0_360 = arith.constant 0 : index
    %453 = vector.load %arg4[%c0_359, %c306, %c0_360] : memref<2x368x128xbf16, #tpu.memory_space<vmem>>, vector<1x15x128xbf16>
    %454 = vector.shape_cast %453 : vector<1x15x128xbf16> to vector<15x128xbf16>
    %455 = vector.shape_cast %452 : vector<15x128xbf16> to vector<1x15x128xbf16>
    tpu.vector_store %arg4[%c0_359, %c306, %c0_360], %455 {strides = array<i32>} : memref<2x368x128xbf16, #tpu.memory_space<vmem>>, vector<1x15x128xbf16>,
    %c1_361 = arith.constant 1 : index
    %c0_362 = arith.constant 0 : index
    %c0_363 = arith.constant 0 : index
    %456 = vector.load %arg1[%c1_361, %c0_362, %c0_363] : memref<2x1024x128xbf16, #tpu.memory_space<vmem>>, vector<1x128x128xbf16>
    %457 = vector.shape_cast %456 : vector<1x128x128xbf16> to vector<128x128xbf16>
    %c0_364 = arith.constant 0 : index
    %c0_365 = arith.constant 0 : index
    %c0_366 = arith.constant 0 : index
    %458 = vector.load %arg2[%c0_364, %c0_365, %c0_366] : memref<1x128x128xbf16, #tpu.memory_space<vmem>>, vector<1x128x128xbf16>
    %459 = vector.shape_cast %458 : vector<1x128x128xbf16> to vector<128x128xbf16>
    %cst_367 = arith.constant dense<0.000000e+00> : vector<128x128xf32>
    %460 = tpu.matmul %457, %459, %cst_367 {dimension_numbers = #tpu.dot_dimension_numbers<[1], [0], [0], [1], [0, 0, 1, 1], [], []>} : vector<128x128xbf16>, vector<128x128xbf16>, vector<128x128xf32> -> vector<128x128xf32>
    %c0_368 = arith.constant 0 : index
    %c0_369 = arith.constant 0 : index
    %461 = vector.load %arg5[%c0_368, %c0_369] : memref<1024x128xf32, #tpu.memory_space<vmem>>, vector<128x128xf32>
    tpu.vector_store %arg5[%c0_368, %c0_369], %460 {strides = array<i32>} : memref<1024x128xf32, #tpu.memory_space<vmem>>, vector<128x128xf32>,
    %c1_370 = arith.constant 1 : index
    %c128_371 = arith.constant 128 : index
    %c0_372 = arith.constant 0 : index
    %462 = vector.load %arg1[%c1_370, %c128_371, %c0_372] : memref<2x1024x128xbf16, #tpu.memory_space<vmem>>, vector<1x128x128xbf16>
    %463 = vector.shape_cast %462 : vector<1x128x128xbf16> to vector<128x128xbf16>
    %c0_373 = arith.constant 0 : index
    %c0_374 = arith.constant 0 : index
    %c0_375 = arith.constant 0 : index
    %464 = vector.load %arg2[%c0_373, %c0_374, %c0_375] : memref<1x128x128xbf16, #tpu.memory_space<vmem>>, vector<1x128x128xbf16>
    %465 = vector.shape_cast %464 : vector<1x128x128xbf16> to vector<128x128xbf16>
    %cst_376 = arith.constant dense<0.000000e+00> : vector<128x128xf32>
    %466 = tpu.matmul %463, %465, %cst_376 {dimension_numbers = #tpu.dot_dimension_numbers<[1], [0], [0], [1], [0, 0, 1, 1], [], []>} : vector<128x128xbf16>, vector<128x128xbf16>, vector<128x128xf32> -> vector<128x128xf32>
    %c128_377 = arith.constant 128 : index
    %c0_378 = arith.constant 0 : index
    %467 = vector.load %arg5[%c128_377, %c0_378] : memref<1024x128xf32, #tpu.memory_space<vmem>>, vector<128x128xf32>
    tpu.vector_store %arg5[%c128_377, %c0_378], %466 {strides = array<i32>} : memref<1024x128xf32, #tpu.memory_space<vmem>>, vector<128x128xf32>,
    %c1_379 = arith.constant 1 : index
    %c256_380 = arith.constant 256 : index
    %c0_381 = arith.constant 0 : index
    %468 = vector.load %arg1[%c1_379, %c256_380, %c0_381] : memref<2x1024x128xbf16, #tpu.memory_space<vmem>>, vector<1x128x128xbf16>
    %469 = vector.shape_cast %468 : vector<1x128x128xbf16> to vector<128x128xbf16>
    %c0_382 = arith.constant 0 : index
    %c0_383 = arith.constant 0 : index
    %c0_384 = arith.constant 0 : index
    %470 = vector.load %arg2[%c0_382, %c0_383, %c0_384] : memref<1x128x128xbf16, #tpu.memory_space<vmem>>, vector<1x128x128xbf16>
    %471 = vector.shape_cast %470 : vector<1x128x128xbf16> to vector<128x128xbf16>
    %cst_385 = arith.constant dense<0.000000e+00> : vector<128x128xf32>
    %472 = tpu.matmul %469, %471, %cst_385 {dimension_numbers = #tpu.dot_dimension_numbers<[1], [0], [0], [1], [0, 0, 1, 1], [], []>} : vector<128x128xbf16>, vector<128x128xbf16>, vector<128x128xf32> -> vector<128x128xf32>
    %c256_386 = arith.constant 256 : index
    %c0_387 = arith.constant 0 : index
    %473 = vector.load %arg5[%c256_386, %c0_387] : memref<1024x128xf32, #tpu.memory_space<vmem>>, vector<128x128xf32>
    tpu.vector_store %arg5[%c256_386, %c0_387], %472 {strides = array<i32>} : memref<1024x128xf32, #tpu.memory_space<vmem>>, vector<128x128xf32>,
    %c1_388 = arith.constant 1 : index
    %c384_389 = arith.constant 384 : index
    %c0_390 = arith.constant 0 : index
    %474 = vector.load %arg1[%c1_388, %c384_389, %c0_390] : memref<2x1024x128xbf16, #tpu.memory_space<vmem>>, vector<1x128x128xbf16>
    %475 = vector.shape_cast %474 : vector<1x128x128xbf16> to vector<128x128xbf16>
    %c0_391 = arith.constant 0 : index
    %c0_392 = arith.constant 0 : index
    %c0_393 = arith.constant 0 : index
    %476 = vector.load %arg2[%c0_391, %c0_392, %c0_393] : memref<1x128x128xbf16, #tpu.memory_space<vmem>>, vector<1x128x128xbf16>
    %477 = vector.shape_cast %476 : vector<1x128x128xbf16> to vector<128x128xbf16>
    %cst_394 = arith.constant dense<0.000000e+00> : vector<128x128xf32>
    %478 = tpu.matmul %475, %477, %cst_394 {dimension_numbers = #tpu.dot_dimension_numbers<[1], [0], [0], [1], [0, 0, 1, 1], [], []>} : vector<128x128xbf16>, vector<128x128xbf16>, vector<128x128xf32> -> vector<128x128xf32>
    %c384_395 = arith.constant 384 : index
    %c0_396 = arith.constant 0 : index
    %479 = vector.load %arg5[%c384_395, %c0_396] : memref<1024x128xf32, #tpu.memory_space<vmem>>, vector<128x128xf32>
    tpu.vector_store %arg5[%c384_395, %c0_396], %478 {strides = array<i32>} : memref<1024x128xf32, #tpu.memory_space<vmem>>, vector<128x128xf32>,
    %c1_397 = arith.constant 1 : index
    %c512_398 = arith.constant 512 : index
    %c0_399 = arith.constant 0 : index
    %480 = vector.load %arg1[%c1_397, %c512_398, %c0_399] : memref<2x1024x128xbf16, #tpu.memory_space<vmem>>, vector<1x128x128xbf16>
    %481 = vector.shape_cast %480 : vector<1x128x128xbf16> to vector<128x128xbf16>
    %c0_400 = arith.constant 0 : index
    %c0_401 = arith.constant 0 : index
    %c0_402 = arith.constant 0 : index
    %482 = vector.load %arg2[%c0_400, %c0_401, %c0_402] : memref<1x128x128xbf16, #tpu.memory_space<vmem>>, vector<1x128x128xbf16>
    %483 = vector.shape_cast %482 : vector<1x128x128xbf16> to vector<128x128xbf16>
    %cst_403 = arith.constant dense<0.000000e+00> : vector<128x128xf32>
    %484 = tpu.matmul %481, %483, %cst_403 {dimension_numbers = #tpu.dot_dimension_numbers<[1], [0], [0], [1], [0, 0, 1, 1], [], []>} : vector<128x128xbf16>, vector<128x128xbf16>, vector<128x128xf32> -> vector<128x128xf32>
    %c512_404 = arith.constant 512 : index
    %c0_405 = arith.constant 0 : index
    %485 = vector.load %arg5[%c512_404, %c0_405] : memref<1024x128xf32, #tpu.memory_space<vmem>>, vector<128x128xf32>
    tpu.vector_store %arg5[%c512_404, %c0_405], %484 {strides = array<i32>} : memref<1024x128xf32, #tpu.memory_space<vmem>>, vector<128x128xf32>,
    %c1_406 = arith.constant 1 : index
    %c640_407 = arith.constant 640 : index
    %c0_408 = arith.constant 0 : index
    %486 = vector.load %arg1[%c1_406, %c640_407, %c0_408] : memref<2x1024x128xbf16, #tpu.memory_space<vmem>>, vector<1x128x128xbf16>
    %487 = vector.shape_cast %486 : vector<1x128x128xbf16> to vector<128x128xbf16>
    %c0_409 = arith.constant 0 : index
    %c0_410 = arith.constant 0 : index
    %c0_411 = arith.constant 0 : index
    %488 = vector.load %arg2[%c0_409, %c0_410, %c0_411] : memref<1x128x128xbf16, #tpu.memory_space<vmem>>, vector<1x128x128xbf16>
    %489 = vector.shape_cast %488 : vector<1x128x128xbf16> to vector<128x128xbf16>
    %cst_412 = arith.constant dense<0.000000e+00> : vector<128x128xf32>
    %490 = tpu.matmul %487, %489, %cst_412 {dimension_numbers = #tpu.dot_dimension_numbers<[1], [0], [0], [1], [0, 0, 1, 1], [], []>} : vector<128x128xbf16>, vector<128x128xbf16>, vector<128x128xf32> -> vector<128x128xf32>
    %c640_413 = arith.constant 640 : index
    %c0_414 = arith.constant 0 : index
    %491 = vector.load %arg5[%c640_413, %c0_414] : memref<1024x128xf32, #tpu.memory_space<vmem>>, vector<128x128xf32>
    tpu.vector_store %arg5[%c640_413, %c0_414], %490 {strides = array<i32>} : memref<1024x128xf32, #tpu.memory_space<vmem>>, vector<128x128xf32>,
    %c1_415 = arith.constant 1 : index
    %c768_416 = arith.constant 768 : index
    %c0_417 = arith.constant 0 : index
    %492 = vector.load %arg1[%c1_415, %c768_416, %c0_417] : memref<2x1024x128xbf16, #tpu.memory_space<vmem>>, vector<1x128x128xbf16>
    %493 = vector.shape_cast %492 : vector<1x128x128xbf16> to vector<128x128xbf16>
    %c0_418 = arith.constant 0 : index
    %c0_419 = arith.constant 0 : index
    %c0_420 = arith.constant 0 : index
    %494 = vector.load %arg2[%c0_418, %c0_419, %c0_420] : memref<1x128x128xbf16, #tpu.memory_space<vmem>>, vector<1x128x128xbf16>
    %495 = vector.shape_cast %494 : vector<1x128x128xbf16> to vector<128x128xbf16>
    %cst_421 = arith.constant dense<0.000000e+00> : vector<128x128xf32>
    %496 = tpu.matmul %493, %495, %cst_421 {dimension_numbers = #tpu.dot_dimension_numbers<[1], [0], [0], [1], [0, 0, 1, 1], [], []>} : vector<128x128xbf16>, vector<128x128xbf16>, vector<128x128xf32> -> vector<128x128xf32>
    %c768_422 = arith.constant 768 : index
    %c0_423 = arith.constant 0 : index
    %497 = vector.load %arg5[%c768_422, %c0_423] : memref<1024x128xf32, #tpu.memory_space<vmem>>, vector<128x128xf32>
    tpu.vector_store %arg5[%c768_422, %c0_423], %496 {strides = array<i32>} : memref<1024x128xf32, #tpu.memory_space<vmem>>, vector<128x128xf32>,
    %c1_424 = arith.constant 1 : index
    %c896_425 = arith.constant 896 : index
    %c0_426 = arith.constant 0 : index
    %498 = vector.load %arg1[%c1_424, %c896_425, %c0_426] : memref<2x1024x128xbf16, #tpu.memory_space<vmem>>, vector<1x128x128xbf16>
    %499 = vector.shape_cast %498 : vector<1x128x128xbf16> to vector<128x128xbf16>
    %c0_427 = arith.constant 0 : index
    %c0_428 = arith.constant 0 : index
    %c0_429 = arith.constant 0 : index
    %500 = vector.load %arg2[%c0_427, %c0_428, %c0_429] : memref<1x128x128xbf16, #tpu.memory_space<vmem>>, vector<1x128x128xbf16>
    %501 = vector.shape_cast %500 : vector<1x128x128xbf16> to vector<128x128xbf16>
    %cst_430 = arith.constant dense<0.000000e+00> : vector<128x128xf32>
    %502 = tpu.matmul %499, %501, %cst_430 {dimension_numbers = #tpu.dot_dimension_numbers<[1], [0], [0], [1], [0, 0, 1, 1], [], []>} : vector<128x128xbf16>, vector<128x128xbf16>, vector<128x128xf32> -> vector<128x128xf32>
    %c896_431 = arith.constant 896 : index
    %c0_432 = arith.constant 0 : index
    %503 = vector.load %arg5[%c896_431, %c0_432] : memref<1024x128xf32, #tpu.memory_space<vmem>>, vector<128x128xf32>
    tpu.vector_store %arg5[%c896_431, %c0_432], %502 {strides = array<i32>} : memref<1024x128xf32, #tpu.memory_space<vmem>>, vector<128x128xf32>,
    %c0_433 = arith.constant 0 : index
    %c0_434 = arith.constant 0 : index
    %504 = vector.load %arg5[%c0_433, %c0_434] : memref<1024x128xf32, #tpu.memory_space<vmem>>, vector<29x128xf32>
    %c1_435 = arith.constant 1 : index
    %c0_436 = arith.constant 0 : index
    %505 = vector.load %arg5[%c1_435, %c0_436] : memref<1024x128xf32, #tpu.memory_space<vmem>>, vector<29x128xf32>
    %506 = arith.maximumf %504, %505 : vector<29x128xf32>
    %c2_437 = arith.constant 2 : index
    %c0_438 = arith.constant 0 : index
    %507 = vector.load %arg5[%c2_437, %c0_438] : memref<1024x128xf32, #tpu.memory_space<vmem>>, vector<29x128xf32>
    %508 = arith.maximumf %506, %507 : vector<29x128xf32>
    %c32_439 = arith.constant 32 : index
    %c0_440 = arith.constant 0 : index
    %509 = vector.load %arg5[%c32_439, %c0_440] : memref<1024x128xf32, #tpu.memory_space<vmem>>, vector<29x128xf32>
    %c33_441 = arith.constant 33 : index
    %c0_442 = arith.constant 0 : index
    %510 = vector.load %arg5[%c33_441, %c0_442] : memref<1024x128xf32, #tpu.memory_space<vmem>>, vector<29x128xf32>
    %511 = arith.maximumf %509, %510 : vector<29x128xf32>
    %c34_443 = arith.constant 34 : index
    %c0_444 = arith.constant 0 : index
    %512 = vector.load %arg5[%c34_443, %c0_444] : memref<1024x128xf32, #tpu.memory_space<vmem>>, vector<29x128xf32>
    %513 = arith.maximumf %511, %512 : vector<29x128xf32>
    %514 = arith.maximumf %508, %513 : vector<29x128xf32>
    %c64_445 = arith.constant 64 : index
    %c0_446 = arith.constant 0 : index
    %515 = vector.load %arg5[%c64_445, %c0_446] : memref<1024x128xf32, #tpu.memory_space<vmem>>, vector<29x128xf32>
    %c65_447 = arith.constant 65 : index
    %c0_448 = arith.constant 0 : index
    %516 = vector.load %arg5[%c65_447, %c0_448] : memref<1024x128xf32, #tpu.memory_space<vmem>>, vector<29x128xf32>
    %517 = arith.maximumf %515, %516 : vector<29x128xf32>
    %c66_449 = arith.constant 66 : index
    %c0_450 = arith.constant 0 : index
    %518 = vector.load %arg5[%c66_449, %c0_450] : memref<1024x128xf32, #tpu.memory_space<vmem>>, vector<29x128xf32>
    %519 = arith.maximumf %517, %518 : vector<29x128xf32>
    %520 = arith.maximumf %514, %519 : vector<29x128xf32>
    %c0_451 = arith.constant 0 : index
    %c0_452 = arith.constant 0 : index
    %521 = vector.load %arg6[%c0_451, %c0_452] : memref<32x128xf32, #tpu.memory_space<vmem>>, vector<29x128xf32>
    tpu.vector_store %arg6[%c0_451, %c0_452], %520 {strides = array<i32>} : memref<32x128xf32, #tpu.memory_space<vmem>>, vector<29x128xf32>,
    %c0_453 = arith.constant 0 : index
    %c0_454 = arith.constant 0 : index
    %522 = tpu.strided_load %arg6[%c0_453, %c0_454] {strides = array<i32: 2, 1>} : memref<32x128xf32, #tpu.memory_space<vmem>>, vector<15x128xf32>
    %523 = vector.broadcast %2 : vector<1x128xf32> to vector<15x128xf32>
    %524 = arith.addf %522, %523 : vector<15x128xf32>
    %cst_455 = arith.constant 0.000000e+00 : f32
    %525 = vector.broadcast %cst_455 : f32 to vector<15x128xf32>
    %526 = arith.maximumf %524, %525 : vector<15x128xf32>
    %527 = arith.truncf %526 : vector<15x128xf32> to vector<15x128xbf16>
    %c1_456 = arith.constant 1 : index
    %c40_457 = arith.constant 40 : index
    %c0_458 = arith.constant 0 : index
    %528 = vector.load %arg4[%c1_456, %c40_457, %c0_458] : memref<2x368x128xbf16, #tpu.memory_space<vmem>>, vector<1x15x128xbf16>
    %529 = vector.shape_cast %528 : vector<1x15x128xbf16> to vector<15x128xbf16>
    %530 = vector.shape_cast %527 : vector<15x128xbf16> to vector<1x15x128xbf16>
    tpu.vector_store %arg4[%c1_456, %c40_457, %c0_458], %530 {strides = array<i32>} : memref<2x368x128xbf16, #tpu.memory_space<vmem>>, vector<1x15x128xbf16>,
    %c64_459 = arith.constant 64 : index
    %c0_460 = arith.constant 0 : index
    %531 = vector.load %arg5[%c64_459, %c0_460] : memref<1024x128xf32, #tpu.memory_space<vmem>>, vector<29x128xf32>
    %c65_461 = arith.constant 65 : index
    %c0_462 = arith.constant 0 : index
    %532 = vector.load %arg5[%c65_461, %c0_462] : memref<1024x128xf32, #tpu.memory_space<vmem>>, vector<29x128xf32>
    %533 = arith.maximumf %531, %532 : vector<29x128xf32>
    %c66_463 = arith.constant 66 : index
    %c0_464 = arith.constant 0 : index
    %534 = vector.load %arg5[%c66_463, %c0_464] : memref<1024x128xf32, #tpu.memory_space<vmem>>, vector<29x128xf32>
    %535 = arith.maximumf %533, %534 : vector<29x128xf32>
    %c96_465 = arith.constant 96 : index
    %c0_466 = arith.constant 0 : index
    %536 = vector.load %arg5[%c96_465, %c0_466] : memref<1024x128xf32, #tpu.memory_space<vmem>>, vector<29x128xf32>
    %c97_467 = arith.constant 97 : index
    %c0_468 = arith.constant 0 : index
    %537 = vector.load %arg5[%c97_467, %c0_468] : memref<1024x128xf32, #tpu.memory_space<vmem>>, vector<29x128xf32>
    %538 = arith.maximumf %536, %537 : vector<29x128xf32>
    %c98_469 = arith.constant 98 : index
    %c0_470 = arith.constant 0 : index
    %539 = vector.load %arg5[%c98_469, %c0_470] : memref<1024x128xf32, #tpu.memory_space<vmem>>, vector<29x128xf32>
    %540 = arith.maximumf %538, %539 : vector<29x128xf32>
    %541 = arith.maximumf %535, %540 : vector<29x128xf32>
    %c128_471 = arith.constant 128 : index
    %c0_472 = arith.constant 0 : index
    %542 = vector.load %arg5[%c128_471, %c0_472] : memref<1024x128xf32, #tpu.memory_space<vmem>>, vector<29x128xf32>
    %c129_473 = arith.constant 129 : index
    %c0_474 = arith.constant 0 : index
    %543 = vector.load %arg5[%c129_473, %c0_474] : memref<1024x128xf32, #tpu.memory_space<vmem>>, vector<29x128xf32>
    %544 = arith.maximumf %542, %543 : vector<29x128xf32>
    %c130_475 = arith.constant 130 : index
    %c0_476 = arith.constant 0 : index
    %545 = vector.load %arg5[%c130_475, %c0_476] : memref<1024x128xf32, #tpu.memory_space<vmem>>, vector<29x128xf32>
    %546 = arith.maximumf %544, %545 : vector<29x128xf32>
    %547 = arith.maximumf %541, %546 : vector<29x128xf32>
    %c0_477 = arith.constant 0 : index
    %c0_478 = arith.constant 0 : index
    %548 = vector.load %arg6[%c0_477, %c0_478] : memref<32x128xf32, #tpu.memory_space<vmem>>, vector<29x128xf32>
    tpu.vector_store %arg6[%c0_477, %c0_478], %547 {strides = array<i32>} : memref<32x128xf32, #tpu.memory_space<vmem>>, vector<29x128xf32>,
    %c0_479 = arith.constant 0 : index
    %c0_480 = arith.constant 0 : index
    %549 = tpu.strided_load %arg6[%c0_479, %c0_480] {strides = array<i32: 2, 1>} : memref<32x128xf32, #tpu.memory_space<vmem>>, vector<15x128xf32>
    %550 = vector.broadcast %2 : vector<1x128xf32> to vector<15x128xf32>
    %551 = arith.addf %549, %550 : vector<15x128xf32>
    %cst_481 = arith.constant 0.000000e+00 : f32
    %552 = vector.broadcast %cst_481 : f32 to vector<15x128xf32>
    %553 = arith.maximumf %551, %552 : vector<15x128xf32>
    %554 = arith.truncf %553 : vector<15x128xf32> to vector<15x128xbf16>
    %c1_482 = arith.constant 1 : index
    %c59_483 = arith.constant 59 : index
    %c0_484 = arith.constant 0 : index
    %555 = vector.load %arg4[%c1_482, %c59_483, %c0_484] : memref<2x368x128xbf16, #tpu.memory_space<vmem>>, vector<1x15x128xbf16>
    %556 = vector.shape_cast %555 : vector<1x15x128xbf16> to vector<15x128xbf16>
    %557 = vector.shape_cast %554 : vector<15x128xbf16> to vector<1x15x128xbf16>
    tpu.vector_store %arg4[%c1_482, %c59_483, %c0_484], %557 {strides = array<i32>} : memref<2x368x128xbf16, #tpu.memory_space<vmem>>, vector<1x15x128xbf16>,
    %c128_485 = arith.constant 128 : index
    %c0_486 = arith.constant 0 : index
    %558 = vector.load %arg5[%c128_485, %c0_486] : memref<1024x128xf32, #tpu.memory_space<vmem>>, vector<29x128xf32>
    %c129_487 = arith.constant 129 : index
    %c0_488 = arith.constant 0 : index
    %559 = vector.load %arg5[%c129_487, %c0_488] : memref<1024x128xf32, #tpu.memory_space<vmem>>, vector<29x128xf32>
    %560 = arith.maximumf %558, %559 : vector<29x128xf32>
    %c130_489 = arith.constant 130 : index
    %c0_490 = arith.constant 0 : index
    %561 = vector.load %arg5[%c130_489, %c0_490] : memref<1024x128xf32, #tpu.memory_space<vmem>>, vector<29x128xf32>
    %562 = arith.maximumf %560, %561 : vector<29x128xf32>
    %c160_491 = arith.constant 160 : index
    %c0_492 = arith.constant 0 : index
    %563 = vector.load %arg5[%c160_491, %c0_492] : memref<1024x128xf32, #tpu.memory_space<vmem>>, vector<29x128xf32>
    %c161_493 = arith.constant 161 : index
    %c0_494 = arith.constant 0 : index
    %564 = vector.load %arg5[%c161_493, %c0_494] : memref<1024x128xf32, #tpu.memory_space<vmem>>, vector<29x128xf32>
    %565 = arith.maximumf %563, %564 : vector<29x128xf32>
    %c162_495 = arith.constant 162 : index
    %c0_496 = arith.constant 0 : index
    %566 = vector.load %arg5[%c162_495, %c0_496] : memref<1024x128xf32, #tpu.memory_space<vmem>>, vector<29x128xf32>
    %567 = arith.maximumf %565, %566 : vector<29x128xf32>
    %568 = arith.maximumf %562, %567 : vector<29x128xf32>
    %c192_497 = arith.constant 192 : index
    %c0_498 = arith.constant 0 : index
    %569 = vector.load %arg5[%c192_497, %c0_498] : memref<1024x128xf32, #tpu.memory_space<vmem>>, vector<29x128xf32>
    %c193_499 = arith.constant 193 : index
    %c0_500 = arith.constant 0 : index
    %570 = vector.load %arg5[%c193_499, %c0_500] : memref<1024x128xf32, #tpu.memory_space<vmem>>, vector<29x128xf32>
    %571 = arith.maximumf %569, %570 : vector<29x128xf32>
    %c194_501 = arith.constant 194 : index
    %c0_502 = arith.constant 0 : index
    %572 = vector.load %arg5[%c194_501, %c0_502] : memref<1024x128xf32, #tpu.memory_space<vmem>>, vector<29x128xf32>
    %573 = arith.maximumf %571, %572 : vector<29x128xf32>
    %574 = arith.maximumf %568, %573 : vector<29x128xf32>
    %c0_503 = arith.constant 0 : index
    %c0_504 = arith.constant 0 : index
    %575 = vector.load %arg6[%c0_503, %c0_504] : memref<32x128xf32, #tpu.memory_space<vmem>>, vector<29x128xf32>
    tpu.vector_store %arg6[%c0_503, %c0_504], %574 {strides = array<i32>} : memref<32x128xf32, #tpu.memory_space<vmem>>, vector<29x128xf32>,
    %c0_505 = arith.constant 0 : index
    %c0_506 = arith.constant 0 : index
    %576 = tpu.strided_load %arg6[%c0_505, %c0_506] {strides = array<i32: 2, 1>} : memref<32x128xf32, #tpu.memory_space<vmem>>, vector<15x128xf32>
    %577 = vector.broadcast %2 : vector<1x128xf32> to vector<15x128xf32>
    %578 = arith.addf %576, %577 : vector<15x128xf32>
    %cst_507 = arith.constant 0.000000e+00 : f32
    %579 = vector.broadcast %cst_507 : f32 to vector<15x128xf32>
    %580 = arith.maximumf %578, %579 : vector<15x128xf32>
    %581 = arith.truncf %580 : vector<15x128xf32> to vector<15x128xbf16>
    %c1_508 = arith.constant 1 : index
    %c78_509 = arith.constant 78 : index
    %c0_510 = arith.constant 0 : index
    %582 = vector.load %arg4[%c1_508, %c78_509, %c0_510] : memref<2x368x128xbf16, #tpu.memory_space<vmem>>, vector<1x15x128xbf16>
    %583 = vector.shape_cast %582 : vector<1x15x128xbf16> to vector<15x128xbf16>
    %584 = vector.shape_cast %581 : vector<15x128xbf16> to vector<1x15x128xbf16>
    tpu.vector_store %arg4[%c1_508, %c78_509, %c0_510], %584 {strides = array<i32>} : memref<2x368x128xbf16, #tpu.memory_space<vmem>>, vector<1x15x128xbf16>,
    %c192_511 = arith.constant 192 : index
    %c0_512 = arith.constant 0 : index
    %585 = vector.load %arg5[%c192_511, %c0_512] : memref<1024x128xf32, #tpu.memory_space<vmem>>, vector<29x128xf32>
    %c193_513 = arith.constant 193 : index
    %c0_514 = arith.constant 0 : index
    %586 = vector.load %arg5[%c193_513, %c0_514] : memref<1024x128xf32, #tpu.memory_space<vmem>>, vector<29x128xf32>
    %587 = arith.maximumf %585, %586 : vector<29x128xf32>
    %c194_515 = arith.constant 194 : index
    %c0_516 = arith.constant 0 : index
    %588 = vector.load %arg5[%c194_515, %c0_516] : memref<1024x128xf32, #tpu.memory_space<vmem>>, vector<29x128xf32>
    %589 = arith.maximumf %587, %588 : vector<29x128xf32>
    %c224_517 = arith.constant 224 : index
    %c0_518 = arith.constant 0 : index
    %590 = vector.load %arg5[%c224_517, %c0_518] : memref<1024x128xf32, #tpu.memory_space<vmem>>, vector<29x128xf32>
    %c225_519 = arith.constant 225 : index
    %c0_520 = arith.constant 0 : index
    %591 = vector.load %arg5[%c225_519, %c0_520] : memref<1024x128xf32, #tpu.memory_space<vmem>>, vector<29x128xf32>
    %592 = arith.maximumf %590, %591 : vector<29x128xf32>
    %c226_521 = arith.constant 226 : index
    %c0_522 = arith.constant 0 : index
    %593 = vector.load %arg5[%c226_521, %c0_522] : memref<1024x128xf32, #tpu.memory_space<vmem>>, vector<29x128xf32>
    %594 = arith.maximumf %592, %593 : vector<29x128xf32>
    %595 = arith.maximumf %589, %594 : vector<29x128xf32>
    %c256_523 = arith.constant 256 : index
    %c0_524 = arith.constant 0 : index
    %596 = vector.load %arg5[%c256_523, %c0_524] : memref<1024x128xf32, #tpu.memory_space<vmem>>, vector<29x128xf32>
    %c257_525 = arith.constant 257 : index
    %c0_526 = arith.constant 0 : index
    %597 = vector.load %arg5[%c257_525, %c0_526] : memref<1024x128xf32, #tpu.memory_space<vmem>>, vector<29x128xf32>
    %598 = arith.maximumf %596, %597 : vector<29x128xf32>
    %c258_527 = arith.constant 258 : index
    %c0_528 = arith.constant 0 : index
    %599 = vector.load %arg5[%c258_527, %c0_528] : memref<1024x128xf32, #tpu.memory_space<vmem>>, vector<29x128xf32>
    %600 = arith.maximumf %598, %599 : vector<29x128xf32>
    %601 = arith.maximumf %595, %600 : vector<29x128xf32>
    %c0_529 = arith.constant 0 : index
    %c0_530 = arith.constant 0 : index
    %602 = vector.load %arg6[%c0_529, %c0_530] : memref<32x128xf32, #tpu.memory_space<vmem>>, vector<29x128xf32>
    tpu.vector_store %arg6[%c0_529, %c0_530], %601 {strides = array<i32>} : memref<32x128xf32, #tpu.memory_space<vmem>>, vector<29x128xf32>,
    %c0_531 = arith.constant 0 : index
    %c0_532 = arith.constant 0 : index
    %603 = tpu.strided_load %arg6[%c0_531, %c0_532] {strides = array<i32: 2, 1>} : memref<32x128xf32, #tpu.memory_space<vmem>>, vector<15x128xf32>
    %604 = vector.broadcast %2 : vector<1x128xf32> to vector<15x128xf32>
    %605 = arith.addf %603, %604 : vector<15x128xf32>
    %cst_533 = arith.constant 0.000000e+00 : f32
    %606 = vector.broadcast %cst_533 : f32 to vector<15x128xf32>
    %607 = arith.maximumf %605, %606 : vector<15x128xf32>
    %608 = arith.truncf %607 : vector<15x128xf32> to vector<15x128xbf16>
    %c1_534 = arith.constant 1 : index
    %c97_535 = arith.constant 97 : index
    %c0_536 = arith.constant 0 : index
    %609 = vector.load %arg4[%c1_534, %c97_535, %c0_536] : memref<2x368x128xbf16, #tpu.memory_space<vmem>>, vector<1x15x128xbf16>
    %610 = vector.shape_cast %609 : vector<1x15x128xbf16> to vector<15x128xbf16>
    %611 = vector.shape_cast %608 : vector<15x128xbf16> to vector<1x15x128xbf16>
    tpu.vector_store %arg4[%c1_534, %c97_535, %c0_536], %611 {strides = array<i32>} : memref<2x368x128xbf16, #tpu.memory_space<vmem>>, vector<1x15x128xbf16>,
    %c256_537 = arith.constant 256 : index
    %c0_538 = arith.constant 0 : index
    %612 = vector.load %arg5[%c256_537, %c0_538] : memref<1024x128xf32, #tpu.memory_space<vmem>>, vector<29x128xf32>
    %c257_539 = arith.constant 257 : index
    %c0_540 = arith.constant 0 : index
    %613 = vector.load %arg5[%c257_539, %c0_540] : memref<1024x128xf32, #tpu.memory_space<vmem>>, vector<29x128xf32>
    %614 = arith.maximumf %612, %613 : vector<29x128xf32>
    %c258_541 = arith.constant 258 : index
    %c0_542 = arith.constant 0 : index
    %615 = vector.load %arg5[%c258_541, %c0_542] : memref<1024x128xf32, #tpu.memory_space<vmem>>, vector<29x128xf32>
    %616 = arith.maximumf %614, %615 : vector<29x128xf32>
    %c288_543 = arith.constant 288 : index
    %c0_544 = arith.constant 0 : index
    %617 = vector.load %arg5[%c288_543, %c0_544] : memref<1024x128xf32, #tpu.memory_space<vmem>>, vector<29x128xf32>
    %c289_545 = arith.constant 289 : index
    %c0_546 = arith.constant 0 : index
    %618 = vector.load %arg5[%c289_545, %c0_546] : memref<1024x128xf32, #tpu.memory_space<vmem>>, vector<29x128xf32>
    %619 = arith.maximumf %617, %618 : vector<29x128xf32>
    %c290_547 = arith.constant 290 : index
    %c0_548 = arith.constant 0 : index
    %620 = vector.load %arg5[%c290_547, %c0_548] : memref<1024x128xf32, #tpu.memory_space<vmem>>, vector<29x128xf32>
    %621 = arith.maximumf %619, %620 : vector<29x128xf32>
    %622 = arith.maximumf %616, %621 : vector<29x128xf32>
    %c320_549 = arith.constant 320 : index
    %c0_550 = arith.constant 0 : index
    %623 = vector.load %arg5[%c320_549, %c0_550] : memref<1024x128xf32, #tpu.memory_space<vmem>>, vector<29x128xf32>
    %c321_551 = arith.constant 321 : index
    %c0_552 = arith.constant 0 : index
    %624 = vector.load %arg5[%c321_551, %c0_552] : memref<1024x128xf32, #tpu.memory_space<vmem>>, vector<29x128xf32>
    %625 = arith.maximumf %623, %624 : vector<29x128xf32>
    %c322_553 = arith.constant 322 : index
    %c0_554 = arith.constant 0 : index
    %626 = vector.load %arg5[%c322_553, %c0_554] : memref<1024x128xf32, #tpu.memory_space<vmem>>, vector<29x128xf32>
    %627 = arith.maximumf %625, %626 : vector<29x128xf32>
    %628 = arith.maximumf %622, %627 : vector<29x128xf32>
    %c0_555 = arith.constant 0 : index
    %c0_556 = arith.constant 0 : index
    %629 = vector.load %arg6[%c0_555, %c0_556] : memref<32x128xf32, #tpu.memory_space<vmem>>, vector<29x128xf32>
    tpu.vector_store %arg6[%c0_555, %c0_556], %628 {strides = array<i32>} : memref<32x128xf32, #tpu.memory_space<vmem>>, vector<29x128xf32>,
    %c0_557 = arith.constant 0 : index
    %c0_558 = arith.constant 0 : index
    %630 = tpu.strided_load %arg6[%c0_557, %c0_558] {strides = array<i32: 2, 1>} : memref<32x128xf32, #tpu.memory_space<vmem>>, vector<15x128xf32>
    %631 = vector.broadcast %2 : vector<1x128xf32> to vector<15x128xf32>
    %632 = arith.addf %630, %631 : vector<15x128xf32>
    %cst_559 = arith.constant 0.000000e+00 : f32
    %633 = vector.broadcast %cst_559 : f32 to vector<15x128xf32>
    %634 = arith.maximumf %632, %633 : vector<15x128xf32>
    %635 = arith.truncf %634 : vector<15x128xf32> to vector<15x128xbf16>
    %c1_560 = arith.constant 1 : index
    %c116_561 = arith.constant 116 : index
    %c0_562 = arith.constant 0 : index
    %636 = vector.load %arg4[%c1_560, %c116_561, %c0_562] : memref<2x368x128xbf16, #tpu.memory_space<vmem>>, vector<1x15x128xbf16>
    %637 = vector.shape_cast %636 : vector<1x15x128xbf16> to vector<15x128xbf16>
    %638 = vector.shape_cast %635 : vector<15x128xbf16> to vector<1x15x128xbf16>
    tpu.vector_store %arg4[%c1_560, %c116_561, %c0_562], %638 {strides = array<i32>} : memref<2x368x128xbf16, #tpu.memory_space<vmem>>, vector<1x15x128xbf16>,
    %c320_563 = arith.constant 320 : index
    %c0_564 = arith.constant 0 : index
    %639 = vector.load %arg5[%c320_563, %c0_564] : memref<1024x128xf32, #tpu.memory_space<vmem>>, vector<29x128xf32>
    %c321_565 = arith.constant 321 : index
    %c0_566 = arith.constant 0 : index
    %640 = vector.load %arg5[%c321_565, %c0_566] : memref<1024x128xf32, #tpu.memory_space<vmem>>, vector<29x128xf32>
    %641 = arith.maximumf %639, %640 : vector<29x128xf32>
    %c322_567 = arith.constant 322 : index
    %c0_568 = arith.constant 0 : index
    %642 = vector.load %arg5[%c322_567, %c0_568] : memref<1024x128xf32, #tpu.memory_space<vmem>>, vector<29x128xf32>
    %643 = arith.maximumf %641, %642 : vector<29x128xf32>
    %c352_569 = arith.constant 352 : index
    %c0_570 = arith.constant 0 : index
    %644 = vector.load %arg5[%c352_569, %c0_570] : memref<1024x128xf32, #tpu.memory_space<vmem>>, vector<29x128xf32>
    %c353_571 = arith.constant 353 : index
    %c0_572 = arith.constant 0 : index
    %645 = vector.load %arg5[%c353_571, %c0_572] : memref<1024x128xf32, #tpu.memory_space<vmem>>, vector<29x128xf32>
    %646 = arith.maximumf %644, %645 : vector<29x128xf32>
    %c354_573 = arith.constant 354 : index
    %c0_574 = arith.constant 0 : index
    %647 = vector.load %arg5[%c354_573, %c0_574] : memref<1024x128xf32, #tpu.memory_space<vmem>>, vector<29x128xf32>
    %648 = arith.maximumf %646, %647 : vector<29x128xf32>
    %649 = arith.maximumf %643, %648 : vector<29x128xf32>
    %c384_575 = arith.constant 384 : index
    %c0_576 = arith.constant 0 : index
    %650 = vector.load %arg5[%c384_575, %c0_576] : memref<1024x128xf32, #tpu.memory_space<vmem>>, vector<29x128xf32>
    %c385_577 = arith.constant 385 : index
    %c0_578 = arith.constant 0 : index
    %651 = vector.load %arg5[%c385_577, %c0_578] : memref<1024x128xf32, #tpu.memory_space<vmem>>, vector<29x128xf32>
    %652 = arith.maximumf %650, %651 : vector<29x128xf32>
    %c386_579 = arith.constant 386 : index
    %c0_580 = arith.constant 0 : index
    %653 = vector.load %arg5[%c386_579, %c0_580] : memref<1024x128xf32, #tpu.memory_space<vmem>>, vector<29x128xf32>
    %654 = arith.maximumf %652, %653 : vector<29x128xf32>
    %655 = arith.maximumf %649, %654 : vector<29x128xf32>
    %c0_581 = arith.constant 0 : index
    %c0_582 = arith.constant 0 : index
    %656 = vector.load %arg6[%c0_581, %c0_582] : memref<32x128xf32, #tpu.memory_space<vmem>>, vector<29x128xf32>
    tpu.vector_store %arg6[%c0_581, %c0_582], %655 {strides = array<i32>} : memref<32x128xf32, #tpu.memory_space<vmem>>, vector<29x128xf32>,
    %c0_583 = arith.constant 0 : index
    %c0_584 = arith.constant 0 : index
    %657 = tpu.strided_load %arg6[%c0_583, %c0_584] {strides = array<i32: 2, 1>} : memref<32x128xf32, #tpu.memory_space<vmem>>, vector<15x128xf32>
    %658 = vector.broadcast %2 : vector<1x128xf32> to vector<15x128xf32>
    %659 = arith.addf %657, %658 : vector<15x128xf32>
    %cst_585 = arith.constant 0.000000e+00 : f32
    %660 = vector.broadcast %cst_585 : f32 to vector<15x128xf32>
    %661 = arith.maximumf %659, %660 : vector<15x128xf32>
    %662 = arith.truncf %661 : vector<15x128xf32> to vector<15x128xbf16>
    %c1_586 = arith.constant 1 : index
    %c135_587 = arith.constant 135 : index
    %c0_588 = arith.constant 0 : index
    %663 = vector.load %arg4[%c1_586, %c135_587, %c0_588] : memref<2x368x128xbf16, #tpu.memory_space<vmem>>, vector<1x15x128xbf16>
    %664 = vector.shape_cast %663 : vector<1x15x128xbf16> to vector<15x128xbf16>
    %665 = vector.shape_cast %662 : vector<15x128xbf16> to vector<1x15x128xbf16>
    tpu.vector_store %arg4[%c1_586, %c135_587, %c0_588], %665 {strides = array<i32>} : memref<2x368x128xbf16, #tpu.memory_space<vmem>>, vector<1x15x128xbf16>,
    %c384_589 = arith.constant 384 : index
    %c0_590 = arith.constant 0 : index
    %666 = vector.load %arg5[%c384_589, %c0_590] : memref<1024x128xf32, #tpu.memory_space<vmem>>, vector<29x128xf32>
    %c385_591 = arith.constant 385 : index
    %c0_592 = arith.constant 0 : index
    %667 = vector.load %arg5[%c385_591, %c0_592] : memref<1024x128xf32, #tpu.memory_space<vmem>>, vector<29x128xf32>
    %668 = arith.maximumf %666, %667 : vector<29x128xf32>
    %c386_593 = arith.constant 386 : index
    %c0_594 = arith.constant 0 : index
    %669 = vector.load %arg5[%c386_593, %c0_594] : memref<1024x128xf32, #tpu.memory_space<vmem>>, vector<29x128xf32>
    %670 = arith.maximumf %668, %669 : vector<29x128xf32>
    %c416_595 = arith.constant 416 : index
    %c0_596 = arith.constant 0 : index
    %671 = vector.load %arg5[%c416_595, %c0_596] : memref<1024x128xf32, #tpu.memory_space<vmem>>, vector<29x128xf32>
    %c417_597 = arith.constant 417 : index
    %c0_598 = arith.constant 0 : index
    %672 = vector.load %arg5[%c417_597, %c0_598] : memref<1024x128xf32, #tpu.memory_space<vmem>>, vector<29x128xf32>
    %673 = arith.maximumf %671, %672 : vector<29x128xf32>
    %c418_599 = arith.constant 418 : index
    %c0_600 = arith.constant 0 : index
    %674 = vector.load %arg5[%c418_599, %c0_600] : memref<1024x128xf32, #tpu.memory_space<vmem>>, vector<29x128xf32>
    %675 = arith.maximumf %673, %674 : vector<29x128xf32>
    %676 = arith.maximumf %670, %675 : vector<29x128xf32>
    %c448_601 = arith.constant 448 : index
    %c0_602 = arith.constant 0 : index
    %677 = vector.load %arg5[%c448_601, %c0_602] : memref<1024x128xf32, #tpu.memory_space<vmem>>, vector<29x128xf32>
    %c449_603 = arith.constant 449 : index
    %c0_604 = arith.constant 0 : index
    %678 = vector.load %arg5[%c449_603, %c0_604] : memref<1024x128xf32, #tpu.memory_space<vmem>>, vector<29x128xf32>
    %679 = arith.maximumf %677, %678 : vector<29x128xf32>
    %c450_605 = arith.constant 450 : index
    %c0_606 = arith.constant 0 : index
    %680 = vector.load %arg5[%c450_605, %c0_606] : memref<1024x128xf32, #tpu.memory_space<vmem>>, vector<29x128xf32>
    %681 = arith.maximumf %679, %680 : vector<29x128xf32>
    %682 = arith.maximumf %676, %681 : vector<29x128xf32>
    %c0_607 = arith.constant 0 : index
    %c0_608 = arith.constant 0 : index
    %683 = vector.load %arg6[%c0_607, %c0_608] : memref<32x128xf32, #tpu.memory_space<vmem>>, vector<29x128xf32>
    tpu.vector_store %arg6[%c0_607, %c0_608], %682 {strides = array<i32>} : memref<32x128xf32, #tpu.memory_space<vmem>>, vector<29x128xf32>,
    %c0_609 = arith.constant 0 : index
    %c0_610 = arith.constant 0 : index
    %684 = tpu.strided_load %arg6[%c0_609, %c0_610] {strides = array<i32: 2, 1>} : memref<32x128xf32, #tpu.memory_space<vmem>>, vector<15x128xf32>
    %685 = vector.broadcast %2 : vector<1x128xf32> to vector<15x128xf32>
    %686 = arith.addf %684, %685 : vector<15x128xf32>
    %cst_611 = arith.constant 0.000000e+00 : f32
    %687 = vector.broadcast %cst_611 : f32 to vector<15x128xf32>
    %688 = arith.maximumf %686, %687 : vector<15x128xf32>
    %689 = arith.truncf %688 : vector<15x128xf32> to vector<15x128xbf16>
    %c1_612 = arith.constant 1 : index
    %c154_613 = arith.constant 154 : index
    %c0_614 = arith.constant 0 : index
    %690 = vector.load %arg4[%c1_612, %c154_613, %c0_614] : memref<2x368x128xbf16, #tpu.memory_space<vmem>>, vector<1x15x128xbf16>
    %691 = vector.shape_cast %690 : vector<1x15x128xbf16> to vector<15x128xbf16>
    %692 = vector.shape_cast %689 : vector<15x128xbf16> to vector<1x15x128xbf16>
    tpu.vector_store %arg4[%c1_612, %c154_613, %c0_614], %692 {strides = array<i32>} : memref<2x368x128xbf16, #tpu.memory_space<vmem>>, vector<1x15x128xbf16>,
    %c448_615 = arith.constant 448 : index
    %c0_616 = arith.constant 0 : index
    %693 = vector.load %arg5[%c448_615, %c0_616] : memref<1024x128xf32, #tpu.memory_space<vmem>>, vector<29x128xf32>
    %c449_617 = arith.constant 449 : index
    %c0_618 = arith.constant 0 : index
    %694 = vector.load %arg5[%c449_617, %c0_618] : memref<1024x128xf32, #tpu.memory_space<vmem>>, vector<29x128xf32>
    %695 = arith.maximumf %693, %694 : vector<29x128xf32>
    %c450_619 = arith.constant 450 : index
    %c0_620 = arith.constant 0 : index
    %696 = vector.load %arg5[%c450_619, %c0_620] : memref<1024x128xf32, #tpu.memory_space<vmem>>, vector<29x128xf32>
    %697 = arith.maximumf %695, %696 : vector<29x128xf32>
    %c480_621 = arith.constant 480 : index
    %c0_622 = arith.constant 0 : index
    %698 = vector.load %arg5[%c480_621, %c0_622] : memref<1024x128xf32, #tpu.memory_space<vmem>>, vector<29x128xf32>
    %c481_623 = arith.constant 481 : index
    %c0_624 = arith.constant 0 : index
    %699 = vector.load %arg5[%c481_623, %c0_624] : memref<1024x128xf32, #tpu.memory_space<vmem>>, vector<29x128xf32>
    %700 = arith.maximumf %698, %699 : vector<29x128xf32>
    %c482_625 = arith.constant 482 : index
    %c0_626 = arith.constant 0 : index
    %701 = vector.load %arg5[%c482_625, %c0_626] : memref<1024x128xf32, #tpu.memory_space<vmem>>, vector<29x128xf32>
    %702 = arith.maximumf %700, %701 : vector<29x128xf32>
    %703 = arith.maximumf %697, %702 : vector<29x128xf32>
    %c512_627 = arith.constant 512 : index
    %c0_628 = arith.constant 0 : index
    %704 = vector.load %arg5[%c512_627, %c0_628] : memref<1024x128xf32, #tpu.memory_space<vmem>>, vector<29x128xf32>
    %c513_629 = arith.constant 513 : index
    %c0_630 = arith.constant 0 : index
    %705 = vector.load %arg5[%c513_629, %c0_630] : memref<1024x128xf32, #tpu.memory_space<vmem>>, vector<29x128xf32>
    %706 = arith.maximumf %704, %705 : vector<29x128xf32>
    %c514_631 = arith.constant 514 : index
    %c0_632 = arith.constant 0 : index
    %707 = vector.load %arg5[%c514_631, %c0_632] : memref<1024x128xf32, #tpu.memory_space<vmem>>, vector<29x128xf32>
    %708 = arith.maximumf %706, %707 : vector<29x128xf32>
    %709 = arith.maximumf %703, %708 : vector<29x128xf32>
    %c0_633 = arith.constant 0 : index
    %c0_634 = arith.constant 0 : index
    %710 = vector.load %arg6[%c0_633, %c0_634] : memref<32x128xf32, #tpu.memory_space<vmem>>, vector<29x128xf32>
    tpu.vector_store %arg6[%c0_633, %c0_634], %709 {strides = array<i32>} : memref<32x128xf32, #tpu.memory_space<vmem>>, vector<29x128xf32>,
    %c0_635 = arith.constant 0 : index
    %c0_636 = arith.constant 0 : index
    %711 = tpu.strided_load %arg6[%c0_635, %c0_636] {strides = array<i32: 2, 1>} : memref<32x128xf32, #tpu.memory_space<vmem>>, vector<15x128xf32>
    %712 = vector.broadcast %2 : vector<1x128xf32> to vector<15x128xf32>
    %713 = arith.addf %711, %712 : vector<15x128xf32>
    %cst_637 = arith.constant 0.000000e+00 : f32
    %714 = vector.broadcast %cst_637 : f32 to vector<15x128xf32>
    %715 = arith.maximumf %713, %714 : vector<15x128xf32>
    %716 = arith.truncf %715 : vector<15x128xf32> to vector<15x128xbf16>
    %c1_638 = arith.constant 1 : index
    %c173_639 = arith.constant 173 : index
    %c0_640 = arith.constant 0 : index
    %717 = vector.load %arg4[%c1_638, %c173_639, %c0_640] : memref<2x368x128xbf16, #tpu.memory_space<vmem>>, vector<1x15x128xbf16>
    %718 = vector.shape_cast %717 : vector<1x15x128xbf16> to vector<15x128xbf16>
    %719 = vector.shape_cast %716 : vector<15x128xbf16> to vector<1x15x128xbf16>
    tpu.vector_store %arg4[%c1_638, %c173_639, %c0_640], %719 {strides = array<i32>} : memref<2x368x128xbf16, #tpu.memory_space<vmem>>, vector<1x15x128xbf16>,
    %c512_641 = arith.constant 512 : index
    %c0_642 = arith.constant 0 : index
    %720 = vector.load %arg5[%c512_641, %c0_642] : memref<1024x128xf32, #tpu.memory_space<vmem>>, vector<29x128xf32>
    %c513_643 = arith.constant 513 : index
    %c0_644 = arith.constant 0 : index
    %721 = vector.load %arg5[%c513_643, %c0_644] : memref<1024x128xf32, #tpu.memory_space<vmem>>, vector<29x128xf32>
    %722 = arith.maximumf %720, %721 : vector<29x128xf32>
    %c514_645 = arith.constant 514 : index
    %c0_646 = arith.constant 0 : index
    %723 = vector.load %arg5[%c514_645, %c0_646] : memref<1024x128xf32, #tpu.memory_space<vmem>>, vector<29x128xf32>
    %724 = arith.maximumf %722, %723 : vector<29x128xf32>
    %c544_647 = arith.constant 544 : index
    %c0_648 = arith.constant 0 : index
    %725 = vector.load %arg5[%c544_647, %c0_648] : memref<1024x128xf32, #tpu.memory_space<vmem>>, vector<29x128xf32>
    %c545_649 = arith.constant 545 : index
    %c0_650 = arith.constant 0 : index
    %726 = vector.load %arg5[%c545_649, %c0_650] : memref<1024x128xf32, #tpu.memory_space<vmem>>, vector<29x128xf32>
    %727 = arith.maximumf %725, %726 : vector<29x128xf32>
    %c546_651 = arith.constant 546 : index
    %c0_652 = arith.constant 0 : index
    %728 = vector.load %arg5[%c546_651, %c0_652] : memref<1024x128xf32, #tpu.memory_space<vmem>>, vector<29x128xf32>
    %729 = arith.maximumf %727, %728 : vector<29x128xf32>
    %730 = arith.maximumf %724, %729 : vector<29x128xf32>
    %c576_653 = arith.constant 576 : index
    %c0_654 = arith.constant 0 : index
    %731 = vector.load %arg5[%c576_653, %c0_654] : memref<1024x128xf32, #tpu.memory_space<vmem>>, vector<29x128xf32>
    %c577_655 = arith.constant 577 : index
    %c0_656 = arith.constant 0 : index
    %732 = vector.load %arg5[%c577_655, %c0_656] : memref<1024x128xf32, #tpu.memory_space<vmem>>, vector<29x128xf32>
    %733 = arith.maximumf %731, %732 : vector<29x128xf32>
    %c578_657 = arith.constant 578 : index
    %c0_658 = arith.constant 0 : index
    %734 = vector.load %arg5[%c578_657, %c0_658] : memref<1024x128xf32, #tpu.memory_space<vmem>>, vector<29x128xf32>
    %735 = arith.maximumf %733, %734 : vector<29x128xf32>
    %736 = arith.maximumf %730, %735 : vector<29x128xf32>
    %c0_659 = arith.constant 0 : index
    %c0_660 = arith.constant 0 : index
    %737 = vector.load %arg6[%c0_659, %c0_660] : memref<32x128xf32, #tpu.memory_space<vmem>>, vector<29x128xf32>
    tpu.vector_store %arg6[%c0_659, %c0_660], %736 {strides = array<i32>} : memref<32x128xf32, #tpu.memory_space<vmem>>, vector<29x128xf32>,
    %c0_661 = arith.constant 0 : index
    %c0_662 = arith.constant 0 : index
    %738 = tpu.strided_load %arg6[%c0_661, %c0_662] {strides = array<i32: 2, 1>} : memref<32x128xf32, #tpu.memory_space<vmem>>, vector<15x128xf32>
    %739 = vector.broadcast %2 : vector<1x128xf32> to vector<15x128xf32>
    %740 = arith.addf %738, %739 : vector<15x128xf32>
    %cst_663 = arith.constant 0.000000e+00 : f32
    %741 = vector.broadcast %cst_663 : f32 to vector<15x128xf32>
    %742 = arith.maximumf %740, %741 : vector<15x128xf32>
    %743 = arith.truncf %742 : vector<15x128xf32> to vector<15x128xbf16>
    %c1_664 = arith.constant 1 : index
    %c192_665 = arith.constant 192 : index
    %c0_666 = arith.constant 0 : index
    %744 = vector.load %arg4[%c1_664, %c192_665, %c0_666] : memref<2x368x128xbf16, #tpu.memory_space<vmem>>, vector<1x15x128xbf16>
    %745 = vector.shape_cast %744 : vector<1x15x128xbf16> to vector<15x128xbf16>
    %746 = vector.shape_cast %743 : vector<15x128xbf16> to vector<1x15x128xbf16>
    tpu.vector_store %arg4[%c1_664, %c192_665, %c0_666], %746 {strides = array<i32>} : memref<2x368x128xbf16, #tpu.memory_space<vmem>>, vector<1x15x128xbf16>,
    %c576_667 = arith.constant 576 : index
    %c0_668 = arith.constant 0 : index
    %747 = vector.load %arg5[%c576_667, %c0_668] : memref<1024x128xf32, #tpu.memory_space<vmem>>, vector<29x128xf32>
    %c577_669 = arith.constant 577 : index
    %c0_670 = arith.constant 0 : index
    %748 = vector.load %arg5[%c577_669, %c0_670] : memref<1024x128xf32, #tpu.memory_space<vmem>>, vector<29x128xf32>
    %749 = arith.maximumf %747, %748 : vector<29x128xf32>
    %c578_671 = arith.constant 578 : index
    %c0_672 = arith.constant 0 : index
    %750 = vector.load %arg5[%c578_671, %c0_672] : memref<1024x128xf32, #tpu.memory_space<vmem>>, vector<29x128xf32>
    %751 = arith.maximumf %749, %750 : vector<29x128xf32>
    %c608_673 = arith.constant 608 : index
    %c0_674 = arith.constant 0 : index
    %752 = vector.load %arg5[%c608_673, %c0_674] : memref<1024x128xf32, #tpu.memory_space<vmem>>, vector<29x128xf32>
    %c609_675 = arith.constant 609 : index
    %c0_676 = arith.constant 0 : index
    %753 = vector.load %arg5[%c609_675, %c0_676] : memref<1024x128xf32, #tpu.memory_space<vmem>>, vector<29x128xf32>
    %754 = arith.maximumf %752, %753 : vector<29x128xf32>
    %c610_677 = arith.constant 610 : index
    %c0_678 = arith.constant 0 : index
    %755 = vector.load %arg5[%c610_677, %c0_678] : memref<1024x128xf32, #tpu.memory_space<vmem>>, vector<29x128xf32>
    %756 = arith.maximumf %754, %755 : vector<29x128xf32>
    %757 = arith.maximumf %751, %756 : vector<29x128xf32>
    %c640_679 = arith.constant 640 : index
    %c0_680 = arith.constant 0 : index
    %758 = vector.load %arg5[%c640_679, %c0_680] : memref<1024x128xf32, #tpu.memory_space<vmem>>, vector<29x128xf32>
    %c641_681 = arith.constant 641 : index
    %c0_682 = arith.constant 0 : index
    %759 = vector.load %arg5[%c641_681, %c0_682] : memref<1024x128xf32, #tpu.memory_space<vmem>>, vector<29x128xf32>
    %760 = arith.maximumf %758, %759 : vector<29x128xf32>
    %c642_683 = arith.constant 642 : index
    %c0_684 = arith.constant 0 : index
    %761 = vector.load %arg5[%c642_683, %c0_684] : memref<1024x128xf32, #tpu.memory_space<vmem>>, vector<29x128xf32>
    %762 = arith.maximumf %760, %761 : vector<29x128xf32>
    %763 = arith.maximumf %757, %762 : vector<29x128xf32>
    %c0_685 = arith.constant 0 : index
    %c0_686 = arith.constant 0 : index
    %764 = vector.load %arg6[%c0_685, %c0_686] : memref<32x128xf32, #tpu.memory_space<vmem>>, vector<29x128xf32>
    tpu.vector_store %arg6[%c0_685, %c0_686], %763 {strides = array<i32>} : memref<32x128xf32, #tpu.memory_space<vmem>>, vector<29x128xf32>,
    %c0_687 = arith.constant 0 : index
    %c0_688 = arith.constant 0 : index
    %765 = tpu.strided_load %arg6[%c0_687, %c0_688] {strides = array<i32: 2, 1>} : memref<32x128xf32, #tpu.memory_space<vmem>>, vector<15x128xf32>
    %766 = vector.broadcast %2 : vector<1x128xf32> to vector<15x128xf32>
    %767 = arith.addf %765, %766 : vector<15x128xf32>
    %cst_689 = arith.constant 0.000000e+00 : f32
    %768 = vector.broadcast %cst_689 : f32 to vector<15x128xf32>
    %769 = arith.maximumf %767, %768 : vector<15x128xf32>
    %770 = arith.truncf %769 : vector<15x128xf32> to vector<15x128xbf16>
    %c1_690 = arith.constant 1 : index
    %c211_691 = arith.constant 211 : index
    %c0_692 = arith.constant 0 : index
    %771 = vector.load %arg4[%c1_690, %c211_691, %c0_692] : memref<2x368x128xbf16, #tpu.memory_space<vmem>>, vector<1x15x128xbf16>
    %772 = vector.shape_cast %771 : vector<1x15x128xbf16> to vector<15x128xbf16>
    %773 = vector.shape_cast %770 : vector<15x128xbf16> to vector<1x15x128xbf16>
    tpu.vector_store %arg4[%c1_690, %c211_691, %c0_692], %773 {strides = array<i32>} : memref<2x368x128xbf16, #tpu.memory_space<vmem>>, vector<1x15x128xbf16>,
    %c640_693 = arith.constant 640 : index
    %c0_694 = arith.constant 0 : index
    %774 = vector.load %arg5[%c640_693, %c0_694] : memref<1024x128xf32, #tpu.memory_space<vmem>>, vector<29x128xf32>
    %c641_695 = arith.constant 641 : index
    %c0_696 = arith.constant 0 : index
    %775 = vector.load %arg5[%c641_695, %c0_696] : memref<1024x128xf32, #tpu.memory_space<vmem>>, vector<29x128xf32>
    %776 = arith.maximumf %774, %775 : vector<29x128xf32>
    %c642_697 = arith.constant 642 : index
    %c0_698 = arith.constant 0 : index
    %777 = vector.load %arg5[%c642_697, %c0_698] : memref<1024x128xf32, #tpu.memory_space<vmem>>, vector<29x128xf32>
    %778 = arith.maximumf %776, %777 : vector<29x128xf32>
    %c672_699 = arith.constant 672 : index
    %c0_700 = arith.constant 0 : index
    %779 = vector.load %arg5[%c672_699, %c0_700] : memref<1024x128xf32, #tpu.memory_space<vmem>>, vector<29x128xf32>
    %c673_701 = arith.constant 673 : index
    %c0_702 = arith.constant 0 : index
    %780 = vector.load %arg5[%c673_701, %c0_702] : memref<1024x128xf32, #tpu.memory_space<vmem>>, vector<29x128xf32>
    %781 = arith.maximumf %779, %780 : vector<29x128xf32>
    %c674_703 = arith.constant 674 : index
    %c0_704 = arith.constant 0 : index
    %782 = vector.load %arg5[%c674_703, %c0_704] : memref<1024x128xf32, #tpu.memory_space<vmem>>, vector<29x128xf32>
    %783 = arith.maximumf %781, %782 : vector<29x128xf32>
    %784 = arith.maximumf %778, %783 : vector<29x128xf32>
    %c704_705 = arith.constant 704 : index
    %c0_706 = arith.constant 0 : index
    %785 = vector.load %arg5[%c704_705, %c0_706] : memref<1024x128xf32, #tpu.memory_space<vmem>>, vector<29x128xf32>
    %c705_707 = arith.constant 705 : index
    %c0_708 = arith.constant 0 : index
    %786 = vector.load %arg5[%c705_707, %c0_708] : memref<1024x128xf32, #tpu.memory_space<vmem>>, vector<29x128xf32>
    %787 = arith.maximumf %785, %786 : vector<29x128xf32>
    %c706_709 = arith.constant 706 : index
    %c0_710 = arith.constant 0 : index
    %788 = vector.load %arg5[%c706_709, %c0_710] : memref<1024x128xf32, #tpu.memory_space<vmem>>, vector<29x128xf32>
    %789 = arith.maximumf %787, %788 : vector<29x128xf32>
    %790 = arith.maximumf %784, %789 : vector<29x128xf32>
    %c0_711 = arith.constant 0 : index
    %c0_712 = arith.constant 0 : index
    %791 = vector.load %arg6[%c0_711, %c0_712] : memref<32x128xf32, #tpu.memory_space<vmem>>, vector<29x128xf32>
    tpu.vector_store %arg6[%c0_711, %c0_712], %790 {strides = array<i32>} : memref<32x128xf32, #tpu.memory_space<vmem>>, vector<29x128xf32>,
    %c0_713 = arith.constant 0 : index
    %c0_714 = arith.constant 0 : index
    %792 = tpu.strided_load %arg6[%c0_713, %c0_714] {strides = array<i32: 2, 1>} : memref<32x128xf32, #tpu.memory_space<vmem>>, vector<15x128xf32>
    %793 = vector.broadcast %2 : vector<1x128xf32> to vector<15x128xf32>
    %794 = arith.addf %792, %793 : vector<15x128xf32>
    %cst_715 = arith.constant 0.000000e+00 : f32
    %795 = vector.broadcast %cst_715 : f32 to vector<15x128xf32>
    %796 = arith.maximumf %794, %795 : vector<15x128xf32>
    %797 = arith.truncf %796 : vector<15x128xf32> to vector<15x128xbf16>
    %c1_716 = arith.constant 1 : index
    %c230_717 = arith.constant 230 : index
    %c0_718 = arith.constant 0 : index
    %798 = vector.load %arg4[%c1_716, %c230_717, %c0_718] : memref<2x368x128xbf16, #tpu.memory_space<vmem>>, vector<1x15x128xbf16>
    %799 = vector.shape_cast %798 : vector<1x15x128xbf16> to vector<15x128xbf16>
    %800 = vector.shape_cast %797 : vector<15x128xbf16> to vector<1x15x128xbf16>
    tpu.vector_store %arg4[%c1_716, %c230_717, %c0_718], %800 {strides = array<i32>} : memref<2x368x128xbf16, #tpu.memory_space<vmem>>, vector<1x15x128xbf16>,
    %c704_719 = arith.constant 704 : index
    %c0_720 = arith.constant 0 : index
    %801 = vector.load %arg5[%c704_719, %c0_720] : memref<1024x128xf32, #tpu.memory_space<vmem>>, vector<29x128xf32>
    %c705_721 = arith.constant 705 : index
    %c0_722 = arith.constant 0 : index
    %802 = vector.load %arg5[%c705_721, %c0_722] : memref<1024x128xf32, #tpu.memory_space<vmem>>, vector<29x128xf32>
    %803 = arith.maximumf %801, %802 : vector<29x128xf32>
    %c706_723 = arith.constant 706 : index
    %c0_724 = arith.constant 0 : index
    %804 = vector.load %arg5[%c706_723, %c0_724] : memref<1024x128xf32, #tpu.memory_space<vmem>>, vector<29x128xf32>
    %805 = arith.maximumf %803, %804 : vector<29x128xf32>
    %c736_725 = arith.constant 736 : index
    %c0_726 = arith.constant 0 : index
    %806 = vector.load %arg5[%c736_725, %c0_726] : memref<1024x128xf32, #tpu.memory_space<vmem>>, vector<29x128xf32>
    %c737_727 = arith.constant 737 : index
    %c0_728 = arith.constant 0 : index
    %807 = vector.load %arg5[%c737_727, %c0_728] : memref<1024x128xf32, #tpu.memory_space<vmem>>, vector<29x128xf32>
    %808 = arith.maximumf %806, %807 : vector<29x128xf32>
    %c738_729 = arith.constant 738 : index
    %c0_730 = arith.constant 0 : index
    %809 = vector.load %arg5[%c738_729, %c0_730] : memref<1024x128xf32, #tpu.memory_space<vmem>>, vector<29x128xf32>
    %810 = arith.maximumf %808, %809 : vector<29x128xf32>
    %811 = arith.maximumf %805, %810 : vector<29x128xf32>
    %c768_731 = arith.constant 768 : index
    %c0_732 = arith.constant 0 : index
    %812 = vector.load %arg5[%c768_731, %c0_732] : memref<1024x128xf32, #tpu.memory_space<vmem>>, vector<29x128xf32>
    %c769_733 = arith.constant 769 : index
    %c0_734 = arith.constant 0 : index
    %813 = vector.load %arg5[%c769_733, %c0_734] : memref<1024x128xf32, #tpu.memory_space<vmem>>, vector<29x128xf32>
    %814 = arith.maximumf %812, %813 : vector<29x128xf32>
    %c770_735 = arith.constant 770 : index
    %c0_736 = arith.constant 0 : index
    %815 = vector.load %arg5[%c770_735, %c0_736] : memref<1024x128xf32, #tpu.memory_space<vmem>>, vector<29x128xf32>
    %816 = arith.maximumf %814, %815 : vector<29x128xf32>
    %817 = arith.maximumf %811, %816 : vector<29x128xf32>
    %c0_737 = arith.constant 0 : index
    %c0_738 = arith.constant 0 : index
    %818 = vector.load %arg6[%c0_737, %c0_738] : memref<32x128xf32, #tpu.memory_space<vmem>>, vector<29x128xf32>
    tpu.vector_store %arg6[%c0_737, %c0_738], %817 {strides = array<i32>} : memref<32x128xf32, #tpu.memory_space<vmem>>, vector<29x128xf32>,
    %c0_739 = arith.constant 0 : index
    %c0_740 = arith.constant 0 : index
    %819 = tpu.strided_load %arg6[%c0_739, %c0_740] {strides = array<i32: 2, 1>} : memref<32x128xf32, #tpu.memory_space<vmem>>, vector<15x128xf32>
    %820 = vector.broadcast %2 : vector<1x128xf32> to vector<15x128xf32>
    %821 = arith.addf %819, %820 : vector<15x128xf32>
    %cst_741 = arith.constant 0.000000e+00 : f32
    %822 = vector.broadcast %cst_741 : f32 to vector<15x128xf32>
    %823 = arith.maximumf %821, %822 : vector<15x128xf32>
    %824 = arith.truncf %823 : vector<15x128xf32> to vector<15x128xbf16>
    %c1_742 = arith.constant 1 : index
    %c249_743 = arith.constant 249 : index
    %c0_744 = arith.constant 0 : index
    %825 = vector.load %arg4[%c1_742, %c249_743, %c0_744] : memref<2x368x128xbf16, #tpu.memory_space<vmem>>, vector<1x15x128xbf16>
    %826 = vector.shape_cast %825 : vector<1x15x128xbf16> to vector<15x128xbf16>
    %827 = vector.shape_cast %824 : vector<15x128xbf16> to vector<1x15x128xbf16>
    tpu.vector_store %arg4[%c1_742, %c249_743, %c0_744], %827 {strides = array<i32>} : memref<2x368x128xbf16, #tpu.memory_space<vmem>>, vector<1x15x128xbf16>,
    %c768_745 = arith.constant 768 : index
    %c0_746 = arith.constant 0 : index
    %828 = vector.load %arg5[%c768_745, %c0_746] : memref<1024x128xf32, #tpu.memory_space<vmem>>, vector<29x128xf32>
    %c769_747 = arith.constant 769 : index
    %c0_748 = arith.constant 0 : index
    %829 = vector.load %arg5[%c769_747, %c0_748] : memref<1024x128xf32, #tpu.memory_space<vmem>>, vector<29x128xf32>
    %830 = arith.maximumf %828, %829 : vector<29x128xf32>
    %c770_749 = arith.constant 770 : index
    %c0_750 = arith.constant 0 : index
    %831 = vector.load %arg5[%c770_749, %c0_750] : memref<1024x128xf32, #tpu.memory_space<vmem>>, vector<29x128xf32>
    %832 = arith.maximumf %830, %831 : vector<29x128xf32>
    %c800_751 = arith.constant 800 : index
    %c0_752 = arith.constant 0 : index
    %833 = vector.load %arg5[%c800_751, %c0_752] : memref<1024x128xf32, #tpu.memory_space<vmem>>, vector<29x128xf32>
    %c801_753 = arith.constant 801 : index
    %c0_754 = arith.constant 0 : index
    %834 = vector.load %arg5[%c801_753, %c0_754] : memref<1024x128xf32, #tpu.memory_space<vmem>>, vector<29x128xf32>
    %835 = arith.maximumf %833, %834 : vector<29x128xf32>
    %c802_755 = arith.constant 802 : index
    %c0_756 = arith.constant 0 : index
    %836 = vector.load %arg5[%c802_755, %c0_756] : memref<1024x128xf32, #tpu.memory_space<vmem>>, vector<29x128xf32>
    %837 = arith.maximumf %835, %836 : vector<29x128xf32>
    %838 = arith.maximumf %832, %837 : vector<29x128xf32>
    %c832_757 = arith.constant 832 : index
    %c0_758 = arith.constant 0 : index
    %839 = vector.load %arg5[%c832_757, %c0_758] : memref<1024x128xf32, #tpu.memory_space<vmem>>, vector<29x128xf32>
    %c833_759 = arith.constant 833 : index
    %c0_760 = arith.constant 0 : index
    %840 = vector.load %arg5[%c833_759, %c0_760] : memref<1024x128xf32, #tpu.memory_space<vmem>>, vector<29x128xf32>
    %841 = arith.maximumf %839, %840 : vector<29x128xf32>
    %c834_761 = arith.constant 834 : index
    %c0_762 = arith.constant 0 : index
    %842 = vector.load %arg5[%c834_761, %c0_762] : memref<1024x128xf32, #tpu.memory_space<vmem>>, vector<29x128xf32>
    %843 = arith.maximumf %841, %842 : vector<29x128xf32>
    %844 = arith.maximumf %838, %843 : vector<29x128xf32>
    %c0_763 = arith.constant 0 : index
    %c0_764 = arith.constant 0 : index
    %845 = vector.load %arg6[%c0_763, %c0_764] : memref<32x128xf32, #tpu.memory_space<vmem>>, vector<29x128xf32>
    tpu.vector_store %arg6[%c0_763, %c0_764], %844 {strides = array<i32>} : memref<32x128xf32, #tpu.memory_space<vmem>>, vector<29x128xf32>,
    %c0_765 = arith.constant 0 : index
    %c0_766 = arith.constant 0 : index
    %846 = tpu.strided_load %arg6[%c0_765, %c0_766] {strides = array<i32: 2, 1>} : memref<32x128xf32, #tpu.memory_space<vmem>>, vector<15x128xf32>
    %847 = vector.broadcast %2 : vector<1x128xf32> to vector<15x128xf32>
    %848 = arith.addf %846, %847 : vector<15x128xf32>
    %cst_767 = arith.constant 0.000000e+00 : f32
    %849 = vector.broadcast %cst_767 : f32 to vector<15x128xf32>
    %850 = arith.maximumf %848, %849 : vector<15x128xf32>
    %851 = arith.truncf %850 : vector<15x128xf32> to vector<15x128xbf16>
    %c1_768 = arith.constant 1 : index
    %c268_769 = arith.constant 268 : index
    %c0_770 = arith.constant 0 : index
    %852 = vector.load %arg4[%c1_768, %c268_769, %c0_770] : memref<2x368x128xbf16, #tpu.memory_space<vmem>>, vector<1x15x128xbf16>
    %853 = vector.shape_cast %852 : vector<1x15x128xbf16> to vector<15x128xbf16>
    %854 = vector.shape_cast %851 : vector<15x128xbf16> to vector<1x15x128xbf16>
    tpu.vector_store %arg4[%c1_768, %c268_769, %c0_770], %854 {strides = array<i32>} : memref<2x368x128xbf16, #tpu.memory_space<vmem>>, vector<1x15x128xbf16>,
    %c832_771 = arith.constant 832 : index
    %c0_772 = arith.constant 0 : index
    %855 = vector.load %arg5[%c832_771, %c0_772] : memref<1024x128xf32, #tpu.memory_space<vmem>>, vector<29x128xf32>
    %c833_773 = arith.constant 833 : index
    %c0_774 = arith.constant 0 : index
    %856 = vector.load %arg5[%c833_773, %c0_774] : memref<1024x128xf32, #tpu.memory_space<vmem>>, vector<29x128xf32>
    %857 = arith.maximumf %855, %856 : vector<29x128xf32>
    %c834_775 = arith.constant 834 : index
    %c0_776 = arith.constant 0 : index
    %858 = vector.load %arg5[%c834_775, %c0_776] : memref<1024x128xf32, #tpu.memory_space<vmem>>, vector<29x128xf32>
    %859 = arith.maximumf %857, %858 : vector<29x128xf32>
    %c864_777 = arith.constant 864 : index
    %c0_778 = arith.constant 0 : index
    %860 = vector.load %arg5[%c864_777, %c0_778] : memref<1024x128xf32, #tpu.memory_space<vmem>>, vector<29x128xf32>
    %c865_779 = arith.constant 865 : index
    %c0_780 = arith.constant 0 : index
    %861 = vector.load %arg5[%c865_779, %c0_780] : memref<1024x128xf32, #tpu.memory_space<vmem>>, vector<29x128xf32>
    %862 = arith.maximumf %860, %861 : vector<29x128xf32>
    %c866_781 = arith.constant 866 : index
    %c0_782 = arith.constant 0 : index
    %863 = vector.load %arg5[%c866_781, %c0_782] : memref<1024x128xf32, #tpu.memory_space<vmem>>, vector<29x128xf32>
    %864 = arith.maximumf %862, %863 : vector<29x128xf32>
    %865 = arith.maximumf %859, %864 : vector<29x128xf32>
    %c896_783 = arith.constant 896 : index
    %c0_784 = arith.constant 0 : index
    %866 = vector.load %arg5[%c896_783, %c0_784] : memref<1024x128xf32, #tpu.memory_space<vmem>>, vector<29x128xf32>
    %c897_785 = arith.constant 897 : index
    %c0_786 = arith.constant 0 : index
    %867 = vector.load %arg5[%c897_785, %c0_786] : memref<1024x128xf32, #tpu.memory_space<vmem>>, vector<29x128xf32>
    %868 = arith.maximumf %866, %867 : vector<29x128xf32>
    %c898_787 = arith.constant 898 : index
    %c0_788 = arith.constant 0 : index
    %869 = vector.load %arg5[%c898_787, %c0_788] : memref<1024x128xf32, #tpu.memory_space<vmem>>, vector<29x128xf32>
    %870 = arith.maximumf %868, %869 : vector<29x128xf32>
    %871 = arith.maximumf %865, %870 : vector<29x128xf32>
    %c0_789 = arith.constant 0 : index
    %c0_790 = arith.constant 0 : index
    %872 = vector.load %arg6[%c0_789, %c0_790] : memref<32x128xf32, #tpu.memory_space<vmem>>, vector<29x128xf32>
    tpu.vector_store %arg6[%c0_789, %c0_790], %871 {strides = array<i32>} : memref<32x128xf32, #tpu.memory_space<vmem>>, vector<29x128xf32>,
    %c0_791 = arith.constant 0 : index
    %c0_792 = arith.constant 0 : index
    %873 = tpu.strided_load %arg6[%c0_791, %c0_792] {strides = array<i32: 2, 1>} : memref<32x128xf32, #tpu.memory_space<vmem>>, vector<15x128xf32>
    %874 = vector.broadcast %2 : vector<1x128xf32> to vector<15x128xf32>
    %875 = arith.addf %873, %874 : vector<15x128xf32>
    %cst_793 = arith.constant 0.000000e+00 : f32
    %876 = vector.broadcast %cst_793 : f32 to vector<15x128xf32>
    %877 = arith.maximumf %875, %876 : vector<15x128xf32>
    %878 = arith.truncf %877 : vector<15x128xf32> to vector<15x128xbf16>
    %c1_794 = arith.constant 1 : index
    %c287_795 = arith.constant 287 : index
    %c0_796 = arith.constant 0 : index
    %879 = vector.load %arg4[%c1_794, %c287_795, %c0_796] : memref<2x368x128xbf16, #tpu.memory_space<vmem>>, vector<1x15x128xbf16>
    %880 = vector.shape_cast %879 : vector<1x15x128xbf16> to vector<15x128xbf16>
    %881 = vector.shape_cast %878 : vector<15x128xbf16> to vector<1x15x128xbf16>
    tpu.vector_store %arg4[%c1_794, %c287_795, %c0_796], %881 {strides = array<i32>} : memref<2x368x128xbf16, #tpu.memory_space<vmem>>, vector<1x15x128xbf16>,
    %c896_797 = arith.constant 896 : index
    %c0_798 = arith.constant 0 : index
    %882 = vector.load %arg5[%c896_797, %c0_798] : memref<1024x128xf32, #tpu.memory_space<vmem>>, vector<29x128xf32>
    %c897_799 = arith.constant 897 : index
    %c0_800 = arith.constant 0 : index
    %883 = vector.load %arg5[%c897_799, %c0_800] : memref<1024x128xf32, #tpu.memory_space<vmem>>, vector<29x128xf32>
    %884 = arith.maximumf %882, %883 : vector<29x128xf32>
    %c898_801 = arith.constant 898 : index
    %c0_802 = arith.constant 0 : index
    %885 = vector.load %arg5[%c898_801, %c0_802] : memref<1024x128xf32, #tpu.memory_space<vmem>>, vector<29x128xf32>
    %886 = arith.maximumf %884, %885 : vector<29x128xf32>
    %c928_803 = arith.constant 928 : index
    %c0_804 = arith.constant 0 : index
    %887 = vector.load %arg5[%c928_803, %c0_804] : memref<1024x128xf32, #tpu.memory_space<vmem>>, vector<29x128xf32>
    %c929_805 = arith.constant 929 : index
    %c0_806 = arith.constant 0 : index
    %888 = vector.load %arg5[%c929_805, %c0_806] : memref<1024x128xf32, #tpu.memory_space<vmem>>, vector<29x128xf32>
    %889 = arith.maximumf %887, %888 : vector<29x128xf32>
    %c930_807 = arith.constant 930 : index
    %c0_808 = arith.constant 0 : index
    %890 = vector.load %arg5[%c930_807, %c0_808] : memref<1024x128xf32, #tpu.memory_space<vmem>>, vector<29x128xf32>
    %891 = arith.maximumf %889, %890 : vector<29x128xf32>
    %892 = arith.maximumf %886, %891 : vector<29x128xf32>
    %c960_809 = arith.constant 960 : index
    %c0_810 = arith.constant 0 : index
    %893 = vector.load %arg5[%c960_809, %c0_810] : memref<1024x128xf32, #tpu.memory_space<vmem>>, vector<29x128xf32>
    %c961_811 = arith.constant 961 : index
    %c0_812 = arith.constant 0 : index
    %894 = vector.load %arg5[%c961_811, %c0_812] : memref<1024x128xf32, #tpu.memory_space<vmem>>, vector<29x128xf32>
    %895 = arith.maximumf %893, %894 : vector<29x128xf32>
    %c962_813 = arith.constant 962 : index
    %c0_814 = arith.constant 0 : index
    %896 = vector.load %arg5[%c962_813, %c0_814] : memref<1024x128xf32, #tpu.memory_space<vmem>>, vector<29x128xf32>
    %897 = arith.maximumf %895, %896 : vector<29x128xf32>
    %898 = arith.maximumf %892, %897 : vector<29x128xf32>
    %c0_815 = arith.constant 0 : index
    %c0_816 = arith.constant 0 : index
    %899 = vector.load %arg6[%c0_815, %c0_816] : memref<32x128xf32, #tpu.memory_space<vmem>>, vector<29x128xf32>
    tpu.vector_store %arg6[%c0_815, %c0_816], %898 {strides = array<i32>} : memref<32x128xf32, #tpu.memory_space<vmem>>, vector<29x128xf32>,
    %c0_817 = arith.constant 0 : index
    %c0_818 = arith.constant 0 : index
    %900 = tpu.strided_load %arg6[%c0_817, %c0_818] {strides = array<i32: 2, 1>} : memref<32x128xf32, #tpu.memory_space<vmem>>, vector<15x128xf32>
    %901 = vector.broadcast %2 : vector<1x128xf32> to vector<15x128xf32>
    %902 = arith.addf %900, %901 : vector<15x128xf32>
    %cst_819 = arith.constant 0.000000e+00 : f32
    %903 = vector.broadcast %cst_819 : f32 to vector<15x128xf32>
    %904 = arith.maximumf %902, %903 : vector<15x128xf32>
    %905 = arith.truncf %904 : vector<15x128xf32> to vector<15x128xbf16>
    %c1_820 = arith.constant 1 : index
    %c306_821 = arith.constant 306 : index
    %c0_822 = arith.constant 0 : index
    %906 = vector.load %arg4[%c1_820, %c306_821, %c0_822] : memref<2x368x128xbf16, #tpu.memory_space<vmem>>, vector<1x15x128xbf16>
    %907 = vector.shape_cast %906 : vector<1x15x128xbf16> to vector<15x128xbf16>
    %908 = vector.shape_cast %905 : vector<15x128xbf16> to vector<1x15x128xbf16>
    tpu.vector_store %arg4[%c1_820, %c306_821, %c0_822], %908 {strides = array<i32>} : memref<2x368x128xbf16, #tpu.memory_space<vmem>>, vector<1x15x128xbf16>,
    return
  }
  func.func @transform_0(%arg0: i32) -> (i32, i32, i32) {
    %c0_i32 = arith.constant 0 : i32
    %c0_i32_0 = arith.constant 0 : i32
    %c0_i32_1 = arith.constant 0 : i32
    return %arg0, %c0_i32, %c0_i32_0 : i32, i32, i32
  }
  func.func @transform_1(%arg0: i32) -> (i32, i32, i32) {
    %c0_i32 = arith.constant 0 : i32
    %c0_i32_0 = arith.constant 0 : i32
    %c0_i32_1 = arith.constant 0 : i32
    %c0_i32_2 = arith.constant 0 : i32
    return %c0_i32, %c0_i32_0, %c0_i32_1 : i32, i32, i32
  }
  func.func @transform_2(%arg0: i32) -> (i32, i32) {
    %c0_i32 = arith.constant 0 : i32
    %c0_i32_0 = arith.constant 0 : i32
    %c0_i32_1 = arith.constant 0 : i32
    return %c0_i32, %c0_i32_0 : i32, i32
  }
  func.func @transform_3(%arg0: i32) -> (i32, i32, i32) {
    %c0_i32 = arith.constant 0 : i32
    %c0_i32_0 = arith.constant 0 : i32
    %c0_i32_1 = arith.constant 0 : i32
    return %arg0, %c0_i32, %c0_i32_0 : i32, i32, i32
  }
}

</mosaic_0001>

<bundles_post_ra>
// kernel: tpu_custom_call.1
= control target key start
LH: loop header
LB: loop body
LE: loop exit
PB: predicated region body
PF: predicated region fallthrough
CT: control target
= control target key end

     0   :  { %8 = vsyncpa [#allocation5], 0  ;;  %s11150_s0 = inlined_call_operand.hbm [shape: bf16[2,1024,128], index: 0, kind: input, shape index: {}]   ;;  %s11151_s1 = inlined_call_operand.hbm [shape: bf16[1,128,128], index: 1, kind: input, shape index: {}]   ;;  %s11152_s2 = inlined_call_operand.vmem [shape: f32[1,128], index: 2, kind: input, shape index: {}]   ;;  %s11153_s3 = inlined_call_operand.hbm [shape: bf16[2,368,128], index: 3, kind: output, shape index: {}]  }
   0x1   :  { %9 = vsyncpa [#allocation8], 0 }
   0x2   :  { %10 = vsyncpa [#allocation6], 0  ;;  %s8597_s12 = smov [#allocation4]   ;;  %s8525_s16 = scalar_lea.hbm %s11150_s0, 16384 }
   0x3   :  { %s16_s13 = sshll.u32 %s8597_s12, 4  ;;  %p8526_p0 = scmp.ne.s32.totalorder %s11150_s0, %s8525_s16  ;;  %s17_s13 = int_to_ptr.vmem [resolvable:$true] %s16_s13 }
   0x4   :  { %p8529_p1 = scmp.lt.u32.totalorder %s8525_s16, %s11150_s0 }
   0x6   :  { %p8531_p2 = pnand %p8529_p1, %p8526_p0 }
   0x8   :  { %8534 = shalt.err (!%p8531_p2)
}
   0x9   :  { %s8535_s21 = scalar_lea.vmem %s17_s13, 16384  ;;  %p8540_p4 = scmp.lt.s32.totalorder %s17_s13, %s17_s13 }
   0xa   :  { %p8536_p3 = scmp.ne.s32.totalorder %s17_s13, %s8535_s21  ;;  %p8541_p5 = scmp.lt.s32.totalorder %s8535_s21, %s8535_s21 }
   0xc   :  { %p8542_p6 = por %p8541_p5, %p8540_p4 }
   0xe   :  { %p8543_p7 = pnand %p8542_p6, %p8536_p3 }
  0x10   :  { %8546 = shalt.err (!%p8543_p7)
}
  0x11   :  { %s8598_s22 = smov 64   ;;  %s8599_s23 = smov 4  }
  0x12   :  { %22 = dma.hbm_to_vmem [thread:$0]  %s11150_s0, 16384, %s17_s13, [#allocation5], %s8598_s22, %s8598_s22, %s8599_s23  }
  0x13   :  { %s8600_s26 = smov [#allocation7]   ;;  %s8547_s30 = scalar_lea.hbm %s11151_s1, 1024 }
  0x14   :  { %s28_s27 = sshll.u32 %s8600_s26, 4  ;;  %p8548_p8 = scmp.ne.s32.totalorder %s11151_s1, %s8547_s30  ;;  %s29_s27 = int_to_ptr.vmem [resolvable:$true] %s28_s27 }
  0x15   :  { %p8551_p9 = scmp.lt.u32.totalorder %s8547_s30, %s11151_s1 }
  0x17   :  { %p8553_p10 = pnand %p8551_p9, %p8548_p8 }
  0x19   :  { %8556 = shalt.err (!%p8553_p10)
}
  0x1a   :  { %s8557_s8 = scalar_lea.vmem %s29_s27, 1024  ;;  %p8562_p12 = scmp.lt.s32.totalorder %s29_s27, %s29_s27 }
  0x1b   :  { %p8558_p11 = scmp.ne.s32.totalorder %s29_s27, %s8557_s8  ;;  %p8563_p13 = scmp.lt.s32.totalorder %s8557_s8, %s8557_s8 }
  0x1d   :  { %p8564_p0 = por %p8563_p13, %p8562_p12 }
  0x1f   :  { %p8565_p1 = pnand %p8564_p0, %p8558_p11 }
  0x21   :  { %8568 = shalt.err (!%p8565_p1)
}
  0x22   :  { %34 = dma.hbm_to_vmem [thread:$0]  %s11151_s1, 1024, %s29_s27, [#allocation8], %s8598_s22, %s8598_s22, %s8599_s23  }
  0x23   :  { %8591 = dma.done.wait [#allocation5], 16384  }
  0x24   :  { %8592 = vsyncadd [#allocation5], 4294950912 }
  0x25   :  { %8593 = dma.done.wait [#allocation8], 1024  }
  0x26   :  { %8594 = vsyncadd [#allocation8], 4294966272  ;;  %v8266_v0 = vld [vmem:[#allocation7] sm:$0xff]   ;;  %v8268_v2 = vld [vmem:[#allocation7 + $0x8] sm:$0xff]   ;;  %vm2249_vm0 = vsmask.f32 1280 }
  0x27   :  { %v8267_v1 = vld [vmem:[#allocation7] sm:$0xff]   ;;  %7748 = vmatprep.subr.bf16.mxu0 %v8266_v0  ;;  %v8269_v3 = vld [vmem:[#allocation7 + $0x8] sm:$0xff]   ;;  %v8270_v4 = vld [vmem:[#allocation7 + $0x10] sm:$0xff]   ;;  %vm2250_vm1 = vsmask.f32 5392  ;;  %vm2366_vm3 = vcmask 1042432  }
  0x28   :  { %7780 = vmatprep.subr.bf16.mxu1 %v8267_v1  ;;  %7749 = vmatpush3.bf16.msra.mxu0 %v8266_v0  ;;  %v8271_v5 = vld [vmem:[#allocation7 + $0x10] sm:$0xff]   ;;  %v8272_v6 = vld [vmem:[#allocation7 + $0x18] sm:$0xff]   ;;  %v8274_v8 = vld [vmem:[#allocation7 + $0x20] sm:$0xff]   ;;  %vm2367_vm4 = vcmask 1046532   ;;  %vm2159_vm6 = vcmask 1043456   ;;  %vm2274_vm8 = vcmask 1043457  }
  0x29   :  { %7781 = vmatpush3.bf16.msra.mxu1 %v8267_v1  ;;  %7750 = vmatprep.subr.bf16.mxu0 %v8268_v2  ;;  %v8273_v7 = vld [vmem:[#allocation7 + $0x18] sm:$0xff]   ;;  %v8275_v9 = vld [vmem:[#allocation7 + $0x20] sm:$0xff]   ;;  %v8276_v10 = vld [vmem:[#allocation7 + $0x28] sm:$0xff]   ;;  %vm2160_vm7 = vsmask.f32 3328  ;;  %vm2579_vm14 = vcmask 1041408  }
  0x2a   :  { %7782 = vmatprep.subr.bf16.mxu1 %v8269_v3  ;;  %v8277_v11 = vld [vmem:[#allocation7 + $0x28] sm:$0xff]   ;;  %v8282_v12 = vld [vmem:[#allocation4] sm:$0xff]   ;;  %v8278_v14 = vld [vmem:[#allocation7 + $0x30] sm:$0xff]   ;;  %vm2275_vm9 = vsmask.f32 7942 }
  0x2b   :  { %v8283_v13 = vld [vmem:[#allocation4 + $0x40] sm:$0xff]   ;;  %7764 = vmatprep.mubr.bf16.mxu0 %v8282_v12  ;;  %v8279_v15 = vld [vmem:[#allocation7 + $0x30] sm:$0xff]   ;;  %v8280_v16 = vld [vmem:[#allocation7 + $0x38] sm:$0xff]   ;;  %vm11176_vm10 = vsmask.f32 2304 }
  0x2c   :  { %7751 = vmatpush3.bf16.msra.mxu0 %v8268_v2  ;;  %7796 = vmatprep.mubr.bf16.mxu1 %v8283_v13  ;;  %v8281_v17 = vld [vmem:[#allocation7 + $0x38] sm:$0xff]   ;;  %v8284_v18 = vld [vmem:[#allocation4 + $0x8] sm:$0xff]   ;;  %v8286_v19 = vld [vmem:[#allocation7] sm:$0xff]   ;;  %vm11177_vm11 = vsmask.f32 256 }
  0x2d   :  { %7783 = vmatpush3.bf16.msra.mxu1 %v8269_v3  ;;  %7752 = vmatprep.subr.bf16.mxu0 %v8270_v4  ;;  %v8287_v20 = vld [vmem:[#allocation7] sm:$0xff]   ;;  %v8285_v21 = vld [vmem:[#allocation4 + $0x48] sm:$0xff]   ;;  %v8290_v24 = vld [vmem:[#allocation4 + $0x10] sm:$0xff]   ;;  %vm2469_vm12 = vsmask.f32 4368 }
  0x2e   :  { %7784 = vmatprep.subr.bf16.mxu1 %v8271_v5  ;;  %v8288_v22 = vld [vmem:[#allocation7 + $0x8] sm:$0xff]   ;;  %v8291_v25 = vld [vmem:[#allocation4 + $0x50] sm:$0xff]   ;;  %v8292_v26 = vld [vmem:[#allocation4 + $0x18] sm:$0xff]   ;;  %vm2489_vm13 = vsmask.f32 7938 }
  0x2f   :  { %v8289_v23 = vld [vmem:[#allocation7 + $0x8] sm:$0xff]   ;;  %v8294_v27 = vld [vmem:[#allocation7 + $0x10] sm:$0xff]   ;;  %v8293_v29 = vld [vmem:[#allocation4 + $0x58] sm:$0xff]  }
  0x30   :  { %7753 = vmatpush3.bf16.msra.mxu0 %v8270_v4  ;;  %v8295_v28 = vld [vmem:[#allocation7 + $0x10] sm:$0xff]   ;;  %v8296_v30 = vld [vmem:[#allocation7 + $0x18] sm:$0xff]   ;;  %v8298_v32 = vld [vmem:[#allocation4 + $0x20] sm:$0xff]  }
  0x31   :  { %7785 = vmatpush3.bf16.msra.mxu1 %v8271_v5  ;;  %7754 = vmatprep.subr.bf16.mxu0 %v8272_v6  ;;  %v8297_v31 = vld [vmem:[#allocation7 + $0x18] sm:$0xff]   ;;  %v8299_v33 = vld [vmem:[#allocation4 + $0x60] sm:$0xff]   ;;  %v8300_v34 = vld [vmem:[#allocation4 + $0x28] sm:$0xff]  }
  0x32   :  { %7786 = vmatprep.subr.bf16.mxu1 %v8273_v7  ;;  %v8302_v35 = vld [vmem:[#allocation7 + $0x20] sm:$0xff]   ;;  %v8301_v37 = vld [vmem:[#allocation4 + $0x68] sm:$0xff]   ;;  %v8306_v40 = vld [vmem:[#allocation4 + $0x30] sm:$0xff]  }
  0x33   :  { %v8303_v36 = vld [vmem:[#allocation7 + $0x20] sm:$0xff]   ;;  %v8304_v38 = vld [vmem:[#allocation7 + $0x28] sm:$0xff]   ;;  %v8307_v41 = vld [vmem:[#allocation4 + $0x70] sm:$0xff]  }
  0x34   :  { %7755 = vmatpush3.bf16.msra.mxu0 %v8272_v6  ;;  %v8305_v39 = vld [vmem:[#allocation7 + $0x28] sm:$0xff]   ;;  %v8308_v42 = vld [vmem:[#allocation4 + $0x38] sm:$0xff]   ;;  %v8310_v43 = vld [vmem:[#allocation7 + $0x30] sm:$0xff]  }
  0x35   :  { %7787 = vmatpush3.bf16.msra.mxu1 %v8273_v7  ;;  %7756 = vmatprep.subr.bf16.mxu0 %v8274_v8  ;;  %v8311_v44 = vld [vmem:[#allocation7 + $0x30] sm:$0xff]   ;;  %v8309_v45 = vld [vmem:[#allocation4 + $0x78] sm:$0xff]   ;;  %v8314_v48 = vld [vmem:[#allocation4 + $0x80] sm:$0xff]  }
  0x36   :  { %7788 = vmatprep.subr.bf16.mxu1 %v8275_v9  ;;  %v8312_v46 = vld [vmem:[#allocation7 + $0x38] sm:$0xff]   ;;  %v8315_v49 = vld [vmem:[#allocation4 + $0xc0] sm:$0xff]   ;;  %v8316_v50 = vld [vmem:[#allocation4 + $0x88] sm:$0xff]  }
  0x37   :  { %v8313_v47 = vld [vmem:[#allocation7 + $0x38] sm:$0xff]   ;;  %v8318_v51 = vld [vmem:[#allocation7] sm:$0xff]   ;;  %v8317_v53 = vld [vmem:[#allocation4 + $0xc8] sm:$0xff]  }
  0x38   :  { %7757 = vmatpush3.bf16.msra.mxu0 %v8274_v8  ;;  %v8319_v52 = vld [vmem:[#allocation7] sm:$0xff]   ;;  %v8320_v54 = vld [vmem:[#allocation7 + $0x8] sm:$0xff]   ;;  %v8322_v56 = vld [vmem:[#allocation4 + $0x90] sm:$0xff]  }
  0x39   :  { %7789 = vmatpush3.bf16.msra.mxu1 %v8275_v9  ;;  %7758 = vmatprep.subr.bf16.mxu0 %v8276_v10  ;;  %v8321_v55 = vld [vmem:[#allocation7 + $0x8] sm:$0xff]   ;;  %v8323_v57 = vld [vmem:[#allocation4 + $0xd0] sm:$0xff]   ;;  %v8324_v58 = vld [vmem:[#allocation4 + $0x98] sm:$0xff]  }
  0x3a   :  { %7790 = vmatprep.subr.bf16.mxu1 %v8277_v11  ;;  %v8326_v59 = vld [vmem:[#allocation7 + $0x10] sm:$0xff]   ;;  %v8325_v61 = vld [vmem:[#allocation4 + $0xd8] sm:$0xff]   ;;  %v8330_v0 = vld [vmem:[#allocation4 + $0xa0] sm:$0xff]  }
  0x3b   :  { %v8327_v60 = vld [vmem:[#allocation7 + $0x10] sm:$0xff]   ;;  %v8328_v62 = vld [vmem:[#allocation7 + $0x18] sm:$0xff]   ;;  %v8331_v1 = vld [vmem:[#allocation4 + $0xe0] sm:$0xff]  }
  0x3c   :  { %7759 = vmatpush3.bf16.msra.mxu0 %v8276_v10  ;;  %v8329_v63 = vld [vmem:[#allocation7 + $0x18] sm:$0xff]   ;;  %v8332_v2 = vld [vmem:[#allocation4 + $0xa8] sm:$0xff]   ;;  %v8334_v3 = vld [vmem:[#allocation7 + $0x20] sm:$0xff]  }
  0x3d   :  { %7791 = vmatpush3.bf16.msra.mxu1 %v8277_v11  ;;  %7760 = vmatprep.subr.bf16.mxu0 %v8278_v14  ;;  %v8335_v4 = vld [vmem:[#allocation7 + $0x20] sm:$0xff]   ;;  %v8333_v5 = vld [vmem:[#allocation4 + $0xe8] sm:$0xff]   ;;  %v8338_v8 = vld [vmem:[#allocation4 + $0xb0] sm:$0xff]  }
  0x3e   :  { %7792 = vmatprep.subr.bf16.mxu1 %v8279_v15  ;;  %v8336_v6 = vld [vmem:[#allocation7 + $0x28] sm:$0xff]   ;;  %v8339_v9 = vld [vmem:[#allocation4 + $0xf0] sm:$0xff]   ;;  %v8340_v10 = vld [vmem:[#allocation4 + $0xb8] sm:$0xff]  }
  0x3f   :  { %v8337_v7 = vld [vmem:[#allocation7 + $0x28] sm:$0xff]   ;;  %v8342_v11 = vld [vmem:[#allocation7 + $0x30] sm:$0xff]   ;;  %v8341_v13 = vld [vmem:[#allocation4 + $0xf8] sm:$0xff]  }
  0x40   :  { %7761 = vmatpush3.bf16.msra.mxu0 %v8278_v14  ;;  %v8343_v12 = vld [vmem:[#allocation7 + $0x30] sm:$0xff]   ;;  %v8344_v14 = vld [vmem:[#allocation7 + $0x38] sm:$0xff]   ;;  %vm9371_vm2 = vmor %vm2249_vm0, %vm2250_vm1  ;;  %vm2580_vm1 = vcmask 1045508  }
  0x41   :  { %7793 = vmatpush3.bf16.msra.mxu1 %v8279_v15  ;;  %7762 = vmatprep.subr.bf16.mxu0 %v8280_v16  ;;  %v8345_v15 = vld [vmem:[#allocation7 + $0x38] sm:$0xff]   ;;  %vm9591_vm5 = vmor %vm2366_vm3, %vm2367_vm4 }
  0x42   :  { %7794 = vmatprep.subr.bf16.mxu1 %v8281_v17  ;;  %vm10020_vm15 = vmand %vm2159_vm6, %vm2160_vm7 }
  0x43   :  { %vm10035_vm4 = vmand %vm2274_vm8, %vm2275_vm9 }
  0x44   :  { %7763 = vmatpush3.bf16.msra.mxu0 %v8280_v16  ;;  %v8346_v16 = vld [vmem:[#allocation4 + $0x100] sm:$0xff]   ;;  %vm10073_vm8 = vmand %vm2366_vm3, %vm11176_vm10  ;;  %vm2705_vm10 = vsmask.f32 7950 }
  0x45   :  { %7795 = vmatpush3.bf16.msra.mxu1 %v8281_v17  ;;  %7812 = vmatprep.subr.bf16.mxu0 %v8286_v19  ;;  %v8347_v17 = vld [vmem:[#allocation4 + $0x140] sm:$0xff]   ;;  %vm10099_vm3 = vmor %vm11177_vm11, %vm2469_vm12  ;;  %vm2797_vm11 = vcmask 1044484  }
  0x46   :  { %7844 = vmatprep.subr.bf16.mxu1 %v8287_v20  ;;  %vm10121_vm9 = vmand %vm2159_vm6, %vm2489_vm13  ;;  %vm2680_vm13 = vsmask.f32 7440 }
  0x47   :  { %7765 = vmatmul.mubr.bf16.vlgmr.msra.gmra.mrb[0].mxu0 %v8284_v18  ;;  %v8348_v18 = vld [vmem:[#allocation4 + $0x108] sm:$0xff]   ;;  %vm10136_vm6 = vmor %vm2579_vm14, %vm2580_vm1  ;;  %vm2704_vm1 = vcmask 1043459  }
  0x48   :  { %7797 = vmatmul.mubr.bf16.vlgmr.msra.gmra.mrb[0].mxu1 %v8285_v21  ;;  %7813 = vmatpush3.bf16.msra.mxu0 %v8286_v19  ;;  %v8350_v19 = vld [vmem:[#allocation7] sm:$0xff]   ;;  %v8349_v21 = vld [vmem:[#allocation4 + $0x148] sm:$0xff]   ;;  %vm10154_vm12 = vmand %vm2579_vm14, %vm2249_vm0  ;;  %vm2796_vm14 = vcmask 1040384  }
  0x49   :  { %7845 = vmatpush3.bf16.msra.mxu1 %v8287_v20  ;;  %7814 = vmatprep.subr.bf16.mxu0 %v8288_v22  ;;  %v8351_v20 = vld [vmem:[#allocation7] sm:$0xff]   ;;  %vm10165_vm0 = vmand %vm2704_vm1, %vm2705_vm10 }
  0x4a   :  { %7846 = vmatprep.subr.bf16.mxu1 %v8289_v23  ;;  %7768 = vmatprep.mubr.bf16.mxu0 %v8290_v24  ;;  %v8354_v24 = vld [vmem:[#allocation4 + $0x110] sm:$0xff]   ;;  %vm10191_vm1 = vmor %vm2796_vm14, %vm2797_vm11 }
  0x4b   :  { %7800 = vmatprep.mubr.bf16.mxu1 %v8291_v25  ;;  %v8355_v25 = vld [vmem:[#allocation4 + $0x150] sm:$0xff]  }
  0x4c   :  { %7815 = vmatpush3.bf16.msra.mxu0 %v8288_v22  ;;  %v8352_v22 = vld [vmem:[#allocation7 + $0x8] sm:$0xff]  }
  0x4d   :  { %7847 = vmatpush3.bf16.msra.mxu1 %v8289_v23  ;;  %7816 = vmatprep.subr.bf16.mxu0 %v8294_v27  ;;  %v8353_v23 = vld [vmem:[#allocation7 + $0x8] sm:$0xff]  }
  0x4e   :  { %7848 = vmatprep.subr.bf16.mxu1 %v8295_v28 }
  0x4f   :  { %7769 = vmatmul.mubr.bf16.gmra.mrb[4].mxu0 %v8292_v26  ;;  %v8356_v26 = vld [vmem:[#allocation4 + $0x118] sm:$0xff]  }
  0x50   :  { %7801 = vmatmul.mubr.bf16.gmra.mrb[4].mxu1 %v8293_v29  ;;  %7817 = vmatpush3.bf16.msra.mxu0 %v8294_v27  ;;  %v8358_v27 = vld [vmem:[#allocation7 + $0x10] sm:$0xff]   ;;  %v8357_v29 = vld [vmem:[#allocation4 + $0x158] sm:$0xff]  }
  0x51   :  { %7849 = vmatpush3.bf16.msra.mxu1 %v8295_v28  ;;  %7818 = vmatprep.subr.bf16.mxu0 %v8296_v30  ;;  %v8359_v28 = vld [vmem:[#allocation7 + $0x10] sm:$0xff]  }
  0x52   :  { %7850 = vmatprep.subr.bf16.mxu1 %v8297_v31  ;;  %7772 = vmatprep.mubr.bf16.mxu0 %v8298_v32  ;;  %v8362_v32 = vld [vmem:[#allocation4 + $0x120] sm:$0xff]  }
  0x53   :  { %7804 = vmatprep.mubr.bf16.mxu1 %v8299_v33  ;;  %v8363_v33 = vld [vmem:[#allocation4 + $0x160] sm:$0xff]  }
  0x54   :  { %7819 = vmatpush3.bf16.msra.mxu0 %v8296_v30  ;;  %v8360_v30 = vld [vmem:[#allocation7 + $0x18] sm:$0xff]  }
  0x55   :  { %7851 = vmatpush3.bf16.msra.mxu1 %v8297_v31  ;;  %7820 = vmatprep.subr.bf16.mxu0 %v8302_v35  ;;  %v8361_v31 = vld [vmem:[#allocation7 + $0x18] sm:$0xff]  }
  0x56   :  { %7852 = vmatprep.subr.bf16.mxu1 %v8303_v36 }
  0x57   :  { %7773 = vmatmul.mubr.bf16.gmra.mrb[8].mxu0 %v8300_v34  ;;  %v8364_v34 = vld [vmem:[#allocation4 + $0x128] sm:$0xff]  }
  0x58   :  { %7805 = vmatmul.mubr.bf16.gmra.mrb[8].mxu1 %v8301_v37  ;;  %7821 = vmatpush3.bf16.msra.mxu0 %v8302_v35  ;;  %v8366_v35 = vld [vmem:[#allocation7 + $0x20] sm:$0xff]   ;;  %v8365_v37 = vld [vmem:[#allocation4 + $0x168] sm:$0xff]  }
  0x59   :  { %7853 = vmatpush3.bf16.msra.mxu1 %v8303_v36  ;;  %7822 = vmatprep.subr.bf16.mxu0 %v8304_v38  ;;  %v8367_v36 = vld [vmem:[#allocation7 + $0x20] sm:$0xff]  }
  0x5a   :  { %7854 = vmatprep.subr.bf16.mxu1 %v8305_v39  ;;  %7776 = vmatprep.mubr.bf16.mxu0 %v8306_v40  ;;  %v8370_v40 = vld [vmem:[#allocation4 + $0x130] sm:$0xff]  }
  0x5b   :  { %7808 = vmatprep.mubr.bf16.mxu1 %v8307_v41  ;;  %v8371_v41 = vld [vmem:[#allocation4 + $0x170] sm:$0xff]  }
  0x5c   :  { %7823 = vmatpush3.bf16.msra.mxu0 %v8304_v38  ;;  %v8368_v38 = vld [vmem:[#allocation7 + $0x28] sm:$0xff]  }
  0x5d   :  { %7855 = vmatpush3.bf16.msra.mxu1 %v8305_v39  ;;  %7824 = vmatprep.subr.bf16.mxu0 %v8310_v43  ;;  %v8369_v39 = vld [vmem:[#allocation7 + $0x28] sm:$0xff]  }
  0x5e   :  { %7856 = vmatprep.subr.bf16.mxu1 %v8311_v44 }
  0x5f   :  { %7777 = vmatmul.mubr.bf16.gmra.mrb[12].mxu0 %v8308_v42  ;;  %v8372_v42 = vld [vmem:[#allocation4 + $0x138] sm:$0xff]  }
  0x60   :  { %7809 = vmatmul.mubr.bf16.gmra.mrb[12].mxu1 %v8309_v45  ;;  %7825 = vmatpush3.bf16.msra.mxu0 %v8310_v43  ;;  %v8374_v43 = vld [vmem:[#allocation7 + $0x30] sm:$0xff]   ;;  %v8373_v45 = vld [vmem:[#allocation4 + $0x178] sm:$0xff]  }
  0x61   :  { %7857 = vmatpush3.bf16.msra.mxu1 %v8311_v44  ;;  %7826 = vmatprep.subr.bf16.mxu0 %v8312_v46  ;;  %v8375_v44 = vld [vmem:[#allocation7 + $0x30] sm:$0xff]  }
  0x62   :  { %7858 = vmatprep.subr.bf16.mxu1 %v8313_v47  ;;  %7828 = vmatprep.mubr.bf16.mxu0 %v8314_v48  ;;  %v8378_v48 = vld [vmem:[#allocation4 + $0x180] sm:$0xff]  }
  0x63   :  { %7860 = vmatprep.mubr.bf16.mxu1 %v8315_v49  ;;  %v8379_v49 = vld [vmem:[#allocation4 + $0x1c0] sm:$0xff]  }
  0x64   :  { %7827 = vmatpush3.bf16.msra.mxu0 %v8312_v46  ;;  %v8376_v46 = vld [vmem:[#allocation7 + $0x38] sm:$0xff]  }
  0x65   :  { %7859 = vmatpush3.bf16.msra.mxu1 %v8313_v47  ;;  %7876 = vmatprep.subr.bf16.mxu0 %v8318_v51  ;;  %v8377_v47 = vld [vmem:[#allocation7 + $0x38] sm:$0xff]  }
  0x66   :  { %7908 = vmatprep.subr.bf16.mxu1 %v8319_v52 }
  0x67   :  { %7829 = vmatmul.mubr.bf16.vlgmr.msra.gmra.mrb[16].mxu0 %v8316_v50  ;;  %v8380_v50 = vld [vmem:[#allocation4 + $0x188] sm:$0xff]  }
  0x68   :  { %7861 = vmatmul.mubr.bf16.vlgmr.msra.gmra.mrb[16].mxu1 %v8317_v53  ;;  %7877 = vmatpush3.bf16.msra.mxu0 %v8318_v51  ;;  %v8382_v51 = vld [vmem:[#allocation7] sm:$0xff]   ;;  %v8381_v53 = vld [vmem:[#allocation4 + $0x1c8] sm:$0xff]  }
  0x69   :  { %7909 = vmatpush3.bf16.msra.mxu1 %v8319_v52  ;;  %7878 = vmatprep.subr.bf16.mxu0 %v8320_v54  ;;  %v8383_v52 = vld [vmem:[#allocation7] sm:$0xff]  }
  0x6a   :  { %7910 = vmatprep.subr.bf16.mxu1 %v8321_v55  ;;  %7832 = vmatprep.mubr.bf16.mxu0 %v8322_v56  ;;  %v8386_v56 = vld [vmem:[#allocation4 + $0x190] sm:$0xff]  }
  0x6b   :  { %7864 = vmatprep.mubr.bf16.mxu1 %v8323_v57  ;;  %v8387_v57 = vld [vmem:[#allocation4 + $0x1d0] sm:$0xff]  }
  0x6c   :  { %7879 = vmatpush3.bf16.msra.mxu0 %v8320_v54  ;;  %v8384_v54 = vld [vmem:[#allocation7 + $0x8] sm:$0xff]  }
  0x6d   :  { %7911 = vmatpush3.bf16.msra.mxu1 %v8321_v55  ;;  %7880 = vmatprep.subr.bf16.mxu0 %v8326_v59  ;;  %v8385_v55 = vld [vmem:[#allocation7 + $0x8] sm:$0xff]  }
  0x6e   :  { %7912 = vmatprep.subr.bf16.mxu1 %v8327_v60 }
  0x6f   :  { %7833 = vmatmul.mubr.bf16.gmra.mrb[20].mxu0 %v8324_v58  ;;  %v8388_v58 = vld [vmem:[#allocation4 + $0x198] sm:$0xff]  }
  0x70   :  { %7865 = vmatmul.mubr.bf16.gmra.mrb[20].mxu1 %v8325_v61  ;;  %7881 = vmatpush3.bf16.msra.mxu0 %v8326_v59  ;;  %v8390_v59 = vld [vmem:[#allocation7 + $0x10] sm:$0xff]   ;;  %v8389_v61 = vld [vmem:[#allocation4 + $0x1d8] sm:$0xff]  }
  0x71   :  { %7913 = vmatpush3.bf16.msra.mxu1 %v8327_v60  ;;  %7882 = vmatprep.subr.bf16.mxu0 %v8328_v62  ;;  %v8391_v60 = vld [vmem:[#allocation7 + $0x10] sm:$0xff]  }
  0x72   :  { %7914 = vmatprep.subr.bf16.mxu1 %v8329_v63  ;;  %7836 = vmatprep.mubr.bf16.mxu0 %v8330_v0  ;;  %v8394_v0 = vld [vmem:[#allocation4 + $0x1a0] sm:$0xff]  }
  0x73   :  { %7868 = vmatprep.mubr.bf16.mxu1 %v8331_v1  ;;  %v8395_v1 = vld [vmem:[#allocation4 + $0x1e0] sm:$0xff]  }
  0x74   :  { %7883 = vmatpush3.bf16.msra.mxu0 %v8328_v62  ;;  %v8392_v62 = vld [vmem:[#allocation7 + $0x18] sm:$0xff]  }
  0x75   :  { %7915 = vmatpush3.bf16.msra.mxu1 %v8329_v63  ;;  %7884 = vmatprep.subr.bf16.mxu0 %v8334_v3  ;;  %v8393_v63 = vld [vmem:[#allocation7 + $0x18] sm:$0xff]  }
  0x76   :  { %7916 = vmatprep.subr.bf16.mxu1 %v8335_v4 }
  0x77   :  { %7837 = vmatmul.mubr.bf16.gmra.mrb[24].mxu0 %v8332_v2  ;;  %v8396_v2 = vld [vmem:[#allocation4 + $0x1a8] sm:$0xff]  }
  0x78   :  { %7869 = vmatmul.mubr.bf16.gmra.mrb[24].mxu1 %v8333_v5  ;;  %7885 = vmatpush3.bf16.msra.mxu0 %v8334_v3  ;;  %v8398_v3 = vld [vmem:[#allocation7 + $0x20] sm:$0xff]   ;;  %v8397_v5 = vld [vmem:[#allocation4 + $0x1e8] sm:$0xff]  }
  0x79   :  { %7917 = vmatpush3.bf16.msra.mxu1 %v8335_v4  ;;  %7886 = vmatprep.subr.bf16.mxu0 %v8336_v6  ;;  %v8399_v4 = vld [vmem:[#allocation7 + $0x20] sm:$0xff]  }
  0x7a   :  { %7918 = vmatprep.subr.bf16.mxu1 %v8337_v7  ;;  %7840 = vmatprep.mubr.bf16.mxu0 %v8338_v8  ;;  %v8402_v8 = vld [vmem:[#allocation4 + $0x1b0] sm:$0xff]  }
  0x7b   :  { %7872 = vmatprep.mubr.bf16.mxu1 %v8339_v9  ;;  %v8403_v9 = vld [vmem:[#allocation4 + $0x1f0] sm:$0xff]  }
  0x7c   :  { %7887 = vmatpush3.bf16.msra.mxu0 %v8336_v6  ;;  %v8400_v6 = vld [vmem:[#allocation7 + $0x28] sm:$0xff]  }
  0x7d   :  { %7919 = vmatpush3.bf16.msra.mxu1 %v8337_v7  ;;  %7888 = vmatprep.subr.bf16.mxu0 %v8342_v11  ;;  %v8401_v7 = vld [vmem:[#allocation7 + $0x28] sm:$0xff]  }
  0x7e   :  { %7920 = vmatprep.subr.bf16.mxu1 %v8343_v12 }
  0x7f   :  { %7841 = vmatmul.mubr.bf16.gmra.mrb[28].mxu0 %v8340_v10  ;;  %v8404_v10 = vld [vmem:[#allocation4 + $0x1b8] sm:$0xff]  }
  0x80   :  { %7873 = vmatmul.mubr.bf16.gmra.mrb[28].mxu1 %v8341_v13  ;;  %7889 = vmatpush3.bf16.msra.mxu0 %v8342_v11  ;;  %v8406_v11 = vld [vmem:[#allocation7 + $0x30] sm:$0xff]   ;;  %v8405_v13 = vld [vmem:[#allocation4 + $0x1f8] sm:$0xff]  }
  0x81   :  { %7921 = vmatpush3.bf16.msra.mxu1 %v8343_v12  ;;  %7890 = vmatprep.subr.bf16.mxu0 %v8344_v14  ;;  %v8407_v12 = vld [vmem:[#allocation7 + $0x30] sm:$0xff]  }
  0x82   :  { %7922 = vmatprep.subr.bf16.mxu1 %v8345_v15  ;;  %7892 = vmatprep.mubr.bf16.mxu0 %v8346_v16  ;;  %v8410_v16 = vld [vmem:[#allocation4 + $0x200] sm:$0xff]  }
  0x83   :  { %7924 = vmatprep.mubr.bf16.mxu1 %v8347_v17  ;;  %v8411_v17 = vld [vmem:[#allocation4 + $0x240] sm:$0xff]  }
  0x84   :  { %7891 = vmatpush3.bf16.msra.mxu0 %v8344_v14  ;;  %v8408_v14 = vld [vmem:[#allocation7 + $0x38] sm:$0xff]  }
  0x85   :  { %7923 = vmatpush3.bf16.msra.mxu1 %v8345_v15  ;;  %7940 = vmatprep.subr.bf16.mxu0 %v8350_v19  ;;  %v8409_v15 = vld [vmem:[#allocation7 + $0x38] sm:$0xff]  }
  0x86   :  { %7972 = vmatprep.subr.bf16.mxu1 %v8351_v20 }
  0x87   :  { %7893 = vmatmul.mubr.bf16.vlgmr.msra.gmra.mrb[32].mxu0 %v8348_v18  ;;  %v8412_v18 = vld [vmem:[#allocation4 + $0x208] sm:$0xff]  }
  0x88   :  { %7925 = vmatmul.mubr.bf16.vlgmr.msra.gmra.mrb[32].mxu1 %v8349_v21  ;;  %7941 = vmatpush3.bf16.msra.mxu0 %v8350_v19  ;;  %v8414_v19 = vld [vmem:[#allocation7] sm:$0xff]   ;;  %v8413_v21 = vld [vmem:[#allocation4 + $0x248] sm:$0xff]  }
  0x89   :  { %7973 = vmatpush3.bf16.msra.mxu1 %v8351_v20  ;;  %7942 = vmatprep.subr.bf16.mxu0 %v8352_v22  ;;  %v8415_v20 = vld [vmem:[#allocation7] sm:$0xff]  }
  0x8a   :  { %7974 = vmatprep.subr.bf16.mxu1 %v8353_v23  ;;  %7896 = vmatprep.mubr.bf16.mxu0 %v8354_v24  ;;  %v8418_v24 = vld [vmem:[#allocation4 + $0x210] sm:$0xff]  }
  0x8b   :  { %7928 = vmatprep.mubr.bf16.mxu1 %v8355_v25  ;;  %v8419_v25 = vld [vmem:[#allocation4 + $0x250] sm:$0xff]  }
  0x8c   :  { %7943 = vmatpush3.bf16.msra.mxu0 %v8352_v22  ;;  %v8416_v22 = vld [vmem:[#allocation7 + $0x8] sm:$0xff]  }
  0x8d   :  { %7975 = vmatpush3.bf16.msra.mxu1 %v8353_v23  ;;  %7944 = vmatprep.subr.bf16.mxu0 %v8358_v27  ;;  %v8417_v23 = vld [vmem:[#allocation7 + $0x8] sm:$0xff]  }
  0x8e   :  { %7976 = vmatprep.subr.bf16.mxu1 %v8359_v28 }
  0x8f   :  { %7897 = vmatmul.mubr.bf16.gmra.mrb[36].mxu0 %v8356_v26  ;;  %v8420_v26 = vld [vmem:[#allocation4 + $0x218] sm:$0xff]  }
  0x90   :  { %7929 = vmatmul.mubr.bf16.gmra.mrb[36].mxu1 %v8357_v29  ;;  %7945 = vmatpush3.bf16.msra.mxu0 %v8358_v27  ;;  %v8422_v27 = vld [vmem:[#allocation7 + $0x10] sm:$0xff]   ;;  %v8421_v29 = vld [vmem:[#allocation4 + $0x258] sm:$0xff]  }
  0x91   :  { %7977 = vmatpush3.bf16.msra.mxu1 %v8359_v28  ;;  %7946 = vmatprep.subr.bf16.mxu0 %v8360_v30  ;;  %v8423_v28 = vld [vmem:[#allocation7 + $0x10] sm:$0xff]  }
  0x92   :  { %7978 = vmatprep.subr.bf16.mxu1 %v8361_v31  ;;  %7900 = vmatprep.mubr.bf16.mxu0 %v8362_v32  ;;  %v8426_v32 = vld [vmem:[#allocation4 + $0x220] sm:$0xff]  }
  0x93   :  { %7932 = vmatprep.mubr.bf16.mxu1 %v8363_v33  ;;  %v8427_v33 = vld [vmem:[#allocation4 + $0x260] sm:$0xff]  }
  0x94   :  { %7947 = vmatpush3.bf16.msra.mxu0 %v8360_v30  ;;  %v8424_v30 = vld [vmem:[#allocation7 + $0x18] sm:$0xff]  }
  0x95   :  { %7979 = vmatpush3.bf16.msra.mxu1 %v8361_v31  ;;  %7948 = vmatprep.subr.bf16.mxu0 %v8366_v35  ;;  %v8425_v31 = vld [vmem:[#allocation7 + $0x18] sm:$0xff]  }
  0x96   :  { %7980 = vmatprep.subr.bf16.mxu1 %v8367_v36 }
  0x97   :  { %7901 = vmatmul.mubr.bf16.gmra.mrb[40].mxu0 %v8364_v34  ;;  %v8428_v34 = vld [vmem:[#allocation4 + $0x228] sm:$0xff]  }
  0x98   :  { %7933 = vmatmul.mubr.bf16.gmra.mrb[40].mxu1 %v8365_v37  ;;  %7949 = vmatpush3.bf16.msra.mxu0 %v8366_v35  ;;  %v8430_v35 = vld [vmem:[#allocation7 + $0x20] sm:$0xff]   ;;  %v8429_v37 = vld [vmem:[#allocation4 + $0x268] sm:$0xff]  }
  0x99   :  { %7981 = vmatpush3.bf16.msra.mxu1 %v8367_v36  ;;  %7950 = vmatprep.subr.bf16.mxu0 %v8368_v38  ;;  %v8431_v36 = vld [vmem:[#allocation7 + $0x20] sm:$0xff]  }
  0x9a   :  { %7982 = vmatprep.subr.bf16.mxu1 %v8369_v39  ;;  %7904 = vmatprep.mubr.bf16.mxu0 %v8370_v40  ;;  %v8434_v40 = vld [vmem:[#allocation4 + $0x230] sm:$0xff]  }
  0x9b   :  { %7936 = vmatprep.mubr.bf16.mxu1 %v8371_v41  ;;  %v8435_v41 = vld [vmem:[#allocation4 + $0x270] sm:$0xff]  }
  0x9c   :  { %7951 = vmatpush3.bf16.msra.mxu0 %v8368_v38  ;;  %v8432_v38 = vld [vmem:[#allocation7 + $0x28] sm:$0xff]  }
  0x9d   :  { %7983 = vmatpush3.bf16.msra.mxu1 %v8369_v39  ;;  %7952 = vmatprep.subr.bf16.mxu0 %v8374_v43  ;;  %v8433_v39 = vld [vmem:[#allocation7 + $0x28] sm:$0xff]  }
  0x9e   :  { %7984 = vmatprep.subr.bf16.mxu1 %v8375_v44 }
  0x9f   :  { %7905 = vmatmul.mubr.bf16.gmra.mrb[44].mxu0 %v8372_v42  ;;  %v8436_v42 = vld [vmem:[#allocation4 + $0x238] sm:$0xff]  }
  0xa0   :  { %7937 = vmatmul.mubr.bf16.gmra.mrb[44].mxu1 %v8373_v45  ;;  %7953 = vmatpush3.bf16.msra.mxu0 %v8374_v43  ;;  %v8438_v43 = vld [vmem:[#allocation7 + $0x30] sm:$0xff]   ;;  %v8437_v45 = vld [vmem:[#allocation4 + $0x278] sm:$0xff]  }
  0xa1   :  { %7985 = vmatpush3.bf16.msra.mxu1 %v8375_v44  ;;  %7954 = vmatprep.subr.bf16.mxu0 %v8376_v46  ;;  %v8439_v44 = vld [vmem:[#allocation7 + $0x30] sm:$0xff]  }
  0xa2   :  { %7986 = vmatprep.subr.bf16.mxu1 %v8377_v47  ;;  %7956 = vmatprep.mubr.bf16.mxu0 %v8378_v48  ;;  %v8442_v48 = vld [vmem:[#allocation4 + $0x280] sm:$0xff]  }
  0xa3   :  { %7988 = vmatprep.mubr.bf16.mxu1 %v8379_v49  ;;  %v8443_v49 = vld [vmem:[#allocation4 + $0x2c0] sm:$0xff]  }
  0xa4   :  { %7955 = vmatpush3.bf16.msra.mxu0 %v8376_v46  ;;  %v8440_v46 = vld [vmem:[#allocation7 + $0x38] sm:$0xff]  }
  0xa5   :  { %7987 = vmatpush3.bf16.msra.mxu1 %v8377_v47  ;;  %8004 = vmatprep.subr.bf16.mxu0 %v8382_v51  ;;  %v8441_v47 = vld [vmem:[#allocation7 + $0x38] sm:$0xff]  }
  0xa6   :  { %8036 = vmatprep.subr.bf16.mxu1 %v8383_v52 }
  0xa7   :  { %7957 = vmatmul.mubr.bf16.vlgmr.msra.gmra.mrb[48].mxu0 %v8380_v50  ;;  %v8653_v50 = vld [vmem:[#allocation4 + $0x288] sm:$0xff]  }
  0xa8   :  { %7989 = vmatmul.mubr.bf16.vlgmr.msra.gmra.mrb[48].mxu1 %v8381_v53  ;;  %8005 = vmatpush3.bf16.msra.mxu0 %v8382_v51  ;;  %v8655_v51 = vld [vmem:[#allocation7] sm:$0xff]   ;;  %v8659_v53 = vld [vmem:[#allocation4 + $0x2c8] sm:$0xff]  }
  0xa9   :  { %8037 = vmatpush3.bf16.msra.mxu1 %v8383_v52  ;;  %8006 = vmatprep.subr.bf16.mxu0 %v8384_v54  ;;  %v8657_v52 = vld [vmem:[#allocation7] sm:$0xff]  }
  0xaa   :  { %8038 = vmatprep.subr.bf16.mxu1 %v8385_v55  ;;  %7960 = vmatprep.mubr.bf16.mxu0 %v8386_v56  ;;  %v8601_v56 = vmov 0  }
  0xab   :  { %7992 = vmatprep.mubr.bf16.mxu1 %v8387_v57  ;;  %82 = vst [vmem:[#allocation9 + $0x98] sm:$0xf] %v8601_v56  ;;  %44 = vst [vmem:[#allocation9] sm:$0xf] %v8601_v56  ;;  %v8450_v57 = vld [vmem:[#allocation4 + $0x290] sm:$0xff]  }
  0xac   :  { %8007 = vmatpush3.bf16.msra.mxu0 %v8384_v54  ;;  %v8661_v54 = vld [vmem:[#allocation7 + $0x8] sm:$0xff]   ;;  %45 = vst [vmem:[#allocation9 + $0x4] sm:$0xf] %v8601_v56  ;;  %46 = vst [vmem:[#allocation9 + $0x8] sm:$0xf] %v8601_v56 }
  0xad   :  { %8039 = vmatpush3.bf16.msra.mxu1 %v8385_v55  ;;  %8008 = vmatprep.subr.bf16.mxu0 %v8390_v59  ;;  %v8664_v55 = vld [vmem:[#allocation7 + $0x8] sm:$0xff]   ;;  %47 = vst [vmem:[#allocation9 + $0xc] sm:$0xf] %v8601_v56  ;;  %48 = vst [vmem:[#allocation9 + $0x10] sm:$0xf] %v8601_v56 }
  0xae   :  { %8040 = vmatprep.subr.bf16.mxu1 %v8391_v60  ;;  %49 = vst [vmem:[#allocation9 + $0x14] sm:$0xf] %v8601_v56  ;;  %50 = vst [vmem:[#allocation9 + $0x18] sm:$0xf] %v8601_v56 }
  0xaf   :  { %7961 = vmatmul.mubr.bf16.gmra.mrb[52].mxu0 %v8388_v58  ;;  %51 = vst [vmem:[#allocation9 + $0x1c] sm:$0xf] %v8601_v56  ;;  %52 = vst [vmem:[#allocation9 + $0x20] sm:$0xf] %v8601_v56  ;;  %v8451_v58 = vld [vmem:[#allocation4 + $0x2d0] sm:$0xff]  }
  0xb0   :  { %7993 = vmatmul.mubr.bf16.gmra.mrb[52].mxu1 %v8389_v61  ;;  %8009 = vmatpush3.bf16.msra.mxu0 %v8390_v59  ;;  %53 = vst [vmem:[#allocation9 + $0x24] sm:$0xf] %v8601_v56  ;;  %54 = vst [vmem:[#allocation9 + $0x28] sm:$0xf] %v8601_v56  ;;  %v8452_v59 = vld [vmem:[#allocation4 + $0x298] sm:$0xff]   ;;  %v8455_v61 = vld [vmem:[#allocation7 + $0x10] sm:$0xff]  }
  0xb1   :  { %8041 = vmatpush3.bf16.msra.mxu1 %v8391_v60  ;;  %8010 = vmatprep.subr.bf16.mxu0 %v8392_v62  ;;  %55 = vst [vmem:[#allocation9 + $0x2c] sm:$0xf] %v8601_v56  ;;  %56 = vst [vmem:[#allocation9 + $0x30] sm:$0xf] %v8601_v56  ;;  %v8454_v60 = vld [vmem:[#allocation7 + $0x10] sm:$0xff]  }
  0xb2   :  { %8042 = vmatprep.subr.bf16.mxu1 %v8393_v63  ;;  %7964 = vmatprep.mubr.bf16.mxu0 %v8394_v0  ;;  %57 = vst [vmem:[#allocation9 + $0x34] sm:$0xf] %v8601_v56  ;;  %58 = vst [vmem:[#allocation9 + $0x38] sm:$0xf] %v8601_v56  ;;  %v8457_v0 = vld [vmem:[#allocation7 + $0x18] sm:$0xff]  }
  0xb3   :  { %7996 = vmatprep.mubr.bf16.mxu1 %v8395_v1  ;;  %59 = vst [vmem:[#allocation9 + $0x3c] sm:$0xf] %v8601_v56  ;;  %60 = vst [vmem:[#allocation9 + $0x40] sm:$0xf] %v8601_v56  ;;  %v8458_v1 = vld [vmem:[#allocation4 + $0x2a0] sm:$0xff]  }
  0xb4   :  { %8011 = vmatpush3.bf16.msra.mxu0 %v8392_v62  ;;  %61 = vst [vmem:[#allocation9 + $0x44] sm:$0xf] %v8601_v56  ;;  %62 = vst [vmem:[#allocation9 + $0x48] sm:$0xf] %v8601_v56  ;;  %v8453_v62 = vld [vmem:[#allocation4 + $0x2d8] sm:$0xff]  }
  0xb5   :  { %8043 = vmatpush3.bf16.msra.mxu1 %v8393_v63  ;;  %8012 = vmatprep.subr.bf16.mxu0 %v8398_v3  ;;  %63 = vst [vmem:[#allocation9 + $0x4c] sm:$0xf] %v8601_v56  ;;  %64 = vst [vmem:[#allocation9 + $0x50] sm:$0xf] %v8601_v56  ;;  %v8456_v63 = vld [vmem:[#allocation7 + $0x18] sm:$0xff]  }
  0xb6   :  { %8044 = vmatprep.subr.bf16.mxu1 %v8399_v4  ;;  %65 = vst [vmem:[#allocation9 + $0x54] sm:$0xf] %v8601_v56  ;;  %66 = vst [vmem:[#allocation9 + $0x58] sm:$0xf] %v8601_v56 }
  0xb7   :  { %7965 = vmatmul.mubr.bf16.gmra.mrb[56].mxu0 %v8396_v2  ;;  %67 = vst [vmem:[#allocation9 + $0x5c] sm:$0xf] %v8601_v56  ;;  %68 = vst [vmem:[#allocation9 + $0x60] sm:$0xf] %v8601_v56  ;;  %v8459_v2 = vld [vmem:[#allocation4 + $0x2e0] sm:$0xff]  }
  0xb8   :  { %7997 = vmatmul.mubr.bf16.gmra.mrb[56].mxu1 %v8397_v5  ;;  %8013 = vmatpush3.bf16.msra.mxu0 %v8398_v3  ;;  %69 = vst [vmem:[#allocation9 + $0x64] sm:$0xf] %v8601_v56  ;;  %70 = vst [vmem:[#allocation9 + $0x68] sm:$0xf] %v8601_v56  ;;  %v8460_v3 = vld [vmem:[#allocation4 + $0x2a8] sm:$0xff]   ;;  %v8463_v5 = vld [vmem:[#allocation7 + $0x20] sm:$0xff]  }
  0xb9   :  { %8045 = vmatpush3.bf16.msra.mxu1 %v8399_v4  ;;  %8014 = vmatprep.subr.bf16.mxu0 %v8400_v6  ;;  %71 = vst [vmem:[#allocation9 + $0x6c] sm:$0xf] %v8601_v56  ;;  %72 = vst [vmem:[#allocation9 + $0x70] sm:$0xf] %v8601_v56  ;;  %v8462_v4 = vld [vmem:[#allocation7 + $0x20] sm:$0xff]  }
  0xba   :  { %8046 = vmatprep.subr.bf16.mxu1 %v8401_v7  ;;  %7968 = vmatprep.mubr.bf16.mxu0 %v8402_v8  ;;  %73 = vst [vmem:[#allocation9 + $0x74] sm:$0xf] %v8601_v56  ;;  %74 = vst [vmem:[#allocation9 + $0x78] sm:$0xf] %v8601_v56  ;;  %v8465_v8 = vld [vmem:[#allocation7 + $0x28] sm:$0xff]  }
  0xbb   :  { %8000 = vmatprep.mubr.bf16.mxu1 %v8403_v9  ;;  %75 = vst [vmem:[#allocation9 + $0x7c] sm:$0xf] %v8601_v56  ;;  %76 = vst [vmem:[#allocation9 + $0x80] sm:$0xf] %v8601_v56  ;;  %v8466_v9 = vld [vmem:[#allocation4 + $0x2b0] sm:$0xff]  }
  0xbc   :  { %8015 = vmatpush3.bf16.msra.mxu0 %v8400_v6  ;;  %77 = vst [vmem:[#allocation9 + $0x84] sm:$0xf] %v8601_v56  ;;  %78 = vst [vmem:[#allocation9 + $0x88] sm:$0xf] %v8601_v56  ;;  %v8461_v6 = vld [vmem:[#allocation4 + $0x2e8] sm:$0xff]  }
  0xbd   :  { %8047 = vmatpush3.bf16.msra.mxu1 %v8401_v7  ;;  %8016 = vmatprep.subr.bf16.mxu0 %v8406_v11  ;;  %79 = vst [vmem:[#allocation9 + $0x8c] sm:$0xf] %v8601_v56  ;;  %80 = vst [vmem:[#allocation9 + $0x90] sm:$0xf] %v8601_v56  ;;  %v8464_v7 = vld [vmem:[#allocation7 + $0x28] sm:$0xff]  }
  0xbe   :  { %8048 = vmatprep.subr.bf16.mxu1 %v8407_v12  ;;  %81 = vst [vmem:[#allocation9 + $0x94] sm:$0xf] %v8601_v56  ;;  %83 = vst [vmem:[#allocation9 + $0x9c] sm:$0xf] %v8601_v56 }
  0xbf   :  { %7969 = vmatmul.mubr.bf16.gmra.mrb[60].mxu0 %v8404_v10  ;;  %84 = vst [vmem:[#allocation9 + $0xa0] sm:$0xf] %v8601_v56  ;;  %85 = vst [vmem:[#allocation9 + $0xa4] sm:$0xf] %v8601_v56  ;;  %v8467_v10 = vld [vmem:[#allocation4 + $0x2f0] sm:$0xff]  }
  0xc0   :  { %8001 = vmatmul.mubr.bf16.gmra.mrb[60].mxu1 %v8405_v13  ;;  %8017 = vmatpush3.bf16.msra.mxu0 %v8406_v11  ;;  %86 = vst [vmem:[#allocation9 + $0xa8] sm:$0xf] %v8601_v56  ;;  %87 = vst [vmem:[#allocation9 + $0xac] sm:$0xf] %v8601_v56  ;;  %v8468_v11 = vld [vmem:[#allocation4 + $0x2b8] sm:$0xff]   ;;  %v8471_v13 = vld [vmem:[#allocation7 + $0x30] sm:$0xff]  }
  0xc1   :  { %8049 = vmatpush3.bf16.msra.mxu1 %v8407_v12  ;;  %8018 = vmatprep.subr.bf16.mxu0 %v8408_v14  ;;  %88 = vst [vmem:[#allocation9 + $0xb0] sm:$0xf] %v8601_v56  ;;  %89 = vst [vmem:[#allocation9 + $0xb4] sm:$0xf] %v8601_v56  ;;  %v8470_v12 = vld [vmem:[#allocation7 + $0x30] sm:$0xff]  }
  0xc2   :  { %8050 = vmatprep.subr.bf16.mxu1 %v8409_v15  ;;  %8020 = vmatprep.mubr.bf16.mxu0 %v8410_v16  ;;  %90 = vst [vmem:[#allocation9 + $0xb8] sm:$0xf] %v8601_v56  ;;  %91 = vst [vmem:[#allocation9 + $0xbc] sm:$0xf] %v8601_v56  ;;  %v8473_v16 = vld [vmem:[#allocation7 + $0x38] sm:$0xff]  }
  0xc3   :  { %8052 = vmatprep.mubr.bf16.mxu1 %v8411_v17  ;;  %92 = vst [vmem:[#allocation9 + $0xc0] sm:$0xf] %v8601_v56  ;;  %93 = vst [vmem:[#allocation9 + $0xc4] sm:$0xf] %v8601_v56  ;;  %v8474_v17 = vld [vmem:[#allocation4 + $0x300] sm:$0xff]  }
  0xc4   :  { %8019 = vmatpush3.bf16.msra.mxu0 %v8408_v14  ;;  %94 = vst [vmem:[#allocation9 + $0xc8] sm:$0xf] %v8601_v56  ;;  %95 = vst [vmem:[#allocation9 + $0xcc] sm:$0xf] %v8601_v56  ;;  %v8469_v14 = vld [vmem:[#allocation4 + $0x2f8] sm:$0xff]  }
  0xc5   :  { %8051 = vmatpush3.bf16.msra.mxu1 %v8409_v15  ;;  %8068 = vmatprep.subr.bf16.mxu0 %v8414_v19  ;;  %96 = vst [vmem:[#allocation9 + $0xd0] sm:$0xf] %v8601_v56  ;;  %97 = vst [vmem:[#allocation9 + $0xd4] sm:$0xf] %v8601_v56  ;;  %v8472_v15 = vld [vmem:[#allocation7 + $0x38] sm:$0xff]  }
  0xc6   :  { %8100 = vmatprep.subr.bf16.mxu1 %v8415_v20  ;;  %98 = vst [vmem:[#allocation9 + $0xd8] sm:$0xf] %v8601_v56  ;;  %99 = vst [vmem:[#allocation9 + $0xdc] sm:$0xf] %v8601_v56 }
  0xc7   :  { %8021 = vmatmul.mubr.bf16.vlgmr.msra.gmra.mrb[64].mxu0 %v8412_v18  ;;  %100 = vst [vmem:[#allocation9 + $0xe0] sm:$0xf] %v8601_v56  ;;  %101 = vst [vmem:[#allocation9 + $0xe4] sm:$0xf] %v8601_v56  ;;  %v8475_v18 = vld [vmem:[#allocation4 + $0x340] sm:$0xff]  }
  0xc8   :  { %8053 = vmatmul.mubr.bf16.vlgmr.msra.gmra.mrb[64].mxu1 %v8413_v21  ;;  %8069 = vmatpush3.bf16.msra.mxu0 %v8414_v19  ;;  %102 = vst [vmem:[#allocation9 + $0xe8] sm:$0xf] %v8601_v56  ;;  %103 = vst [vmem:[#allocation9 + $0xec] sm:$0xf] %v8601_v56  ;;  %v8476_v19 = vld [vmem:[#allocation4 + $0x308] sm:$0xff]   ;;  %v8479_v21 = vld [vmem:[#allocation7] sm:$0xff]  }
  0xc9   :  { %8101 = vmatpush3.bf16.msra.mxu1 %v8415_v20  ;;  %8070 = vmatprep.subr.bf16.mxu0 %v8416_v22  ;;  %104 = vst [vmem:[#allocation9 + $0xf0] sm:$0xf] %v8601_v56  ;;  %105 = vst [vmem:[#allocation9 + $0xf4] sm:$0xf] %v8601_v56  ;;  %v8478_v20 = vld [vmem:[#allocation7] sm:$0xff]  }
  0xca   :  { %8102 = vmatprep.subr.bf16.mxu1 %v8417_v23  ;;  %8024 = vmatprep.mubr.bf16.mxu0 %v8418_v24  ;;  %106 = vst [vmem:[#allocation9 + $0xf8] sm:$0xf] %v8601_v56  ;;  %107 = vst [vmem:[#allocation9 + $0xfc] sm:$0xf] %v8601_v56  ;;  %v8481_v24 = vld [vmem:[#allocation7 + $0x8] sm:$0xff]  }
  0xcb   :  { %8056 = vmatprep.mubr.bf16.mxu1 %v8419_v25  ;;  %108 = vst [vmem:[#allocation9 + $0x100] sm:$0xf] %v8601_v56  ;;  %109 = vst [vmem:[#allocation9 + $0x104] sm:$0xf] %v8601_v56  ;;  %v8482_v25 = vld [vmem:[#allocation4 + $0x310] sm:$0xff]  }
  0xcc   :  { %8071 = vmatpush3.bf16.msra.mxu0 %v8416_v22  ;;  %110 = vst [vmem:[#allocation9 + $0x108] sm:$0xf] %v8601_v56  ;;  %111 = vst [vmem:[#allocation9 + $0x10c] sm:$0xf] %v8601_v56  ;;  %v8477_v22 = vld [vmem:[#allocation4 + $0x348] sm:$0xff]  }
  0xcd   :  { %8103 = vmatpush3.bf16.msra.mxu1 %v8417_v23  ;;  %8072 = vmatprep.subr.bf16.mxu0 %v8422_v27  ;;  %112 = vst [vmem:[#allocation9 + $0x110] sm:$0xf] %v8601_v56  ;;  %113 = vst [vmem:[#allocation9 + $0x114] sm:$0xf] %v8601_v56  ;;  %v8480_v23 = vld [vmem:[#allocation7 + $0x8] sm:$0xff]  }
  0xce   :  { %8104 = vmatprep.subr.bf16.mxu1 %v8423_v28  ;;  %114 = vst [vmem:[#allocation9 + $0x118] sm:$0xf] %v8601_v56  ;;  %115 = vst [vmem:[#allocation9 + $0x11c] sm:$0xf] %v8601_v56 }
  0xcf   :  { %8025 = vmatmul.mubr.bf16.gmra.mrb[68].mxu0 %v8420_v26  ;;  %116 = vst [vmem:[#allocation9 + $0x120] sm:$0xf] %v8601_v56  ;;  %117 = vst [vmem:[#allocation9 + $0x124] sm:$0xf] %v8601_v56  ;;  %v8483_v26 = vld [vmem:[#allocation4 + $0x350] sm:$0xff]  }
  0xd0   :  { %8057 = vmatmul.mubr.bf16.gmra.mrb[68].mxu1 %v8421_v29  ;;  %8073 = vmatpush3.bf16.msra.mxu0 %v8422_v27  ;;  %118 = vst [vmem:[#allocation9 + $0x128] sm:$0xf] %v8601_v56  ;;  %119 = vst [vmem:[#allocation9 + $0x12c] sm:$0xf] %v8601_v56  ;;  %v8484_v27 = vld [vmem:[#allocation4 + $0x318] sm:$0xff]   ;;  %v8487_v29 = vld [vmem:[#allocation7 + $0x10] sm:$0xff]  }
  0xd1   :  { %8105 = vmatpush3.bf16.msra.mxu1 %v8423_v28  ;;  %8074 = vmatprep.subr.bf16.mxu0 %v8424_v30  ;;  %120 = vst [vmem:[#allocation9 + $0x130] sm:$0xf] %v8601_v56  ;;  %121 = vst [vmem:[#allocation9 + $0x134] sm:$0xf] %v8601_v56  ;;  %v8486_v28 = vld [vmem:[#allocation7 + $0x10] sm:$0xff]  }
  0xd2   :  { %8106 = vmatprep.subr.bf16.mxu1 %v8425_v31  ;;  %8028 = vmatprep.mubr.bf16.mxu0 %v8426_v32  ;;  %122 = vst [vmem:[#allocation9 + $0x138] sm:$0xf] %v8601_v56  ;;  %123 = vst [vmem:[#allocation9 + $0x13c] sm:$0xf] %v8601_v56  ;;  %v8489_v32 = vld [vmem:[#allocation7 + $0x18] sm:$0xff]  }
  0xd3   :  { %8060 = vmatprep.mubr.bf16.mxu1 %v8427_v33  ;;  %124 = vst [vmem:[#allocation9 + $0x140] sm:$0xf] %v8601_v56  ;;  %125 = vst [vmem:[#allocation9 + $0x144] sm:$0xf] %v8601_v56  ;;  %v8490_v33 = vld [vmem:[#allocation4 + $0x320] sm:$0xff]  }
  0xd4   :  { %8075 = vmatpush3.bf16.msra.mxu0 %v8424_v30  ;;  %126 = vst [vmem:[#allocation9 + $0x148] sm:$0xf] %v8601_v56  ;;  %127 = vst [vmem:[#allocation9 + $0x14c] sm:$0xf] %v8601_v56  ;;  %v8485_v30 = vld [vmem:[#allocation4 + $0x358] sm:$0xff]  }
  0xd5   :  { %8107 = vmatpush3.bf16.msra.mxu1 %v8425_v31  ;;  %8076 = vmatprep.subr.bf16.mxu0 %v8430_v35  ;;  %128 = vst [vmem:[#allocation9 + $0x150] sm:$0xf] %v8601_v56  ;;  %129 = vst [vmem:[#allocation9 + $0x154] sm:$0xf] %v8601_v56  ;;  %v8488_v31 = vld [vmem:[#allocation7 + $0x18] sm:$0xff]  }
  0xd6   :  { %8108 = vmatprep.subr.bf16.mxu1 %v8431_v36  ;;  %130 = vst [vmem:[#allocation9 + $0x158] sm:$0xf] %v8601_v56  ;;  %131 = vst [vmem:[#allocation9 + $0x15c] sm:$0xf] %v8601_v56 }
  0xd7   :  { %8029 = vmatmul.mubr.bf16.gmra.mrb[72].mxu0 %v8428_v34  ;;  %132 = vst [vmem:[#allocation9 + $0x160] sm:$0xf] %v8601_v56  ;;  %133 = vst [vmem:[#allocation9 + $0x164] sm:$0xf] %v8601_v56  ;;  %v8491_v34 = vld [vmem:[#allocation4 + $0x360] sm:$0xff]  }
  0xd8   :  { %8061 = vmatmul.mubr.bf16.gmra.mrb[72].mxu1 %v8429_v37  ;;  %8077 = vmatpush3.bf16.msra.mxu0 %v8430_v35  ;;  %134 = vst [vmem:[#allocation9 + $0x168] sm:$0xf] %v8601_v56  ;;  %135 = vst [vmem:[#allocation9 + $0x16c] sm:$0xf] %v8601_v56  ;;  %v8492_v35 = vld [vmem:[#allocation4 + $0x328] sm:$0xff]   ;;  %v8495_v37 = vld [vmem:[#allocation7 + $0x20] sm:$0xff]  }
  0xd9   :  { %8109 = vmatpush3.bf16.msra.mxu1 %v8431_v36  ;;  %8078 = vmatprep.subr.bf16.mxu0 %v8432_v38  ;;  %v8494_v36 = vld [vmem:[#allocation7 + $0x20] sm:$0xff]  }
  0xda   :  { %8110 = vmatprep.subr.bf16.mxu1 %v8433_v39  ;;  %8032 = vmatprep.mubr.bf16.mxu0 %v8434_v40  ;;  %v8497_v40 = vld [vmem:[#allocation7 + $0x28] sm:$0xff]  }
  0xdb   :  { %8064 = vmatprep.mubr.bf16.mxu1 %v8435_v41  ;;  %v8498_v41 = vld [vmem:[#allocation4 + $0x330] sm:$0xff]  }
  0xdc   :  { %8079 = vmatpush3.bf16.msra.mxu0 %v8432_v38  ;;  %v8493_v38 = vld [vmem:[#allocation4 + $0x368] sm:$0xff]  }
  0xdd   :  { %8111 = vmatpush3.bf16.msra.mxu1 %v8433_v39  ;;  %8080 = vmatprep.subr.bf16.mxu0 %v8438_v43  ;;  %v8496_v39 = vld [vmem:[#allocation7 + $0x28] sm:$0xff]  }
  0xde   :  { %8112 = vmatprep.subr.bf16.mxu1 %v8439_v44 }
  0xdf   :  { %8033 = vmatmul.mubr.bf16.gmra.mrb[76].mxu0 %v8436_v42  ;;  %v8499_v42 = vld [vmem:[#allocation4 + $0x370] sm:$0xff]  }
  0xe0   :  { %8065 = vmatmul.mubr.bf16.gmra.mrb[76].mxu1 %v8437_v45  ;;  %8081 = vmatpush3.bf16.msra.mxu0 %v8438_v43  ;;  %v8500_v43 = vld [vmem:[#allocation4 + $0x338] sm:$0xff]  }
  0xe1   :  { %8113 = vmatpush3.bf16.msra.mxu1 %v8439_v44  ;;  %8082 = vmatprep.subr.bf16.mxu0 %v8440_v46  ;;  %v8502_v44 = vld [vmem:[#allocation7 + $0x30] sm:$0xff]  }
  0xe2   :  { %8114 = vmatprep.subr.bf16.mxu1 %v8441_v47  ;;  %8084 = vmatprep.mubr.bf16.mxu0 %v8442_v48 }
  0xe3   :  { %8116 = vmatprep.mubr.bf16.mxu1 %v8443_v49 }
  0xe4   :  { %8083 = vmatpush3.bf16.msra.mxu0 %v8440_v46  ;;  %v8501_v46 = vld [vmem:[#allocation4 + $0x378] sm:$0xff]  }
  0xe5   :  { %8115 = vmatpush3.bf16.msra.mxu1 %v8441_v47  ;;  %8132 = vmatprep.subr.bf16.mxu0 %v8655_v51  ;;  %v8503_v47 = vld [vmem:[#allocation7 + $0x30] sm:$0xff]  }
  0xe6   :  { %8164 = vmatprep.subr.bf16.mxu1 %v8657_v52 }
  0xe7   :  { %8085 = vmatmul.mubr.bf16.vlgmr.msra.gmra.mrb[80].mxu0 %v8653_v50 }
  0xe8   :  { %8117 = vmatmul.mubr.bf16.vlgmr.msra.gmra.mrb[80].mxu1 %v8659_v53  ;;  %8133 = vmatpush3.bf16.msra.mxu0 %v8655_v51  ;;  %v8505_v53 = vld [vmem:[#allocation7 + $0x38] sm:$0xff]  }
  0xe9   :  { %8165 = vmatpush3.bf16.msra.mxu1 %v8657_v52  ;;  %8134 = vmatprep.subr.bf16.mxu0 %v8661_v54  ;;  %v8504_v52 = vld [vmem:[#allocation7 + $0x38] sm:$0xff]  }
  0xea   :  { %8166 = vmatprep.subr.bf16.mxu1 %v8664_v55  ;;  %8088 = vmatprep.mubr.bf16.mxu0 %v8450_v57  ;;  %v8506_v57 = vld [vmem:[#allocation4 + $0x380] sm:$0xff]  }
  0xeb   :  { %8120 = vmatprep.mubr.bf16.mxu1 %v8451_v58  ;;  %v8507_v58 = vld [vmem:[#allocation4 + $0x3c0] sm:$0xff]  }
  0xec   :  { %8135 = vmatpush3.bf16.msra.mxu0 %v8661_v54 }
  0xed   :  { %8167 = vmatpush3.bf16.msra.mxu1 %v8664_v55  ;;  %8136 = vmatprep.subr.bf16.mxu0 %v8454_v60 }
  0xee   :  { %8168 = vmatprep.subr.bf16.mxu1 %v8455_v61 }
  0xef   :  { %8089 = vmatmul.mubr.bf16.gmra.mrb[84].mxu0 %v8452_v59 }
  0xf0   :  { %8121 = vmatmul.mubr.bf16.gmra.mrb[84].mxu1 %v8453_v62  ;;  %8137 = vmatpush3.bf16.msra.mxu0 %v8454_v60  ;;  %v8508_v60 = vld [vmem:[#allocation4 + $0x388] sm:$0xff]  }
  0xf1   :  { %8169 = vmatpush3.bf16.msra.mxu1 %v8455_v61  ;;  %8138 = vmatprep.subr.bf16.mxu0 %v8456_v63 }
  0xf2   :  { %8170 = vmatprep.subr.bf16.mxu1 %v8457_v0  ;;  %8092 = vmatprep.mubr.bf16.mxu0 %v8458_v1 }
  0xf3   :  { %8124 = vmatprep.mubr.bf16.mxu1 %v8459_v2 }
  0xf4   :  { %8139 = vmatpush3.bf16.msra.mxu0 %v8456_v63  ;;  %v8509_v63 = vld [vmem:[#allocation4 + $0x3c8] sm:$0xff]  }
  0xf5   :  { %8171 = vmatpush3.bf16.msra.mxu1 %v8457_v0  ;;  %8140 = vmatprep.subr.bf16.mxu0 %v8462_v4  ;;  %v8510_v0 = vld [vmem:[#allocation4 + $0x390] sm:$0xff]  }
  0xf6   :  { %8172 = vmatprep.subr.bf16.mxu1 %v8463_v5 }
  0xf7   :  { %8093 = vmatmul.mubr.bf16.gmra.mrb[88].mxu0 %v8460_v3 }
  0xf8   :  { %8125 = vmatmul.mubr.bf16.gmra.mrb[88].mxu1 %v8461_v6  ;;  %8141 = vmatpush3.bf16.msra.mxu0 %v8462_v4  ;;  %v8511_v4 = vld [vmem:[#allocation4 + $0x3d0] sm:$0xff]  }
  0xf9   :  { %8173 = vmatpush3.bf16.msra.mxu1 %v8463_v5  ;;  %8142 = vmatprep.subr.bf16.mxu0 %v8464_v7 }
  0xfa   :  { %8174 = vmatprep.subr.bf16.mxu1 %v8465_v8  ;;  %8096 = vmatprep.mubr.bf16.mxu0 %v8466_v9 }
  0xfb   :  { %8128 = vmatprep.mubr.bf16.mxu1 %v8467_v10  ;;  %v8512_v10 = vld [vmem:[#allocation4 + $0x398] sm:$0xff]  }
  0xfc   :  { %8143 = vmatpush3.bf16.msra.mxu0 %v8464_v7 }
  0xfd   :  { %8175 = vmatpush3.bf16.msra.mxu1 %v8465_v8  ;;  %8144 = vmatprep.subr.bf16.mxu0 %v8470_v12 }
  0xfe   :  { %8176 = vmatprep.subr.bf16.mxu1 %v8471_v13 }
  0xff   :  { %8097 = vmatmul.mubr.bf16.gmra.mrb[92].mxu0 %v8468_v11  ;;  %v8513_v11 = vld [vmem:[#allocation4 + $0x3d8] sm:$0xff]  }
 0x100   :  { %8129 = vmatmul.mubr.bf16.gmra.mrb[92].mxu1 %v8469_v14  ;;  %8145 = vmatpush3.bf16.msra.mxu0 %v8470_v12  ;;  %v8514_v12 = vld [vmem:[#allocation4 + $0x3a0] sm:$0xff]  }
 0x101   :  { %8177 = vmatpush3.bf16.msra.mxu1 %v8471_v13  ;;  %8146 = vmatprep.subr.bf16.mxu0 %v8472_v15 }
 0x102   :  { %8178 = vmatprep.subr.bf16.mxu1 %v8473_v16  ;;  %8148 = vmatprep.mubr.bf16.mxu0 %v8474_v17 }
 0x103   :  { %8180 = vmatprep.mubr.bf16.mxu1 %v8475_v18 }
 0x104   :  { %8147 = vmatpush3.bf16.msra.mxu0 %v8472_v15  ;;  %v8515_v15 = vld [vmem:[#allocation4 + $0x3e0] sm:$0xff]  }
 0x105   :  { %8179 = vmatpush3.bf16.msra.mxu1 %v8473_v16  ;;  %8196 = vmatprep.subr.bf16.mxu0 %v8478_v20 }
 0x106   :  { %8228 = vmatprep.subr.bf16.mxu1 %v8479_v21 }
 0x107   :  { %8149 = vmatmul.mubr.bf16.vlgmr.msra.gmra.mrb[96].mxu0 %v8476_v19 }
 0x108   :  { %8181 = vmatmul.mubr.bf16.vlgmr.msra.gmra.mrb[96].mxu1 %v8477_v22  ;;  %8197 = vmatpush3.bf16.msra.mxu0 %v8478_v20 }
 0x109   :  { %8229 = vmatpush3.bf16.msra.mxu1 %v8479_v21  ;;  %8198 = vmatprep.subr.bf16.mxu0 %v8480_v23 }
 0x10a   :  { %8230 = vmatprep.subr.bf16.mxu1 %v8481_v24  ;;  %8152 = vmatprep.mubr.bf16.mxu0 %v8482_v25 }
 0x10b   :  { %8184 = vmatprep.mubr.bf16.mxu1 %v8483_v26 }
 0x10c   :  { %8199 = vmatpush3.bf16.msra.mxu0 %v8480_v23 }
 0x10d   :  { %8231 = vmatpush3.bf16.msra.mxu1 %v8481_v24  ;;  %8200 = vmatprep.subr.bf16.mxu0 %v8486_v28 }
 0x10e   :  { %8232 = vmatprep.subr.bf16.mxu1 %v8487_v29 }
 0x10f   :  { %8153 = vmatmul.mubr.bf16.gmra.mrb[100].mxu0 %v8484_v27 }
 0x110   :  { %8185 = vmatmul.mubr.bf16.gmra.mrb[100].mxu1 %v8485_v30  ;;  %8201 = vmatpush3.bf16.msra.mxu0 %v8486_v28 }
 0x111   :  { %8233 = vmatpush3.bf16.msra.mxu1 %v8487_v29  ;;  %8202 = vmatprep.subr.bf16.mxu0 %v8488_v31 }
 0x112   :  { %8234 = vmatprep.subr.bf16.mxu1 %v8489_v32  ;;  %8156 = vmatprep.mubr.bf16.mxu0 %v8490_v33 }
 0x113   :  { %8188 = vmatprep.mubr.bf16.mxu1 %v8491_v34 }
 0x114   :  { %8203 = vmatpush3.bf16.msra.mxu0 %v8488_v31 }
 0x115   :  { %8235 = vmatpush3.bf16.msra.mxu1 %v8489_v32  ;;  %8204 = vmatprep.subr.bf16.mxu0 %v8494_v36  ;;  %v8516_v32 = vld [vmem:[#allocation4 + $0x3a8] sm:$0xff]  }
 0x116   :  { %8236 = vmatprep.subr.bf16.mxu1 %v8495_v37 }
 0x117   :  { %8157 = vmatmul.mubr.bf16.gmra.mrb[104].mxu0 %v8492_v35 }
 0x118   :  { %8189 = vmatmul.mubr.bf16.gmra.mrb[104].mxu1 %v8493_v38  ;;  %8205 = vmatpush3.bf16.msra.mxu0 %v8494_v36  ;;  %v8517_v36 = vld [vmem:[#allocation4 + $0x3e8] sm:$0xff]  }
 0x119   :  { %8237 = vmatpush3.bf16.msra.mxu1 %v8495_v37  ;;  %8206 = vmatprep.subr.bf16.mxu0 %v8496_v39  ;;  %v8518_v37 = vld [vmem:[#allocation4 + $0x3b0] sm:$0xff]  }
 0x11a   :  { %v7766_v45 = vpop.f32.mrb[0].mxu0  ;;  %8238 = vmatprep.subr.bf16.mxu1 %v8497_v40  ;;  %8160 = vmatprep.mubr.bf16.mxu0 %v8498_v41 }
 0x11b   :  { %364 = vst [vmem:[#allocation2 + $0x10] sm:$0xff] %v7766_v45  ;;  %v299_v48 = vpop.f32.mrb[1].mxu0  ;;  %8192 = vmatprep.mubr.bf16.mxu1 %v8499_v42  ;;  %v8767_v49 = vpop.f32.mrb[0].mxu1 }
 0x11c   :  { %362 = vst [vmem:[#allocation2] sm:$0xff] %v299_v48  ;;  %v7767_v50 = vpop.f32.mrb[2].mxu0  ;;  %8207 = vmatpush3.bf16.msra.mxu0 %v8496_v39  ;;  %605 = vst [vmem:[#allocation2 + $0x90] sm:$0xff] %v8767_v49  ;;  %v8770_v51 = vpop.f32.mrb[1].mxu1 }
 0x11d   :  { %365 = vst [vmem:[#allocation2 + $0x18] sm:$0xff] %v7767_v50  ;;  %8239 = vmatpush3.bf16.msra.mxu1 %v8497_v40  ;;  %v302_v54 = vpop.f32.mrb[3].mxu0  ;;  %8208 = vmatprep.subr.bf16.mxu0 %v8502_v44  ;;  %603 = vst [vmem:[#allocation2 + $0x80] sm:$0xff] %v8770_v51  ;;  %v7799_v55 = vpop.f32.mrb[2].mxu1 }
 0x11e   :  { %363 = vst [vmem:[#allocation2 + $0x8] sm:$0xff] %v302_v54  ;;  %8240 = vmatprep.subr.bf16.mxu1 %v8503_v47  ;;  %606 = vst [vmem:[#allocation2 + $0x98] sm:$0xff] %v7799_v55  ;;  %v8773_v56 = vpop.f32.mrb[3].mxu1 }
 0x11f   :  { %8161 = vmatmul.mubr.bf16.gmra.mrb[108].mxu0 %v8500_v43  ;;  %604 = vst [vmem:[#allocation2 + $0x88] sm:$0xff] %v8773_v56  ;;  %v8520_v43 = vld [vmem:[#allocation4 + $0x3f0] sm:$0xff]  }
 0x120   :  { %8193 = vmatmul.mubr.bf16.gmra.mrb[108].mxu1 %v8501_v46  ;;  %8209 = vmatpush3.bf16.msra.mxu0 %v8502_v44 }
 0x121   :  { %8241 = vmatpush3.bf16.msra.mxu1 %v8503_v47  ;;  %8210 = vmatprep.subr.bf16.mxu0 %v8504_v52 }
 0x122   :  { %v7770_v59 = vpop.f32.mrb[4].mxu0  ;;  %8242 = vmatprep.subr.bf16.mxu1 %v8505_v53  ;;  %8212 = vmatprep.mubr.bf16.mxu0 %v8506_v57  ;;  %v2067_v30 = vld [vmem:[#allocation2 + $0x10] sm:$0xff] }
 0x123   :  { %368 = vst [vmem:[#allocation2 + $0x30] sm:$0xff] %v7770_v59  ;;  %v315_v61 = vpop.f32.mrb[5].mxu0  ;;  %v7802_v62 = vpop.f32.mrb[4].mxu1  ;;  %8244 = vmatprep.mubr.bf16.mxu1 %v8507_v58 }
 0x124   :  { %366 = vst [vmem:[#allocation2 + $0x20] sm:$0xff] %v315_v61  ;;  %v7771_v1 = vpop.f32.mrb[6].mxu0  ;;  %8211 = vmatpush3.bf16.msra.mxu0 %v8504_v52  ;;  %609 = vst [vmem:[#allocation2 + $0xb0] sm:$0xff] %v7802_v62  ;;  %v556_v2 = vpop.f32.mrb[5].mxu1  ;;  %v2068_v16 = vld [vmem:[#allocation2 + $0x18] sm:$0x1f] }
 0x125   :  { %369 = vst [vmem:[#allocation2 + $0x38] sm:$0xff] %v7771_v1  ;;  %8243 = vmatpush3.bf16.msra.mxu1 %v8505_v53  ;;  %v318_v3 = vpop.f32.mrb[7].mxu0  ;;  %607 = vst [vmem:[#allocation2 + $0xa0] sm:$0xff] %v556_v2  ;;  %v7803_v5 = vpop.f32.mrb[6].mxu1  ;;  %v2071_v23 = vld [vmem:[#allocation2 + $0x11] sm:$0xff] }
 0x126   :  { %367 = vst [vmem:[#allocation2 + $0x28] sm:$0xff] %v318_v3  ;;  %610 = vst [vmem:[#allocation2 + $0xb8] sm:$0xff] %v7803_v5  ;;  %v559_v6 = vpop.f32.mrb[7].mxu1  ;;  %v2072_v24 = vld [vmem:[#allocation2 + $0x19] sm:$0x1f]  ;;  %v2215_v31 = vld [vmem:[#allocation2 + $0x91] sm:$0xff]  ;;  %v2075_v33 = vmax.f32 %v2067_v30, %v2071_v23 }
 0x127   :  { %8213 = vmatmul.mubr.bf16.vlgmr.msra.gmra.mrb[112].mxu0 %v8508_v60  ;;  %608 = vst [vmem:[#allocation2 + $0xa8] sm:$0xff] %v559_v6  ;;  %v2076_v34 = vmax.f32 %v2068_v16, %v2072_v24  ;;  %v2079_v44 = vld [vmem:[#allocation2 + $0x12] sm:$0xff]  ;;  %v2080_v45 = vld [vmem:[#allocation2 + $0x1a] sm:$0x1f]  ;;  %v2219_v50 = vmax.f32 %v8767_v49, %v2215_v31  ;;  %v8802_v3 = vld [vmem:[#allocation2 + $0x8] sm:$0xff] }
 0x128   :  { %8245 = vmatmul.mubr.bf16.vlgmr.msra.gmra.mrb[112].mxu1 %v8509_v63  ;;  %8216 = vmatprep.mubr.bf16.mxu0 %v8510_v0  ;;  %v8795_v57 = vld [vmem:[#allocation2 + $0x98] sm:$0x1f]  ;;  %v2083_v63 = vmax.f32 %v2075_v33, %v2079_v44 }
 0x129   :  { %8248 = vmatprep.mubr.bf16.mxu1 %v8511_v4  ;;  %v8797_v58 = vld [vmem:[#allocation2 + $0x99] sm:$0x1f]  ;;  %v2084_v0 = vmax.f32 %v2076_v34, %v2080_v45 }
 0x12a   :  { %v8776_v7 = vpop.f32.mrb[8].mxu0  ;;  %v2087_v25 = vld [vmem:[#allocation2 + $0x30] sm:$0xff]  ;;  %v2224_v16 = vld [vmem:[#allocation2 + $0x9a] sm:$0x1f] }
 0x12b   :  { %372 = vst [vmem:[#allocation2 + $0x50] sm:$0xff] %v8776_v7  ;;  %v8779_v8 = vpop.f32.mrb[8].mxu1  ;;  %v8781_v9 = vpop.f32.mrb[9].mxu0  ;;  %v2304_v28 = vld [vmem:[#allocation2 + $0xb0] sm:$0xff]  ;;  %v8519_v31 = vld [vmem:[#allocation4 + $0x3b8] sm:$0xff]  }
 0x12c   :  { %613 = vst [vmem:[#allocation2 + $0xd0] sm:$0xff] %v8779_v8  ;;  %370 = vst [vmem:[#allocation2 + $0x40] sm:$0xff] %v8781_v9  ;;  %v8785_v13 = vpop.f32.mrb[9].mxu1  ;;  %v7775_v14 = vpop.f32.mrb[10].mxu0  ;;  %v2091_v17 = vld [vmem:[#allocation2 + $0x31] sm:$0xff] }
 0x12d   :  { %611 = vst [vmem:[#allocation2 + $0xc0] sm:$0xff] %v8785_v13  ;;  %373 = vst [vmem:[#allocation2 + $0x58] sm:$0xff] %v7775_v14  ;;  %v7807_v18 = vpop.f32.mrb[10].mxu1  ;;  %v8788_v19 = vpop.f32.mrb[11].mxu0  ;;  %v2088_v20 = vld [vmem:[#allocation2 + $0x38] sm:$0x1f]  ;;  %v2095_v26 = vmax.f32 %v2087_v25, %v2091_v17 }
 0x12e   :  { %v2092_v21 = vld [vmem:[#allocation2 + $0x39] sm:$0x1f]  ;;  %614 = vst [vmem:[#allocation2 + $0xd8] sm:$0xff] %v7807_v18  ;;  %371 = vst [vmem:[#allocation2 + $0x48] sm:$0xff] %v8788_v19  ;;  %v8791_v22 = vpop.f32.mrb[11].mxu1  ;;  %v2308_v29 = vld [vmem:[#allocation2 + $0xb1] sm:$0xff] }
 0x12f   :  { %612 = vst [vmem:[#allocation2 + $0xc8] sm:$0xff] %v8791_v22  ;;  %8217 = vmatmul.mubr.bf16.gmra.mrb[116].mxu0 %v8512_v10  ;;  %v2096_v27 = vmax.f32 %v2088_v20, %v2092_v21  ;;  %v2099_v38 = vld [vmem:[#allocation2 + $0x32] sm:$0xff]  ;;  %v2100_v39 = vld [vmem:[#allocation2 + $0x3a] sm:$0x1f]  ;;  %v2312_v40 = vmax.f32 %v2304_v28, %v2308_v29  ;;  %v8806_v14 = vld [vmem:[#allocation2 + $0x1] sm:$0xff] }
 0x130   :  { %8249 = vmatmul.mubr.bf16.gmra.mrb[116].mxu1 %v8513_v11  ;;  %8220 = vmatprep.mubr.bf16.mxu0 %v8514_v12  ;;  %v2103_v46 = vmax.f32 %v2095_v26, %v2099_v38  ;;  %v2316_v48 = vld [vmem:[#allocation2 + $0xb2] sm:$0xff]  ;;  %v8817_v23 = vld [vmem:[#allocation2 + $0x28] sm:$0xff]  ;;  %v2220_v26 = vmax.f32 %v8795_v57, %v8797_v58 }
 0x131   :  { %8252 = vmatprep.mubr.bf16.mxu1 %v8515_v15  ;;  %v2104_v47 = vmax.f32 %v2096_v27, %v2100_v39  ;;  %v2223_v59 = vld [vmem:[#allocation2 + $0x92] sm:$0xff]  ;;  %v8800_v2 = vmax.f32 %v2312_v40, %v2316_v48  ;;  %v8808_v15 = vld [vmem:[#allocation2 + $0x9] sm:$0xff]  ;;  %v8819_v24 = vld [vmem:[#allocation2 + $0x21] sm:$0xff] }
 0x132   :  { %v7778_v35 = vpop.f32.mrb[12].mxu0  ;;  %v8810_v17 = vmax.f32 %v2219_v50, %v2223_v59  ;;  %v8812_v18 = vld [vmem:[#allocation2 + $0x98] sm:$0x1f]  ;;  %v8821_v25 = vld [vmem:[#allocation2 + $0x29] sm:$0xff]  ;;  %v2074_v40 = vmax.f32 %v8802_v3, %v8808_v15 }
 0x133   :  { %376 = vst [vmem:[#allocation2 + $0x70] sm:$0xff] %v7778_v35  ;;  %v347_v41 = vpop.f32.mrb[13].mxu0  ;;  %v7810_v42 = vpop.f32.mrb[12].mxu1  ;;  %v2108_v12 = vmax.f32 %v2084_v0, %v2104_v47  ;;  %v8814_v20 = vld [vmem:[#allocation2 + $0x99] sm:$0x1f]  ;;  %v8825_v27 = vld [vmem:[#allocation2 + $0x89] sm:$0xff]  ;;  %v2094_v50 = vmax.f32 %v8817_v23, %v8821_v25 }
 0x134   :  { %v2112_v52 = vld [vmem:[#allocation2 + $0x58] sm:$0x1f]  ;;  %374 = vst [vmem:[#allocation2 + $0x60] sm:$0xff] %v347_v41  ;;  %v7779_v55 = vpop.f32.mrb[14].mxu0  ;;  %617 = vst [vmem:[#allocation2 + $0xf0] sm:$0xff] %v7810_v42  ;;  %v588_v11 = vpop.f32.mrb[13].mxu1  ;;  %v2324_v39 = vmax.f32 %v8810_v17, %v8800_v2 }
 0x135   :  { %v2115_v53 = vld [vmem:[#allocation2 + $0x51] sm:$0xff]  ;;  %v2116_v54 = vld [vmem:[#allocation2 + $0x59] sm:$0x1f]  ;;  %377 = vst [vmem:[#allocation2 + $0x78] sm:$0xff] %v7779_v55  ;;  %v350_v62 = vpop.f32.mrb[15].mxu0  ;;  %615 = vst [vmem:[#allocation2 + $0xe0] sm:$0xff] %v588_v11  ;;  %v2218_v11 = vmax.f32 %v8773_v56, %v8825_v27 }
 0x136   :  { %v2119_v60 = vmax.f32 %v8776_v7, %v2115_v53  ;;  %v2120_v61 = vmax.f32 %v2112_v52, %v2116_v54  ;;  %v2123_v1 = vld [vmem:[#allocation2 + $0x52] sm:$0xff]  ;;  %v2124_v49 = vld [vmem:[#allocation2 + $0x5a] sm:$0x1f]  ;;  %375 = vst [vmem:[#allocation2 + $0x68] sm:$0xff] %v350_v62  ;;  %v2107_v7 = vmax.f32 %v2083_v63, %v2103_v46  ;;  %v8831_v30 = vld [vmem:[#allocation2 + $0x49] sm:$0xff]  ;;  %v2293_v62 = vmax.f32 %v8812_v18, %v8814_v20 }
 0x137   :  { %v2332_v6 = vld [vmem:[#allocation2 + $0xd1] sm:$0xff]  ;;  %8221 = vmatmul.mubr.bf16.gmra.mrb[120].mxu0 %v8516_v32  ;;  %v8829_v29 = vld [vmem:[#allocation2 + $0x59] sm:$0x1f]  ;;  %v2085_v41 = vld [vmem:[#allocation2 + $0x20] sm:$0xff]  ;;  %v2118_v42 = vmax.f32 %v8788_v19, %v8831_v30 }
 0x138   :  { %v8804_v4 = vmax.f32 %v2119_v60, %v2123_v1  ;;  %v2128_v5 = vmax.f32 %v2120_v61, %v2124_v49  ;;  %v2340_v10 = vld [vmem:[#allocation2 + $0xd2] sm:$0xff]  ;;  %v2336_v21 = vmax.f32 %v8779_v8, %v2332_v6  ;;  %8253 = vmatmul.mubr.bf16.gmra.mrb[120].mxu1 %v8517_v36  ;;  %8224 = vmatprep.mubr.bf16.mxu0 %v8518_v37  ;;  %v7811_v8 = vpop.f32.mrb[14].mxu1  ;;  %v2065_v46 = vld [vmem:[#allocation2] sm:$0xff]  ;;  %v2078_v47 = vld [vmem:[#allocation2 + $0xa] sm:$0xff] }
 0x139   :  { %v8827_v28 = vld [vmem:[#allocation2 + $0x58] sm:$0x1f]  ;;  %8256 = vmatprep.mubr.bf16.mxu1 %v8520_v43  ;;  %618 = vst [vmem:[#allocation2 + $0xf8] sm:$0xff] %v7811_v8  ;;  %v591_v35 = vpop.f32.mrb[15].mxu1  ;;  %v2093_v48 = vmax.f32 %v2085_v41, %v8819_v24  ;;  %v2122_v52 = vld [vmem:[#allocation2 + $0x4a] sm:$0xff]  ;;  %v2073_v60 = vmax.f32 %v2065_v46, %v8806_v14  ;;  %v8866_v61 = vmax.f32 %v2220_v26, %v2224_v16  ;;  %v8870_v0 = vld [vmem:[#allocation2 + $0x41] sm:$0xff] }
 0x13a   :  { %v2131_v32 = vmax.f32 %v2107_v7, %v8804_v4  ;;  %v2132_v33 = vmax.f32 %v2108_v12, %v2128_v5  ;;  %v8834_v34 = vmax.f32 %v2336_v21, %v2340_v10  ;;  %v8836_v36 = vpop.f32.mrb[16].mxu0  ;;  %v8521_v37 = vld [vmem:[#allocation4 + $0x3f8] sm:$0xff]   ;;  %616 = vst [vmem:[#allocation2 + $0xe8] sm:$0xff] %v591_v35  ;;  %v2176_v19 = vmax.f32 %v8827_v28, %v8829_v29  ;;  %v2187_v55 = vld [vmem:[#allocation2 + $0x70] sm:$0xff]  ;;  %v2077_v6 = vld [vmem:[#allocation2 + $0x2] sm:$0xff] }
 0x13b   :  { %v8838_v38 = vld [vmem:[#allocation2 + $0xb8] sm:$0x1f]  ;;  %846 = vst [vmem:[#allocation2 + $0x110] sm:$0xff] %v8836_v36  ;;  %v8847_v43 = vpop.f32.mrb[17].mxu0  ;;  %v8849_v44 = vpop.f32.mrb[16].mxu1  ;;  %v8875_v10 = vld [vmem:[#allocation2 + $0x81] sm:$0xff]  ;;  %v2082_v16 = vmax.f32 %v2074_v40, %v2078_v47  ;;  %v8886_v25 = vmax.f32 %v2118_v42, %v2122_v52 }
 0x13c   :  { %2135 = vst [vmem:[#allocation3 + $0x10] sm:$0xff] %v2131_v32  ;;  %2136 = vst [vmem:[#allocation3 + $0x18] sm:$0x1f] %v2132_v33  ;;  %v8851_v45 = vld [vmem:[#allocation2 + $0xb9] sm:$0x1f]  ;;  %v7831_v53 = vpop.f32.mrb[18].mxu0  ;;  %v8863_v59 = vmax.f32 %v2324_v39, %v8834_v34  ;;  %v2081_v39 = vmax.f32 %v2073_v60, %v2077_v6 }
 0x13d   :  { %844 = vst [vmem:[#allocation2 + $0x100] sm:$0xff] %v8847_v43  ;;  %1087 = vst [vmem:[#allocation2 + $0x190] sm:$0xff] %v8849_v44  ;;  %v8860_v54 = vpop.f32.mrb[17].mxu1  ;;  %v2188_v57 = vld [vmem:[#allocation2 + $0x78] sm:$0x1f]  ;;  %v8872_v1 = vpop.f32.mrb[19].mxu0  ;;  %v2313_v14 = vmax.f32 %v8838_v38, %v8851_v45 }
 0x13e   :  { %v2191_v58 = vld [vmem:[#allocation2 + $0x71] sm:$0xff]  ;;  %v2180_v63 = vld [vmem:[#allocation2 + $0x5a] sm:$0x1f]  ;;  %847 = vst [vmem:[#allocation2 + $0x118] sm:$0xff] %v7831_v53  ;;  %1085 = vst [vmem:[#allocation2 + $0x180] sm:$0xff] %v8860_v54  ;;  %v7863_v49 = vpop.f32.mrb[18].mxu1 }
 0x13f   :  { %v2192_v2 = vld [vmem:[#allocation2 + $0x79] sm:$0x1f]  ;;  %v2195_v3 = vmax.f32 %v2187_v55, %v2191_v58  ;;  %845 = vst [vmem:[#allocation2 + $0x108] sm:$0xff] %v8872_v1  ;;  %1088 = vst [vmem:[#allocation2 + $0x198] sm:$0xff] %v7863_v49  ;;  %v8880_v7 = vpop.f32.mrb[19].mxu1  ;;  %v2406_v15 = vld [vmem:[#allocation2 + $0xf0] sm:$0xff]  ;;  %8225 = vmatmul.mubr.bf16.gmra.mrb[124].mxu0 %v8519_v31  ;;  %v2184_v33 = vmax.f32 %v2176_v19, %v2180_v63 }
 0x140   :  { %v2199_v5 = vld [vmem:[#allocation2 + $0x72] sm:$0xff]  ;;  %v2196_v12 = vmax.f32 %v2188_v57, %v2192_v2  ;;  %v2097_v21 = vld [vmem:[#allocation2 + $0x22] sm:$0xff]  ;;  %v2098_v23 = vld [vmem:[#allocation2 + $0x2a] sm:$0xff]  ;;  %1086 = vst [vmem:[#allocation2 + $0x188] sm:$0xff] %v8880_v7  ;;  %8257 = vmatmul.mubr.bf16.gmra.mrb[124].mxu1 %v8521_v37 }
 0x141   :  { %v8884_v24 = vld [vmem:[#allocation2 + $0xd8] sm:$0x1f]  ;;  %v2203_v28 = vmax.f32 %v2195_v3, %v2199_v5  ;;  %v2101_v29 = vmax.f32 %v2093_v48, %v2097_v21  ;;  %v2102_v30 = vmax.f32 %v2094_v50, %v2098_v23  ;;  %v2109_v8 = vld [vmem:[#allocation2 + $0x40] sm:$0xff]  ;;  %v2186_v46 = vld [vmem:[#allocation2 + $0x68] sm:$0xff]  ;;  %v2173_v48 = vmax.f32 %v8781_v9, %v8870_v0 }
 0x142   :  { %v2200_v26 = vld [vmem:[#allocation2 + $0x7a] sm:$0x1f]  ;;  %v2113_v32 = vld [vmem:[#allocation2 + $0x41] sm:$0xff]  ;;  %v2410_v52 = vld [vmem:[#allocation2 + $0xf1] sm:$0xff]  ;;  %v7834_v19 = vpop.f32.mrb[20].mxu0  ;;  %v2217_v23 = vmax.f32 %v8770_v51, %v8875_v10 }
 0x143   :  { %v2204_v35 = vmax.f32 %v2196_v12, %v2200_v26  ;;  %v2117_v40 = vmax.f32 %v2109_v8, %v2113_v32  ;;  %v2185_v41 = vld [vmem:[#allocation2 + $0x60] sm:$0xff]  ;;  %v2297_v53 = vld [vmem:[#allocation2 + $0x9a] sm:$0x1f]  ;;  %v2207_v31 = vmax.f32 %v8804_v4, %v2203_v28  ;;  %v2106_v55 = vmax.f32 %v2082_v16, %v2102_v30  ;;  %v2418_v49 = vld [vmem:[#allocation2 + $0xf2] sm:$0xff]  ;;  %850 = vst [vmem:[#allocation2 + $0x130] sm:$0xff] %v7834_v19  ;;  %v797_v12 = vpop.f32.mrb[21].mxu0 }
 0x144   :  { %v2189_v47 = vld [vmem:[#allocation2 + $0x61] sm:$0xff]  ;;  %v2333_v42 = vld [vmem:[#allocation2 + $0xd9] sm:$0x1f]  ;;  %v2414_v60 = vmax.f32 %v2406_v15, %v2410_v52  ;;  %v2105_v2 = vmax.f32 %v2081_v39, %v2101_v29  ;;  %v2190_v5 = vld [vmem:[#allocation2 + $0x69] sm:$0xff]  ;;  %v7866_v4 = vpop.f32.mrb[20].mxu1  ;;  %848 = vst [vmem:[#allocation2 + $0x120] sm:$0xff] %v797_v12 }
 0x145   :  { %v2121_v57 = vld [vmem:[#allocation2 + $0x42] sm:$0xff]  ;;  %v2193_v50 = vmax.f32 %v2185_v41, %v2189_v47  ;;  %v2208_v37 = vmax.f32 %v2184_v33, %v2204_v35  ;;  %v2317_v63 = vld [vmem:[#allocation2 + $0xba] sm:$0x1f]  ;;  %v2222_v6 = vld [vmem:[#allocation2 + $0x8a] sm:$0xff]  ;;  %v2231_v16 = vmax.f32 %v2207_v31, %v8810_v17  ;;  %v2130_v9 = vmax.f32 %v2106_v55, %v8886_v25  ;;  %v7835_v28 = vpop.f32.mrb[22].mxu0  ;;  %1091 = vst [vmem:[#allocation2 + $0x1b0] sm:$0xff] %v7866_v4 }
 0x146   :  { %v2221_v58 = vld [vmem:[#allocation2 + $0x82] sm:$0xff]  ;;  %v2125_v3 = vmax.f32 %v2117_v40, %v2121_v57  ;;  %v8892_v21 = vld [vmem:[#allocation3 + $0x10] ss:$2 sm:$0x7f]  ;;  %v2194_v0 = vmax.f32 %v2186_v46, %v2190_v5  ;;  %v2337_v15 = vmax.f32 %v8884_v24, %v2333_v42  ;;  %v2422_v30 = vmax.f32 %v2414_v60, %v2418_v49  ;;  %851 = vst [vmem:[#allocation2 + $0x138] sm:$0xff] %v7835_v28  ;;  %v800_v40 = vpop.f32.mrb[23].mxu0 }
 0x147   :  { %v2434_v26 = vld [vmem:[#allocation2 + $0x111] sm:$0xff]  ;;  %v2232_v29 = vmax.f32 %v2208_v37, %v8866_v61  ;;  %v2197_v32 = vld [vmem:[#allocation2 + $0x62] sm:$0xff]  ;;  %v2341_v35 = vld [vmem:[#allocation2 + $0xda] sm:$0x1f]  ;;  %2235 = vst [vmem:[#allocation3 + $0x10] sm:$0xff] %v2231_v16  ;;  %v2301_v24 = vmax.f32 %v2293_v62, %v2297_v53  ;;  %v1038_v61 = vpop.f32.mrb[21].mxu1  ;;  %v2321_v46 = vmax.f32 %v2313_v14, %v2317_v63  ;;  %v8910_v47 = vmax.f32 %v2218_v11, %v2222_v6 }
 0x148   :  { %v2129_v8 = vmax.f32 %v2105_v2, %v2125_v3  ;;  %v2198_v33 = vld [vmem:[#allocation2 + $0x6a] sm:$0xff]  ;;  %v2177_v17 = vld [vmem:[#allocation2 + $0x42] sm:$0xff]  ;;  %v2438_v39 = vmax.f32 %v8836_v36, %v2434_v26  ;;  %2134 = vst [vmem:[#allocation3 + $0x8] sm:$0xff] %v2130_v9  ;;  %v2201_v51 = vmax.f32 %v2193_v50, %v2197_v32  ;;  %v2442_v41 = vld [vmem:[#allocation2 + $0x112] sm:$0xff]  ;;  %v7867_v18 = vpop.f32.mrb[22].mxu1  ;;  %v8914_v20 = vmax.f32 %v2217_v23, %v2221_v58 }
 0x149   :  { %v2202_v10 = vmax.f32 %v2194_v0, %v2198_v33  ;;  %849 = vst [vmem:[#allocation2 + $0x128] sm:$0xff] %v800_v40  ;;  %2236 = vst [vmem:[#allocation3 + $0x18] sm:$0x1f] %v2232_v29  ;;  %v2181_v36 = vmax.f32 %v2173_v48, %v2177_v17  ;;  %v2345_v62 = vmax.f32 %v2337_v15, %v2341_v35  ;;  %v1041_v53 = vpop.f32.mrb[23].mxu1  ;;  %v2387_v55 = vld [vmem:[#allocation2 + $0xd8] sm:$0x1f] }
 0x14a   :  { %2133 = vst [vmem:[#allocation3] sm:$0xff] %v2129_v8  ;;  %v8912_v42 = vmax.f32 %v2438_v39, %v2442_v41  ;;  %1089 = vst [vmem:[#allocation2 + $0x1a0] sm:$0xff] %v1038_v61  ;;  %v2426_v31 = vmax.f32 %v8834_v34, %v2422_v30  ;;  %v8918_v14 = vpop.f32.mrb[24].mxu0  ;;  %v2325_v56 = vmax.f32 %v2301_v24, %v2321_v46  ;;  %v2391_v57 = vld [vmem:[#allocation2 + $0xd9] sm:$0x1f]  ;;  %v8936_v63 = vld [vmem:[#allocation2 + $0xc9] sm:$0xff] }
 0x14b   :  { %1092 = vst [vmem:[#allocation2 + $0x1b8] sm:$0xff] %v7867_v18  ;;  %v2205_v38 = vmax.f32 %v2181_v36, %v2201_v51  ;;  %v2206_v45 = vmax.f32 %v8886_v25, %v2202_v10  ;;  %1090 = vst [vmem:[#allocation2 + $0x1a8] sm:$0xff] %v1041_v53  ;;  %v8926_v48 = vpop.f32.mrb[24].mxu1  ;;  %v8928_v34 = vpop.f32.mrb[25].mxu0  ;;  %v8934_v19 = vld [vmem:[#allocation2 + $0xf8] sm:$0x1f]  ;;  %v2395_v15 = vmax.f32 %v2387_v55, %v2391_v57 }
 0x14c   :  { %v8921_v27 = vmax.f32 %v2426_v31, %v8912_v42  ;;  %854 = vst [vmem:[#allocation2 + $0x150] sm:$0xff] %v8918_v14  ;;  %1095 = vst [vmem:[#allocation2 + $0x1d0] sm:$0xff] %v8926_v48  ;;  %v8932_v25 = vpop.f32.mrb[25].mxu1  ;;  %v7839_v50 = vpop.f32.mrb[26].mxu0  ;;  %v2349_v58 = vmax.f32 %v2325_v56, %v2345_v62  ;;  %v2431_v3 = vld [vmem:[#allocation2 + $0x118] sm:$0x1f]  ;;  %v2335_v35 = vmax.f32 %v8791_v22, %v8936_v63 }
 0x14d   :  { %v2229_v11 = vmax.f32 %v2205_v38, %v8914_v20  ;;  %v2230_v52 = vmax.f32 %v2206_v45, %v8910_v47  ;;  %852 = vst [vmem:[#allocation2 + $0x140] sm:$0xff] %v8928_v34  ;;  %v2521_v37 = vld [vmem:[#allocation2 + $0x131] sm:$0xff]  ;;  %1093 = vst [vmem:[#allocation2 + $0x1c0] sm:$0xff] %v8932_v25  ;;  %v7871_v60 = vpop.f32.mrb[26].mxu1  ;;  %v8939_v49 = vpop.f32.mrb[27].mxu0  ;;  %v2303_v32 = vld [vmem:[#allocation2 + $0xa8] sm:$0xff] }
 0x14e   :  { %855 = vst [vmem:[#allocation2 + $0x158] sm:$0xff] %v7839_v50  ;;  %1096 = vst [vmem:[#allocation2 + $0x1d8] sm:$0xff] %v7871_v60  ;;  %v8944_v5 = vpop.f32.mrb[27].mxu1  ;;  %v2411_v6 = vld [vmem:[#allocation2 + $0xf9] sm:$0x1f]  ;;  %v2517_v12 = vld [vmem:[#allocation2 + $0x130] sm:$0xff] }
 0x14f   :  { %853 = vst [vmem:[#allocation2 + $0x148] sm:$0xff] %v8939_v49  ;;  %v2399_v4 = vld [vmem:[#allocation2 + $0xda] sm:$0x1f]  ;;  %1094 = vst [vmem:[#allocation2 + $0x1c8] sm:$0xff] %v8944_v5  ;;  %v2525_v9 = vmax.f32 %v2517_v12, %v2521_v37  ;;  %v2734_v0 = vld [vmem:[#allocation2 + $0x1b0] sm:$0xff]  ;;  %v2415_v8 = vmax.f32 %v8934_v19, %v2411_v6 }
 0x150   :  { %v8941_v2 = vld [vmem:[#allocation3 + $0x10] ss:$2 sm:$0x7f]  ;;  %v2306_v33 = vld [vmem:[#allocation2 + $0xa1] sm:$0xff]  ;;  %v8958_v38 = vmax.f32 %v2395_v15, %v2399_v4 }
 0x151   :  { %2352 = vst [vmem:[#allocation3 + $0x10] sm:$0xff] %v8863_v59  ;;  %2353 = vst [vmem:[#allocation3 + $0x18] sm:$0x1f] %v2349_v58  ;;  %v2435_v16 = vld [vmem:[#allocation2 + $0x119] sm:$0x1f]  ;;  %v2646_v26 = vld [vmem:[#allocation2 + $0x191] sm:$0xff] }
 0x152   :  { %v2738_v23 = vld [vmem:[#allocation2 + $0x1b1] sm:$0xff]  ;;  %v2419_v28 = vld [vmem:[#allocation2 + $0xfa] sm:$0x1f]  ;;  %v8948_v29 = vld [vmem:[#allocation3] ss:$2 sm:$0xff]  ;;  %v2439_v17 = vmax.f32 %v2431_v3, %v2435_v16  ;;  %v8953_v39 = vpop.f32.mrb[28].mxu0  ;;  %v2650_v45 = vmax.f32 %v8849_v44, %v2646_v26 }
 0x153   :  { %11219 = vst [vmem:[#allocation13_spill] sm:$0xff] %v8948_v29  ;;  %v2339_v30 = vld [vmem:[#allocation2 + $0xca] sm:$0xff]  ;;  %2233 = vst [vmem:[#allocation3] sm:$0xff] %v2229_v11  ;;  %v2302_v59 = vld [vmem:[#allocation2 + $0xa0] sm:$0xff]  ;;  %v2742_v51 = vmax.f32 %v2734_v0, %v2738_v23  ;;  %v829_v41 = vpop.f32.mrb[29].mxu0  ;;  %v8956_v61 = vpop.f32.mrb[28].mxu1  ;;  %v2423_v44 = vmax.f32 %v2415_v8, %v2419_v28 }
 0x154   :  { %2234 = vst [vmem:[#allocation3 + $0x8] sm:$0xff] %v2230_v52  ;;  %v2529_v40 = vld [vmem:[#allocation2 + $0x132] sm:$0xff]  ;;  %v2307_v10 = vld [vmem:[#allocation2 + $0xa9] sm:$0xff]  ;;  %858 = vst [vmem:[#allocation2 + $0x170] sm:$0xff] %v8953_v39  ;;  %v2310_v18 = vmax.f32 %v2302_v59, %v2306_v33  ;;  %v7843_v11 = vpop.f32.mrb[30].mxu0  ;;  %v8972_v3 = vmax.f32 %v2335_v35, %v2339_v30  ;;  %v1070_v26 = vpop.f32.mrb[29].mxu1 }
 0x155   :  { %v2315_v24 = vld [vmem:[#allocation2 + $0xaa] sm:$0xff]  ;;  %v2533_v46 = vmax.f32 %v2525_v9, %v2529_v40  ;;  %v2746_v36 = vld [vmem:[#allocation2 + $0x1b2] sm:$0xff]  ;;  %v2311_v62 = vmax.f32 %v2303_v32, %v2307_v10  ;;  %v2326_v53 = vld [vmem:[#allocation2 + $0xc0] sm:$0xff]  ;;  %856 = vst [vmem:[#allocation2 + $0x160] sm:$0xff] %v829_v41  ;;  %v832_v37 = vpop.f32.mrb[31].mxu0  ;;  %v2427_v41 = vmax.f32 %v8958_v38, %v2423_v44 }
 0x156   :  { %v2330_v31 = vld [vmem:[#allocation2 + $0xc1] sm:$0xff]  ;;  %v2545_v56 = vld [vmem:[#allocation2 + $0x151] sm:$0xff]  ;;  %1099 = vst [vmem:[#allocation2 + $0x1f0] sm:$0xff] %v8956_v61  ;;  %v8967_v52 = vld [vmem:[%s11152_s2] ss:$0 sm:$0xff]  ;;  %v2750_v16 = vmax.f32 %v2742_v51, %v2746_v36 }
 0x157   :  { %v8960_v22 = vld [vmem:[#allocation2 + $0xc1] sm:$0xff]  ;;  %v2443_v57 = vld [vmem:[#allocation2 + $0x11a] sm:$0x1f]  ;;  %v2654_v58 = vld [vmem:[#allocation2 + $0x192] sm:$0xff]  ;;  %v2549_v19 = vmax.f32 %v8918_v14, %v2545_v56  ;;  %859 = vst [vmem:[#allocation2 + $0x178] sm:$0xff] %v7843_v11  ;;  %v2319_v63 = vmax.f32 %v2311_v62, %v2315_v24  ;;  %v2334_v60 = vmax.f32 %v2326_v53, %v2330_v31  ;;  %v2537_v28 = vmax.f32 %v8912_v42, %v2533_v46  ;;  %v7875_v24 = vpop.f32.mrb[30].mxu1 }
 0x158   :  { %v2314_v55 = vld [vmem:[#allocation2 + $0xa2] sm:$0xff]  ;;  %v8969_v50 = vld [vmem:[#allocation2 + $0x118] sm:$0x1f]  ;;  %v2447_v6 = vmax.f32 %v2439_v17, %v2443_v57  ;;  %857 = vst [vmem:[#allocation2 + $0x168] sm:$0xff] %v832_v37  ;;  %v8985_v30 = vadd.f32 %v8967_v52, %v8941_v2  ;;  %v8991_v33 = vmax.f32 %v2650_v45, %v2654_v58  ;;  %1097 = vst [vmem:[#allocation2 + $0x1e0] sm:$0xff] %v1070_v26  ;;  %v1073_v62 = vpop.f32.mrb[31].mxu1 }
 0x159   :  { %v8974_v12 = vld [vmem:[#allocation2 + $0x119] sm:$0x1f]  ;;  %v2338_v9 = vld [vmem:[#allocation2 + $0xc2] sm:$0xff]  ;;  %v2762_v15 = vld [vmem:[#allocation2 + $0x1d1] sm:$0xff]  ;;  %v8981_v8 = vmax.f32 %v2310_v18, %v2314_v55  ;;  %v2323_v17 = vmax.f32 %v8910_v47, %v2319_v63  ;;  %v2392_v42 = vmax.f32 %v8785_v13, %v8960_v22  ;;  %1100 = vst [vmem:[#allocation2 + $0x1f8] sm:$0xff] %v7875_v24  ;;  %v9048_v26 = vadd.f32 %v8967_v52, %v8892_v21 }
 0x15a   :  { %v2553_v4 = vld [vmem:[#allocation2 + $0x152] sm:$0xff]  ;;  %v8976_v0 = vld [vmem:[#allocation2 + $0x109] sm:$0xff]  ;;  %v2766_v35 = vmax.f32 %v8926_v48, %v2762_v15  ;;  %v2506_v40 = vmax.f32 %v8969_v50, %v8974_v12  ;;  %v8999_v51 = vld [vmem:[#allocation2 + $0x101] sm:$0xff]  ;;  %v2342_v46 = vmax.f32 %v2334_v60, %v2338_v9  ;;  %v9013_v53 = vpop.f32.mrb[32].mxu0  ;;  %v2754_v38 = vmax.f32 %v8991_v33, %v2750_v16  ;;  %1098 = vst [vmem:[#allocation2 + $0x1e8] sm:$0xff] %v1073_v62 }
 0x15b   :  { %v8978_v23 = vmax.f32 %v2549_v19, %v2553_v4  ;;  %v2770_v14 = vld [vmem:[#allocation2 + $0x1d2] sm:$0xff]  ;;  %v2437_v47 = vmax.f32 %v8872_v1, %v8976_v0  ;;  %v2655_v36 = vld [vmem:[#allocation2 + $0x19a] sm:$0x1f]  ;;  %v2347_v56 = vmax.f32 %v2323_v17, %v8972_v3  ;;  %v2396_v11 = vld [vmem:[#allocation2 + $0xc2] sm:$0xff]  ;;  %1328 = vst [vmem:[#allocation2 + $0x210] sm:$0xff] %v9013_v53  ;;  %v9028_v58 = vpop.f32.mrb[33].mxu0  ;;  %v2451_v37 = vmax.f32 %v2427_v41, %v2447_v6 }
 0x15c   :  { %v8987_v59 = vld [vmem:[#allocation2 + $0x198] sm:$0x1f]  ;;  %v9011_v18 = vmax.f32 %v2766_v35, %v2770_v14  ;;  %v9023_v1 = vld [vmem:[#allocation2 + $0x181] sm:$0xff]  ;;  %v9025_v57 = vld [vmem:[#allocation2 + $0x189] sm:$0xff]  ;;  %v9030_v19 = vpop.f32.mrb[32].mxu1  ;;  %v2322_v44 = vmax.f32 %v8914_v20, %v8981_v8  ;;  %v2242_v63 = vmax.f32 %v8985_v30, 0.0  ;;  %v2503_v20 = vmax.f32 %v8847_v43, %v8999_v51 }
 0x15d   :  { %v8989_v32 = vld [vmem:[#allocation2 + $0x199] sm:$0x1f]  ;;  %v9007_v48 = vmax.f32 %v2537_v28, %v8978_v23  ;;  %v2441_v4 = vld [vmem:[#allocation2 + $0x10a] sm:$0xff]  ;;  %1326 = vst [vmem:[#allocation2 + $0x200] sm:$0xff] %v9028_v58  ;;  %v7895_v9 = vpop.f32.mrb[34].mxu0  ;;  %1569 = vst [vmem:[#allocation2 + $0x290] sm:$0xff] %v9030_v19 }
 0x15e   :  { %v9001_v2 = vld [vmem:[#allocation2 + $0x198] sm:$0x1f]  ;;  %v2651_v55 = vmax.f32 %v8987_v59, %v8989_v32  ;;  %v9037_v0 = vpop.f32.mrb[33].mxu1  ;;  %v9042_v6 = vmax.f32 %v2754_v38, %v9011_v18  ;;  %v2507_v28 = vld [vmem:[#allocation2 + $0x102] sm:$0xff]  ;;  %v2653_v59 = vld [vmem:[#allocation2 + $0x18a] sm:$0xff]  ;;  %1329 = vst [vmem:[#allocation2 + $0x218] sm:$0xff] %v7895_v9 }
 0x15f   :  { %v9003_v10 = vld [vmem:[#allocation2 + $0x199] sm:$0x1f]  ;;  %v2622_v14 = vld [vmem:[#allocation2 + $0x171] sm:$0xff]  ;;  %v2652_v30 = vld [vmem:[#allocation2 + $0x182] sm:$0xff]  ;;  %v9052_v32 = vpop.f32.mrb[35].mxu0  ;;  %1567 = vst [vmem:[#allocation2 + $0x280] sm:$0xff] %v9037_v0 }
 0x160   :  { %v9015_v31 = vld [vmem:[#allocation2 + $0x138] sm:$0x1f]  ;;  %11220 = vst [vmem:[#allocation14_spill] sm:$0xff] %v9042_v6  ;;  %v2723_v8 = vmax.f32 %v9001_v2, %v9003_v10  ;;  %v7927_v35 = vpop.f32.mrb[34].mxu1  ;;  %v2626_v21 = vmax.f32 %v8953_v39, %v2622_v14  ;;  %v2346_v2 = vmax.f32 %v2322_v44, %v2342_v46  ;;  %v2649_v10 = vmax.f32 %v8880_v7, %v9025_v57  ;;  %v2237_v38 = vld [vmem:[#allocation3] ss:$2 sm:$0xff] }
 0x161   :  { %v9017_v45 = vld [vmem:[#allocation2 + $0x139] sm:$0x1f]  ;;  %1327 = vst [vmem:[#allocation2 + $0x208] sm:$0xff] %v9052_v32  ;;  %1570 = vst [vmem:[#allocation2 + $0x298] sm:$0xff] %v7927_v35  ;;  %v9066_v41 = vpop.f32.mrb[35].mxu1  ;;  %v9071_v39 = vmax.f32 %v2392_v42, %v2396_v11  ;;  %v2648_v46 = vmax.f32 %v8860_v54, %v9023_v1  ;;  %v9085_v13 = vld [vmem:[#allocation2 + $0xe0] sm:$0xff] }
 0x162   :  { %v2510_v60 = vld [vmem:[#allocation2 + $0x11a] sm:$0x1f]  ;;  %v2526_v43 = vmax.f32 %v9015_v31, %v9017_v45  ;;  %v2630_v62 = vld [vmem:[#allocation2 + $0x172] sm:$0xff]  ;;  %v9080_v31 = vmax.f32 %v2437_v47, %v2441_v4  ;;  %v9082_v45 = vmax.f32 %v2651_v55, %v2655_v36  ;;  %1568 = vst [vmem:[#allocation2 + $0x288] sm:$0xff] %v9066_v41  ;;  %2350 = vst [vmem:[#allocation3] sm:$0xff] %v2346_v2  ;;  %v2149_v47 = vmax.f32 %v9048_v26, 0.0 }
 0x163   :  { %v2727_v16 = vld [vmem:[#allocation2 + $0x19a] sm:$0x1f]  ;;  %v9078_v7 = vmax.f32 %v2506_v40, %v2510_v60  ;;  %2351 = vst [vmem:[#allocation3 + $0x8] sm:$0xff] %v2347_v56  ;;  %v2405_v22 = vld [vmem:[#allocation2 + $0xe8] sm:$0xff]  ;;  %v9090_v40 = vmax.f32 %v2503_v20, %v2507_v28  ;;  %v9093_v36 = vpack.c.bf16 %v2242_v63, %v2242_v63  ;;  %v2839_v44 = vld [vmem:[#allocation2 + $0x1f1] sm:$0xff]  ;;  %v9100_v4 = vmax.f32 %v2649_v10, %v2653_v59 }
 0x164   :  { %v9039_v15 = vld [vmem:[#allocation3 + $0x10] ss:$2 sm:$0x7f]  ;;  %v9088_v42 = vld [vmem:[#allocation2 + $0xe1] sm:$0xff]  ;;  %v9095_v11 = vmax.f32 %v2723_v8, %v2727_v16  ;;  %v9111_v16 = vpop.f32.mrb[36].mxu0  ;;  %v2843_v28 = vmax.f32 %v8956_v61, %v2839_v44  ;;  %v9114_v8 = vmax.f32 %v2648_v46, %v2652_v30 }
 0x165   :  { %2454 = vst [vmem:[#allocation3 + $0x10] sm:$0xff] %v8921_v27  ;;  %2455 = vst [vmem:[#allocation3 + $0x18] sm:$0x1f] %v2451_v37  ;;  %v9059_v17 = vld [vmem:[#allocation2 + $0x1b8] sm:$0x1f]  ;;  %v2634_v37 = vmax.f32 %v2626_v21, %v2630_v62  ;;  %v2409_v50 = vld [vmem:[#allocation2 + $0xe9] sm:$0xff]  ;;  %v2412_v61 = vmax.f32 %v9085_v13, %v9088_v42 }
 0x166   :  { %v2739_v51 = vld [vmem:[#allocation2 + $0x1b9] sm:$0x1f]  ;;  %v2417_v12 = vld [vmem:[#allocation2 + $0xea] sm:$0xff]  ;;  %v2413_v60 = vmax.f32 %v2405_v22, %v2409_v50  ;;  %11221 = vst [vmem:[#allocation15_spill] sm:$0xff] %v9100_v4  ;;  %1332 = vst [vmem:[#allocation2 + $0x230] sm:$0xff] %v9111_v16  ;;  %v2262_v50 = vshrl.u32 %v9093_v36, 16 }
 0x167   :  { %v9063_v24 = vld [vmem:[#allocation2 + $0x158] sm:$0x1f]  ;;  %v2743_v54 = vmax.f32 %v9059_v17, %v2739_v51  ;;  %v2638_v56 = vmax.f32 %v8978_v23, %v2634_v37  ;;  %v9120_v21 = vld [vmem:[#allocation2 + $0x149] sm:$0xff]  ;;  %v1279_v17 = vpop.f32.mrb[37].mxu0  ;;  %v9123_v51 = vpop.f32.mrb[36].mxu1  ;;  %v2432_v10 = vld [vmem:[#allocation2 + $0x101] sm:$0xff] }
 0x168   :  { %v2530_v27 = vld [vmem:[#allocation2 + $0x13a] sm:$0x1f]  ;;  %v2847_v23 = vld [vmem:[#allocation2 + $0x1f2] sm:$0xff]  ;;  %v2421_v30 = vmax.f32 %v2413_v60, %v2417_v12  ;;  %1330 = vst [vmem:[#allocation2 + $0x220] sm:$0xff] %v1279_v17  ;;  %v7899_v62 = vpop.f32.mrb[38].mxu0  ;;  %1573 = vst [vmem:[#allocation2 + $0x2b0] sm:$0xff] %v9123_v51 }
 0x169   :  { %v2546_v57 = vld [vmem:[#allocation2 + $0x159] sm:$0x1f]  ;;  %v9097_v55 = vmax.f32 %v2526_v43, %v2530_v27  ;;  %v9126_v2 = vmax.f32 %v2638_v56, %v8991_v33  ;;  %v2863_v27 = vld [vmem:[#allocation2 + $0x211] sm:$0xff]  ;;  %v2416_v37 = vld [vmem:[#allocation2 + $0xe2] sm:$0xff]  ;;  %v9136_v33 = vpack.c.bf16 %v2149_v47, %v2149_v47  ;;  %1333 = vst [vmem:[#allocation2 + $0x238] sm:$0xff] %v7899_v62  ;;  %v1282_v42 = vpop.f32.mrb[39].mxu0 }
 0x16a   :  { %v2747_v1 = vld [vmem:[#allocation2 + $0x1ba] sm:$0x1f]  ;;  %v2550_v9 = vmax.f32 %v9063_v24, %v2546_v57  ;;  %v9131_v24 = vadd.f32 %v8967_v52, %v2237_v38  ;;  %v2851_v57 = vmax.f32 %v2843_v28, %v2847_v23  ;;  %v2428_v22 = vld [vmem:[#allocation2 + $0x100] sm:$0xff]  ;;  %v2867_v13 = vmax.f32 %v9013_v53, %v2863_v27  ;;  %v2871_v60 = vld [vmem:[#allocation2 + $0x212] sm:$0xff]  ;;  %1331 = vst [vmem:[#allocation2 + $0x228] sm:$0xff] %v1282_v42  ;;  %v1520_v28 = vpop.f32.mrb[37].mxu1 }
 0x16b   :  { %v9103_v14 = vld [vmem:[#allocation2 + $0x158] sm:$0x1f]  ;;  %v9134_v46 = vmax.f32 %v2743_v54, %v2747_v1  ;;  %11222 = vst [vmem:[#allocation16_spill] sm:$0xff] %v9136_v33  ;;  %v2538_v38 = vmax.f32 %v9078_v7, %v9097_v55  ;;  %v2436_v54 = vmax.f32 %v2428_v22, %v2432_v10  ;;  %v2265_v1 = vshll.u32 %v9093_v36, 16  ;;  %v9153_v17 = vld [vmem:[#allocation2 + $0x141] sm:$0xff]  ;;  %v9155_v10 = vld [vmem:[#allocation2 + $0x1c9] sm:$0xff] }
 0x16c   :  { %v9105_v20 = vld [vmem:[#allocation2 + $0x159] sm:$0x1f]  ;;  %v2855_v53 = vmax.f32 %v9011_v18, %v2851_v57  ;;  %v2425_v23 = vmax.f32 %v8972_v3, %v2421_v30  ;;  %v9157_v36 = vmax.f32 %v2867_v13, %v2871_v60  ;;  %1571 = vst [vmem:[#allocation2 + $0x2a0] sm:$0xff] %v1520_v28  ;;  %v2440_v27 = vld [vmem:[#allocation2 + $0x102] sm:$0xff]  ;;  %v2264_v57 = vrot.slane %v2262_v50, 6  ;;  %v9179_v42 = vpop.f32.mrb[40].mxu0 }
 0x16d   :  { %v9107_v26 = vld [vmem:[#allocation2 + $0x1d8] sm:$0x1f]  ;;  %v2607_v7 = vmax.f32 %v9103_v14, %v9105_v20  ;;  %v2548_v14 = vmax.f32 %v8939_v49, %v9120_v21  ;;  %v2267_v49 = vrot.slane %v2265_v1, 7  ;;  %v2765_v22 = vmax.f32 %v8944_v5, %v9155_v10  ;;  %v9177_v13 = vld [vmem:[#allocation2 + $0x1c1] sm:$0xff]  ;;  %1336 = vst [vmem:[#allocation2 + $0x250] sm:$0xff] %v9179_v42  ;;  %v2528_v6 = vld [vmem:[#allocation2 + $0x12a] sm:$0xff] }
 0x16e   :  { %v9109_v63 = vld [vmem:[#allocation2 + $0x1d9] sm:$0x1f]  ;;  %v9167_v62 = vmax.f32 %v2425_v23, %v9080_v31  ;;  %v2608_v50 = vld [vmem:[#allocation2 + $0x142] sm:$0xff]  ;;  %v9188_v1 = vld [vmem:[#allocation2 + $0x291] sm:$0xff] }
 0x16f   :  { %v2554_v35 = vld [vmem:[#allocation2 + $0x15a] sm:$0x1f]  ;;  %v2767_v47 = vmax.f32 %v9107_v26, %v9109_v63  ;;  %v2420_v26 = vmax.f32 %v2412_v61, %v2416_v37  ;;  %v2241_v63 = vmax.f32 %v9131_v24, 0.0  ;;  %v2755_v61 = vmax.f32 %v9095_v11, %v9134_v46  ;;  %v2552_v37 = vld [vmem:[#allocation2 + $0x14a] sm:$0xff] }
 0x170   :  { %v9116_v59 = vld [vmem:[#allocation2 + $0x1d8] sm:$0x1f]  ;;  %v2558_v44 = vmax.f32 %v2550_v9, %v2554_v35  ;;  %v7931_v9 = vpop.f32.mrb[38].mxu1  ;;  %v2604_v11 = vmax.f32 %v8928_v34, %v9153_v17  ;;  %v9200_v34 = vmax.f32 %v2548_v14, %v2552_v37  ;;  %v3073_v37 = vmax.f32 %v9030_v19, %v9188_v1  ;;  %v2516_v1 = vld [vmem:[#allocation2 + $0x128] sm:$0xff] }
 0x171   :  { %v9118_v43 = vld [vmem:[#allocation2 + $0x1d9] sm:$0x1f]  ;;  %1574 = vst [vmem:[#allocation2 + $0x2b8] sm:$0xff] %v7931_v9  ;;  %v1523_v20 = vpop.f32.mrb[39].mxu1  ;;  %v9196_v23 = vpack.c.bf16 %v2241_v63, %v2241_v63 }
 0x172   :  { %v9142_v12 = vld [vmem:[#allocation2 + $0x178] sm:$0x1f]  ;;  %v2824_v18 = vmax.f32 %v9116_v59, %v9118_v43  ;;  %1572 = vst [vmem:[#allocation2 + $0x2a8] sm:$0xff] %v1523_v20  ;;  %v2444_v43 = vmax.f32 %v2436_v54, %v2440_v27  ;;  %v2769_v54 = vld [vmem:[#allocation2 + $0x1ca] sm:$0xff]  ;;  %v9191_v5 = vpop.f32.mrb[40].mxu1  ;;  %v2562_v60 = vmax.f32 %v2538_v38, %v2558_v44  ;;  %v9225_v27 = vor.u32 %v2267_v49, %v2264_v57 }
 0x173   :  { %v9144_v56 = vld [vmem:[#allocation2 + $0x179] sm:$0x1f]  ;;  %1577 = vst [vmem:[#allocation2 + $0x2d0] sm:$0xff] %v9191_v5  ;;  %v9206_v10 = vpop.f32.mrb[41].mxu1  ;;  %v2253_v19 = vshrl.u32 %v9196_v23, 16 }
 0x174   :  { %v2771_v55 = vld [vmem:[#allocation2 + $0x1da] sm:$0x1f]  ;;  %v2627_v30 = vmax.f32 %v9142_v12, %v9144_v56  ;;  %v9182_v56 = vmax.f32 %v2855_v53, %v9157_v36  ;;  %v2424_v53 = vmax.f32 %v9071_v39, %v2420_v26  ;;  %v2955_v26 = vld [vmem:[#allocation2 + $0x231] sm:$0xff]  ;;  %1575 = vst [vmem:[#allocation2 + $0x2c0] sm:$0xff] %v9206_v10 }
 0x175   :  { %v2611_v35 = vld [vmem:[#allocation2 + $0x15a] sm:$0x1f]  ;;  %v2775_v21 = vmax.f32 %v2767_v47, %v2771_v55  ;;  %v9193_v47 = vpop.f32.mrb[41].mxu0  ;;  %v2959_v14 = vmax.f32 %v9111_v16, %v2955_v26  ;;  %v2963_v16 = vld [vmem:[#allocation2 + $0x232] sm:$0xff] }
 0x176   :  { %v2828_v3 = vld [vmem:[#allocation2 + $0x1da] sm:$0x1f]  ;;  %11223 = vst [vmem:[#allocation17_spill] sm:$0xff] %v9182_v56  ;;  %v9186_v46 = vmax.f32 %v2607_v7, %v2611_v35  ;;  %v2825_v7 = vld [vmem:[#allocation2 + $0x1c2] sm:$0xff]  ;;  %1334 = vst [vmem:[#allocation2 + $0x240] sm:$0xff] %v9193_v47  ;;  %v7903_v9 = vpop.f32.mrb[42].mxu0  ;;  %v2448_v20 = vmax.f32 %v2424_v53, %v2444_v43 }
 0x177   :  { %v9171_v24 = vld [vmem:[#allocation2 + $0x1f8] sm:$0x1f]  ;;  %v9198_v55 = vmax.f32 %v2824_v18, %v2828_v3  ;;  %1337 = vst [vmem:[#allocation2 + $0x258] sm:$0xff] %v7903_v9  ;;  %v7935_v18 = vpop.f32.mrb[42].mxu1  ;;  %v9219_v3 = vpop.f32.mrb[43].mxu0  ;;  %v9243_v49 = vmax.f32 %v2959_v14, %v2963_v16  ;;  %v9261_v9 = vld [vmem:[#allocation2 + $0x201] sm:$0xff] }
 0x178   :  { %v9173_v59 = vld [vmem:[#allocation2 + $0x1f9] sm:$0x1f]  ;;  %1578 = vst [vmem:[#allocation2 + $0x2d8] sm:$0xff] %v7935_v18  ;;  %1335 = vst [vmem:[#allocation2 + $0x248] sm:$0xff] %v9219_v3  ;;  %v2354_v43 = vld [vmem:[#allocation3] ss:$2 sm:$0xff] }
 0x179   :  { %v2631_v12 = vld [vmem:[#allocation2 + $0x17a] sm:$0x1f]  ;;  %v2844_v39 = vmax.f32 %v9171_v24, %v9173_v59  ;;  %v9227_v24 = vmax.f32 %v2765_v22, %v2769_v54  ;;  %v3077_v57 = vld [vmem:[#allocation2 + $0x292] sm:$0xff]  ;;  %2452 = vst [vmem:[#allocation3] sm:$0xff] %v2448_v20  ;;  %2453 = vst [vmem:[#allocation3 + $0x8] sm:$0xff] %v9167_v62  ;;  %v2256_v62 = vshll.u32 %v9196_v23, 16 }
 0x17a   :  { %v2848_v28 = vld [vmem:[#allocation2 + $0x1fa] sm:$0x1f]  ;;  %v9210_v44 = vmax.f32 %v2627_v30, %v2631_v12  ;;  %v2821_v30 = vmax.f32 %v8932_v25, %v9177_v13  ;;  %v9236_v12 = vmax.f32 %v2755_v61, %v2775_v21  ;;  %v9240_v25 = vld [vmem:[#allocation2 + $0x209] sm:$0xff]  ;;  %v3156_v22 = vld [vmem:[#allocation2 + $0x2b1] sm:$0xff]  ;;  %v9249_v61 = vadd.f32 %v8967_v52, %v9039_v15  ;;  %v9278_v14 = vpop.f32.mrb[44].mxu0 }
 0x17b   :  { %v9202_v17 = vld [vmem:[#allocation2 + $0x218] sm:$0x1f]  ;;  %11224 = vst [vmem:[#allocation18_spill] sm:$0xff] %v9227_v24  ;;  %v9253_v13 = vmax.f32 %v2844_v39, %v2848_v28  ;;  %v9256_v54 = vld [vmem:[#allocation2 + $0x120] sm:$0xff]  ;;  %v9276_v18 = vmax.f32 %v3073_v37, %v3077_v57  ;;  %1340 = vst [vmem:[#allocation2 + $0x270] sm:$0xff] %v9278_v14 }
 0x17c   :  { %v9208_v38 = vld [vmem:[#allocation3 + $0x10] ss:$2 sm:$0x7f]  ;;  %11225 = vst [vmem:[#allocation19_spill] sm:$0xff] %v9236_v12  ;;  %v2639_v21 = vmax.f32 %v9186_v46, %v9210_v44  ;;  %v2519_v28 = vld [vmem:[#allocation2 + $0x121] sm:$0xff]  ;;  %v9267_v39 = vmax.f32 %v2821_v30, %v2825_v7 }
 0x17d   :  { %v9214_v63 = vld [vmem:[#allocation2 + $0x219] sm:$0x1f]  ;;  %2565 = vst [vmem:[#allocation3 + $0x10] sm:$0xff] %v9007_v48  ;;  %2566 = vst [vmem:[#allocation3 + $0x18] sm:$0x1f] %v2562_v60  ;;  %v9234_v48 = vpop.f32.mrb[43].mxu1  ;;  %v9238_v60 = vmax.f32 %v2604_v11, %v2608_v50  ;;  %v3160_v11 = vmax.f32 %v9123_v51, %v3156_v22  ;;  %v2856_v56 = vmax.f32 %v9198_v55, %v9253_v13 }
 0x17e   :  { %v9216_v35 = vld [vmem:[#allocation2 + $0x218] sm:$0x1f]  ;;  %1576 = vst [vmem:[#allocation2 + $0x2c8] sm:$0xff] %v9234_v48  ;;  %v2868_v53 = vmax.f32 %v9202_v17, %v9214_v63  ;;  %v2520_v44 = vld [vmem:[#allocation2 + $0x129] sm:$0xff]  ;;  %11226 = vst [vmem:[#allocation20_spill] sm:$0xff] %v9267_v39  ;;  %v2270_v51 = vrot.slane %v9225_v27, 4  ;;  %v2866_v17 = vmax.f32 %v9052_v32, %v9240_v25  ;;  %v2523_v25 = vmax.f32 %v9256_v54, %v2519_v28 }
 0x17f   :  { %v9229_v59 = vld [vmem:[#allocation2 + $0x219] sm:$0x1f]  ;;  %v9284_v7 = vld [vmem:[#allocation2 + $0x141] sm:$0xff]  ;;  %v2870_v22 = vld [vmem:[#allocation2 + $0x20a] sm:$0xff]  ;;  %v1311_v32 = vpop.f32.mrb[45].mxu0  ;;  %v2524_v57 = vmax.f32 %v2516_v1, %v2520_v44  ;;  %v9298_v39 = vmax.f32 %v2639_v21, %v9082_v45 }
 0x180   :  { %v3164_v50 = vld [vmem:[#allocation2 + $0x2b2] sm:$0xff]  ;;  %v2872_v26 = vld [vmem:[#allocation2 + $0x21a] sm:$0x1f]  ;;  %v2940_v23 = vmax.f32 %v9216_v35, %v9229_v59  ;;  %v9291_v59 = vpop.f32.mrb[44].mxu1  ;;  %2281 = vst [vmem:[#allocation9 + $0x24] sm:$0x1] %v2270_v51 }
 0x181   :  { %v9263_v15 = vld [vmem:[#allocation2 + $0x298] sm:$0x1f]  ;;  %v9282_v16 = vmax.f32 %v3160_v11, %v3164_v50  ;;  %v2255_v11 = vrot.slane %v2253_v19, 6  ;;  %v2258_v50 = vrot.slane %v2256_v62, 7  ;;  %1338 = vst [vmem:[#allocation2 + $0x260] sm:$0xff] %v1311_v32  ;;  %v7907_v33 = vpop.f32.mrb[46].mxu0  ;;  %v9305_v19 = vadd.f32 %v8967_v52, %v2354_v43 }
 0x182   :  { %v9274_v63 = vld [vmem:[#allocation2 + $0x299] sm:$0x1f]  ;;  %v2979_v29 = vld [vmem:[#allocation2 + $0x251] sm:$0xff]  ;;  %1581 = vst [vmem:[#allocation2 + $0x2f0] sm:$0xff] %v9291_v59  ;;  %v2539_v54 = vld [vmem:[#allocation2 + $0x140] sm:$0xff]  ;;  %v2876_v1 = vmax.f32 %v2868_v53, %v2872_v26  ;;  %v1314_v44 = vpop.f32.mrb[47].mxu0  ;;  %v2532_v55 = vmax.f32 %v2524_v57, %v2528_v6  ;;  %v9317_v32 = vmax.f32 %v2866_v17, %v2870_v22 }
 0x183   :  { %v9280_v20 = vld [vmem:[#allocation2 + $0x238] sm:$0x1f]  ;;  %v9307_v62 = vld [vmem:[#allocation2 + $0x281] sm:$0xff]  ;;  %v2983_v28 = vmax.f32 %v9179_v42, %v2979_v29  ;;  %1341 = vst [vmem:[#allocation2 + $0x278] sm:$0xff] %v7907_v33  ;;  %v2547_v13 = vmax.f32 %v2539_v54, %v9284_v7  ;;  %1339 = vst [vmem:[#allocation2 + $0x268] sm:$0xff] %v1314_v44  ;;  %v2937_v33 = vmax.f32 %v9028_v58, %v9261_v9  ;;  %v2358_v24 = vmax.f32 %v9305_v19, 0.0 }
 0x184   :  { %v2944_v30 = vld [vmem:[#allocation2 + $0x21a] sm:$0x1f]  ;;  %11227 = vst [vmem:[#allocation21_spill] sm:$0xff] %v9317_v32  ;;  %v2987_v26 = vld [vmem:[#allocation2 + $0x252] sm:$0xff]  ;;  %v2527_v29 = vld [vmem:[#allocation2 + $0x122] sm:$0xff]  ;;  %v9335_v54 = vor.u32 %v2258_v50, %v2255_v11  ;;  %v9346_v50 = vmax.f32 %v2856_v56, %v2876_v1  ;;  %v9364_v1 = vpop.f32.mrb[48].mxu0 }
 0x185   :  { %v9286_v46 = vld [vmem:[#allocation2 + $0x298] sm:$0x1f]  ;;  %v9315_v51 = vmax.f32 %v2940_v23, %v2944_v30  ;;  %v9325_v12 = vld [vmem:[#allocation2 + $0x289] sm:$0xff]  ;;  %v9329_v23 = vmax.f32 %v2983_v28, %v2987_v26  ;;  %v1552_v30 = vpop.f32.mrb[45].mxu1  ;;  %v9333_v57 = vmax.f32 %v2523_v25, %v2527_v29  ;;  %v2536_v26 = vmax.f32 %v9080_v31, %v2532_v55  ;;  %1810 = vst [vmem:[#allocation2 + $0x310] sm:$0xff] %v9364_v1 }
 0x186   :  { %v9288_v35 = vld [vmem:[#allocation2 + $0x299] sm:$0x1f]  ;;  %v3180_v17 = vld [vmem:[#allocation2 + $0x2d1] sm:$0xff]  ;;  %11228 = vst [vmem:[#allocation22_spill] sm:$0xff] %v9335_v54  ;;  %v2941_v44 = vld [vmem:[#allocation2 + $0x202] sm:$0xff]  ;;  %v7939_v11 = vpop.f32.mrb[46].mxu1 }
 0x187   :  { %v9293_v37 = vld [vmem:[#allocation2 + $0x239] sm:$0x1f]  ;;  %v3141_v58 = vmax.f32 %v9286_v46, %v9288_v35  ;;  %v3184_v9 = vmax.f32 %v9191_v5, %v3180_v17  ;;  %1579 = vst [vmem:[#allocation2 + $0x2e0] sm:$0xff] %v1552_v30  ;;  %v2551_v32 = vld [vmem:[#allocation2 + $0x142] sm:$0xff]  ;;  %v11229_v5 = vmax.f32 %v9157_v36, %v9243_v49  ;;  %1582 = vst [vmem:[#allocation2 + $0x2f8] sm:$0xff] %v7939_v11  ;;  %v1555_v56 = vpop.f32.mrb[47].mxu1 }
 0x188   :  { %v9310_v45 = vld [vmem:[#allocation2 + $0x2b8] sm:$0x1f]  ;;  %v2960_v22 = vmax.f32 %v9280_v20, %v9293_v37  ;;  %v3075_v20 = vld [vmem:[#allocation2 + $0x282] sm:$0xff]  ;;  %v2555_v35 = vmax.f32 %v2547_v13, %v2551_v32  ;;  %v2560_v36 = vmax.f32 %v2536_v26, %v9200_v34  ;;  %v3071_v49 = vmax.f32 %v9037_v0, %v9307_v62  ;;  %1580 = vst [vmem:[#allocation2 + $0x2e8] sm:$0xff] %v1555_v56  ;;  %v9378_v32 = vpop.f32.mrb[49].mxu0  ;;  %v3076_v11 = vld [vmem:[#allocation2 + $0x28a] sm:$0xff] }
 0x189   :  { %v9312_v21 = vld [vmem:[#allocation2 + $0x2b9] sm:$0x1f]  ;;  %v9352_v46 = vmax.f32 %v11229_v5, %v9329_v23  ;;  %v2535_v0 = vmax.f32 %v9090_v40, %v9333_v57  ;;  %v9386_v62 = vld [vmem:[#allocation2 + $0x168] sm:$0xff]  ;;  %v2260_v30 = vrot.slane %v9335_v54, 4  ;;  %v3072_v26 = vmax.f32 %v9066_v41, %v9325_v12  ;;  %1808 = vst [vmem:[#allocation2 + $0x300] sm:$0xff] %v9378_v32  ;;  %v7959_v5 = vpop.f32.mrb[50].mxu0 }
 0x18a   :  { %v9321_v53 = vld [vmem:[#allocation2 + $0x258] sm:$0x1f]  ;;  %v3161_v31 = vmax.f32 %v9310_v45, %v9312_v21  ;;  %v11230_v45 = vmov 0  ;;  %v9407_v57 = vpack.c.bf16 %v2358_v24, %v2358_v24  ;;  %1811 = vst [vmem:[#allocation2 + $0x318] sm:$0xff] %v7959_v5  ;;  %v9411_v12 = vpop.f32.mrb[51].mxu0  ;;  %v11235_v54 = vmax.f32 %v9263_v15, %v9274_v63 }
 0x18b   :  { %v3145_v42 = vld [vmem:[#allocation2 + $0x29a] sm:$0x1f]  ;;  %v3188_v7 = vld [vmem:[#allocation2 + $0x2d2] sm:$0xff]  ;;  %v11231_v45 = vsel %vm9371_vm2, 4294967295, %v11230_v45  ;;  %v2559_v24 = vmax.f32 %v2535_v0, %v2555_v35  ;;  %v2269_v5 = vsel %vm9371_vm2, %v2260_v30, %v9225_v27  ;;  %1809 = vst [vmem:[#allocation2 + $0x308] sm:$0xff] %v9411_v12  ;;  %v9438_v27 = vmax.f32 %v3071_v49, %v3075_v20  ;;  %v9459_v30 = vld [vmem:[#allocation2 + $0x241] sm:$0xff] }
 0x18c   :  { %v9327_v6 = vld [vmem:[#allocation2 + $0x259] sm:$0x1f]  ;;  %v9362_v17 = vmax.f32 %v3184_v9, %v3188_v7  ;;  %11232 = vst [vmem:[#allocation23_spill] sm:$0xff] %v11231_v45  ;;  %v9388_v7 = vmax.f32 %v2937_v33, %v2941_v44  ;;  %v9391_v9 = vmax.f32 %v3141_v58, %v3145_v42  ;;  %v11233_v33 = vmax.f32 %v9276_v18, %v9282_v16  ;;  %v9436_v35 = vld [vmem:[#allocation3] ss:$2 sm:$0xff] }
 0x18d   :  { %v2964_v43 = vld [vmem:[#allocation2 + $0x23a] sm:$0x1f]  ;;  %v2984_v19 = vmax.f32 %v9321_v53, %v9327_v6  ;;  %v9380_v53 = vpop.f32.mrb[48].mxu1  ;;  %2280 = vst [vmem:[#allocation9 + $0x20] sm:$0xf] %v2269_v5  ;;  %2563 = vst [vmem:[#allocation3] sm:$0xff] %v2559_v24  ;;  %v9447_v20 = vadd.f32 %v8967_v52, %v9208_v38 }
 0x18e   :  { %v3165_v28 = vld [vmem:[#allocation2 + $0x2ba] sm:$0x1f]  ;;  %v9382_v6 = vmax.f32 %v2960_v22, %v2964_v43  ;;  %2051 = vst [vmem:[#allocation2 + $0x390] sm:$0xff] %v9380_v53  ;;  %v9397_v43 = vpop.f32.mrb[49].mxu1  ;;  %v3045_v22 = vld [vmem:[#allocation2 + $0x271] sm:$0xff]  ;;  %v9405_v42 = vmax.f32 %v11233_v33, %v9362_v17  ;;  %v2616_v33 = vld [vmem:[#allocation2 + $0x160] sm:$0xff] }
 0x18f   :  { %v3078_v4 = vld [vmem:[#allocation2 + $0x29a] sm:$0x1f]  ;;  %2049 = vst [vmem:[#allocation2 + $0x380] sm:$0xff] %v9397_v43  ;;  %v7991_v44 = vpop.f32.mrb[50].mxu1  ;;  %v3049_v16 = vmax.f32 %v9278_v14, %v3045_v22  ;;  %v9419_v56 = vmax.f32 %v3161_v31, %v3165_v28  ;;  %v3053_v31 = vld [vmem:[#allocation2 + $0x272] sm:$0xff]  ;;  %2564 = vst [vmem:[#allocation3 + $0x8] sm:$0xff] %v2560_v36  ;;  %v9457_v36 = vmax.f32 %v3072_v26, %v3076_v11 }
 0x190   :  { %v9342_v37 = vld [vmem:[#allocation2 + $0x258] sm:$0x1f]  ;;  %11234 = vst [vmem:[#allocation24_spill] sm:$0xff] %v9405_v42  ;;  %v9427_v42 = vmax.f32 %v11235_v54, %v3078_v4  ;;  %2052 = vst [vmem:[#allocation2 + $0x398] sm:$0xff] %v7991_v44  ;;  %v9432_v14 = vpop.f32.mrb[51].mxu1  ;;  %v2972_v54 = vmax.f32 %v9315_v51, %v9382_v6  ;;  %v11158_v6 = vrot.slane %v9407_v57, 5 }
 0x191   :  { %v9344_v25 = vld [vmem:[#allocation2 + $0x259] sm:$0x1f]  ;;  %2050 = vst [vmem:[#allocation2 + $0x388] sm:$0xff] %v9432_v14  ;;  %v3253_v22 = vld [vmem:[#allocation2 + $0x2f1] sm:$0xff] }
 0x192   :  { %v9358_v55 = vld [vmem:[#allocation2 + $0x2d8] sm:$0x1f]  ;;  %v2629_v44 = vld [vmem:[#allocation2 + $0x16a] sm:$0xff]  ;;  %2377 = vst [vmem:[#allocation9 + $0x24] sm:$0x8] %v11158_v6 }
 0x193   :  { %v9360_v29 = vld [vmem:[#allocation2 + $0x2d9] sm:$0x1f] }
 0x194   :  { %v2988_v21 = vld [vmem:[#allocation2 + $0x25a] sm:$0x1f]  ;;  %v3185_v4 = vmax.f32 %v9358_v55, %v9360_v29  ;;  %v9451_v55 = vld [vmem:[#allocation2 + $0x249] sm:$0xff] }
 0x195   :  { %v9375_v13 = vld [vmem:[#allocation2 + $0x2d8] sm:$0x1f]  ;;  %v9453_v29 = vld [vmem:[#allocation2 + $0x2c9] sm:$0xff] }
 0x196   :  { %v9399_v40 = vld [vmem:[#allocation3 + $0x10] ss:$2 sm:$0x7f] }
 0x197   :  { %v9409_v41 = vld [vmem:[#allocation2 + $0x2d9] sm:$0x1f]  ;;  %2666 = vst [vmem:[#allocation3 + $0x10] sm:$0xff] %v9126_v2  ;;  %2667 = vst [vmem:[#allocation3 + $0x18] sm:$0x1f] %v9298_v39  ;;  %v2992_v2 = vmax.f32 %v2984_v19, %v2988_v21  ;;  %v3030_v39 = vmax.f32 %v9342_v37, %v9344_v25  ;;  %v3057_v37 = vmax.f32 %v3049_v16, %v3053_v31  ;;  %v2620_v25 = vld [vmem:[#allocation2 + $0x161] sm:$0xff] }
 0x198   :  { %v9416_v58 = vld [vmem:[#allocation2 + $0x278] sm:$0x1f]  ;;  %v2621_v19 = vld [vmem:[#allocation2 + $0x169] sm:$0xff]  ;;  %v3238_v49 = vmax.f32 %v9375_v13, %v9409_v41  ;;  %v2624_v0 = vmax.f32 %v2616_v33, %v2620_v25  ;;  %v3173_v13 = vmax.f32 %v9391_v9, %v9419_v56  ;;  %v3257_v33 = vmax.f32 %v9291_v59, %v3253_v22  ;;  %v9479_v31 = vld [vmem:[#allocation2 + $0x2c1] sm:$0xff] }
 0x199   :  { %v9434_v28 = vld [vmem:[#allocation2 + $0x279] sm:$0x1f]  ;;  %v2625_v51 = vmax.f32 %v9386_v62, %v2621_v19  ;;  %v3061_v38 = vmax.f32 %v9329_v23, %v3057_v37  ;;  %v2628_v41 = vld [vmem:[#allocation2 + $0x162] sm:$0xff]  ;;  %v9468_v62 = vpop.f32.mrb[52].mxu0  ;;  %v9470_v24 = vmax.f32 %v2972_v54, %v2992_v2 }
 0x19a   :  { %v3034_v15 = vld [vmem:[#allocation2 + $0x25a] sm:$0x1f]  ;;  %v3050_v52 = vmax.f32 %v9416_v58, %v9434_v28  ;;  %v3261_v58 = vld [vmem:[#allocation2 + $0x2f2] sm:$0xff]  ;;  %v2632_v5 = vmax.f32 %v2624_v0, %v2628_v41  ;;  %v2733_v23 = vld [vmem:[#allocation2 + $0x1a8] sm:$0xff]  ;;  %1814 = vst [vmem:[#allocation2 + $0x330] sm:$0xff] %v9468_v62  ;;  %v1761_v2 = vpop.f32.mrb[53].mxu0 }
 0x19b   :  { %v3189_v63 = vld [vmem:[#allocation2 + $0x2da] sm:$0x1f]  ;;  %v9466_v16 = vmax.f32 %v3030_v39, %v3034_v15  ;;  %v2982_v39 = vmax.f32 %v9219_v3, %v9451_v55  ;;  %v9482_v15 = vpop.f32.mrb[52].mxu1  ;;  %v9485_v54 = vmax.f32 %v3061_v38, %v9276_v18  ;;  %v2633_v37 = vmax.f32 %v2625_v51, %v2629_v44  ;;  %v2737_v25 = vld [vmem:[#allocation2 + $0x1a9] sm:$0xff]  ;;  %1812 = vst [vmem:[#allocation2 + $0x320] sm:$0xff] %v1761_v2  ;;  %v7963_v3 = vpop.f32.mrb[54].mxu0 }
 0x19c   :  { %v3242_v21 = vld [vmem:[#allocation2 + $0x2da] sm:$0x1f]  ;;  %v3193_v28 = vmax.f32 %v3185_v4, %v3189_v63  ;;  %v3183_v4 = vmax.f32 %v9234_v48, %v9453_v29  ;;  %v3277_v63 = vld [vmem:[#allocation2 + $0x311] sm:$0xff]  ;;  %2055 = vst [vmem:[#allocation2 + $0x3b0] sm:$0xff] %v9482_v15  ;;  %v3265_v55 = vmax.f32 %v3257_v33, %v3261_v58  ;;  %v2636_v0 = vmax.f32 %v9238_v60, %v2632_v5  ;;  %v2732_v22 = vld [vmem:[#allocation2 + $0x1a0] sm:$0xff]  ;;  %v1764_v51 = vpop.f32.mrb[55].mxu0 }
 0x19d   :  { %v3054_v26 = vld [vmem:[#allocation2 + $0x27a] sm:$0x1f]  ;;  %v9487_v19 = vmax.f32 %v3238_v49, %v3242_v21  ;;  %v2736_v41 = vld [vmem:[#allocation2 + $0x1a1] sm:$0xff]  ;;  %v3281_v18 = vmax.f32 %v9364_v1, %v3277_v63  ;;  %1815 = vst [vmem:[#allocation2 + $0x338] sm:$0xff] %v7963_v3  ;;  %v2637_v49 = vmax.f32 %v9200_v34, %v2633_v37  ;;  %v2741_v21 = vmax.f32 %v2733_v23, %v2737_v25  ;;  %v2745_v48 = vld [vmem:[#allocation2 + $0x1aa] sm:$0xff]  ;;  %v2002_v2 = vpop.f32.mrb[53].mxu1 }
 0x19e   :  { %v9472_v11 = vld [vmem:[#allocation2 + $0x2f8] sm:$0x1f]  ;;  %v9494_v38 = vmax.f32 %v3050_v52, %v3054_v26  ;;  %v2986_v29 = vld [vmem:[#allocation2 + $0x24a] sm:$0xff]  ;;  %1813 = vst [vmem:[#allocation2 + $0x328] sm:$0xff] %v1764_v51  ;;  %v3269_v60 = vmax.f32 %v9362_v17, %v3265_v55  ;;  %v9500_v5 = vmax.f32 %v2636_v0, %v9114_v8  ;;  %v3027_v1 = vmax.f32 %v9193_v47, %v9459_v30  ;;  %v7995_v23 = vpop.f32.mrb[54].mxu1  ;;  %v3239_v25 = vld [vmem:[#allocation2 + $0x2c2] sm:$0xff] }
 0x19f   :  { %v3254_v59 = vld [vmem:[#allocation2 + $0x2f9] sm:$0x1f]  ;;  %2053 = vst [vmem:[#allocation2 + $0x3a0] sm:$0xff] %v2002_v2  ;;  %v2740_v37 = vmax.f32 %v2732_v22, %v2736_v41  ;;  %v2359_v17 = vmax.f32 %v9249_v61, 0.0  ;;  %2056 = vst [vmem:[#allocation2 + $0x3b8] sm:$0xff] %v7995_v23  ;;  %v2005_v63 = vpop.f32.mrb[55].mxu1  ;;  %v2749_v55 = vmax.f32 %v2741_v21, %v2745_v48  ;;  %v9516_v0 = vmax.f32 %v2982_v39, %v2986_v29 }
 0x1a0   :  { %v3285_v44 = vld [vmem:[#allocation2 + $0x312] sm:$0xff]  ;;  %v3258_v33 = vmax.f32 %v9472_v11, %v3254_v59  ;;  %v3262_v58 = vld [vmem:[#allocation2 + $0x2fa] sm:$0x1f]  ;;  %v3235_v11 = vmax.f32 %v9206_v10, %v9479_v31  ;;  %v3187_v59 = vld [vmem:[#allocation2 + $0x2ca] sm:$0xff]  ;;  %2054 = vst [vmem:[#allocation2 + $0x3a8] sm:$0xff] %v2005_v63  ;;  %v3062_v61 = vmax.f32 %v9466_v16, %v9494_v38  ;;  %v9529_v31 = vmax.f32 %v3173_v13, %v3193_v28  ;;  %v9538_v48 = vpop.f32.mrb[56].mxu0 }
 0x1a1   :  { %v9504_v52 = vld [vmem:[#allocation2 + $0x318] sm:$0x1f]  ;;  %v9508_v26 = vmax.f32 %v3281_v18, %v3285_v44  ;;  %v11236_v3 = vld [vmem:[#allocation15_spill] sm:$0xff]  ;;  %v9522_v10 = vld [vmem:[#allocation2 + $0x309] sm:$0xff]  ;;  %v9546_v56 = vmax.f32 %v3183_v4, %v3187_v59  ;;  %1818 = vst [vmem:[#allocation2 + $0x350] sm:$0xff] %v9538_v48  ;;  %v9553_v44 = vpop.f32.mrb[56].mxu1 }
 0x1a2   :  { %v9506_v34 = vld [vmem:[#allocation2 + $0x319] sm:$0x1f]  ;;  %v9514_v47 = vmax.f32 %v2637_v49, %v11236_v3  ;;  %v2744_v30 = vld [vmem:[#allocation2 + $0x1a2] sm:$0xff]  ;;  %11237 = vst [vmem:[#allocation15_spill] sm:$0xff] %v9529_v31  ;;  %v9536_v21 = vld [vmem:[#allocation2 + $0x391] sm:$0xff]  ;;  %v9540_v29 = vmax.f32 %v3258_v33, %v3262_v58  ;;  %v2753_v9 = vmax.f32 %v11236_v3, %v2749_v55  ;;  %v9555_v2 = vpop.f32.mrb[57].mxu0 }
 0x1a3   :  { %v9518_v18 = vld [vmem:[#allocation2 + $0x318] sm:$0x1f]  ;;  %v3031_v51 = vld [vmem:[#allocation2 + $0x242] sm:$0xff]  ;;  %v3282_v39 = vmax.f32 %v9504_v52, %v9506_v34  ;;  %v9543_v16 = vmax.f32 %v3269_v60, %v9508_v26  ;;  %11239 = vst [vmem:[#allocation26_spill] sm:$0xff] %v9546_v56  ;;  %v9557_v33 = vmax.f32 %v2740_v37, %v2744_v30  ;;  %v9561_v60 = vpack.c.bf16 %v2359_v17, %v2359_v17  ;;  %v2018_v59 = vpop.f32.mrb[57].mxu1  ;;  %v7967_v37 = vpop.f32.mrb[58].mxu0 }
 0x1a4   :  { %v9520_v22 = vld [vmem:[#allocation2 + $0x319] sm:$0x1f]  ;;  %v9534_v49 = vld [vmem:[#allocation2 + $0x301] sm:$0xff]  ;;  %v9559_v58 = vmax.f32 %v3027_v1, %v3031_v51  ;;  %v3280_v52 = vmax.f32 %v9411_v12, %v9522_v10  ;;  %2059 = vst [vmem:[#allocation2 + $0x3d0] sm:$0xff] %v9553_v44  ;;  %1816 = vst [vmem:[#allocation2 + $0x340] sm:$0xff] %v9555_v2  ;;  %v9576_v30 = vmax.f32 %v3235_v11, %v3239_v25  ;;  %v7999_v51 = vpop.f32.mrb[58].mxu1 }
 0x1a5   :  { %11238 = vst [vmem:[#allocation25_spill] sm:$0xff] %v9543_v16  ;;  %v3286_v13 = vld [vmem:[#allocation2 + $0x31a] sm:$0x1f]  ;;  %v3344_v4 = vmax.f32 %v9518_v18, %v9520_v22  ;;  %v3488_v34 = vld [vmem:[#allocation2 + $0x392] sm:$0xff]  ;;  %v3284_v18 = vld [vmem:[#allocation2 + $0x30a] sm:$0xff]  ;;  %v3484_v12 = vmax.f32 %v9380_v53, %v9536_v21  ;;  %v9584_v41 = vpop.f32.mrb[59].mxu0 }
 0x1a6   :  { %v9548_v28 = vld [vmem:[#allocation2 + $0x398] sm:$0x1f]  ;;  %v9582_v10 = vld [vmem:[#allocation2 + $0x381] sm:$0xff]  ;;  %2057 = vst [vmem:[#allocation2 + $0x3c0] sm:$0xff] %v2018_v59  ;;  %1819 = vst [vmem:[#allocation2 + $0x358] sm:$0xff] %v7967_v37  ;;  %v11244_v25 = vmov 0  ;;  %v3290_v37 = vmax.f32 %v3282_v39, %v3286_v13  ;;  %v9637_v31 = vmax.f32 %v3280_v52, %v3284_v18 }
 0x1a7   :  { %v9550_v38 = vld [vmem:[#allocation2 + $0x399] sm:$0x1f]  ;;  %v3359_v1 = vld [vmem:[#allocation2 + $0x331] sm:$0xff]  ;;  %v11245_v25 = vsel %vm9591_vm5, 4294967295, %v11244_v25  ;;  %v11247_v53 = vrot.slane %v9407_v57, 5  ;;  %2060 = vst [vmem:[#allocation2 + $0x3d8] sm:$0xff] %v7999_v51  ;;  %v3270_v57 = vmax.f32 %v9487_v19, %v9540_v29  ;;  %v9644_v19 = vmax.f32 %v3484_v12, %v3488_v34 }
 0x1a8   :  { %v9567_v23 = vld [vmem:[#allocation2 + $0x398] sm:$0x1f]  ;;  %v3363_v11 = vmax.f32 %v9468_v62, %v3359_v1  ;;  %v9600_v59 = vld [vmem:[%s11152_s2] ss:$0 sm:$0xff]  ;;  %v9606_v62 = vld [vmem:[#allocation2 + $0x389] sm:$0xff]  ;;  %1817 = vst [vmem:[#allocation2 + $0x348] sm:$0xff] %v9584_v41  ;;  %v3482_v52 = vmax.f32 %v9397_v43, %v9582_v10 }
 0x1a9   :  { %v9571_v63 = vld [vmem:[#allocation3 + $0x10] ss:$2 sm:$0x7f]  ;;  %v2370_v21 = vrot.slane %v11247_v53, 4  ;;  %v2021_v1 = vpop.f32.mrb[59].mxu1  ;;  %11250 = vst [vmem:[#allocation28_spill] sm:$0xff] %v9637_v31  ;;  %v3483_v56 = vmax.f32 %v9432_v14, %v9606_v62 }
 0x1aa   :  { %v11240_v17 = vld [vmem:[#allocation18_spill] sm:$0xff]  ;;  %v9616_v16 = vld [vmem:[#allocation3] ss:$2 sm:$0xff]  ;;  %2058 = vst [vmem:[#allocation2 + $0x3c8] sm:$0xff] %v2021_v1 }
 0x1ab   :  { %v9574_v3 = vmax.f32 %v2753_v9, %v11240_v17  ;;  %11241 = vst [vmem:[#allocation18_spill] sm:$0xff] %v9576_v30  ;;  %v3348_v55 = vld [vmem:[#allocation2 + $0x31a] sm:$0x1f]  ;;  %v11243_v9 = vld [vmem:[#allocation19_spill] sm:$0xff]  ;;  %v3367_v45 = vld [vmem:[#allocation2 + $0x332] sm:$0xff] }
 0x1ac   :  { %v9580_v22 = vld [vmem:[#allocation2 + $0x399] sm:$0x1f]  ;;  %2783 = vst [vmem:[#allocation3 + $0x18] sm:$0x1f] %v11243_v9  ;;  %v9610_v9 = vmax.f32 %v3062_v61, %v9427_v42  ;;  %v9624_v51 = vmax.f32 %v3363_v11, %v3367_v45  ;;  %v3567_v61 = vld [vmem:[#allocation2 + $0x3b1] sm:$0xff]  ;;  %2664 = vst [vmem:[#allocation3] sm:$0xff] %v9500_v5  ;;  %v9635_v1 = vmax.f32 %v3344_v4, %v3348_v55 }
 0x1ad   :  { %v11242_v6 = vld [vmem:[#allocation14_spill] sm:$0xff]  ;;  %2665 = vst [vmem:[#allocation3 + $0x8] sm:$0xff] %v9514_v47  ;;  %v3345_v45 = vld [vmem:[#allocation2 + $0x302] sm:$0xff]  ;;  %v3485_v11 = vmax.f32 %v9548_v28, %v9550_v38  ;;  %v3571_v5 = vmax.f32 %v9482_v15, %v3567_v61  ;;  %v11251_v28 = vrot.slane %v9561_v60, 5  ;;  %v9654_v38 = vpop.f32.mrb[60].mxu0 }
 0x1ae   :  { %2782 = vst [vmem:[#allocation3 + $0x10] sm:$0xff] %v11242_v6  ;;  %11246 = vst [vmem:[#allocation14_spill] sm:$0xff] %v11245_v25  ;;  %v9604_v6 = vadd.f32 %v9600_v59, %v9399_v40  ;;  %v9614_v53 = vld [vmem:[#allocation2 + $0x338] sm:$0x1f]  ;;  %v9620_v40 = vadd.f32 %v9600_v59, %v9436_v35  ;;  %v3341_v35 = vmax.f32 %v9378_v32, %v9534_v49  ;;  %v2756_v30 = vld [vmem:[#allocation2 + $0x1c0] sm:$0xff] }
 0x1af   :  { %11249 = vst [vmem:[#allocation27_spill] sm:$0xff] %v9610_v9  ;;  %v3489_v39 = vld [vmem:[#allocation2 + $0x39a] sm:$0x1f]  ;;  %v3575_v47 = vld [vmem:[#allocation2 + $0x3b2] sm:$0xff]  ;;  %v3552_v32 = vmax.f32 %v9567_v23, %v9580_v22  ;;  %v3486_v4 = vld [vmem:[#allocation2 + $0x382] sm:$0xff]  ;;  %v2372_v15 = vsel %vm9591_vm5, %v2370_v21, %v11251_v28  ;;  %v1793_v21 = vpop.f32.mrb[61].mxu0  ;;  %v9665_v28 = vmax.f32 %v3270_v57, %v3290_v37 }
 0x1b0   :  { %11248 = vst [vmem:[#allocation19_spill] sm:$0xff] %v9604_v6  ;;  %v9622_v13 = vld [vmem:[#allocation2 + $0x339] sm:$0x1f]  ;;  %v2760_v55 = vld [vmem:[#allocation2 + $0x1c1] sm:$0xff]  ;;  %v9658_v12 = vmax.f32 %v3571_v5, %v3575_v47  ;;  %v2838_v31 = vld [vmem:[#allocation2 + $0x1e9] sm:$0xff]  ;;  %v8002_v47 = vpop.f32.mrb[60].mxu1 }
 0x1b1   :  { %v9626_v42 = vld [vmem:[#allocation2 + $0x3b8] sm:$0x1f]  ;;  %v2768_v18 = vld [vmem:[#allocation2 + $0x1c2] sm:$0xff]  ;;  %v3364_v34 = vmax.f32 %v9614_v53, %v9622_v13  ;;  %v2764_v23 = vmax.f32 %v2756_v30, %v2760_v55  ;;  %2378 = vst [vmem:[#allocation9 + $0x28] sm:$0xf] %v2372_v15  ;;  %v3487_v25 = vld [vmem:[#allocation2 + $0x38a] sm:$0xff]  ;;  %v9667_v30 = vmax.f32 %v3341_v35, %v3345_v45  ;;  %v9669_v55 = vmax.f32 %v3485_v11, %v3489_v39 }
 0x1b2   :  { %v9641_v6 = vld [vmem:[#allocation2 + $0x3b9] sm:$0x1f]  ;;  %v2833_v29 = vld [vmem:[#allocation2 + $0x1e0] sm:$0xff]  ;;  %v2834_v22 = vld [vmem:[#allocation2 + $0x1e8] sm:$0xff]  ;;  %1822 = vst [vmem:[#allocation2 + $0x370] sm:$0xff] %v9654_v38  ;;  %v7971_v15 = vpop.f32.mrb[62].mxu0 }
 0x1b3   :  { %v3556_v49 = vld [vmem:[#allocation2 + $0x39a] sm:$0x1f]  ;;  %v2837_v61 = vld [vmem:[#allocation2 + $0x1e1] sm:$0xff]  ;;  %11252 = vst [vmem:[#allocation29_spill] sm:$0xff] %v9665_v28  ;;  %v2842_v13 = vmax.f32 %v2834_v22, %v2838_v31  ;;  %v2846_v5 = vld [vmem:[#allocation2 + $0x1ea] sm:$0xff]  ;;  %v3572_v14 = vmax.f32 %v9626_v42, %v9641_v6  ;;  %v9676_v35 = vpop.f32.mrb[63].mxu0  ;;  %v2772_v39 = vmax.f32 %v2764_v23, %v2768_v18 }
 0x1b4   :  { %v3368_v53 = vld [vmem:[#allocation2 + $0x33a] sm:$0x1f]  ;;  %v3383_v43 = vld [vmem:[#allocation2 + $0x351] sm:$0xff]  ;;  %1820 = vst [vmem:[#allocation2 + $0x360] sm:$0xff] %v1793_v21  ;;  %v2841_v62 = vmax.f32 %v2833_v29, %v2837_v61  ;;  %1823 = vst [vmem:[#allocation2 + $0x378] sm:$0xff] %v7971_v15  ;;  %v2460_v22 = vmax.f32 %v9620_v40, 0.0  ;;  %v9679_v21 = vmax.f32 %v3552_v32, %v3556_v49  ;;  %v9695_v40 = vmax.f32 %v3483_v56, %v3487_v25 }
 0x1b5   :  { %v3380_v9 = vld [vmem:[#allocation2 + $0x358] sm:$0x1f]  ;;  %v3387_v31 = vmax.f32 %v9538_v48, %v3383_v43  ;;  %v2845_v45 = vld [vmem:[#allocation2 + $0x1e2] sm:$0xff]  ;;  %v2850_v11 = vmax.f32 %v2842_v13, %v2846_v5  ;;  %v9685_v42 = vmax.f32 %v3364_v34, %v3368_v53  ;;  %1821 = vst [vmem:[#allocation2 + $0x368] sm:$0xff] %v9676_v35  ;;  %v9688_v48 = vmax.f32 %v3482_v52, %v3486_v4  ;;  %v2034_v29 = vpop.f32.mrb[61].mxu1 }
 0x1b6   :  { %v3384_v10 = vld [vmem:[#allocation2 + $0x359] sm:$0x1f]  ;;  %v11253_v18 = vmax.f32 %v9447_v20, 0.0  ;;  %v8003_v61 = vpop.f32.mrb[62].mxu1  ;;  %v9701_v34 = vadd.f32 %v9600_v59, %v9571_v63  ;;  %v9703_v13 = vld [vmem:[#allocation2 + $0x349] sm:$0xff]  ;;  %v3591_v20 = vld [vmem:[#allocation2 + $0x3d1] sm:$0xff]  ;;  %v9709_v5 = vmax.f32 %v2841_v62, %v2845_v45  ;;  %v11255_v15 = vmax.f32 %v9508_v26, %v9624_v51 }
 0x1b7   :  { %v3576_v57 = vld [vmem:[#allocation2 + $0x3ba] sm:$0x1f]  ;;  %v3391_v47 = vld [vmem:[#allocation2 + $0x352] sm:$0xff]  ;;  %v3388_v32 = vmax.f32 %v3380_v9, %v3384_v10  ;;  %v2854_v56 = vmax.f32 %v11240_v17, %v2850_v11  ;;  %v2857_v25 = vld [vmem:[#allocation2 + $0x200] sm:$0xff]  ;;  %v9714_v9 = vadd.f32 %v9600_v59, %v9616_v16  ;;  %v11257_v16 = vmax.f32 %v9114_v8, %v9557_v33  ;;  %v9747_v8 = vpop.f32.mrb[64].mxu0 }
 0x1b8   :  { %v9681_v28 = vld [vmem:[#allocation2 + $0x358] sm:$0x1f]  ;;  %v9693_v23 = vpack.c.bf16 %v11253_v18, %v11253_v18  ;;  %v9697_v49 = vmax.f32 %v3387_v31, %v3391_v47  ;;  %v9707_v52 = vmax.f32 %v3572_v14, %v3576_v57  ;;  %v9718_v43 = vld [vmem:[#allocation2 + $0x341] sm:$0xff]  ;;  %v11254_v10 = vld [vmem:[#allocation17_spill] sm:$0xff]  ;;  %v11258_v57 = vrot.slane %v9561_v60, 5  ;;  %3866 = vst [vmem:[#allocation2 + $0x10] sm:$0xff] %v9747_v8 }
 0x1b9   :  { %v9683_v6 = vld [vmem:[#allocation2 + $0x359] sm:$0x1f]  ;;  %v2776_v31 = vmax.f32 %v11257_v16, %v2772_v39  ;;  %v3595_v26 = vmax.f32 %v9553_v44, %v3591_v20  ;;  %v9742_v51 = vld [vmem:[#allocation3] ss:$2 sm:$0xff]  ;;  %v11260_v29 = vld [vmem:[#allocation21_spill] sm:$0xff]  ;;  %v9749_v33 = vpack.c.bf16 %v2460_v22, %v2460_v22  ;;  %v3386_v39 = vmax.f32 %v9584_v41, %v9703_v13  ;;  %v9757_v20 = vpop.f32.mrb[65].mxu0 }
 0x1ba   :  { %v3392_v53 = vld [vmem:[#allocation2 + $0x35a] sm:$0x1f]  ;;  %v3441_v63 = vmax.f32 %v9681_v28, %v9683_v6  ;;  %v9726_v14 = vmax.f32 %v11255_v15, %v9697_v49  ;;  %v3599_v62 = vld [vmem:[#allocation2 + $0x3d2] sm:$0xff]  ;;  %v2037_v28 = vpop.f32.mrb[63].mxu1  ;;  %v9735_v45 = vrot.slane %v11258_v57, 4  ;;  %v2861_v6 = vld [vmem:[#allocation2 + $0x201] sm:$0xff]  ;;  %v9745_v18 = vmax.f32 %v2854_v56, %v11260_v29 }
 0x1bb   :  { %v9705_v4 = vld [vmem:[#allocation3 + $0x10] ss:$2 sm:$0x7f]  ;;  %v3396_v60 = vmax.f32 %v3388_v32, %v3392_v53  ;;  %2780 = vst [vmem:[#allocation3] sm:$0xff] %v2776_v31  ;;  %2781 = vst [vmem:[#allocation3 + $0x8] sm:$0xff] %v9574_v3  ;;  %v2950_v44 = vld [vmem:[#allocation2 + $0x228] sm:$0xff]  ;;  %v3603_v13 = vmax.f32 %v3595_v26, %v3599_v62  ;;  %v3438_v16 = vmax.f32 %v9555_v2, %v9718_v43 }
 0x1bc   :  { %2883 = vst [vmem:[#allocation3 + $0x10] sm:$0xff] %v11254_v10  ;;  %2884 = vst [vmem:[#allocation3 + $0x18] sm:$0x1f] %v9346_v50  ;;  %v9728_v17 = vld [vmem:[#allocation2 + $0x3d8] sm:$0x1f]  ;;  %v3376_v50 = vmax.f32 %v9635_v1, %v9685_v42  ;;  %v2865_v1 = vmax.f32 %v2857_v25, %v2861_v6  ;;  %v2869_v42 = vld [vmem:[#allocation2 + $0x202] sm:$0xff] }
 0x1bd   :  { %11256 = vst [vmem:[#allocation17_spill] sm:$0xff] %v9726_v14  ;;  %11259 = vst [vmem:[#allocation30_spill] sm:$0xff] %v9735_v45  ;;  %v3445_v11 = vld [vmem:[#allocation2 + $0x35a] sm:$0x1f]  ;;  %v9754_v61 = vld [vmem:[#allocation2 + $0x221] sm:$0xff]  ;;  %v9759_v56 = vpop.f32.mrb[64].mxu1 }
 0x1be   :  { %v9739_v47 = vld [vmem:[#allocation2 + $0x3d9] sm:$0x1f]  ;;  %v3390_v32 = vld [vmem:[#allocation2 + $0x34a] sm:$0xff]  ;;  %3864 = vst [vmem:[#allocation2] sm:$0xff] %v9757_v20  ;;  %v8023_v31 = vpop.f32.mrb[66].mxu0  ;;  %4107 = vst [vmem:[#allocation2 + $0x90] sm:$0xff] %v9759_v56  ;;  %v9770_v28 = vmax.f32 %v3441_v63, %v3445_v11  ;;  %v2873_v3 = vmax.f32 %v2865_v1, %v2869_v42  ;;  %v11262_v63 = vmax.f32 %v9644_v19, %v9658_v12 }
 0x1bf   :  { %v3453_v53 = vld [vmem:[#allocation2 + $0x378] sm:$0x1f]  ;;  %v11261_v25 = vld [vmem:[#allocation20_spill] sm:$0xff]  ;;  %v2949_v62 = vld [vmem:[#allocation2 + $0x220] sm:$0xff]  ;;  %3867 = vst [vmem:[#allocation2 + $0x18] sm:$0xff] %v8023_v31  ;;  %v3596_v45 = vmax.f32 %v9728_v17, %v9739_v47 }
 0x1c0   :  { %v3456_v10 = vld [vmem:[#allocation2 + $0x371] sm:$0xff]  ;;  %v3457_v41 = vld [vmem:[#allocation2 + $0x379] sm:$0x1f]  ;;  %v2853_v15 = vmax.f32 %v11261_v25, %v9709_v5  ;;  %v3442_v57 = vld [vmem:[#allocation2 + $0x342] sm:$0xff]  ;;  %v9773_v5 = vpop.f32.mrb[67].mxu0  ;;  %v9775_v25 = vpop.f32.mrb[65].mxu1  ;;  %v9782_v11 = vmax.f32 %v11262_v63, %v3603_v13 }
 0x1c1   :  { %v3460_v6 = vmax.f32 %v9654_v38, %v3456_v10  ;;  %v3461_v22 = vmax.f32 %v3453_v53, %v3457_v41  ;;  %v3600_v37 = vld [vmem:[#allocation2 + $0x3da] sm:$0x1f]  ;;  %v2954_v26 = vld [vmem:[#allocation2 + $0x229] sm:$0xff]  ;;  %v3464_v2 = vld [vmem:[#allocation2 + $0x372] sm:$0xff]  ;;  %v2957_v38 = vmax.f32 %v2949_v62, %v9754_v61  ;;  %3865 = vst [vmem:[#allocation2 + $0x8] sm:$0xff] %v9773_v5  ;;  %v8055_v53 = vpop.f32.mrb[66].mxu1  ;;  %v9787_v10 = vmax.f32 %v3386_v39, %v3390_v32 }
 0x1c2   :  { %v3465_v43 = vld [vmem:[#allocation2 + $0x37a] sm:$0x1f]  ;;  %11263 = vst [vmem:[#allocation21_spill] sm:$0xff] %v9782_v11  ;;  %v2958_v1 = vmax.f32 %v2950_v44, %v2954_v26  ;;  %v2962_v42 = vld [vmem:[#allocation2 + $0x22a] sm:$0xff]  ;;  %4105 = vst [vmem:[#allocation2 + $0x80] sm:$0xff] %v9775_v25  ;;  %v9789_v41 = vmax.f32 %v3376_v50, %v3396_v60  ;;  %v9791_v13 = vpop.f32.mrb[67].mxu1  ;;  %v9798_v32 = vmax.f32 %v3438_v16, %v3442_v57 }
 0x1c3   :  { %v3468_v31 = vmax.f32 %v3460_v6, %v3464_v2  ;;  %v2961_v17 = vld [vmem:[#allocation2 + $0x222] sm:$0xff]  ;;  %4108 = vst [vmem:[#allocation2 + $0x98] sm:$0xff] %v8055_v53  ;;  %v2472_v44 = vshrl.u32 %v9749_v33, 16  ;;  %v9794_v61 = vld [vmem:[#allocation3 + $0x10] ss:$2 sm:$0x7f]  ;;  %v9796_v62 = vmax.f32 %v3461_v22, %v3465_v43  ;;  %v9803_v50 = vadd.f32 %v9600_v59, %v9742_v51 }
 0x1c4   :  { %11264 = vst [vmem:[#allocation20_spill] sm:$0xff] %v9789_v41  ;;  %v2973_v47 = vld [vmem:[#allocation2 + $0x240] sm:$0xff]  ;;  %11265 = vst [vmem:[#allocation31_spill] sm:$0xff] %v9794_v61  ;;  %v2966_v26 = vmax.f32 %v2958_v1, %v2962_v42  ;;  %v3040_v63 = vld [vmem:[#allocation2 + $0x268] sm:$0xff]  ;;  %v2877_v6 = vmax.f32 %v2853_v15, %v2873_v3  ;;  %v3604_v16 = vmax.f32 %v3596_v45, %v3600_v37 }
 0x1c5   :  { %v2977_v14 = vld [vmem:[#allocation2 + $0x241] sm:$0xff]  ;;  %4106 = vst [vmem:[#allocation2 + $0x88] sm:$0xff] %v9791_v13  ;;  %2999 = vst [vmem:[#allocation3 + $0x10] sm:$0xff] %v9352_v46  ;;  %v3472_v60 = vmax.f32 %v9697_v49, %v3468_v31  ;;  %v3044_v2 = vld [vmem:[#allocation2 + $0x269] sm:$0xff]  ;;  %v9810_v53 = vmax.f32 %v2957_v38, %v2961_v17  ;;  %v9824_v38 = vrot.slane %v2472_v44, 7  ;;  %v9828_v31 = vadd.f32 %v9600_v59, %v9705_v4 }
 0x1c6   :  { %v3039_v12 = vld [vmem:[#allocation2 + $0x260] sm:$0xff]  ;;  %3000 = vst [vmem:[#allocation3 + $0x18] sm:$0x1f] %v9470_v24  ;;  %v2981_v22 = vmax.f32 %v2973_v47, %v2977_v14  ;;  %v3052_v42 = vld [vmem:[#allocation2 + $0x26a] sm:$0xff]  ;;  %v2970_v51 = vmax.f32 %v11260_v29, %v2966_v26  ;;  %v3048_v41 = vmax.f32 %v3040_v63, %v3044_v2  ;;  %v9813_v24 = vpop.f32.mrb[68].mxu0  ;;  %v9822_v29 = vpop.f32.mrb[68].mxu1 }
 0x1c7   :  { %v3043_v39 = vld [vmem:[#allocation2 + $0x261] sm:$0xff]  ;;  %v9816_v49 = vmax.f32 %v3472_v60, %v9644_v19  ;;  %v3155_v45 = vld [vmem:[#allocation2 + $0x2a9] sm:$0xff]  ;;  %3870 = vst [vmem:[#allocation2 + $0x30] sm:$0xff] %v9813_v24  ;;  %v9820_v15 = vpop.f32.mrb[69].mxu0  ;;  %v3473_v19 = vmax.f32 %v9770_v28, %v9796_v62  ;;  %4111 = vst [vmem:[#allocation2 + $0xb0] sm:$0xff] %v9822_v29  ;;  %v9835_v44 = vpop.f32.mrb[69].mxu1 }
 0x1c8   :  { %v3047_v43 = vmax.f32 %v3039_v12, %v3043_v39  ;;  %v3051_v1 = vld [vmem:[#allocation2 + $0x262] sm:$0xff]  ;;  %v3056_v17 = vmax.f32 %v3048_v41, %v3052_v42  ;;  %v3163_v12 = vld [vmem:[#allocation2 + $0x2aa] sm:$0xff]  ;;  %3868 = vst [vmem:[#allocation2 + $0x20] sm:$0xff] %v9820_v15  ;;  %v8027_v39 = vpop.f32.mrb[70].mxu0  ;;  %4109 = vst [vmem:[#allocation2 + $0xa0] sm:$0xff] %v9835_v44  ;;  %v11266_v42 = vmax.f32 %v9679_v21, %v9707_v52 }
 0x1c9   :  { %v9808_v57 = vld [vmem:[#allocation3] ss:$2 sm:$0xff]  ;;  %3871 = vst [vmem:[#allocation2 + $0x38] sm:$0xff] %v8027_v39  ;;  %v9838_v41 = vpop.f32.mrb[71].mxu0 }
 0x1ca   :  { %v2985_v11 = vld [vmem:[#allocation2 + $0x242] sm:$0xff]  ;;  %2881 = vst [vmem:[#allocation3] sm:$0xff] %v2877_v6  ;;  %2882 = vst [vmem:[#allocation3 + $0x8] sm:$0xff] %v9745_v18  ;;  %v3055_v14 = vmax.f32 %v3047_v43, %v3051_v1  ;;  %v2994_v18 = vmax.f32 %v2970_v51, %v9516_v0  ;;  %v8059_v1 = vpop.f32.mrb[70].mxu1  ;;  %v9844_v51 = vmax.f32 %v11266_v42, %v3604_v16  ;;  %v3260_v16 = vld [vmem:[#allocation2 + $0x2ea] sm:$0xff] }
 0x1cb   :  { %v3150_v46 = vld [vmem:[#allocation2 + $0x2a0] sm:$0xff]  ;;  %v3151_v61 = vld [vmem:[#allocation2 + $0x2a8] sm:$0xff]  ;;  %v2989_v60 = vmax.f32 %v2981_v22, %v2985_v11  ;;  %v2969_v11 = vmax.f32 %v9388_v7, %v9810_v53  ;;  %3869 = vst [vmem:[#allocation2 + $0x28] sm:$0xff] %v9838_v41  ;;  %4112 = vst [vmem:[#allocation2 + $0xb8] sm:$0xff] %v8059_v1  ;;  %v2475_v7 = vshll.u32 %v9749_v33, 16  ;;  %v9860_v53 = vmax.f32 %v3473_v19, %v9669_v55 }
 0x1cc   :  { %v3154_v37 = vld [vmem:[#allocation2 + $0x2a1] sm:$0xff]  ;;  %v3059_v4 = vmax.f32 %v9559_v58, %v3055_v14  ;;  %v3159_v6 = vmax.f32 %v3151_v61, %v3155_v45  ;;  %11267 = vst [vmem:[#allocation32_spill] sm:$0xff] %v9844_v51  ;;  %v3060_v58 = vmax.f32 %v9516_v0, %v3056_v17  ;;  %v9850_v14 = vpop.f32.mrb[71].mxu1  ;;  %v3358_v1 = vld [vmem:[#allocation2 + $0x329] sm:$0xff] }
 0x1cd   :  { %v3162_v3 = vld [vmem:[#allocation2 + $0x2a2] sm:$0xff]  ;;  %v3158_v47 = vmax.f32 %v3150_v46, %v3154_v37  ;;  %4110 = vst [vmem:[#allocation2 + $0xa8] sm:$0xff] %v9850_v14  ;;  %v9857_v0 = vld [vmem:[#allocation3 + $0x10] ss:$2 sm:$0x7f]  ;;  %11269 = vst [vmem:[#allocation34_spill] sm:$0xff] %v9860_v53  ;;  %v2993_v39 = vmax.f32 %v2969_v11, %v2989_v60 }
 0x1ce   :  { %v3174_v26 = vld [vmem:[#allocation2 + $0x2c0] sm:$0xff]  ;;  %v3248_v43 = vld [vmem:[#allocation2 + $0x2e8] sm:$0xff]  ;;  %v9853_v37 = vmax.f32 %v3059_v4, %v9438_v27  ;;  %v3167_v45 = vmax.f32 %v3159_v6, %v3163_v12  ;;  %11268 = vst [vmem:[#allocation33_spill] sm:$0xff] %v9857_v0  ;;  %3089 = vst [vmem:[#allocation3 + $0x10] sm:$0xff] %v9485_v54 }
 0x1cf   :  { %v3178_v63 = vld [vmem:[#allocation2 + $0x2c1] sm:$0xff]  ;;  %v3166_v61 = vmax.f32 %v3158_v47, %v3162_v3  ;;  %v3252_v46 = vld [vmem:[#allocation2 + $0x2e9] sm:$0xff]  ;;  %v9863_v3 = vmax.f32 %v3060_v58, %v9457_v36  ;;  %v9876_v58 = vpop.f32.mrb[72].mxu0  ;;  %v11272_v60 = vld [vmem:[#allocation26_spill] sm:$0xff] }
 0x1d0   :  { %v3182_v2 = vmax.f32 %v3174_v26, %v3178_v63  ;;  %v3186_v28 = vld [vmem:[#allocation2 + $0x2c2] sm:$0xff]  ;;  %v3256_v47 = vmax.f32 %v3248_v43, %v3252_v46  ;;  %v3171_v4 = vmax.f32 %v9457_v36, %v3167_v45  ;;  %v9879_v36 = vor.u32 %v2475_v7, %v9824_v38  ;;  %v3366_v46 = vld [vmem:[#allocation2 + $0x32a] sm:$0xff]  ;;  %3874 = vst [vmem:[#allocation2 + $0x50] sm:$0xff] %v9876_v58 }
 0x1d1   :  { %v3247_v62 = vld [vmem:[#allocation2 + $0x2e0] sm:$0xff]  ;;  %v3354_v33 = vld [vmem:[#allocation2 + $0x328] sm:$0xff] }
 0x1d2   :  { %v3251_v22 = vld [vmem:[#allocation2 + $0x2e1] sm:$0xff]  ;;  %v3190_v17 = vmax.f32 %v3182_v2, %v3186_v28  ;;  %v3170_v2 = vmax.f32 %v9438_v27, %v3166_v61  ;;  %v3264_v43 = vmax.f32 %v3256_v47, %v3260_v16  ;;  %v9882_v11 = vmax.f32 %v3171_v4, %v11272_v60  ;;  %v9889_v61 = vpop.f32.mrb[72].mxu1  ;;  %v3574_v0 = vld [vmem:[#allocation2 + $0x3aa] sm:$0xff] }
 0x1d3   :  { %v3255_v21 = vmax.f32 %v3247_v62, %v3251_v22  ;;  %v3259_v52 = vld [vmem:[#allocation2 + $0x2e2] sm:$0xff]  ;;  %v3362_v22 = vmax.f32 %v3354_v33, %v3358_v1  ;;  %11273 = vst [vmem:[#allocation26_spill] sm:$0xff] %v9889_v61  ;;  %4115 = vst [vmem:[#allocation2 + $0xd0] sm:$0xff] %v9889_v61  ;;  %v9905_v4 = vpop.f32.mrb[73].mxu1  ;;  %v2483_v33 = vshll.u32 %v9693_v23, 16  ;;  %v11277_v61 = vld [vmem:[#allocation18_spill] sm:$0xff] }
 0x1d4   :  { %v3275_v26 = vld [vmem:[#allocation2 + $0x301] sm:$0xff]  ;;  %v3268_v7 = vmax.f32 %v11272_v60, %v3264_v43  ;;  %11276 = vst [vmem:[#allocation36_spill] sm:$0xff] %v9905_v4  ;;  %v3463_v60 = vld [vmem:[#allocation2 + $0x36a] sm:$0xff]  ;;  %4113 = vst [vmem:[#allocation2 + $0xc0] sm:$0xff] %v9905_v4  ;;  %v8063_v55 = vpop.f32.mrb[74].mxu1 }
 0x1d5   :  { %v3271_v63 = vld [vmem:[#allocation2 + $0x300] sm:$0xff]  ;;  %v9874_v28 = vmax.f32 %v3255_v21, %v3259_v52  ;;  %v9891_v21 = vpop.f32.mrb[73].mxu0  ;;  %v11275_v52 = vshrl.u32 %v9693_v23, 16  ;;  %4116 = vst [vmem:[#allocation2 + $0xd8] sm:$0xff] %v8063_v55 }
 0x1d6   :  { %v11270_v12 = vld [vmem:[#allocation27_spill] sm:$0xff]  ;;  %v3279_v6 = vmax.f32 %v3271_v63, %v3275_v26  ;;  %11274 = vst [vmem:[#allocation35_spill] sm:$0xff] %v9891_v21  ;;  %v9899_v26 = vmax.f32 %v3170_v2, %v3190_v17  ;;  %3872 = vst [vmem:[#allocation2 + $0x40] sm:$0xff] %v9891_v21 }
 0x1d7   :  { %3090 = vst [vmem:[#allocation3 + $0x18] sm:$0x1f] %v11270_v12  ;;  %v9868_v62 = vld [vmem:[#allocation2 + $0x321] sm:$0xff]  ;;  %11271 = vst [vmem:[#allocation27_spill] sm:$0xff] %v9876_v58  ;;  %v2482_v16 = vrot.slane %v11275_v52, 7  ;;  %v3370_v52 = vmax.f32 %v3362_v22, %v3366_v46  ;;  %v3267_v21 = vmax.f32 %v11277_v61, %v9874_v28  ;;  %v3566_v22 = vld [vmem:[#allocation2 + $0x3a9] sm:$0xff] }
 0x1d8   :  { %v9871_v19 = vld [vmem:[#allocation3] ss:$2 sm:$0xff] }
 0x1d9   :  { %v3283_v54 = vld [vmem:[#allocation2 + $0x302] sm:$0xff]  ;;  %2997 = vst [vmem:[#allocation3] sm:$0xff] %v2993_v39  ;;  %2998 = vst [vmem:[#allocation3 + $0x8] sm:$0xff] %v2994_v18  ;;  %v9897_v18 = vadd.f32 %v9600_v59, %v9808_v57 }
 0x1da   :  { %v3353_v42 = vld [vmem:[#allocation2 + $0x320] sm:$0xff]  ;;  %v3455_v39 = vld [vmem:[#allocation2 + $0x369] sm:$0xff]  ;;  %v3287_v1 = vmax.f32 %v3279_v6, %v3283_v54 }
 0x1db   :  { %v9884_v45 = vld [vmem:[#allocation2 + $0x340] sm:$0xff]  ;;  %v3361_v47 = vmax.f32 %v3353_v42, %v9868_v62  ;;  %v3459_v2 = vmax.f32 %v9676_v35, %v3455_v39  ;;  %v8031_v42 = vpop.f32.mrb[74].mxu0  ;;  %v11278_v58 = vld [vmem:[#allocation28_spill] sm:$0xff]  ;;  %v2571_v35 = vmax.f32 %v9714_v9, 0.0 }
 0x1dc   :  { %v9886_v27 = vld [vmem:[#allocation2 + $0x341] sm:$0xff]  ;;  %v9913_v51 = vmax.f32 %v3268_v7, %v11278_v58  ;;  %3875 = vst [vmem:[#allocation2 + $0x58] sm:$0xff] %v8031_v42  ;;  %v9918_v46 = vpop.f32.mrb[75].mxu0 }
 0x1dd   :  { %v3450_v63 = vld [vmem:[#allocation2 + $0x360] sm:$0xff]  ;;  %v3385_v23 = vmax.f32 %v9884_v45, %v9886_v27  ;;  %v3562_v6 = vld [vmem:[#allocation2 + $0x3a8] sm:$0xff]  ;;  %11279 = vst [vmem:[#allocation18_spill] sm:$0xff] %v9918_v46  ;;  %v3467_v7 = vmax.f32 %v3459_v2, %v3463_v60  ;;  %3873 = vst [vmem:[#allocation2 + $0x48] sm:$0xff] %v9918_v46  ;;  %v9939_v46 = vpop.f32.mrb[76].mxu0 }
 0x1de   :  { %v3454_v12 = vld [vmem:[#allocation2 + $0x361] sm:$0xff]  ;;  %v9925_v9 = vld [vmem:[#allocation3 + $0x10] ss:$2 sm:$0x7f]  ;;  %v3570_v27 = vmax.f32 %v3562_v6, %v3566_v22  ;;  %3878 = vst [vmem:[#allocation2 + $0x70] sm:$0xff] %v9939_v46 }
 0x1df   :  { %v3365_v57 = vld [vmem:[#allocation2 + $0x322] sm:$0xff]  ;;  %v3458_v17 = vmax.f32 %v3450_v63, %v3454_v12  ;;  %v9920_v63 = vpop.f32.mrb[75].mxu1  ;;  %v3374_v12 = vmax.f32 %v11278_v58, %v3370_v52  ;;  %v9927_v58 = vor.u32 %v2483_v33, %v2482_v16  ;;  %v3598_v22 = vld [vmem:[#allocation2 + $0x3ca] sm:$0xff] }
 0x1e0   :  { %v3462_v43 = vld [vmem:[#allocation2 + $0x362] sm:$0xff]  ;;  %11280 = vst [vmem:[#allocation28_spill] sm:$0xff] %v9920_v63  ;;  %4114 = vst [vmem:[#allocation2 + $0xc8] sm:$0xff] %v9920_v63  ;;  %v3369_v55 = vmax.f32 %v3361_v47, %v3365_v57  ;;  %v3471_v47 = vmax.f32 %v9787_v10, %v3467_v7 }
 0x1e1   :  { %v3561_v62 = vld [vmem:[#allocation2 + $0x3a0] sm:$0xff]  ;;  %v3466_v61 = vmax.f32 %v3458_v17, %v3462_v43  ;;  %v3586_v42 = vld [vmem:[#allocation2 + $0x3c8] sm:$0xff]  ;;  %v9933_v60 = vmax.f32 %v3374_v12, %v9787_v10  ;;  %v9943_v10 = vmax.f32 %v3267_v21, %v3287_v1  ;;  %v9951_v12 = vld [vmem:[#allocation2 + $0x18] sm:$0x1f] }
 0x1e2   :  { %v3565_v54 = vld [vmem:[#allocation2 + $0x3a1] sm:$0xff]  ;;  %v3590_v6 = vld [vmem:[#allocation2 + $0x3c9] sm:$0xff] }
 0x1e3   :  { %v3389_v28 = vld [vmem:[#allocation2 + $0x342] sm:$0xff]  ;;  %v3569_v39 = vmax.f32 %v3561_v62, %v3565_v54  ;;  %v3470_v62 = vmax.f32 %v9798_v32, %v3466_v61  ;;  %v3594_v63 = vmax.f32 %v3586_v42, %v3590_v6  ;;  %v9960_v61 = vpack.c.bf16 %v2571_v35, %v2571_v35  ;;  %v5590_v42 = vld [vmem:[#allocation2 + $0x38] sm:$0x1f] }
 0x1e4   :  { %v3573_v4 = vld [vmem:[#allocation2 + $0x3a2] sm:$0xff]  ;;  %v3393_v33 = vmax.f32 %v3385_v23, %v3389_v28  ;;  %v9957_v23 = vpop.f32.mrb[77].mxu0 }
 0x1e5   :  { %v3585_v45 = vld [vmem:[#allocation2 + $0x3c0] sm:$0xff]  ;;  %v11282_v2 = vld [vmem:[#allocation24_spill] sm:$0xff]  ;;  %v3577_v57 = vmax.f32 %v3569_v39, %v3573_v4  ;;  %v9946_v32 = vmax.f32 %v3470_v62, %v9688_v48  ;;  %v9949_v4 = vmax.f32 %v3471_v47, %v9695_v40  ;;  %v3602_v21 = vmax.f32 %v3594_v63, %v3598_v22  ;;  %3876 = vst [vmem:[#allocation2 + $0x60] sm:$0xff] %v9957_v23  ;;  %v8035_v7 = vpop.f32.mrb[78].mxu0  ;;  %v9963_v39 = vpop.f32.mrb[76].mxu1  ;;  %v5601_v22 = vld [vmem:[#allocation2 + $0x32] sm:$0xff] }
 0x1e6   :  { %v3589_v53 = vld [vmem:[#allocation2 + $0x3c1] sm:$0xff]  ;;  %3200 = vst [vmem:[#allocation3 + $0x10] sm:$0xff] %v11282_v2  ;;  %v5572_v28 = vld [vmem:[#allocation2 + $0x9] sm:$0xff]  ;;  %3879 = vst [vmem:[#allocation2 + $0x78] sm:$0xff] %v8035_v7  ;;  %v9970_v35 = vpop.f32.mrb[79].mxu0 }
 0x1e7   :  { %v11281_v52 = vld [vmem:[#allocation19_spill] sm:$0xff]  ;;  %v3593_v2 = vmax.f32 %v3585_v45, %v3589_v53  ;;  %4119 = vst [vmem:[#allocation2 + $0xf0] sm:$0xff] %v9963_v39  ;;  %3877 = vst [vmem:[#allocation2 + $0x68] sm:$0xff] %v9970_v35 }
 0x1e8   :  { %v2572_v17 = vmax.f32 %v11281_v52, 0.0  ;;  %v11283_v43 = vld [vmem:[#allocation15_spill] sm:$0xff]  ;;  %v3578_v52 = vmax.f32 %v3570_v27, %v3574_v0  ;;  %v9953_v0 = vld [vmem:[#allocation2 + $0x19] sm:$0x1f]  ;;  %v5576_v27 = vmax.f32 %v9773_v5, %v5572_v28  ;;  %v11286_v28 = vld [vmem:[#allocation29_spill] sm:$0xff] }
 0x1e9   :  { %3201 = vst [vmem:[#allocation3 + $0x18] sm:$0x1f] %v11283_v43  ;;  %v3597_v54 = vld [vmem:[#allocation2 + $0x3c2] sm:$0xff]  ;;  %v5573_v43 = vld [vmem:[#allocation2 + $0x11] sm:$0xff]  ;;  %v5594_v5 = vld [vmem:[#allocation2 + $0x39] sm:$0x1f] }
 0x1ea   :  { %v9937_v16 = vld [vmem:[#allocation3] ss:$2 sm:$0xff]  ;;  %v5577_v53 = vmax.f32 %v9747_v8, %v5573_v43  ;;  %v3581_v8 = vmax.f32 %v9688_v48, %v3577_v57  ;;  %v9968_v63 = vpack.c.bf16 %v2572_v17, %v2572_v17  ;;  %v3582_v62 = vmax.f32 %v9695_v40, %v3578_v52  ;;  %v9980_v17 = vpop.f32.mrb[77].mxu1  ;;  %v5582_v43 = vld [vmem:[#allocation2 + $0x1a] sm:$0x1f] }
 0x1eb   :  { %11284 = vst [vmem:[#allocation19_spill] sm:$0xff] %v9937_v16  ;;  %3087 = vst [vmem:[#allocation3] sm:$0xff] %v9853_v37  ;;  %v3373_v37 = vmax.f32 %v9667_v30, %v3369_v55  ;;  %v5571_v1 = vld [vmem:[#allocation2 + $0x1] sm:$0xff]  ;;  %v5593_v30 = vld [vmem:[#allocation2 + $0x31] sm:$0xff]  ;;  %v5578_v48 = vmax.f32 %v9951_v12, %v9953_v0  ;;  %v8067_v52 = vpop.f32.mrb[78].mxu1 }
 0x1ec   :  { %3088 = vst [vmem:[#allocation3 + $0x8] sm:$0xff] %v9863_v3  ;;  %v3601_v3 = vmax.f32 %v3593_v2, %v3597_v54  ;;  %v5575_v45 = vmax.f32 %v9757_v20, %v5571_v1  ;;  %v5581_v20 = vld [vmem:[#allocation2 + $0x12] sm:$0xff]  ;;  %v5597_v47 = vmax.f32 %v9813_v24, %v5593_v30  ;;  %v5598_v54 = vmax.f32 %v5590_v42, %v5594_v5  ;;  %v5592_v40 = vld [vmem:[#allocation2 + $0x29] sm:$0xff] }
 0x1ed   :  { %v9973_v55 = vmax.f32 %v3373_v37, %v3393_v33  ;;  %v9984_v6 = vmax.f32 %v5577_v53, %v5581_v20  ;;  %v5591_v33 = vld [vmem:[#allocation2 + $0x21] sm:$0xff]  ;;  %4117 = vst [vmem:[#allocation2 + $0xe0] sm:$0xff] %v9980_v17  ;;  %v9989_v24 = vmax.f32 %v3582_v62, %v3602_v21  ;;  %v5580_v0 = vld [vmem:[#allocation2 + $0xa] sm:$0xff]  ;;  %4120 = vst [vmem:[#allocation2 + $0xf8] sm:$0xff] %v8067_v52  ;;  %v2582_v62 = vrot.slane %v9960_v61, 6 }
 0x1ee   :  { %v9982_v57 = vmax.f32 %v3581_v8, %v3601_v3  ;;  %v5579_v12 = vld [vmem:[#allocation2 + $0x2] sm:$0xff]  ;;  %v9991_v37 = vmax.f32 %v5597_v47, %v5601_v22  ;;  %v5595_v53 = vmax.f32 %v9820_v15, %v5591_v33  ;;  %v5596_v3 = vmax.f32 %v9838_v41, %v5592_v40  ;;  %v11285_v1 = vld [vmem:[#allocation25_spill] sm:$0xff]  ;;  %v5602_v15 = vld [vmem:[#allocation2 + $0x3a] sm:$0x1f] }
 0x1ef   :  { %v9997_v7 = vmax.f32 %v5575_v45, %v5579_v12  ;;  %v9999_v8 = vmax.f32 %v5576_v27, %v5580_v0  ;;  %v5599_v21 = vld [vmem:[#allocation2 + $0x22] sm:$0xff]  ;;  %v5600_v42 = vld [vmem:[#allocation2 + $0x2a] sm:$0xff]  ;;  %v11171_v20 = vrot.slane %v9968_v63, 6  ;;  %v5783_v27 = vld [vmem:[#allocation2 + $0x92] sm:$0xff]  ;;  %v10014_v61 = vmax.f32 %v5578_v48, %v5582_v43  ;;  %2590 = vst [vmem:[#allocation9 + $0x38] sm:$0xc] %v2582_v62 }
 0x1f0   :  { %v9987_v2 = vld [vmem:[#allocation3 + $0x10] ss:$2 sm:$0x7f]  ;;  %v10007_v47 = vmax.f32 %v5595_v53, %v5599_v21  ;;  %v10009_v22 = vmax.f32 %v5596_v3, %v5600_v42  ;;  %v10016_v33 = vmax.f32 %v5598_v54, %v5602_v15  ;;  %v11287_v12 = vmov 0  ;;  %v5773_v54 = vld [vmem:[#allocation2 + $0x81] sm:$0xff]  ;;  %v10043_v3 = vpop.f32.mrb[80].mxu0 }
 0x1f1   :  { %3297 = vst [vmem:[#allocation3 + $0x10] sm:$0xff] %v11285_v1  ;;  %3298 = vst [vmem:[#allocation3 + $0x18] sm:$0x1f] %v11286_v28  ;;  %v5775_v30 = vld [vmem:[#allocation2 + $0x91] sm:$0xff]  ;;  %v11288_v12 = vsel %vm10020_vm15, 4294967295, %v11287_v12  ;;  %v5774_v43 = vld [vmem:[#allocation2 + $0x89] sm:$0xff]  ;;  %v5777_v28 = vmax.f32 %v9775_v25, %v5773_v54 }
 0x1f2   :  { %v5779_v45 = vmax.f32 %v9759_v56, %v5775_v30  ;;  %v5795_v40 = vld [vmem:[#allocation2 + $0xb1] sm:$0xff]  ;;  %11289 = vst [vmem:[#allocation24_spill] sm:$0xff] %v11288_v12  ;;  %v10026_v56 = vadd.f32 %v9600_v59, %v9871_v19  ;;  %v11290_v0 = vmov 0  ;;  %v10039_v53 = vrot.slane %v2582_v62, 4  ;;  %v10041_v19 = vpop.f32.mrb[79].mxu1  ;;  %v5781_v21 = vld [vmem:[#allocation2 + $0x82] sm:$0xff] }
 0x1f3   :  { %v10003_v5 = vld [vmem:[#allocation3] ss:$2 sm:$0xff]  ;;  %v5803_v52 = vld [vmem:[#allocation2 + $0xb2] sm:$0xff]  ;;  %v5799_v48 = vmax.f32 %v9822_v29, %v5795_v40  ;;  %v11291_v0 = vsel %vm10035_vm4, 4294967295, %v11290_v0  ;;  %v5778_v29 = vmax.f32 %v9791_v13, %v5774_v43  ;;  %v10051_v15 = vrot.slane %v11171_v20, 4  ;;  %4118 = vst [vmem:[#allocation2 + $0xe8] sm:$0xff] %v10041_v19 }
 0x1f4   :  { %3198 = vst [vmem:[#allocation3] sm:$0xff] %v9899_v26  ;;  %3199 = vst [vmem:[#allocation3 + $0x8] sm:$0xff] %v9882_v11  ;;  %v10045_v1 = vmax.f32 %v5779_v45, %v5783_v27  ;;  %v5782_v42 = vld [vmem:[#allocation2 + $0x8a] sm:$0xff]  ;;  %v5793_v30 = vld [vmem:[#allocation2 + $0xa1] sm:$0xff]  ;;  %v10055_v62 = vpop.f32.mrb[81].mxu0  ;;  %v10057_v40 = vpop.f32.mrb[80].mxu1  ;;  %v10068_v20 = vmax.f32 %v5777_v28, %v5781_v21 }
 0x1f5   :  { %11292 = vst [vmem:[#allocation15_spill] sm:$0xff] %v11291_v0  ;;  %4348 = vst [vmem:[#allocation2 + $0x110] sm:$0xff] %v10043_v3  ;;  %v10059_v45 = vmax.f32 %v5799_v48, %v5803_v52  ;;  %v5794_v25 = vld [vmem:[#allocation2 + $0xa9] sm:$0xff]  ;;  %v5797_v13 = vmax.f32 %v9835_v44, %v5793_v30  ;;  %v2672_v43 = vmax.f32 %v9803_v50, 0.0  ;;  %v2673_v26 = vmax.f32 %v9701_v34, 0.0  ;;  %v8087_v11 = vpop.f32.mrb[82].mxu0 }
 0x1f6   :  { %11293 = vst [vmem:[#allocation25_spill] sm:$0xff] %v10055_v62  ;;  %11294 = vst [vmem:[#allocation29_spill] sm:$0xff] %v10057_v40  ;;  %v5801_v27 = vld [vmem:[#allocation2 + $0xa2] sm:$0xff]  ;;  %v5802_v54 = vld [vmem:[#allocation2 + $0xaa] sm:$0xff]  ;;  %v5798_v52 = vmax.f32 %v9850_v14, %v5794_v25  ;;  %v11295_v50 = vmov 0  ;;  %v10081_v16 = vpop.f32.mrb[83].mxu0 }
 0x1f7   :  { %4346 = vst [vmem:[#allocation2 + $0x100] sm:$0xff] %v10055_v62  ;;  %4589 = vst [vmem:[#allocation2 + $0x190] sm:$0xff] %v10057_v40  ;;  %v2162_v48 = vld [vmem:[#allocation9 + $0x18] sm:$0xf]  ;;  %v2277_v44 = vld [vmem:[#allocation9 + $0x1c] sm:$0xe]  ;;  %v10089_v21 = vmax.f32 %v5797_v13, %v5801_v27 }
 0x1f8   :  { %v11296_v50 = vsel %vm10073_vm8, 4294967295, %v11295_v50  ;;  %v11298_v34 = vld [vmem:[#allocation31_spill] sm:$0xff]  ;;  %4349 = vst [vmem:[#allocation2 + $0x118] sm:$0xff] %v8087_v11  ;;  %v10083_v41 = vpop.f32.mrb[81].mxu1  ;;  %v11301_v25 = vld [vmem:[#allocation16_spill] sm:$0xff]  ;;  %v11302_v62 = vld [vmem:[#allocation22_spill] sm:$0xff] }
 0x1f9   :  { %11297 = vst [vmem:[#allocation37_spill] sm:$0xff] %v11296_v50  ;;  %v10079_v30 = vadd.f32 %v9600_v59, %v11298_v34  ;;  %11299 = vst [vmem:[#allocation31_spill] sm:$0xff] %v10081_v16  ;;  %v10085_v28 = vld [vmem:[#allocation3 + $0x10] ss:$2 sm:$0x7f]  ;;  %v2163_v40 = vsel %vm10020_vm15, %v11301_v25, %v2162_v48  ;;  %v2278_v59 = vsel %vm10035_vm4, %v11302_v62, %v2277_v44  ;;  %v11303_v34 = vmov 0 }
 0x1fa   :  { %11300 = vst [vmem:[#allocation38_spill] sm:$0xff] %v10083_v41  ;;  %v2381_v11 = vld [vmem:[#allocation9 + $0x2c] sm:$0x7]  ;;  %v11304_v34 = vsel %vm10099_vm3, 4294967295, %v11303_v34  ;;  %4347 = vst [vmem:[#allocation2 + $0x108] sm:$0xff] %v10081_v16  ;;  %v8119_v13 = vpop.f32.mrb[82].mxu1  ;;  %v10107_v48 = vmax.f32 %v5778_v29, %v5782_v42  ;;  %v10109_v25 = vmax.f32 %v5798_v52, %v5802_v54 }
 0x1fb   :  { %11305 = vst [vmem:[#allocation16_spill] sm:$0xff] %v11304_v34  ;;  %4587 = vst [vmem:[#allocation2 + $0x180] sm:$0xff] %v10083_v41  ;;  %v11306_v27 = vld [vmem:[#allocation17_spill] sm:$0xff]  ;;  %v11307_v14 = vld [vmem:[#allocation20_spill] sm:$0xff]  ;;  %v11309_v16 = vrot.slane %v9824_v38, 4 }
 0x1fc   :  { %3403 = vst [vmem:[#allocation3 + $0x10] sm:$0xff] %v11306_v27  ;;  %3404 = vst [vmem:[#allocation3 + $0x18] sm:$0x1f] %v11307_v14  ;;  %v11308_v62 = vld [vmem:[#allocation30_spill] sm:$0xff]  ;;  %v11310_v14 = vmov 0 }
 0x1fd   :  { %2164 = vst [vmem:[#allocation9 + $0x18] sm:$0xf] %v2163_v40  ;;  %2279 = vst [vmem:[#allocation9 + $0x1c] sm:$0xe] %v2278_v59  ;;  %v2382_v44 = vsel %vm10073_vm8, %v11308_v62, %v2381_v11  ;;  %v2486_v41 = vsel %vm10099_vm3, %v11309_v16, %v9927_v58  ;;  %v11311_v14 = vsel %vm10121_vm9, 4294967295, %v11310_v14  ;;  %v10125_v40 = vpop.f32.mrb[83].mxu1  ;;  %v7442_v16 = vpack.c.bf16 %v2672_v43, %v2672_v43 }
 0x1fe   :  { %11312 = vst [vmem:[#allocation22_spill] sm:$0xff] %v11311_v14  ;;  %v2491_v29 = vld [vmem:[#allocation9 + $0x30] sm:$0xf]  ;;  %v2593_v42 = vld [vmem:[#allocation9 + $0x40] sm:$0x3]  ;;  %4590 = vst [vmem:[#allocation2 + $0x198] sm:$0xff] %v8119_v13  ;;  %v7443_v59 = vpack.c.bf16 %v2673_v26, %v2673_v26 }
 0x1ff   :  { %11313 = vst [vmem:[#allocation17_spill] sm:$0xff] %v10125_v40  ;;  %v10127_v54 = vld [vmem:[#allocation3] ss:$2 sm:$0xff]  ;;  %2383 = vst [vmem:[#allocation9 + $0x2c] sm:$0x7] %v2382_v44  ;;  %v2492_v38 = vsel %vm10121_vm9, %v9879_v36, %v2491_v29  ;;  %v11314_v58 = vmov 0 }
 0x200   :  { %2494 = vst [vmem:[#allocation9 + $0x34] sm:$0xf] %v2486_v41  ;;  %v11315_v58 = vsel %vm10136_vm6, 4294967295, %v11314_v58  ;;  %v10140_v11 = vpop.f32.mrb[84].mxu0  ;;  %4588 = vst [vmem:[#allocation2 + $0x188] sm:$0xff] %v10125_v40  ;;  %v11318_v41 = vrot.slane %v9968_v63, 6 }
 0x201   :  { %11316 = vst [vmem:[#allocation20_spill] sm:$0xff] %v11315_v58  ;;  %11317 = vst [vmem:[#allocation30_spill] sm:$0xff] %v10140_v11  ;;  %v11319_v26 = vmov 0  ;;  %v2686_v63 = vshrl.u32 %v7442_v16, 16  ;;  %v2692_v43 = vshll.u32 %v7443_v59, 16  ;;  %v2788_v62 = vmax.f32 %v9897_v18, 0.0 }
 0x202   :  { %3295 = vst [vmem:[#allocation3] sm:$0xff] %v9943_v10  ;;  %3296 = vst [vmem:[#allocation3 + $0x8] sm:$0xff] %v9913_v51  ;;  %v2585_v13 = vsel %vm10136_vm6, %v10039_v53, %v11318_v41  ;;  %v11320_v26 = vsel %vm10154_vm12, 4294967295, %v11319_v26  ;;  %v2594_v51 = vsel %vm10154_vm12, %v10051_v15, %v2593_v42  ;;  %v2683_v10 = vshll.u32 %v7442_v16, 16  ;;  %v2707_v27 = vld [vmem:[#allocation9 + $0x40] sm:$0x8] }
 0x203   :  { %2493 = vst [vmem:[#allocation9 + $0x30] sm:$0xf] %v2492_v38  ;;  %11321 = vst [vmem:[#allocation39_spill] sm:$0xff] %v11320_v26  ;;  %v2696_v53 = vshrl.u32 %v7443_v59, 16  ;;  %v2789_v44 = vmax.f32 %v9828_v31, 0.0  ;;  %v2688_v38 = vrot.slane %v2686_v63, 4  ;;  %v7444_v42 = vpack.c.bf16 %v2788_v62, %v2788_v62 }
 0x204   :  { %4352 = vst [vmem:[#allocation2 + $0x130] sm:$0xff] %v10140_v11  ;;  %2591 = vst [vmem:[#allocation9 + $0x3c] sm:$0xf] %v2585_v13  ;;  %v2685_v29 = vrot.slane %v2683_v10, 5  ;;  %v2694_v41 = vrot.slane %v2692_v43, 5  ;;  %v11322_v13 = vmov 0 }
 0x205   :  { %2595 = vst [vmem:[#allocation9 + $0x40] sm:$0x3] %v2594_v51  ;;  %v11323_v13 = vsel %vm10165_vm0, 4294967295, %v11322_v13  ;;  %v2698_v15 = vrot.slane %v2696_v53, 4  ;;  %v7445_v16 = vpack.c.bf16 %v2789_v44, %v2789_v44  ;;  %vm10173_vm12 = vmor %vm2160_vm7, %vm2680_vm13  ;;  %v11325_v18 = vmov 0  ;;  %v11328_v43 = vld [vmem:[#allocation34_spill] sm:$0xff] }
 0x206   :  { %11324 = vst [vmem:[#allocation40_spill] sm:$0xff] %v11323_v13  ;;  %v10169_v51 = vld [vmem:[#allocation3 + $0x10] ss:$2 sm:$0x7f]  ;;  %v11326_v18 = vsel %vm10173_vm12, 4294967295, %v11325_v18  ;;  %v2689_v31 = vor.u32 %v2688_v38, %v2685_v29  ;;  %v2708_v59 = vsel %vm10165_vm0, %v2685_v29, %v2707_v27  ;;  %v2889_v10 = vmax.f32 %v10026_v56, 0.0 }
 0x207   :  { %11327 = vst [vmem:[#allocation41_spill] sm:$0xff] %v11326_v18  ;;  %v2890_v63 = vmax.f32 %v10079_v30, 0.0  ;;  %3500 = vst [vmem:[#allocation3 + $0x10] sm:$0xff] %v9816_v49  ;;  %v2699_v53 = vor.u32 %v2698_v15, %v2694_v41  ;;  %v2799_v62 = vrot.slane %v7444_v42, 7  ;;  %v2801_v44 = vrot.slane %v7445_v16, 7  ;;  %v5826_v14 = vld [vmem:[#allocation2 + $0xca] sm:$0xff] }
 0x208   :  { %3501 = vst [vmem:[#allocation3 + $0x18] sm:$0x1f] %v11328_v43  ;;  %2709 = vst [vmem:[#allocation9 + $0x40] sm:$0x8] %v2708_v59  ;;  %vm11329_vm7 = vsmask.f32 256  ;;  %v7446_v30 = vpack.c.bf16 %v2889_v10, %v2889_v10 }
 0x209   :  { %vm10185_vm10 = vmand %vm2796_vm14, %vm11329_vm7  ;;  %v11330_v36 = vmov 0  ;;  %vm2897_vm13 = vsmask.f32 6416  ;;  %v3299_v27 = vld [vmem:[#allocation3] ss:$2 sm:$0xff]  ;;  %v2690_v29 = vrot.slane %v2689_v31, 4  ;;  %v7447_v38 = vpack.c.bf16 %v2890_v63, %v2890_v63 }
 0x20a   :  { %v11331_v36 = vsel %vm10185_vm10, 4294967295, %v11330_v36  ;;  %v11333_v56 = vmov 0  ;;  %v2810_v49 = vld [vmem:[#allocation9 + $0x54] sm:$0x1]  ;;  %vm2921_vm0 = vcmask 1043458   ;;  %3401 = vst [vmem:[#allocation3] sm:$0xff] %v9973_v55 }
 0x20b   :  { %11332 = vst [vmem:[#allocation34_spill] sm:$0xff] %v11331_v36  ;;  %v11334_v56 = vsel %vm10191_vm1, 4294967295, %v11333_v56  ;;  %3402 = vst [vmem:[#allocation3 + $0x8] sm:$0xff] %v9933_v60  ;;  %v2700_v15 = vrot.slane %v2699_v53, 4  ;;  %v2800_v42 = vrot.slane %v2799_v62, 4  ;;  %v2803_v16 = vrot.slane %v2801_v44, 4 }
 0x20c   :  { %11335 = vst [vmem:[#allocation42_spill] sm:$0xff] %v11334_v56  ;;  %2807 = vst [vmem:[#allocation9 + $0x4c] sm:$0xe] %v2799_v62  ;;  %vm2922_vm7 = vsmask.f32 7946  ;;  %v2695_v31 = vsel %vm10173_vm12, %v2690_v29, %v2694_v41  ;;  %v2900_v59 = vshrl.u32 %v7446_v30, 16 }
 0x20d   :  { %v2903_v43 = vshll.u32 %v7446_v30, 16  ;;  %v2909_v52 = vshrl.u32 %v7447_v38, 16  ;;  %2710 = vst [vmem:[#allocation9 + $0x44] sm:$0xf] %v2695_v31  ;;  %2711 = vst [vmem:[#allocation9 + $0x48] sm:$0x7] %v2700_v15  ;;  %v2802_v10 = vsel %vm10191_vm1, %v2800_v42, %v2801_v44  ;;  %v2811_v55 = vsel %vm10185_vm10, %v2803_v16, %v2810_v49 }
 0x20e   :  { %v2912_v60 = vshll.u32 %v7447_v38, 16  ;;  %v10206_v63 = vld [vmem:[%s11152_s2] ss:$0 sm:$0xff]  ;;  %v11336_v53 = vld [vmem:[#allocation33_spill] sm:$0xff]  ;;  %2808 = vst [vmem:[#allocation9 + $0x50] sm:$0xf] %v2802_v10  ;;  %vm10214_vm11 = vmand %vm2921_vm0, %vm2922_vm7  ;;  %vm11350_vm7 = vnez %v11323_v13 }
 0x20f   :  { %v3004_v41 = vadd.f32 %v10206_v63, %v11336_v53  ;;  %2812 = vst [vmem:[#allocation9 + $0x54] sm:$0x1] %v2811_v55  ;;  %v2902_v62 = vrot.slane %v2900_v59, 5  ;;  %v2905_v29 = vrot.slane %v2903_v43, 6  ;;  %v2911_v30 = vrot.slane %v2909_v52, 5  ;;  %v11341_v53 = vld [vmem:[#allocation32_spill] sm:$0xff] }
 0x210   :  { %v3093_v44 = vadd.f32 %v10206_v63, %v10003_v5  ;;  %v2914_v15 = vrot.slane %v2912_v60, 6  ;;  %v11337_v49 = vmov 0  ;;  %v2924_v38 = vld [vmem:[#allocation9 + $0x54] sm:$0xc]  ;;  %v3094_v16 = vadd.f32 %v10206_v63, %v9925_v9  ;;  %v3016_v43 = vld [vmem:[#allocation9 + $0x64] sm:$0xf] }
 0x211   :  { %v11338_v49 = vsel %vm10214_vm11, 4294967295, %v11337_v49  ;;  %v3006_v42 = vmax.f32 %v3004_v41, 0.0  ;;  %v3204_v31 = vadd.f32 %v10206_v63, %v10127_v54  ;;  %v10222_v59 = vld [vmem:[#allocation3 + $0x10] ss:$2 sm:$0x7f]  ;;  %v2906_v52 = vor.u32 %v2905_v29, %v2902_v62  ;;  %v5825_v36 = vld [vmem:[#allocation2 + $0xc2] sm:$0xff] }
 0x212   :  { %11339 = vst [vmem:[#allocation33_spill] sm:$0xff] %v11338_v49  ;;  %v3095_v5 = vmax.f32 %v3093_v44, 0.0  ;;  %v3205_v10 = vadd.f32 %v10206_v63, %v9987_v2  ;;  %v3301_v55 = vadd.f32 %v10206_v63, %v3299_v27  ;;  %v11340_v60 = vld [vmem:[#allocation21_spill] sm:$0xff]  ;;  %3612 = vst [vmem:[#allocation3 + $0x18] sm:$0x1f] %v11341_v53  ;;  %v11343_v9 = vmov 0 }
 0x213   :  { %3611 = vst [vmem:[#allocation3 + $0x10] sm:$0xff] %v11340_v60  ;;  %vm11342_vm0 = vsmask.f32 2304  ;;  %v2915_v54 = vor.u32 %v2914_v15, %v2911_v30  ;;  %v7449_v41 = vpack.c.bf16 %v3006_v42, %v3006_v42  ;;  %v3096_v62 = vmax.f32 %v3094_v16, 0.0  ;;  %v3405_v44 = vld [vmem:[#allocation3] ss:$2 sm:$0xff] }
 0x214   :  { %vm10231_vm14 = vmor %vm11342_vm0, %vm2897_vm13  ;;  %v3206_v29 = vmax.f32 %v3204_v31, 0.0  ;;  %v2907_v40 = vrot.slane %v2906_v52, 4  ;;  %v2925_v2 = vsel %vm10214_vm11, %v2906_v52, %v2924_v38  ;;  %v7450_v27 = vpack.c.bf16 %v3095_v5, %v3095_v5  ;;  %3498 = vst [vmem:[#allocation3] sm:$0xff] %v9946_v32  ;;  %v10241_v42 = vpop.f32.mrb[85].mxu0  ;;  %v5681_v34 = vld [vmem:[#allocation2 + $0x78] sm:$0x1f] }
 0x215   :  { %v11344_v9 = vsel %vm10231_vm14, 4294967295, %v11343_v9  ;;  %v3207_v11 = vmax.f32 %v3205_v10, 0.0  ;;  %3499 = vst [vmem:[#allocation3 + $0x8] sm:$0xff] %v9949_v4  ;;  %v2917_v60 = vrot.slane %v2915_v54, 4  ;;  %2926 = vst [vmem:[#allocation9 + $0x54] sm:$0xc] %v2925_v2  ;;  %v3017_v53 = vsel %vm10020_vm15, %v7449_v41, %v3016_v43 }
 0x216   :  { %11345 = vst [vmem:[#allocation21_spill] sm:$0xff] %v11344_v9  ;;  %v7451_v30 = vpack.c.bf16 %v3096_v62, %v3096_v62  ;;  %v7452_v15 = vpack.c.bf16 %v3206_v29, %v3206_v29  ;;  %v2916_v16 = vsel %vm10231_vm14, %v2907_v40, %v2915_v54  ;;  %3018 = vst [vmem:[#allocation9 + $0x64] sm:$0xf] %v3017_v53  ;;  %v3104_v38 = vshrl.u32 %v7450_v27, 16  ;;  %v3125_v62 = vld [vmem:[#allocation9 + $0x68] sm:$0xe] }
 0x217   :  { %v3107_v31 = vshll.u32 %v7450_v27, 16  ;;  %v7453_v52 = vpack.c.bf16 %v3207_v11, %v3207_v11  ;;  %4350 = vst [vmem:[#allocation2 + $0x120] sm:$0xff] %v10241_v42  ;;  %2927 = vst [vmem:[#allocation9 + $0x58] sm:$0xf] %v2916_v16  ;;  %v3302_v43 = vadd.f32 %v10206_v63, %v10085_v28  ;;  %v3303_v2 = vmax.f32 %v3301_v55, 0.0  ;;  %v5916_v56 = vld [vmem:[#allocation2 + $0x111] sm:$0xff] }
 0x218   :  { %2928 = vst [vmem:[#allocation9 + $0x5c] sm:$0x3] %v2917_v60  ;;  %v3113_v32 = vshrl.u32 %v7451_v30, 16  ;;  %v3116_v4 = vshll.u32 %v7451_v30, 16  ;;  %v3214_v5 = vrot.slane %v7452_v15, 5  ;;  %v3106_v10 = vrot.slane %v3104_v38, 6 }
 0x219   :  { %v3109_v41 = vrot.slane %v3107_v31, 7  ;;  %v3216_v29 = vrot.slane %v7453_v52, 5  ;;  %v3224_v11 = vld [vmem:[#allocation9 + $0x78] sm:$0x7]  ;;  %v3304_v27 = vmax.f32 %v3302_v43, 0.0  ;;  %v7454_v49 = vpack.c.bf16 %v3303_v2, %v3303_v2  ;;  %v11372_v58 = vld [vmem:[#allocation17_spill] sm:$0xff] }
 0x21a   :  { %v3115_v40 = vrot.slane %v3113_v32, 6  ;;  %v3118_v54 = vrot.slane %v3116_v4, 7  ;;  %v3215_v53 = vrot.slane %v3214_v5, 4  ;;  %3222 = vst [vmem:[#allocation9 + $0x70] sm:$0x8] %v3214_v5  ;;  %v3407_v30 = vadd.f32 %v10206_v63, %v3405_v44 }
 0x21b   :  { %v3614_v9 = vld [vmem:[#allocation3 + $0x10] ss:$2 sm:$0x7f]  ;;  %v3110_v16 = vor.u32 %v3109_v41, %v3106_v10  ;;  %v3218_v60 = vrot.slane %v3216_v29, 4  ;;  %v7455_v52 = vpack.c.bf16 %v3304_v27, %v3304_v27  ;;  %v3312_v43 = vshrl.u32 %v7454_v49, 16 }
 0x21c   :  { %v3616_v15 = vadd.f32 %v10206_v63, %v3614_v9  ;;  %v3119_v28 = vor.u32 %v3118_v54, %v3115_v40  ;;  %v3217_v31 = vsel %vm9591_vm5, %v3215_v53, %v3216_v29  ;;  %v3502_v55 = vld [vmem:[#allocation3] ss:$2 sm:$0xff]  ;;  %v3315_v44 = vshll.u32 %v7454_v49, 16 }
 0x21d   :  { %v3111_v32 = vrot.slane %v3110_v16, 4  ;;  %v3126_v4 = vsel %vm10035_vm4, %v3110_v16, %v3125_v62  ;;  %3223 = vst [vmem:[#allocation9 + $0x74] sm:$0xf] %v3217_v31  ;;  %v3225_v5 = vsel %vm10073_vm8, %v3218_v60, %v3224_v11  ;;  %3609 = vst [vmem:[#allocation3] sm:$0xff] %v9982_v57  ;;  %v3320_v41 = vshrl.u32 %v7455_v52, 16  ;;  %v5617_v16 = vld [vmem:[#allocation2 + $0x51] sm:$0xff] }
 0x21e   :  { %v3618_v10 = vmax.f32 %v3616_v15, 0.0  ;;  %3610 = vst [vmem:[#allocation3 + $0x8] sm:$0xff] %v9989_v24  ;;  %v3121_v9 = vrot.slane %v3119_v28, 4  ;;  %3127 = vst [vmem:[#allocation9 + $0x68] sm:$0xe] %v3126_v4  ;;  %v3314_v40 = vrot.slane %v3312_v43, 7  ;;  %v3408_v54 = vadd.f32 %v10206_v63, %v10169_v51 }
 0x21f   :  { %3226 = vst [vmem:[#allocation9 + $0x78] sm:$0x7] %v3225_v5  ;;  %v3120_v2 = vsel %vm9371_vm2, %v3111_v32, %v3119_v28  ;;  %v3323_v62 = vshll.u32 %v7455_v52, 16  ;;  %v3322_v57 = vrot.slane %v3320_v41, 7  ;;  %v3329_v11 = vld [vmem:[#allocation9 + $0x7c] sm:$0xf]  ;;  %v3504_v27 = vadd.f32 %v10206_v63, %v3502_v55 }
 0x220   :  { %v10262_v53 = vpack.c.bf16 %v3618_v10, %v3618_v10  ;;  %3128 = vst [vmem:[#allocation9 + $0x6c] sm:$0xf] %v3120_v2  ;;  %3129 = vst [vmem:[#allocation9 + $0x70] sm:$0x1] %v3121_v9  ;;  %v3409_v24 = vmax.f32 %v3407_v30, 0.0  ;;  %v3317_v49 = vor.u32 %v3315_v44, %v3314_v40  ;;  %v3318_v60 = vrot.slane %v3314_v40, 4 }
 0x221   :  { %v3410_v15 = vmax.f32 %v3408_v54, 0.0  ;;  %v3505_v28 = vadd.f32 %v10206_v63, %v10222_v59  ;;  %v3325_v52 = vor.u32 %v3323_v62, %v3322_v57  ;;  %v3506_v32 = vmax.f32 %v3504_v27, 0.0  ;;  %v5614_v4 = vld [vmem:[#allocation2 + $0x58] sm:$0x1f]  ;;  %v11348_v55 = vld [vmem:[#allocation27_spill] sm:$0xff]  ;;  %v8091_v44 = vpop.f32.mrb[86].mxu0 }
 0x222   :  { %v11186_v31 = vrot.slane %v10262_v53, 7  ;;  %v7456_v51 = vpack.c.bf16 %v3409_v24, %v3409_v24  ;;  %v5618_v5 = vld [vmem:[#allocation2 + $0x59] sm:$0x1f]  ;;  %v3330_v43 = vsel %vm10121_vm9, %v3317_v49, %v3329_v11  ;;  %v5621_v9 = vmax.f32 %v11348_v55, %v5617_v16  ;;  %v3635_v62 = vld [vmem:[#allocation9 + $0xa0] sm:$0x1]  ;;  %4353 = vst [vmem:[#allocation2 + $0x138] sm:$0xff] %v8091_v44 }
 0x223   :  { %v7457_v30 = vpack.c.bf16 %v3410_v15, %v3410_v15  ;;  %v3507_v10 = vmax.f32 %v3505_v28, 0.0  ;;  %v3326_v59 = vsel %vm10099_vm3, %v3318_v60, %v3325_v52  ;;  %3331 = vst [vmem:[#allocation9 + $0x7c] sm:$0xf] %v3330_v43  ;;  %v7458_v40 = vpack.c.bf16 %v3506_v32, %v3506_v32  ;;  %v5625_v54 = vld [vmem:[#allocation2 + $0x52] sm:$0xff]  ;;  %v3427_v28 = vld [vmem:[#allocation9 + $0x8c] sm:$0x3] }
 0x224   :  { %v3629_v41 = vrot.slane %v11186_v31, 4  ;;  %v3417_v2 = vrot.slane %v7456_v51, 6  ;;  %3332 = vst [vmem:[#allocation9 + $0x80] sm:$0xf] %v3326_v59  ;;  %v5622_v27 = vmax.f32 %v5614_v4, %v5618_v5  ;;  %v10275_v49 = vmax.f32 %v5621_v9, %v5625_v54  ;;  %v5819_v52 = vld [vmem:[#allocation2 + $0xd1] sm:$0xff]  ;;  %v10278_v51 = vpop.f32.mrb[87].mxu0 }
 0x225   :  { %v3613_v57 = vld [vmem:[#allocation3] ss:$2 sm:$0xff]  ;;  %v3419_v11 = vrot.slane %v7457_v30, 6  ;;  %v7459_v24 = vpack.c.bf16 %v3507_v10, %v3507_v10  ;;  %v3515_v55 = vshll.u32 %v7458_v40, 16  ;;  %v3518_v60 = vshrl.u32 %v7458_v40, 16  ;;  %4351 = vst [vmem:[#allocation2 + $0x128] sm:$0xff] %v10278_v51 }
 0x226   :  { %v3615_v16 = vadd.f32 %v10206_v63, %v3613_v57  ;;  %v3418_v15 = vrot.slane %v3417_v2, 4  ;;  %3425 = vst [vmem:[#allocation9 + $0x84] sm:$0xc] %v3417_v2  ;;  %v3536_v31 = vld [vmem:[#allocation9 + $0x8c] sm:$0x8]  ;;  %v3636_v30 = vsel %vm10185_vm10, %v3629_v41, %v3635_v62  ;;  %v10283_v4 = vpop.f32.mrb[84].mxu1  ;;  %vm11349_vm13 = vnez %v11320_v26 }
 0x227   :  { %v3421_v32 = vrot.slane %v3419_v11, 4  ;;  %v3524_v43 = vshll.u32 %v7459_v24, 16  ;;  %v3528_v44 = vshrl.u32 %v7459_v24, 16  ;;  %v3517_v9 = vrot.slane %v3515_v55, 5  ;;  %3637 = vst [vmem:[#allocation9 + $0xa0] sm:$0x1] %v3636_v30 }
 0x228   :  { %v3617_v5 = vmax.f32 %v3615_v16, 0.0  ;;  %v3420_v10 = vsel %vm10136_vm6, %v3418_v15, %v3419_v11  ;;  %v3520_v59 = vrot.slane %v3518_v60, 4  ;;  %v5626_v2 = vld [vmem:[#allocation2 + $0x5a] sm:$0x1f]  ;;  %4593 = vst [vmem:[#allocation2 + $0x1b0] sm:$0xff] %v10283_v4  ;;  %v10288_v40 = vpop.f32.mrb[85].mxu1  ;;  %v11351_v30 = vmax.f32 %v9984_v6, %v9991_v37 }
 0x229   :  { %3426 = vst [vmem:[#allocation9 + $0x88] sm:$0xf] %v3420_v10  ;;  %v3428_v41 = vsel %vm11349_vm13, %v3421_v32, %v3427_v28  ;;  %v3526_v62 = vrot.slane %v3524_v43, 5  ;;  %v3530_v54 = vrot.slane %v3528_v44, 4  ;;  %v5630_v57 = vmax.f32 %v5622_v27, %v5626_v2  ;;  %v5615_v24 = vld [vmem:[#allocation2 + $0x41] sm:$0xff]  ;;  %v5616_v16 = vld [vmem:[#allocation2 + $0x49] sm:$0xff] }
 0x22a   :  { %4591 = vst [vmem:[#allocation2 + $0x1a0] sm:$0xff] %v10288_v40  ;;  %v8123_v11 = vpop.f32.mrb[86].mxu1  ;;  %v7460_v15 = vpack.c.bf16 %v3617_v5, %v3617_v5  ;;  %3429 = vst [vmem:[#allocation9 + $0x8c] sm:$0x3] %v3428_v41  ;;  %v3521_v55 = vor.u32 %v3520_v59, %v3517_v9  ;;  %v3537_v60 = vsel %vm11350_vm7, %v3517_v9, %v3536_v31  ;;  %v5827_v28 = vld [vmem:[#allocation2 + $0xd2] sm:$0xff]  ;;  %v5817_v32 = vld [vmem:[#allocation2 + $0xc1] sm:$0xff] }
 0x22b   :  { %v5633_v10 = vmax.f32 %v11351_v30, %v10275_v49  ;;  %4594 = vst [vmem:[#allocation2 + $0x1b8] sm:$0xff] %v8123_v11  ;;  %v10299_v27 = vpop.f32.mrb[87].mxu1  ;;  %v3531_v43 = vor.u32 %v3530_v54, %v3526_v62  ;;  %3538 = vst [vmem:[#allocation9 + $0x8c] sm:$0x8] %v3537_v60  ;;  %v11352_v44 = vmax.f32 %v10014_v61, %v10016_v33  ;;  %v11353_v59 = vld [vmem:[#allocation26_spill] sm:$0xff]  ;;  %v5623_v41 = vld [vmem:[#allocation2 + $0x42] sm:$0xff] }
 0x22c   :  { %v5823_v2 = vmax.f32 %v11353_v59, %v5819_v52  ;;  %v5624_v31 = vld [vmem:[#allocation2 + $0x4a] sm:$0xff]  ;;  %4592 = vst [vmem:[#allocation2 + $0x1a8] sm:$0xff] %v10299_v27  ;;  %v10306_v6 = vpop.f32.mrb[88].mxu0  ;;  %v3625_v37 = vrot.slane %v7460_v15, 7  ;;  %v3522_v11 = vrot.slane %v3521_v55, 4  ;;  %v11354_v30 = vld [vmem:[#allocation35_spill] sm:$0xff] }
 0x22d   :  { %v5634_v5 = vmax.f32 %v11352_v44, %v5630_v57  ;;  %v5818_v9 = vld [vmem:[#allocation2 + $0xc9] sm:$0xff]  ;;  %5637 = vst [vmem:[#allocation3 + $0x10] sm:$0xff] %v5633_v10  ;;  %v5619_v54 = vmax.f32 %v11354_v30, %v5615_v24  ;;  %v11355_v60 = vld [vmem:[#allocation18_spill] sm:$0xff]  ;;  %4356 = vst [vmem:[#allocation2 + $0x150] sm:$0xff] %v10306_v6  ;;  %v3532_v52 = vrot.slane %v3531_v43, 4  ;;  %v10316_v55 = vpop.f32.mrb[88].mxu1 }
 0x22e   :  { %v5620_v13 = vmax.f32 %v11355_v60, %v5616_v16  ;;  %v10310_v61 = vld [vmem:[#allocation2 + $0x58] sm:$0x1f]  ;;  %v10313_v57 = vmax.f32 %v5823_v2, %v5827_v28  ;;  %v11356_v44 = vld [vmem:[#allocation36_spill] sm:$0xff]  ;;  %v3626_v10 = vrot.slane %v3625_v37, 4  ;;  %3633 = vst [vmem:[#allocation9 + $0x98] sm:$0xe] %v3625_v37  ;;  %v3527_v24 = vsel %vm10173_vm12, %v3522_v11, %v3526_v62 }
 0x22f   :  { %v5665_v33 = vld [vmem:[#allocation2 + $0x59] sm:$0x1f]  ;;  %5638 = vst [vmem:[#allocation3 + $0x18] sm:$0x1f] %v5634_v5  ;;  %v5821_v59 = vmax.f32 %v11356_v44, %v5817_v32  ;;  %v10320_v16 = vmax.f32 %v5619_v54, %v5623_v41  ;;  %v5684_v60 = vld [vmem:[#allocation2 + $0x71] sm:$0xff]  ;;  %4597 = vst [vmem:[#allocation2 + $0x1d0] sm:$0xff] %v10316_v55  ;;  %v11357_v5 = vmax.f32 %v10045_v1, %v10059_v45 }
 0x230   :  { %v5685_v15 = vld [vmem:[#allocation2 + $0x79] sm:$0x1f]  ;;  %v10322_v30 = vmax.f32 %v5620_v13, %v5624_v31  ;;  %v10327_v28 = vpop.f32.mrb[89].mxu0  ;;  %v10329_v32 = vpop.f32.mrb[89].mxu1  ;;  %3539 = vst [vmem:[#allocation9 + $0x90] sm:$0xf] %v3527_v24 }
 0x231   :  { %v10324_v43 = vld [vmem:[#allocation2 + $0x98] sm:$0x1f]  ;;  %3540 = vst [vmem:[#allocation9 + $0x94] sm:$0x7] %v3532_v52  ;;  %v10335_v62 = vmax.f32 %v11357_v5, %v10313_v57  ;;  %v11358_v2 = vld [vmem:[#allocation28_spill] sm:$0xff]  ;;  %v10338_v41 = vmax.f32 %v5821_v59, %v5825_v36  ;;  %4354 = vst [vmem:[#allocation2 + $0x140] sm:$0xff] %v10327_v28  ;;  %v11361_v59 = vmax.f32 %v9999_v8, %v10009_v22 }
 0x232   :  { %v5822_v13 = vmax.f32 %v11358_v2, %v5818_v9  ;;  %v5709_v31 = vld [vmem:[#allocation2 + $0x99] sm:$0x1f]  ;;  %v5682_v37 = vld [vmem:[#allocation2 + $0x61] sm:$0xff]  ;;  %v5683_v11 = vld [vmem:[#allocation2 + $0x69] sm:$0xff]  ;;  %4595 = vst [vmem:[#allocation2 + $0x1c0] sm:$0xff] %v10329_v32  ;;  %v8095_v54 = vpop.f32.mrb[90].mxu0  ;;  %v11360_v9 = vmax.f32 %v9997_v7, %v10007_v47  ;;  %v5669_v5 = vmax.f32 %v10310_v61, %v5665_v33  ;;  %v11362_v7 = vmax.f32 %v10068_v20, %v10089_v21 }
 0x233   :  { %v8127_v44 = vpop.f32.mrb[90].mxu1  ;;  %v11359_v52 = vrot.slane %v10262_v53, 7  ;;  %v5632_v24 = vmax.f32 %v11361_v59, %v10322_v30  ;;  %4357 = vst [vmem:[#allocation2 + $0x158] sm:$0xff] %v8095_v54  ;;  %v10355_v2 = vpop.f32.mrb[91].mxu0  ;;  %v5688_v8 = vmax.f32 %v9939_v46, %v5684_v60  ;;  %v5689_v22 = vmax.f32 %v5681_v34, %v5685_v15  ;;  %v5692_v61 = vld [vmem:[#allocation2 + $0x72] sm:$0xff]  ;;  %v5691_v59 = vld [vmem:[#allocation2 + $0x6a] sm:$0xff] }
 0x234   :  { %v5631_v36 = vmax.f32 %v11360_v9, %v10320_v16  ;;  %4598 = vst [vmem:[#allocation2 + $0x1d8] sm:$0xff] %v8127_v44  ;;  %v10357_v53 = vpop.f32.mrb[91].mxu1  ;;  %v10365_v47 = vmax.f32 %v11362_v7, %v10338_v41  ;;  %v5892_v33 = vld [vmem:[#allocation2 + $0xf1] sm:$0xff]  ;;  %4355 = vst [vmem:[#allocation2 + $0x148] sm:$0xff] %v10355_v2  ;;  %v10370_v54 = vpop.f32.mrb[92].mxu0  ;;  %v5686_v44 = vmax.f32 %v9957_v23, %v5682_v37  ;;  %v6212_v18 = vld [vmem:[#allocation2 + $0x1a2] sm:$0xff] }
 0x235   :  { %v3628_v45 = vsel %vm10191_vm1, %v3626_v10, %v11359_v52  ;;  %v10359_v10 = vmax.f32 %v5822_v13, %v5826_v14  ;;  %v5673_v52 = vld [vmem:[#allocation2 + $0x5a] sm:$0x1f]  ;;  %4596 = vst [vmem:[#allocation2 + $0x1c8] sm:$0xff] %v10357_v53  ;;  %5636 = vst [vmem:[#allocation3 + $0x8] sm:$0xff] %v5632_v24  ;;  %v5713_v13 = vmax.f32 %v10324_v43, %v5709_v31  ;;  %v10376_v46 = vpop.f32.mrb[93].mxu0  ;;  %v10378_v34 = vpop.f32.mrb[92].mxu1 }
 0x236   :  { %3634 = vst [vmem:[#allocation9 + $0x9c] sm:$0xf] %v3628_v45  ;;  %5635 = vst [vmem:[#allocation3] sm:$0xff] %v5631_v36  ;;  %v5693_v14 = vld [vmem:[#allocation2 + $0x7a] sm:$0x1f]  ;;  %v5687_v45 = vmax.f32 %v9970_v35, %v5683_v11  ;;  %v11363_v15 = vmax.f32 %v10107_v48, %v10109_v25  ;;  %v5677_v9 = vmax.f32 %v5669_v5, %v5673_v52  ;;  %v5690_v31 = vld [vmem:[#allocation2 + $0x62] sm:$0xff] }
 0x237   :  { %v5717_v21 = vld [vmem:[#allocation2 + $0x9a] sm:$0x1f]  ;;  %4360 = vst [vmem:[#allocation2 + $0x170] sm:$0xff] %v10370_v54  ;;  %v5696_v36 = vmax.f32 %v5688_v8, %v5692_v61  ;;  %v5697_v43 = vmax.f32 %v5689_v22, %v5693_v14  ;;  %v5900_v23 = vld [vmem:[#allocation2 + $0xf2] sm:$0xff]  ;;  %4358 = vst [vmem:[#allocation2 + $0x160] sm:$0xff] %v10376_v46  ;;  %v8099_v35 = vpop.f32.mrb[94].mxu0  ;;  %v5694_v24 = vmax.f32 %v5686_v44, %v5690_v31 }
 0x238   :  { %v10384_v60 = vmax.f32 %v11363_v15, %v10359_v10  ;;  %4601 = vst [vmem:[#allocation2 + $0x1f0] sm:$0xff] %v10378_v34  ;;  %v10388_v37 = vpop.f32.mrb[93].mxu1  ;;  %v5640_v11 = vld [vmem:[#allocation3 + $0x10] ss:$2 sm:$0x7f]  ;;  %v5695_v7 = vmax.f32 %v5687_v45, %v5691_v59  ;;  %v5896_v25 = vmax.f32 %v9963_v39, %v5892_v33  ;;  %v5890_v15 = vld [vmem:[#allocation2 + $0xe1] sm:$0xff]  ;;  %v5721_v14 = vmax.f32 %v5713_v13, %v5717_v21 }
 0x239   :  { %4361 = vst [vmem:[#allocation2 + $0x178] sm:$0xff] %v8099_v35  ;;  %v10391_v5 = vpop.f32.mrb[95].mxu0  ;;  %4599 = vst [vmem:[#allocation2 + $0x1e0] sm:$0xff] %v10388_v37  ;;  %v8131_v52 = vpop.f32.mrb[94].mxu1  ;;  %v5642_v8 = vadd.f32 %v10206_v63, %v5640_v11  ;;  %v5700_v22 = vmax.f32 %v10275_v49, %v5696_v36  ;;  %v5701_v61 = vmax.f32 %v5677_v9, %v5697_v43  ;;  %v5891_v59 = vld [vmem:[#allocation2 + $0xe9] sm:$0xff]  ;;  %v5914_v43 = vld [vmem:[#allocation2 + $0x101] sm:$0xff] }
 0x23a   :  { %4359 = vst [vmem:[#allocation2 + $0x168] sm:$0xff] %v10391_v5  ;;  %4602 = vst [vmem:[#allocation2 + $0x1f8] sm:$0xff] %v8131_v52  ;;  %v10397_v44 = vpop.f32.mrb[95].mxu1  ;;  %v10399_v45 = vpop.f32.mrb[96].mxu0  ;;  %v5698_v39 = vmax.f32 %v10320_v16, %v5694_v24  ;;  %v5699_v33 = vmax.f32 %v10322_v30, %v5695_v7  ;;  %v5904_v31 = vmax.f32 %v5896_v25, %v5900_v23  ;;  %v5898_v35 = vld [vmem:[#allocation2 + $0xe2] sm:$0xff]  ;;  %v5899_v7 = vld [vmem:[#allocation2 + $0xea] sm:$0xff] }
 0x23b   :  { %4600 = vst [vmem:[#allocation2 + $0x1e8] sm:$0xff] %v10397_v44  ;;  %4830 = vst [vmem:[#allocation2 + $0x210] sm:$0xff] %v10399_v45  ;;  %v10405_v49 = vpop.f32.mrb[97].mxu0  ;;  %v10407_v13 = vpop.f32.mrb[96].mxu1  ;;  %v5644_v21 = vmax.f32 %v5642_v8, 0.0  ;;  %v5724_v9 = vmax.f32 %v5700_v22, %v10045_v1  ;;  %v5725_v36 = vmax.f32 %v5701_v61, %v5721_v14  ;;  %v5894_v16 = vmax.f32 %v9980_v17, %v5890_v15  ;;  %v5915_v22 = vld [vmem:[#allocation2 + $0x109] sm:$0xff] }
 0x23c   :  { %4828 = vst [vmem:[#allocation2 + $0x200] sm:$0xff] %v10405_v49  ;;  %5071 = vst [vmem:[#allocation2 + $0x290] sm:$0xff] %v10407_v13  ;;  %v5655_v30 = vld [vmem:[#allocation9 + $0xd0] sm:$0xf]  ;;  %v5722_v23 = vmax.f32 %v5698_v39, %v10068_v20  ;;  %v5723_v11 = vmax.f32 %v5699_v33, %v10107_v48  ;;  %v5908_v24 = vmax.f32 %v10313_v57, %v5904_v31  ;;  %v8151_v25 = vpop.f32.mrb[98].mxu0  ;;  %v6020_v38 = vld [vmem:[#allocation2 + $0x141] sm:$0xff] }
 0x23d   :  { %v7463_v52 = vpack.c.bf16 %v5644_v21, %v5644_v21  ;;  %v5639_v8 = vld [vmem:[#allocation3] ss:$2 sm:$0xff]  ;;  %5728 = vst [vmem:[#allocation3 + $0x10] sm:$0xff] %v5724_v9  ;;  %5729 = vst [vmem:[#allocation3 + $0x18] sm:$0x1f] %v5725_v36  ;;  %v5895_v17 = vmax.f32 %v10041_v19, %v5891_v59  ;;  %v5902_v1 = vmax.f32 %v5894_v16, %v5898_v35  ;;  %v10418_v61 = vpop.f32.mrb[99].mxu0 }
 0x23e   :  { %v5920_v15 = vmax.f32 %v10043_v3, %v5916_v56  ;;  %4831 = vst [vmem:[#allocation2 + $0x218] sm:$0xff] %v8151_v25  ;;  %v5641_v20 = vadd.f32 %v10206_v63, %v5639_v8  ;;  %5726 = vst [vmem:[#allocation3] sm:$0xff] %v5722_v23  ;;  %v5924_v48 = vld [vmem:[#allocation2 + $0x112] sm:$0xff]  ;;  %v10423_v33 = vpop.f32.mrb[100].mxu0  ;;  %v10425_v19 = vpop.f32.mrb[97].mxu1  ;;  %v5922_v63 = vld [vmem:[#allocation2 + $0x102] sm:$0xff] }
 0x23f   :  { %5727 = vst [vmem:[#allocation3 + $0x8] sm:$0xff] %v5723_v11  ;;  %v11364_v57 = vld [vmem:[#allocation25_spill] sm:$0xff]  ;;  %4829 = vst [vmem:[#allocation2 + $0x208] sm:$0xff] %v10418_v61  ;;  %v5656_v3 = vsel %vm10020_vm15, %v7463_v52, %v5655_v30  ;;  %v5903_v56 = vmax.f32 %v5895_v17, %v5899_v7  ;;  %v5906_v31 = vmax.f32 %v10338_v41, %v5902_v1  ;;  %v10433_v35 = vpop.f32.mrb[101].mxu0  ;;  %v8183_v21 = vpop.f32.mrb[98].mxu1  ;;  %v11365_v36 = vld [vmem:[#allocation31_spill] sm:$0xff] }
 0x240   :  { %v5918_v14 = vmax.f32 %v11364_v57, %v5914_v43  ;;  %v5998_v39 = vld [vmem:[#allocation2 + $0x131] sm:$0xff]  ;;  %v10430_v59 = vmax.f32 %v5920_v15, %v5924_v48  ;;  %4834 = vst [vmem:[#allocation2 + $0x230] sm:$0xff] %v10423_v33  ;;  %5069 = vst [vmem:[#allocation2 + $0x280] sm:$0xff] %v10425_v19  ;;  %v5643_v9 = vmax.f32 %v5641_v20, 0.0  ;;  %v5919_v16 = vmax.f32 %v11365_v36, %v5915_v22  ;;  %v5996_v30 = vld [vmem:[#allocation2 + $0x121] sm:$0xff]  ;;  %v8155_v41 = vpop.f32.mrb[102].mxu0 }
 0x241   :  { %5657 = vst [vmem:[#allocation9 + $0xd0] sm:$0xf] %v5656_v3  ;;  %4832 = vst [vmem:[#allocation2 + $0x220] sm:$0xff] %v10433_v35  ;;  %v10440_v23 = vpop.f32.mrb[99].mxu1  ;;  %v5907_v11 = vmax.f32 %v10359_v10, %v5903_v56  ;;  %v5923_v25 = vld [vmem:[#allocation2 + $0x10a] sm:$0xff]  ;;  %v11367_v52 = vld [vmem:[#allocation30_spill] sm:$0xff] }
 0x242   :  { %v10437_v43 = vmax.f32 %v5918_v14, %v5922_v63  ;;  %5072 = vst [vmem:[#allocation2 + $0x298] sm:$0xff] %v8183_v21  ;;  %v10444_v7 = vmax.f32 %v5908_v24, %v10430_v59  ;;  %v6002_v8 = vmax.f32 %v11367_v52, %v5998_v39  ;;  %v5997_v17 = vld [vmem:[#allocation2 + $0x129] sm:$0xff]  ;;  %v6186_v1 = vld [vmem:[#allocation2 + $0x191] sm:$0xff]  ;;  %4835 = vst [vmem:[#allocation2 + $0x238] sm:$0xff] %v8155_v41  ;;  %v10447_v15 = vpop.f32.mrb[103].mxu0  ;;  %v10456_v24 = vpop.f32.mrb[100].mxu1 }
 0x243   :  { %5070 = vst [vmem:[#allocation2 + $0x288] sm:$0xff] %v10440_v23  ;;  %v7462_v22 = vpack.c.bf16 %v5643_v9, %v5643_v9  ;;  %v10450_v20 = vmax.f32 %v5919_v16, %v5923_v25  ;;  %v6006_v10 = vld [vmem:[#allocation2 + $0x132] sm:$0xff]  ;;  %4833 = vst [vmem:[#allocation2 + $0x228] sm:$0xff] %v10447_v15  ;;  %v6000_v39 = vmax.f32 %v10241_v42, %v5996_v30  ;;  %v10462_v56 = vpop.f32.mrb[101].mxu1  ;;  %v6004_v21 = vld [vmem:[#allocation2 + $0x122] sm:$0xff]  ;;  %v10470_v42 = vpop.f32.mrb[104].mxu0 }
 0x244   :  { %11366 = vst [vmem:[#allocation32_spill] sm:$0xff] %v10444_v7  ;;  %v10453_v48 = vmax.f32 %v5906_v31, %v10437_v43  ;;  %v6206_v57 = vld [vmem:[#allocation2 + $0x1b1] sm:$0xff]  ;;  %v10458_v14 = vmax.f32 %v6002_v8, %v6006_v10  ;;  %5075 = vst [vmem:[#allocation2 + $0x2b0] sm:$0xff] %v10456_v24  ;;  %v6001_v31 = vmax.f32 %v10278_v51, %v5997_v17  ;;  %v6184_v41 = vld [vmem:[#allocation2 + $0x181] sm:$0xff]  ;;  %v8187_v25 = vpop.f32.mrb[102].mxu1 }
 0x245   :  { %v6194_v3 = vld [vmem:[#allocation2 + $0x192] sm:$0xff]  ;;  %5654 = vst [vmem:[#allocation9 + $0xcc] sm:$0xf] %v7462_v22  ;;  %v10465_v63 = vmax.f32 %v5907_v11, %v10450_v20  ;;  %5073 = vst [vmem:[#allocation2 + $0x2a0] sm:$0xff] %v10462_v56  ;;  %v6005_v52 = vld [vmem:[#allocation2 + $0x12a] sm:$0xff]  ;;  %v10474_v8 = vmax.f32 %v6000_v39, %v6004_v21  ;;  %v6210_v11 = vmax.f32 %v10283_v4, %v6206_v57  ;;  %v10477_v17 = vpop.f32.mrb[103].mxu1 }
 0x246   :  { %11368 = vst [vmem:[#allocation27_spill] sm:$0xff] %v10453_v48  ;;  %v11370_v9 = vld [vmem:[#allocation29_spill] sm:$0xff]  ;;  %v6204_v51 = vld [vmem:[#allocation2 + $0x1a1] sm:$0xff]  ;;  %5076 = vst [vmem:[#allocation2 + $0x2b8] sm:$0xff] %v8187_v25  ;;  %v10483_v12 = vpop.f32.mrb[104].mxu1 }
 0x247   :  { %11369 = vst [vmem:[#allocation26_spill] sm:$0xff] %v10465_v63  ;;  %v6190_v36 = vmax.f32 %v11370_v9, %v6186_v1  ;;  %v6214_v16 = vld [vmem:[#allocation2 + $0x1b2] sm:$0xff]  ;;  %v6185_v22 = vld [vmem:[#allocation2 + $0x189] sm:$0xff]  ;;  %4838 = vst [vmem:[#allocation2 + $0x250] sm:$0xff] %v10470_v42  ;;  %v10480_v1 = vmax.f32 %v6001_v31, %v6005_v52  ;;  %v10491_v31 = vpop.f32.mrb[105].mxu0  ;;  %v6208_v50 = vmax.f32 %v10288_v40, %v6204_v51 }
 0x248   :  { %v6205_v10 = vld [vmem:[#allocation2 + $0x1a9] sm:$0xff]  ;;  %v6022_v9 = vld [vmem:[#allocation2 + $0x151] sm:$0xff]  ;;  %5074 = vst [vmem:[#allocation2 + $0x2a8] sm:$0xff] %v10477_v17  ;;  %v6218_v4 = vmax.f32 %v6210_v11, %v6214_v16  ;;  %5079 = vst [vmem:[#allocation2 + $0x2d0] sm:$0xff] %v10483_v12  ;;  %v6189_v26 = vmax.f32 %v11372_v58, %v6185_v22  ;;  %v8159_v16 = vpop.f32.mrb[106].mxu0 }
 0x249   :  { %v10487_v21 = vmax.f32 %v6190_v36, %v6194_v3  ;;  %v11371_v57 = vld [vmem:[#allocation38_spill] sm:$0xff]  ;;  %v6192_v30 = vld [vmem:[#allocation2 + $0x182] sm:$0xff]  ;;  %v6193_v29 = vld [vmem:[#allocation2 + $0x18a] sm:$0xff]  ;;  %4836 = vst [vmem:[#allocation2 + $0x240] sm:$0xff] %v10491_v31  ;;  %v10498_v36 = vpop.f32.mrb[105].mxu1  ;;  %v6209_v11 = vmax.f32 %v10299_v27, %v6205_v10  ;;  %v10504_v40 = vpop.f32.mrb[107].mxu0  ;;  %v6216_v51 = vmax.f32 %v6208_v50, %v6212_v18 }
 0x24a   :  { %v6188_v25 = vmax.f32 %v11371_v57, %v6184_v41  ;;  %v6213_v39 = vld [vmem:[#allocation2 + $0x1aa] sm:$0xff]  ;;  %v6026_v57 = vmax.f32 %v10306_v6, %v6022_v9  ;;  %5077 = vst [vmem:[#allocation2 + $0x2c0] sm:$0xff] %v10498_v36  ;;  %4839 = vst [vmem:[#allocation2 + $0x258] sm:$0xff] %v8159_v16  ;;  %v8191_v58 = vpop.f32.mrb[106].mxu1  ;;  %v6030_v0 = vld [vmem:[#allocation2 + $0x152] sm:$0xff]  ;;  %v10511_v27 = vmax.f32 %v6189_v26, %v6193_v29 }
 0x24b   :  { %v6230_v3 = vld [vmem:[#allocation2 + $0x1d1] sm:$0xff]  ;;  %v6222_v41 = vmax.f32 %v10487_v21, %v6218_v4  ;;  %v6021_v52 = vld [vmem:[#allocation2 + $0x149] sm:$0xff]  ;;  %5080 = vst [vmem:[#allocation2 + $0x2d8] sm:$0xff] %v8191_v58  ;;  %4837 = vst [vmem:[#allocation2 + $0x248] sm:$0xff] %v10504_v40  ;;  %v10509_v4 = vpop.f32.mrb[107].mxu1  ;;  %v6217_v6 = vmax.f32 %v6209_v11, %v6213_v39  ;;  %v11373_v39 = vmax.f32 %v10430_v59, %v10458_v14 }
 0x24c   :  { %v10506_v22 = vmax.f32 %v6188_v25, %v6192_v30  ;;  %v6238_v63 = vld [vmem:[#allocation2 + $0x1d2] sm:$0xff]  ;;  %v10513_v10 = vmax.f32 %v6026_v57, %v6030_v0  ;;  %v6234_v9 = vmax.f32 %v10316_v55, %v6230_v3  ;;  %v6228_v16 = vld [vmem:[#allocation2 + $0x1c1] sm:$0xff]  ;;  %5078 = vst [vmem:[#allocation2 + $0x2c8] sm:$0xff] %v10509_v4  ;;  %v10517_v30 = vpop.f32.mrb[108].mxu0  ;;  %v10519_v50 = vpop.f32.mrb[108].mxu1  ;;  %v6024_v25 = vmax.f32 %v10327_v28, %v6020_v38  ;;  %v6229_v29 = vld [vmem:[#allocation2 + $0x1c9] sm:$0xff] }
 0x24d   :  { %v6025_v58 = vmax.f32 %v10355_v2, %v6021_v52  ;;  %v6028_v26 = vld [vmem:[#allocation2 + $0x142] sm:$0xff]  ;;  %4842 = vst [vmem:[#allocation2 + $0x270] sm:$0xff] %v10517_v30  ;;  %v10525_v0 = vpop.f32.mrb[109].mxu0  ;;  %5083 = vst [vmem:[#allocation2 + $0x2f0] sm:$0xff] %v10519_v50  ;;  %v6221_v55 = vmax.f32 %v10511_v27, %v6217_v6  ;;  %v6029_v38 = vld [vmem:[#allocation2 + $0x14a] sm:$0xff]  ;;  %v6232_v6 = vmax.f32 %v10329_v32, %v6228_v16 }
 0x24e   :  { %v6220_v18 = vmax.f32 %v10506_v22, %v6216_v51  ;;  %v10533_v3 = vmax.f32 %v11373_v39, %v10513_v10  ;;  %v10535_v11 = vmax.f32 %v6234_v9, %v6238_v63  ;;  %v6236_v28 = vld [vmem:[#allocation2 + $0x1c2] sm:$0xff]  ;;  %v6095_v2 = vld [vmem:[#allocation2 + $0x171] sm:$0xff]  ;;  %4840 = vst [vmem:[#allocation2 + $0x260] sm:$0xff] %v10525_v0  ;;  %v8163_v52 = vpop.f32.mrb[110].mxu0  ;;  %v10538_v57 = vmax.f32 %v6024_v25, %v6028_v26  ;;  %v10550_v39 = vpop.f32.mrb[109].mxu1 }
 0x24f   :  { %v10540_v51 = vmax.f32 %v6025_v58, %v6029_v38  ;;  %v6237_v48 = vld [vmem:[#allocation2 + $0x1ca] sm:$0xff]  ;;  %4843 = vst [vmem:[#allocation2 + $0x278] sm:$0xff] %v8163_v52  ;;  %v10543_v7 = vpop.f32.mrb[111].mxu0  ;;  %v6233_v14 = vmax.f32 %v10357_v53, %v6229_v29  ;;  %v6093_v63 = vld [vmem:[#allocation2 + $0x161] sm:$0xff]  ;;  %v11376_v32 = vmax.f32 %v10437_v43, %v10474_v8  ;;  %v10566_v53 = vmax.f32 %v6232_v6, %v6236_v28  ;;  %v8195_v29 = vpop.f32.mrb[110].mxu1  ;;  %v6103_v8 = vld [vmem:[#allocation2 + $0x172] sm:$0xff] }
 0x250   :  { %11374 = vst [vmem:[#allocation35_spill] sm:$0xff] %v10533_v3  ;;  %v10546_v59 = vmax.f32 %v6222_v41, %v10535_v11  ;;  %v6094_v9 = vld [vmem:[#allocation2 + $0x169] sm:$0xff]  ;;  %4841 = vst [vmem:[#allocation2 + $0x268] sm:$0xff] %v10543_v7  ;;  %v10552_v25 = vpop.f32.mrb[112].mxu0  ;;  %v11378_v41 = vmax.f32 %v10450_v20, %v10480_v1  ;;  %v6099_v26 = vmax.f32 %v10370_v54, %v6095_v2  ;;  %v6303_v52 = vld [vmem:[#allocation2 + $0x1f1] sm:$0xff] }
 0x251   :  { %v10558_v16 = vmax.f32 %v11376_v32, %v10538_v57  ;;  %5081 = vst [vmem:[#allocation2 + $0x2e0] sm:$0xff] %v10550_v39  ;;  %5312 = vst [vmem:[#allocation2 + $0x310] sm:$0xff] %v10552_v25  ;;  %v10571_v38 = vpop.f32.mrb[113].mxu0  ;;  %v10573_v43 = vmax.f32 %v6233_v14, %v6237_v48  ;;  %v10575_v32 = vpop.f32.mrb[111].mxu1  ;;  %v10579_v20 = vmax.f32 %v6220_v18, %v10566_v53  ;;  %v6301_v2 = vld [vmem:[#allocation2 + $0x1e1] sm:$0xff]  ;;  %v6326_v3 = vld [vmem:[#allocation2 + $0x209] sm:$0xff] }
 0x252   :  { %11375 = vst [vmem:[#allocation18_spill] sm:$0xff] %v10546_v59  ;;  %v10564_v58 = vmax.f32 %v11378_v41, %v10540_v51  ;;  %5084 = vst [vmem:[#allocation2 + $0x2f8] sm:$0xff] %v8195_v29  ;;  %v6107_v54 = vmax.f32 %v6099_v26, %v6103_v8  ;;  %v6097_v1 = vmax.f32 %v10376_v46, %v6093_v63  ;;  %v8215_v48 = vpop.f32.mrb[114].mxu0  ;;  %v6101_v14 = vld [vmem:[#allocation2 + $0x162] sm:$0xff]  ;;  %v6102_v41 = vld [vmem:[#allocation2 + $0x16a] sm:$0xff]  ;;  %v10589_v18 = vpop.f32.mrb[112].mxu1 }
 0x253   :  { %11377 = vst [vmem:[#allocation36_spill] sm:$0xff] %v10558_v16  ;;  %5310 = vst [vmem:[#allocation2 + $0x300] sm:$0xff] %v10571_v38  ;;  %v6098_v28 = vmax.f32 %v10391_v5, %v6094_v9  ;;  %v10585_v6 = vmax.f32 %v6221_v55, %v10573_v43  ;;  %v6311_v29 = vld [vmem:[#allocation2 + $0x1f2] sm:$0xff]  ;;  %v10587_v59 = vpop.f32.mrb[115].mxu0  ;;  %v6307_v5 = vmax.f32 %v10378_v34, %v6303_v52  ;;  %v6302_v9 = vld [vmem:[#allocation2 + $0x1e9] sm:$0xff] }
 0x254   :  { %11379 = vst [vmem:[#allocation28_spill] sm:$0xff] %v10564_v58  ;;  %11380 = vst [vmem:[#allocation25_spill] sm:$0xff] %v10579_v20  ;;  %v6111_v26 = vmax.f32 %v10513_v10, %v6107_v54  ;;  %v6105_v46 = vmax.f32 %v6097_v1, %v6101_v14  ;;  %v6309_v8 = vld [vmem:[#allocation2 + $0x1e2] sm:$0xff]  ;;  %v10594_v55 = vpop.f32.mrb[116].mxu0  ;;  %v6327_v20 = vld [vmem:[#allocation2 + $0x211] sm:$0xff] }
 0x255   :  { %5082 = vst [vmem:[#allocation2 + $0x2e8] sm:$0xff] %v10575_v32  ;;  %11381 = vst [vmem:[#allocation31_spill] sm:$0xff] %v10585_v6  ;;  %v6106_v63 = vmax.f32 %v6098_v28, %v6102_v41  ;;  %v10597_v6 = vpop.f32.mrb[113].mxu1  ;;  %v10601_v10 = vpop.f32.mrb[117].mxu0  ;;  %v6315_v28 = vmax.f32 %v6307_v5, %v6311_v29  ;;  %v6310_v14 = vld [vmem:[#allocation2 + $0x1ea] sm:$0xff]  ;;  %v6306_v41 = vmax.f32 %v10397_v44, %v6302_v9  ;;  %v6325_v16 = vld [vmem:[#allocation2 + $0x201] sm:$0xff] }
 0x256   :  { %5313 = vst [vmem:[#allocation2 + $0x318] sm:$0xff] %v8215_v48  ;;  %5311 = vst [vmem:[#allocation2 + $0x308] sm:$0xff] %v10587_v59  ;;  %v6305_v48 = vmax.f32 %v10388_v37, %v6301_v2  ;;  %v8247_v34 = vpop.f32.mrb[114].mxu1  ;;  %v10605_v52 = vmax.f32 %v6111_v26, %v10487_v21  ;;  %v6109_v54 = vmax.f32 %v10538_v57, %v6105_v46  ;;  %v8219_v37 = vpop.f32.mrb[118].mxu0  ;;  %v6414_v46 = vld [vmem:[#allocation2 + $0x231] sm:$0xff] }
 0x257   :  { %5553 = vst [vmem:[#allocation2 + $0x390] sm:$0xff] %v10589_v18  ;;  %5316 = vst [vmem:[#allocation2 + $0x330] sm:$0xff] %v10594_v55  ;;  %v6110_v1 = vmax.f32 %v10540_v51, %v6106_v63  ;;  %v10610_v2 = vpop.f32.mrb[115].mxu1  ;;  %v10613_v21 = vpop.f32.mrb[119].mxu0  ;;  %v6319_v29 = vmax.f32 %v10535_v11, %v6315_v28  ;;  %v6331_v26 = vmax.f32 %v10399_v45, %v6327_v20  ;;  %v6335_v9 = vld [vmem:[#allocation2 + $0x212] sm:$0xff]  ;;  %v6334_v28 = vld [vmem:[#allocation2 + $0x20a] sm:$0xff] }
 0x258   :  { %5551 = vst [vmem:[#allocation2 + $0x380] sm:$0xff] %v10597_v6  ;;  %11382 = vst [vmem:[#allocation30_spill] sm:$0xff] %v10605_v52  ;;  %v6313_v58 = vmax.f32 %v6305_v48, %v6309_v8  ;;  %v10617_v57 = vmax.f32 %v6109_v54, %v10506_v22  ;;  %v10625_v44 = vpop.f32.mrb[116].mxu1  ;;  %v6314_v63 = vmax.f32 %v6306_v41, %v6310_v14  ;;  %v10631_v8 = vpop.f32.mrb[120].mxu0  ;;  %v10635_v11 = vld [vmem:[#allocation2 + $0x99] sm:$0x1f] }
 0x259   :  { %5314 = vst [vmem:[#allocation2 + $0x320] sm:$0xff] %v10601_v10  ;;  %5554 = vst [vmem:[#allocation2 + $0x398] sm:$0xff] %v8247_v34  ;;  %v10620_v51 = vmax.f32 %v6110_v1, %v10511_v27  ;;  %v10629_v22 = vpop.f32.mrb[117].mxu1  ;;  %v10633_v27 = vld [vmem:[#allocation2 + $0x98] sm:$0x1f]  ;;  %v10637_v45 = vmax.f32 %v6331_v26, %v6335_v9  ;;  %v6329_v20 = vmax.f32 %v10405_v49, %v6325_v16  ;;  %v6333_v34 = vld [vmem:[#allocation2 + $0x202] sm:$0xff] }
 0x25a   :  { %11383 = vst [vmem:[#allocation29_spill] sm:$0xff] %v10610_v2  ;;  %5317 = vst [vmem:[#allocation2 + $0x338] sm:$0xff] %v8219_v37  ;;  %v6317_v5 = vmax.f32 %v10566_v53, %v6313_v58  ;;  %v6330_v48 = vmax.f32 %v10418_v61, %v6326_v3  ;;  %v6412_v54 = vld [vmem:[#allocation2 + $0x221] sm:$0xff]  ;;  %v8251_v58 = vpop.f32.mrb[118].mxu1  ;;  %v10643_v53 = vpop.f32.mrb[121].mxu0  ;;  %v6318_v1 = vmax.f32 %v10573_v43, %v6314_v63  ;;  %v6413_v37 = vld [vmem:[#allocation2 + $0x229] sm:$0xff] }
 0x25b   :  { %5552 = vst [vmem:[#allocation2 + $0x388] sm:$0xff] %v10610_v2  ;;  %11384 = vst [vmem:[#allocation38_spill] sm:$0xff] %v10617_v57  ;;  %v6418_v14 = vmax.f32 %v10423_v33, %v6414_v46  ;;  %v6595_v41 = vld [vmem:[#allocation2 + $0x291] sm:$0xff]  ;;  %v10647_v49 = vpop.f32.mrb[119].mxu1  ;;  %v8223_v61 = vpop.f32.mrb[122].mxu0  ;;  %v10653_v26 = vmax.f32 %v6319_v29, %v10637_v45  ;;  %v10655_v9 = vmax.f32 %v6329_v20, %v6333_v34 }
 0x25c   :  { %11385 = vst [vmem:[#allocation17_spill] sm:$0xff] %v10620_v51  ;;  %5315 = vst [vmem:[#allocation2 + $0x328] sm:$0xff] %v10613_v21  ;;  %v10650_v3 = vld [vmem:[#allocation2 + $0xb8] sm:$0x1f]  ;;  %v10657_v43 = vmax.f32 %v6330_v48, %v6334_v28  ;;  %v10660_v33 = vpop.f32.mrb[120].mxu1  ;;  %v6420_v51 = vld [vmem:[#allocation2 + $0x222] sm:$0xff]  ;;  %v5780_v52 = vmax.f32 %v10633_v27, %v10635_v11 }
 0x25d   :  { %5557 = vst [vmem:[#allocation2 + $0x3b0] sm:$0xff] %v10625_v44  ;;  %11386 = vst [vmem:[#allocation43_spill] sm:$0xff] %v10629_v22  ;;  %v5796_v16 = vld [vmem:[#allocation2 + $0xb9] sm:$0x1f]  ;;  %v6615_v57 = vld [vmem:[#allocation2 + $0x2b1] sm:$0xff]  ;;  %v10666_v29 = vpop.f32.mrb[121].mxu1  ;;  %v10669_v48 = vmax.f32 %v6317_v5, %v10655_v9 }
 0x25e   :  { %11387 = vst [vmem:[#allocation44_spill] sm:$0xff] %v10631_v8  ;;  %5555 = vst [vmem:[#allocation2 + $0x3a0] sm:$0xff] %v10629_v22  ;;  %v6422_v63 = vld [vmem:[#allocation2 + $0x232] sm:$0xff]  ;;  %v5784_v20 = vld [vmem:[#allocation2 + $0x9a] sm:$0x1f]  ;;  %v10672_v28 = vmax.f32 %v6318_v1, %v10657_v43 }
 0x25f   :  { %5320 = vst [vmem:[#allocation2 + $0x350] sm:$0xff] %v10631_v8  ;;  %11388 = vst [vmem:[#allocation45_spill] sm:$0xff] %v10643_v53  ;;  %v10662_v46 = vmax.f32 %v6418_v14, %v6422_v63  ;;  %v5804_v34 = vld [vmem:[#allocation2 + $0xba] sm:$0x1f]  ;;  %v6421_v14 = vld [vmem:[#allocation2 + $0x22a] sm:$0xff]  ;;  %v6599_v63 = vmax.f32 %v10407_v13, %v6595_v41 }
 0x260   :  { %5558 = vst [vmem:[#allocation2 + $0x3b8] sm:$0xff] %v8251_v58  ;;  %11389 = vst [vmem:[#allocation46_spill] sm:$0xff] %v10647_v49  ;;  %v6416_v58 = vmax.f32 %v10433_v35, %v6412_v54  ;;  %v6593_v35 = vld [vmem:[#allocation2 + $0x281] sm:$0xff]  ;;  %v6594_v54 = vld [vmem:[#allocation2 + $0x289] sm:$0xff] }
 0x261   :  { %5318 = vst [vmem:[#allocation2 + $0x340] sm:$0xff] %v10643_v53  ;;  %11390 = vst [vmem:[#allocation47_spill] sm:$0xff] %v10653_v26  ;;  %v8255_v26 = vpop.f32.mrb[122].mxu1  ;;  %v5800_v53 = vmax.f32 %v10650_v3, %v5796_v16  ;;  %v10680_v5 = vld [vmem:[#allocation2 + $0xd8] sm:$0x1f]  ;;  %v6613_v13 = vld [vmem:[#allocation2 + $0x2a1] sm:$0xff] }
 0x262   :  { %5556 = vst [vmem:[#allocation2 + $0x3a8] sm:$0xff] %v10647_v49  ;;  %11391 = vst [vmem:[#allocation48_spill] sm:$0xff] %v10660_v33  ;;  %v10686_v41 = vld [vmem:[#allocation2 + $0xd9] sm:$0x1f]  ;;  %v6614_v27 = vld [vmem:[#allocation2 + $0x2a9] sm:$0xff]  ;;  %v10691_v3 = vpop.f32.mrb[123].mxu0 }
 0x263   :  { %5321 = vst [vmem:[#allocation2 + $0x358] sm:$0xff] %v8223_v61  ;;  %5561 = vst [vmem:[#allocation2 + $0x3d0] sm:$0xff] %v10660_v33  ;;  %v6417_v61 = vmax.f32 %v10447_v15, %v6413_v37  ;;  %v6603_v15 = vld [vmem:[#allocation2 + $0x292] sm:$0xff]  ;;  %v10693_v16 = vpop.f32.mrb[123].mxu1  ;;  %v6621_v1 = vld [vmem:[#allocation2 + $0x2a2] sm:$0xff]  ;;  %v6618_v2 = vmax.f32 %v10477_v17, %v6614_v27 }
 0x264   :  { %11392 = vst [vmem:[#allocation49_spill] sm:$0xff] %v10666_v29  ;;  %11393 = vst [vmem:[#allocation50_spill] sm:$0xff] %v10669_v48  ;;  %v6623_v37 = vld [vmem:[#allocation2 + $0x2b2] sm:$0xff]  ;;  %v10709_v8 = vmax.f32 %v6599_v63, %v6603_v15  ;;  %v6602_v22 = vld [vmem:[#allocation2 + $0x28a] sm:$0xff] }
 0x265   :  { %11394 = vst [vmem:[#allocation51_spill] sm:$0xff] %v10672_v28  ;;  %5559 = vst [vmem:[#allocation2 + $0x3c0] sm:$0xff] %v10666_v29  ;;  %v10684_v28 = vmax.f32 %v6416_v58, %v6420_v51  ;;  %v10688_v48 = vmax.f32 %v6417_v61, %v6421_v14  ;;  %v6619_v29 = vmax.f32 %v10456_v24, %v6615_v57  ;;  %v6438_v11 = vld [vmem:[#allocation2 + $0x251] sm:$0xff]  ;;  %v10697_v51 = vld [vmem:[#allocation2 + $0xd9] sm:$0x1f]  ;;  %v10705_v24 = vpop.f32.mrb[124].mxu0 }
 0x266   :  { %5562 = vst [vmem:[#allocation2 + $0x3d8] sm:$0xff] %v8255_v26  ;;  %11395 = vst [vmem:[#allocation52_spill] sm:$0xff] %v10691_v3  ;;  %v10695_v33 = vld [vmem:[#allocation2 + $0xd8] sm:$0x1f]  ;;  %v6597_v26 = vmax.f32 %v10425_v19, %v6593_v35  ;;  %v6598_v61 = vmax.f32 %v10440_v23, %v6594_v54  ;;  %v6601_v14 = vld [vmem:[#allocation2 + $0x282] sm:$0xff]  ;;  %v6617_v58 = vmax.f32 %v10462_v56, %v6613_v13  ;;  %v10713_v23 = vpop.f32.mrb[125].mxu0 }
 0x267   :  { %11396 = vst [vmem:[#allocation53_spill] sm:$0xff] %v10693_v16  ;;  %5319 = vst [vmem:[#allocation2 + $0x348] sm:$0xff] %v10691_v3  ;;  %v6627_v49 = vmax.f32 %v6619_v29, %v6623_v37  ;;  %v6622_v19 = vld [vmem:[#allocation2 + $0x2aa] sm:$0xff]  ;;  %v10715_v54 = vmax.f32 %v5780_v52, %v5784_v20  ;;  %v5889_v3 = vld [vmem:[#allocation2 + $0xf8] sm:$0x1f]  ;;  %v6442_v63 = vmax.f32 %v10470_v42, %v6438_v11  ;;  %v8227_v56 = vpop.f32.mrb[126].mxu0 }
 0x268   :  { %5560 = vst [vmem:[#allocation2 + $0x3c8] sm:$0xff] %v10693_v16  ;;  %11397 = vst [vmem:[#allocation54_spill] sm:$0xff] %v10705_v24  ;;  %v6639_v35 = vld [vmem:[#allocation2 + $0x2d1] sm:$0xff]  ;;  %v10717_v16 = vmax.f32 %v5800_v53, %v5804_v34  ;;  %v6436_v15 = vld [vmem:[#allocation2 + $0x241] sm:$0xff]  ;;  %v5824_v37 = vmax.f32 %v10680_v5, %v10686_v41  ;;  %v10725_v52 = vmax.f32 %v6597_v26, %v6601_v14  ;;  %v10727_v17 = vpop.f32.mrb[127].mxu0 }
 0x269   :  { %5324 = vst [vmem:[#allocation2 + $0x370] sm:$0xff] %v10705_v24  ;;  %11398 = vst [vmem:[#allocation55_spill] sm:$0xff] %v10713_v23  ;;  %v6437_v29 = vld [vmem:[#allocation2 + $0x249] sm:$0xff]  ;;  %v5893_v13 = vld [vmem:[#allocation2 + $0xf9] sm:$0x1f]  ;;  %v6631_v57 = vmax.f32 %v10709_v8, %v6627_v49  ;;  %v6625_v53 = vmax.f32 %v6617_v58, %v6621_v1  ;;  %v10729_v11 = vmax.f32 %v6598_v61, %v6602_v22 }
 0x26a   :  { %5322 = vst [vmem:[#allocation2 + $0x360] sm:$0xff] %v10713_v23  ;;  %v6446_v20 = vld [vmem:[#allocation2 + $0x252] sm:$0xff]  ;;  %5325 = vst [vmem:[#allocation2 + $0x378] sm:$0xff] %v8227_v56  ;;  %v5828_v42 = vld [vmem:[#allocation2 + $0xda] sm:$0x1f]  ;;  %v6626_v23 = vmax.f32 %v6618_v2, %v6622_v19  ;;  %v6643_v5 = vmax.f32 %v10483_v12, %v6639_v35  ;;  %v5877_v49 = vmax.f32 %v10695_v33, %v10697_v51 }
 0x26b   :  { %v6647_v34 = vld [vmem:[#allocation2 + $0x2d2] sm:$0xff]  ;;  %v10731_v24 = vmax.f32 %v6442_v63, %v6446_v20  ;;  %v6637_v41 = vld [vmem:[#allocation2 + $0x2c1] sm:$0xff]  ;;  %5323 = vst [vmem:[#allocation2 + $0x368] sm:$0xff] %v10727_v17  ;;  %v6629_v58 = vmax.f32 %v10725_v52, %v6625_v53  ;;  %v6440_v26 = vmax.f32 %v10491_v31, %v6436_v15  ;;  %v6441_v14 = vmax.f32 %v10504_v40, %v6437_v29  ;;  %v6638_v61 = vld [vmem:[#allocation2 + $0x2c9] sm:$0xff] }
 0x26c   :  { %v5913_v27 = vld [vmem:[#allocation2 + $0x118] sm:$0x1f]  ;;  %v6444_v22 = vld [vmem:[#allocation2 + $0x242] sm:$0xff]  ;;  %v5897_v2 = vmax.f32 %v5889_v3, %v5893_v13  ;;  %v6630_v19 = vmax.f32 %v10729_v11, %v6626_v23  ;;  %v11399_v12 = vmax.f32 %v10637_v45, %v10662_v46  ;;  %v10747_v63 = vmax.f32 %v6643_v5, %v6647_v34  ;;  %v6445_v33 = vld [vmem:[#allocation2 + $0x24a] sm:$0xff] }
 0x26d   :  { %v5917_v1 = vld [vmem:[#allocation2 + $0x119] sm:$0x1f]  ;;  %v6645_v51 = vld [vmem:[#allocation2 + $0x2c2] sm:$0xff]  ;;  %v6504_v56 = vld [vmem:[#allocation2 + $0x271] sm:$0xff]  ;;  %v10749_v15 = vmax.f32 %v6440_v26, %v6444_v22  ;;  %v10751_v40 = vmax.f32 %v6441_v14, %v6445_v33  ;;  %v6641_v3 = vmax.f32 %v10498_v36, %v6637_v41  ;;  %v5832_v29 = vmax.f32 %v5824_v37, %v5828_v42 }
 0x26e   :  { %v10745_v35 = vmax.f32 %v11399_v12, %v10731_v24  ;;  %v5881_v53 = vld [vmem:[#allocation2 + $0xda] sm:$0x1f]  ;;  %v6646_v23 = vld [vmem:[#allocation2 + $0x2ca] sm:$0xff]  ;;  %v5921_v13 = vmax.f32 %v5913_v27, %v5917_v1  ;;  %v10755_v45 = vmax.f32 %v6631_v57, %v10747_v63  ;;  %v6642_v46 = vmax.f32 %v10509_v4, %v6638_v61  ;;  %v6502_v20 = vld [vmem:[#allocation2 + $0x261] sm:$0xff] }
 0x26f   :  { %v5901_v31 = vld [vmem:[#allocation2 + $0xfa] sm:$0x1f]  ;;  %v6503_v34 = vld [vmem:[#allocation2 + $0x269] sm:$0xff]  ;;  %v11400_v26 = vmax.f32 %v10655_v9, %v10684_v28  ;;  %v11401_v36 = vmax.f32 %v10657_v43, %v10688_v48  ;;  %v10772_v57 = vmax.f32 %v6641_v3, %v6645_v51  ;;  %v6508_v4 = vmax.f32 %v10517_v30, %v6504_v56  ;;  %v6512_v28 = vld [vmem:[#allocation2 + $0x272] sm:$0xff] }
 0x270   :  { %v5925_v5 = vld [vmem:[#allocation2 + $0x11a] sm:$0x1f]  ;;  %v5812_v42 = vmax.f32 %v10715_v54, %v10717_v16  ;;  %v5885_v27 = vmax.f32 %v5877_v49, %v5881_v53  ;;  %v5905_v41 = vmax.f32 %v5897_v2, %v5901_v31  ;;  %v10779_v9 = vmax.f32 %v6642_v46, %v6646_v23  ;;  %v6712_v22 = vld [vmem:[#allocation2 + $0x2f1] sm:$0xff]  ;;  %v6710_v54 = vld [vmem:[#allocation2 + $0x2e1] sm:$0xff]  ;;  %v8258_v49 = vpop.f32.mrb[124].mxu1 }
 0x271   :  { %v10758_v12 = vld [vmem:[#allocation2 + $0x118] sm:$0x1f]  ;;  %v10764_v14 = vmax.f32 %v11400_v26, %v10749_v15  ;;  %v10770_v37 = vmax.f32 %v11401_v36, %v10751_v40  ;;  %v10784_v48 = vmax.f32 %v6629_v58, %v10772_v57  ;;  %v6516_v51 = vmax.f32 %v6508_v4, %v6512_v28  ;;  %v6510_v31 = vld [vmem:[#allocation2 + $0x262] sm:$0xff]  ;;  %v6511_v3 = vld [vmem:[#allocation2 + $0x26a] sm:$0xff]  ;;  %v5536_v46 = vpop.f32.mrb[125].mxu1 }
 0x272   :  { %v10777_v1 = vld [vmem:[#allocation2 + $0x119] sm:$0x1f]  ;;  %v6506_v30 = vmax.f32 %v10525_v0, %v6502_v20  ;;  %v6507_v16 = vmax.f32 %v10543_v7, %v6503_v34  ;;  %v10788_v2 = vmax.f32 %v5812_v42, %v5832_v29  ;;  %v5929_v56 = vmax.f32 %v5921_v13, %v5925_v5  ;;  %v6711_v20 = vld [vmem:[#allocation2 + $0x2e9] sm:$0xff]  ;;  %v8259_v29 = vpop.f32.mrb[126].mxu1  ;;  %v6736_v28 = vld [vmem:[#allocation2 + $0x311] sm:$0xff] }
 0x273   :  { %v5995_v61 = vld [vmem:[#allocation2 + $0x138] sm:$0x1f]  ;;  %v10791_v53 = vmax.f32 %v6630_v19, %v10779_v9  ;;  %v6520_v58 = vmax.f32 %v10731_v24, %v6516_v51  ;;  %v6716_v7 = vmax.f32 %v10519_v50, %v6712_v22  ;;  %v6718_v34 = vld [vmem:[#allocation2 + $0x2e2] sm:$0xff]  ;;  %v5909_v4 = vmax.f32 %v5885_v27, %v5905_v41  ;;  %v5539_v49 = vpop.f32.mrb[127].mxu1 }
 0x274   :  { %v5999_v33 = vld [vmem:[#allocation2 + $0x139] sm:$0x1f]  ;;  %v6514_v36 = vmax.f32 %v6506_v30, %v6510_v31  ;;  %v6515_v0 = vmax.f32 %v6507_v16, %v6511_v3  ;;  %v5983_v19 = vmax.f32 %v10758_v12, %v10777_v1  ;;  %v6714_v42 = vmax.f32 %v10550_v39, %v6710_v54  ;;  %v6719_v12 = vld [vmem:[#allocation2 + $0x2ea] sm:$0xff]  ;;  %v6734_v54 = vld [vmem:[#allocation2 + $0x301] sm:$0xff] }
 0x275   :  { %v10781_v43 = vld [vmem:[#allocation2 + $0x198] sm:$0x1f]  ;;  %v6003_v13 = vmax.f32 %v5995_v61, %v5999_v33  ;;  %v10805_v50 = vmax.f32 %v6520_v58, %v10709_v8  ;;  %v10809_v1 = vmax.f32 %v5909_v4, %v5929_v56  ;;  %v6715_v30 = vmax.f32 %v10575_v32, %v6711_v20  ;;  %v6735_v8 = vld [vmem:[#allocation2 + $0x309] sm:$0xff]  ;;  %v6816_v4 = vld [vmem:[#allocation2 + $0x321] sm:$0xff] }
 0x276   :  { %v6720_v23 = vld [vmem:[#allocation2 + $0x2f2] sm:$0xff]  ;;  %v6007_v46 = vld [vmem:[#allocation2 + $0x13a] sm:$0x1f]  ;;  %v6518_v22 = vmax.f32 %v10749_v15, %v6514_v36  ;;  %v6519_v27 = vmax.f32 %v10751_v40, %v6515_v0  ;;  %v6722_v16 = vmax.f32 %v6714_v42, %v6718_v34  ;;  %v6742_v29 = vld [vmem:[#allocation2 + $0x302] sm:$0xff] }
 0x277   :  { %v10793_v26 = vld [vmem:[#allocation2 + $0x199] sm:$0x1f]  ;;  %v6724_v41 = vmax.f32 %v6716_v7, %v6720_v23  ;;  %v6740_v23 = vmax.f32 %v10552_v25, %v6736_v28  ;;  %v6723_v0 = vmax.f32 %v6715_v30, %v6719_v12  ;;  %v6739_v25 = vmax.f32 %v10587_v59, %v6735_v8 }
 0x278   :  { %v10799_v5 = vld [vmem:[#allocation2 + $0x1b8] sm:$0x1f]  ;;  %v6191_v39 = vmax.f32 %v10781_v43, %v10793_v26  ;;  %v10817_v15 = vmax.f32 %v6518_v22, %v10725_v52  ;;  %v10820_v40 = vmax.f32 %v6519_v27, %v10729_v11  ;;  %v10824_v26 = vmax.f32 %v6003_v13, %v6007_v46  ;;  %v6817_v46 = vld [vmem:[#allocation2 + $0x329] sm:$0xff] }
 0x279   :  { %v6207_v24 = vld [vmem:[#allocation2 + $0x1b9] sm:$0x1f]  ;;  %v6728_v56 = vmax.f32 %v10747_v63, %v6724_v41  ;;  %v6818_v43 = vld [vmem:[#allocation2 + $0x331] sm:$0xff]  ;;  %v6726_v7 = vmax.f32 %v10772_v57, %v6722_v16  ;;  %v6738_v63 = vmax.f32 %v10571_v38, %v6734_v54  ;;  %v6727_v57 = vmax.f32 %v10779_v9, %v6723_v0 }
 0x27a   :  { %v10802_v51 = vld [vmem:[#allocation2 + $0x158] sm:$0x1f]  ;;  %v6211_v32 = vmax.f32 %v10799_v5, %v6207_v24  ;;  %v6822_v49 = vmax.f32 %v10594_v55, %v6818_v43  ;;  %v6820_v16 = vmax.f32 %v10601_v10, %v6816_v4  ;;  %v6825_v54 = vld [vmem:[#allocation2 + $0x32a] sm:$0xff] }
 0x27b   :  { %v5987_v61 = vld [vmem:[#allocation2 + $0x11a] sm:$0x1f]  ;;  %v6744_v20 = vld [vmem:[#allocation2 + $0x312] sm:$0xff]  ;;  %v10853_v9 = vmax.f32 %v6738_v63, %v6742_v29  ;;  %v7024_v63 = vld [vmem:[#allocation2 + $0x3a1] sm:$0xff] }
 0x27c   :  { %v10813_v33 = vld [vmem:[#allocation2 + $0x159] sm:$0x1f]  ;;  %v10828_v52 = vmax.f32 %v5983_v19, %v5987_v61  ;;  %v10830_v11 = vmax.f32 %v6740_v23, %v6744_v20  ;;  %v6743_v19 = vld [vmem:[#allocation2 + $0x30a] sm:$0xff]  ;;  %v6824_v61 = vld [vmem:[#allocation2 + $0x322] sm:$0xff]  ;;  %v6821_v23 = vmax.f32 %v10613_v21, %v6817_v46 }
 0x27d   :  { %v6227_v31 = vld [vmem:[#allocation2 + $0x1d8] sm:$0x1f]  ;;  %v6027_v5 = vmax.f32 %v10802_v51, %v10813_v33  ;;  %v10855_v55 = vmax.f32 %v6739_v25, %v6743_v19  ;;  %v10882_v20 = vmax.f32 %v6820_v16, %v6824_v61  ;;  %v7013_v29 = vld [vmem:[#allocation2 + $0x38a] sm:$0xff]  ;;  %v11403_v46 = vld [vmem:[#allocation43_spill] sm:$0xff] }
 0x27e   :  { %v6231_v3 = vld [vmem:[#allocation2 + $0x1d9] sm:$0x1f]  ;;  %v7006_v24 = vld [vmem:[#allocation2 + $0x391] sm:$0xff]  ;;  %v10851_v41 = vmax.f32 %v6728_v56, %v10830_v11  ;;  %v10887_v21 = vmax.f32 %v6821_v23, %v6825_v54  ;;  %v7025_v4 = vld [vmem:[#allocation2 + $0x3a9] sm:$0xff] }
 0x27f   :  { %v6195_v58 = vld [vmem:[#allocation2 + $0x19a] sm:$0x1f]  ;;  %v6235_v42 = vmax.f32 %v6227_v31, %v6231_v3  ;;  %v6826_v12 = vld [vmem:[#allocation2 + $0x332] sm:$0xff]  ;;  %v10869_v3 = vmax.f32 %v6726_v7, %v10853_v9  ;;  %v10872_v56 = vmax.f32 %v6727_v57, %v10855_v55  ;;  %v7010_v43 = vmax.f32 %v10589_v18, %v7006_v24  ;;  %v11405_v54 = vld [vmem:[#allocation44_spill] sm:$0xff] }
 0x280   :  { %v6215_v36 = vld [vmem:[#allocation2 + $0x1ba] sm:$0x1f]  ;;  %v10844_v59 = vmax.f32 %v6191_v39, %v6195_v58  ;;  %v10865_v30 = vmax.f32 %v6822_v49, %v6826_v12  ;;  %v7014_v8 = vld [vmem:[#allocation2 + $0x392] sm:$0xff]  ;;  %v7005_v58 = vld [vmem:[#allocation2 + $0x389] sm:$0xff]  ;;  %v7028_v24 = vmax.f32 %v11403_v46, %v7024_v63 }
 0x281   :  { %v6239_v34 = vld [vmem:[#allocation2 + $0x1da] sm:$0x1f]  ;;  %v7026_v31 = vld [vmem:[#allocation2 + $0x3b1] sm:$0xff]  ;;  %v10889_v25 = vmax.f32 %v7010_v43, %v7014_v8  ;;  %v11406_v8 = vld [vmem:[#allocation32_spill] sm:$0xff] }
 0x282   :  { %v10834_v13 = vld [vmem:[#allocation3 + $0x10] ss:$2 sm:$0x7f]  ;;  %v10878_v0 = vmax.f32 %v6235_v42, %v6239_v34  ;;  %v6834_v10 = vmax.f32 %v10830_v11, %v10865_v30  ;;  %v7030_v34 = vmax.f32 %v10625_v44, %v7026_v31  ;;  %v6832_v42 = vmax.f32 %v10853_v9, %v10882_v20  ;;  %v7048_v46 = vld [vmem:[#allocation2 + $0x3c1] sm:$0xff] }
 0x283   :  { %v10838_v28 = vld [vmem:[#allocation2 + $0x178] sm:$0x1f]  ;;  %5839 = vst [vmem:[#allocation3 + $0x10] sm:$0xff] %v10335_v62  ;;  %5840 = vst [vmem:[#allocation3 + $0x18] sm:$0x1f] %v10788_v2  ;;  %v6015_v62 = vmax.f32 %v10828_v52, %v10824_v26  ;;  %v10859_v2 = vmax.f32 %v6211_v32, %v6215_v36  ;;  %v7004_v26 = vld [vmem:[#allocation2 + $0x381] sm:$0xff] }
 0x284   :  { %v6031_v38 = vld [vmem:[#allocation2 + $0x15a] sm:$0x1f]  ;;  %v10876_v32 = vld [vmem:[#allocation3] ss:$2 sm:$0xff]  ;;  %v7034_v7 = vld [vmem:[#allocation2 + $0x3b2] sm:$0xff] }
 0x285   :  { %v10846_v22 = vld [vmem:[#allocation2 + $0x158] sm:$0x1f]  ;;  %v6035_v36 = vmax.f32 %v6027_v5, %v6031_v38  ;;  %v7012_v52 = vld [vmem:[#allocation2 + $0x382] sm:$0xff]  ;;  %5837 = vst [vmem:[#allocation3] sm:$0xff] %v10365_v47  ;;  %5838 = vst [vmem:[#allocation3 + $0x8] sm:$0xff] %v10384_v60  ;;  %v7008_v47 = vmax.f32 %v10597_v6, %v7004_v26  ;;  %v7038_v49 = vmax.f32 %v7030_v34, %v7034_v7 }
 0x286   :  { %v10848_v51 = vld [vmem:[#allocation2 + $0x159] sm:$0x1f]  ;;  %v6842_v11 = vld [vmem:[#allocation2 + $0x351] sm:$0xff] }
 0x287   :  { %v6096_v27 = vld [vmem:[#allocation2 + $0x179] sm:$0x1f]  ;;  %v6080_v5 = vmax.f32 %v10846_v22, %v10848_v51  ;;  %v11402_v60 = vld [vmem:[#allocation29_spill] sm:$0xff]  ;;  %v10905_v61 = vmax.f32 %v7008_v47, %v7012_v52  ;;  %v6039_v31 = vmax.f32 %v6015_v62, %v6035_v36  ;;  %v7042_v26 = vmax.f32 %v10889_v25, %v7038_v49  ;;  %v11407_v36 = vld [vmem:[#allocation48_spill] sm:$0xff] }
 0x288   :  { %v10861_v39 = vld [vmem:[#allocation2 + $0x198] sm:$0x1f]  ;;  %v6100_v18 = vmax.f32 %v10838_v28, %v6096_v27  ;;  %v7009_v57 = vmax.f32 %v11402_v60, %v7005_v58  ;;  %v7032_v28 = vld [vmem:[#allocation2 + $0x3a2] sm:$0xff]  ;;  %v7033_v38 = vld [vmem:[#allocation2 + $0x3aa] sm:$0xff] }
 0x289   :  { %v10863_v33 = vld [vmem:[#allocation2 + $0x199] sm:$0x1f]  ;;  %v7050_v27 = vld [vmem:[#allocation2 + $0x3d1] sm:$0xff]  ;;  %v7036_v58 = vmax.f32 %v7028_v24, %v7032_v28  ;;  %v7049_v24 = vld [vmem:[#allocation2 + $0x3c9] sm:$0xff] }
 0x28a   :  { %v6124_v19 = vmax.f32 %v10861_v39, %v10863_v33  ;;  %v10903_v22 = vld [vmem:[#allocation3 + $0x10] ss:$2 sm:$0x7f]  ;;  %v10907_v6 = vmax.f32 %v7009_v57, %v7013_v29  ;;  %v6846_v39 = vmax.f32 %v11405_v54, %v6842_v11  ;;  %v6840_v33 = vld [vmem:[#allocation2 + $0x341] sm:$0xff] }
 0x28b   :  { %v6104_v51 = vld [vmem:[#allocation2 + $0x17a] sm:$0x1f]  ;;  %5936 = vst [vmem:[#allocation3 + $0x10] sm:$0xff] %v11406_v8  ;;  %5937 = vst [vmem:[#allocation3 + $0x18] sm:$0x1f] %v10809_v1  ;;  %v6850_v7 = vld [vmem:[#allocation2 + $0x352] sm:$0xff]  ;;  %v7040_v57 = vmax.f32 %v10905_v61, %v7036_v58 }
 0x28c   :  { %v6128_v12 = vld [vmem:[#allocation2 + $0x19a] sm:$0x1f]  ;;  %v10913_v43 = vmax.f32 %v6100_v18, %v6104_v51  ;;  %v7058_v52 = vld [vmem:[#allocation2 + $0x3d2] sm:$0xff]  ;;  %v10925_v1 = vld [vmem:[%s11152_s2] ss:$0 sm:$0xff]  ;;  %v7054_v18 = vmax.f32 %v11407_v36, %v7050_v27  ;;  %s8602_s2 = smov [#allocation9]  }
 0x28d   :  { %v11404_v30 = vld [vmem:[#allocation46_spill] sm:$0xff]  ;;  %v5733_v62 = vadd.f32 %v10925_v1, %v10834_v13  ;;  %v6841_v11 = vld [vmem:[#allocation2 + $0x349] sm:$0xff]  ;;  %v6132_v60 = vmax.f32 %v6124_v19, %v6128_v12  ;;  %v11409_v8 = vld [vmem:[#allocation27_spill] sm:$0xff]  ;;  %s7102_s17 = sshll.u32 %s8602_s2, 4  ;;  %s7103_s17 = int_to_ptr.vmem [resolvable:$true] %s7102_s17 }
 0x28e   :  { %v7029_v16 = vmax.f32 %v11404_v30, %v7025_v4  ;;  %v6084_v23 = vld [vmem:[#allocation2 + $0x15a] sm:$0x1f]  ;;  %v10920_v4 = vmax.f32 %v6846_v39, %v6850_v7  ;;  %v11408_v28 = vld [vmem:[#allocation45_spill] sm:$0xff]  ;;  %v7062_v39 = vmax.f32 %v7054_v18, %v7058_v52  ;;  %v6848_v27 = vld [vmem:[#allocation2 + $0x342] sm:$0xff]  ;;  %s8569_s18 = scalar_lea.vmem %s7103_s17, 5888  ;;  %p8574_p3 = scmp.lt.s32.totalorder %s7103_s17, %s7103_s17 }
 0x28f   :  { %v10916_v63 = vld [vmem:[#allocation2 + $0x1d8] sm:$0x1f]  ;;  %v6088_v47 = vmax.f32 %v6080_v5, %v6084_v23  ;;  %v6844_v49 = vmax.f32 %v11408_v28, %v6840_v33  ;;  %v5735_v13 = vmax.f32 %v5733_v62, 0.0  ;;  %v11411_v33 = vld [vmem:[#allocation52_spill] sm:$0xff]  ;;  %v11412_v62 = vld [vmem:[#allocation49_spill] sm:$0xff]  ;;  %p8570_p2 = scmp.ne.s32.totalorder %s7103_s17, %s8569_s18  ;;  %p8575_p4 = scmp.lt.s32.totalorder %s8569_s18, %s8569_s18 }
 0x290   :  { %v10918_v34 = vld [vmem:[#allocation2 + $0x1d9] sm:$0x1f]  ;;  %v7037_v29 = vmax.f32 %v7029_v16, %v7033_v38  ;;  %v5841_v38 = vld [vmem:[#allocation3] ss:$2 sm:$0xff]  ;;  %v10934_v54 = vmax.f32 %v6834_v10, %v10920_v4  ;;  %v6845_v23 = vmax.f32 %v11411_v33, %v6841_v11  ;;  %v10944_v36 = vmax.f32 %v7042_v26, %v7062_v39  ;;  %v11413_v28 = vld [vmem:[#allocation53_spill] sm:$0xff] }
 0x291   :  { %v6300_v51 = vld [vmem:[#allocation2 + $0x1f8] sm:$0x1f]  ;;  %5934 = vst [vmem:[#allocation3] sm:$0xff] %v11409_v8  ;;  %v6112_v19 = vmax.f32 %v6088_v47, %v10913_v43  ;;  %v6288_v12 = vmax.f32 %v10916_v63, %v10918_v34  ;;  %v10942_v58 = vmax.f32 %v6844_v49, %v6848_v27  ;;  %v7056_v7 = vld [vmem:[#allocation2 + $0x3c2] sm:$0xff]  ;;  %v7465_v10 = vpack.c.bf16 %v5735_v13, %v5735_v13  ;;  %v6849_v52 = vld [vmem:[#allocation2 + $0x34a] sm:$0xff]  ;;  %p8576_p5 = por %p8575_p4, %p8574_p3 }
 0x292   :  { %v6304_v30 = vld [vmem:[#allocation2 + $0x1f9] sm:$0x1f]  ;;  %v7041_v16 = vmax.f32 %v10907_v6, %v7037_v29  ;;  %v7057_v29 = vld [vmem:[#allocation2 + $0x3ca] sm:$0xff]  ;;  %v7052_v18 = vmax.f32 %v11412_v62, %v7048_v46  ;;  %v7053_v8 = vmax.f32 %v11413_v28, %v7049_v24  ;;  %v10948_v44 = vmax.f32 %v6845_v23, %v6849_v52  ;;  %v11414_v46 = vld [vmem:[#allocation35_spill] sm:$0xff] }
 0x293   :  { %v11410_v5 = vld [vmem:[#allocation26_spill] sm:$0xff]  ;;  %v10954_v43 = vmax.f32 %v6832_v42, %v10942_v58  ;;  %v5732_v63 = vadd.f32 %v10925_v1, %v10876_v32  ;;  %v5752_v26 = vshrl.u32 %v7465_v10, 16  ;;  %v5755_v11 = vshll.u32 %v7465_v10, 16  ;;  %v11416_v62 = vld [vmem:[#allocation36_spill] sm:$0xff]  ;;  %p8577_p6 = pnand %p8576_p5, %p8570_p2 }
 0x294   :  { %5935 = vst [vmem:[#allocation3 + $0x8] sm:$0xff] %v11410_v5  ;;  %v6308_v5 = vmax.f32 %v6300_v51, %v6304_v30  ;;  %v5939_v34 = vld [vmem:[#allocation3 + $0x10] ss:$2 sm:$0x7f]  ;;  %v7060_v47 = vmax.f32 %v7052_v18, %v7056_v7  ;;  %v7061_v49 = vmax.f32 %v7053_v8, %v7057_v29  ;;  %v11415_v51 = vmax.f32 %v10855_v55, %v10887_v21  ;;  %v11417_v18 = vld [vmem:[#allocation28_spill] sm:$0xff] }
 0x295   :  { %6042 = vst [vmem:[#allocation3 + $0x10] sm:$0xff] %v11414_v46  ;;  %6043 = vst [vmem:[#allocation3 + $0x18] sm:$0x1f] %v6039_v31  ;;  %v6292_v24 = vld [vmem:[#allocation2 + $0x1da] sm:$0x1f]  ;;  %v5734_v9 = vmax.f32 %v5732_v63, 0.0  ;;  %v5843_v20 = vadd.f32 %v10925_v1, %v5841_v38  ;;  %v5844_v32 = vadd.f32 %v10925_v1, %v10903_v22  ;;  %v5941_v21 = vadd.f32 %v10925_v1, %v5939_v34 }
 0x296   :  { %v10963_v30 = vmax.f32 %v11415_v51, %v10948_v44  ;;  %v6915_v42 = vld [vmem:[#allocation2 + $0x371] sm:$0xff]  ;;  %v5754_v13 = vrot.slane %v5752_v26, 6  ;;  %v5757_v39 = vrot.slane %v5755_v11, 7  ;;  %v10968_v27 = vmax.f32 %v7040_v57, %v7060_v47  ;;  %v6312_v31 = vld [vmem:[#allocation2 + $0x1fa] sm:$0x1f] }
 0x297   :  { %v10970_v33 = vmax.f32 %v7041_v16, %v7061_v49  ;;  %v7464_v23 = vpack.c.bf16 %v5734_v9, %v5734_v9  ;;  %v5845_v7 = vmax.f32 %v5843_v20, 0.0  ;;  %v5846_v55 = vmax.f32 %v5844_v32, 0.0  ;;  %v6324_v52 = vld [vmem:[#allocation2 + $0x218] sm:$0x1f] }
 0x298   :  { %v6136_v10 = vmax.f32 %v6112_v19, %v6132_v60  ;;  %v10975_v38 = vmax.f32 %v6288_v12, %v6292_v24  ;;  %v5758_v22 = vor.u32 %v5757_v39, %v5754_v13  ;;  %v11418_v57 = vld [vmem:[#allocation54_spill] sm:$0xff]  ;;  %v10980_v49 = vmax.f32 %v6308_v5, %v6312_v31  ;;  %v5764_v24 = vld [vmem:[#allocation9 + $0xd4] sm:$0xe] }
 0x299   :  { %v6919_v16 = vmax.f32 %v11418_v57, %v6915_v42  ;;  %v6328_v28 = vld [vmem:[#allocation2 + $0x219] sm:$0x1f]  ;;  %v5743_v8 = vshrl.u32 %v7464_v23, 16  ;;  %v5746_v63 = vshll.u32 %v7464_v23, 16  ;;  %v7466_v26 = vpack.c.bf16 %v5845_v7, %v5845_v7  ;;  %v5863_v42 = vld [vmem:[#allocation9 + $0xe4] sm:$0x7] }
 0x29a   :  { %v7467_v11 = vpack.c.bf16 %v5846_v55, %v5846_v55  ;;  %v6923_v47 = vld [vmem:[#allocation2 + $0x372] sm:$0xff]  ;;  %v5760_v34 = vrot.slane %v5758_v22, 4  ;;  %v5943_v60 = vmax.f32 %v5941_v21, 0.0  ;;  %v6223_v20 = vmax.f32 %v10844_v59, %v10859_v2 }
 0x29b   :  { %v10972_v29 = vld [vmem:[#allocation3] ss:$2 sm:$0xff]  ;;  %v6927_v19 = vmax.f32 %v6919_v16, %v6923_v47  ;;  %v5745_v12 = vrot.slane %v5743_v8, 6  ;;  %v5748_v46 = vrot.slane %v5746_v63, 7  ;;  %v5853_v51 = vrot.slane %v7466_v26, 5  ;;  %v11420_v57 = vld [vmem:[#allocation13_spill] sm:$0xff] }
 0x29c   :  { %6040 = vst [vmem:[#allocation3] sm:$0xff] %v11416_v62  ;;  %6041 = vst [vmem:[#allocation3 + $0x8] sm:$0xff] %v11417_v18  ;;  %v5855_v9 = vrot.slane %v7467_v11, 5  ;;  %v6332_v32 = vmax.f32 %v6324_v52, %v6328_v28  ;;  %v10984_v13 = vpack.c.bf16 %v5943_v60, %v5943_v60  ;;  %v6045_v39 = vld [vmem:[#allocation3 + $0x10] ss:$2 sm:$0x7f]  ;;  %v6247_v59 = vmax.f32 %v6223_v20, %v10878_v0 }
 0x29d   :  { %5768 = vst [vmem:[#allocation9 + $0xdc] sm:$0x1] %v5760_v34  ;;  %v6931_v5 = vmax.f32 %v10920_v4, %v6927_v19  ;;  %v10987_v31 = vld [vmem:[#allocation2 + $0x238] sm:$0x1f]  ;;  %v5749_v7 = vor.u32 %v5748_v46, %v5745_v12  ;;  %v5854_v55 = vrot.slane %v5853_v51, 4  ;;  %v6047_v62 = vadd.f32 %v10925_v1, %v6045_v39  ;;  %v6913_v52 = vld [vmem:[#allocation2 + $0x361] sm:$0xff] }
 0x29e   :  { %v10989_v23 = vld [vmem:[#allocation2 + $0x239] sm:$0x1f]  ;;  %5861 = vst [vmem:[#allocation9 + $0xdc] sm:$0x8] %v5853_v51  ;;  %v5857_v21 = vrot.slane %v5855_v9, 4  ;;  %v6320_v2 = vmax.f32 %v10975_v38, %v10980_v49  ;;  %v5959_v4 = vshrl.u32 %v10984_v13, 16  ;;  %v2146_v16 = vadd.f32 %v10925_v1, %v11420_v57 }
 0x29f   :  { %v11419_v18 = vld [vmem:[#allocation30_spill] sm:$0xff]  ;;  %6140 = vst [vmem:[#allocation3 + $0x18] sm:$0x1f] %v6136_v10  ;;  %v5750_v8 = vrot.slane %v5749_v7, 4  ;;  %v5765_v26 = vsel %vm10035_vm4, %v5749_v7, %v5764_v24  ;;  %v5856_v10 = vsel %vm9591_vm5, %v5854_v55, %v5855_v9  ;;  %v6914_v60 = vld [vmem:[#allocation2 + $0x369] sm:$0xff]  ;;  %v6049_v24 = vmax.f32 %v6047_v62, 0.0 }
 0x2a0   :  { %6139 = vst [vmem:[#allocation3 + $0x10] sm:$0xff] %v11419_v18  ;;  %v6336_v28 = vld [vmem:[#allocation2 + $0x21a] sm:$0x1f]  ;;  %v5864_v0 = vsel %vm10073_vm8, %v5857_v21, %v5863_v42  ;;  %5766 = vst [vmem:[#allocation9 + $0xd4] sm:$0xe] %v5765_v26  ;;  %v11425_v51 = vld [vmem:[#allocation17_spill] sm:$0xff]  ;;  %v11012_v20 = vmax.f32 %v6931_v5, %v10889_v25  ;;  %v6918_v57 = vmax.f32 %v10727_v17, %v6914_v60 }
 0x2a1   :  { %v11005_v19 = vmax.f32 %v6332_v32, %v6336_v28  ;;  %v11424_v46 = vld [vmem:[#allocation38_spill] sm:$0xff]  ;;  %5862 = vst [vmem:[#allocation9 + $0xe0] sm:$0xf] %v5856_v10  ;;  %5865 = vst [vmem:[#allocation9 + $0xe4] sm:$0x7] %v5864_v0  ;;  %v5759_v42 = vsel %vm9371_vm2, %v5750_v8, %v5758_v22  ;;  %v5940_v32 = vadd.f32 %v10925_v1, %v10972_v29  ;;  %v11427_v7 = vld [vmem:[#allocation55_spill] sm:$0xff] }
 0x2a2   :  { %v6917_v55 = vmax.f32 %v11427_v7, %v6913_v52  ;;  %5767 = vst [vmem:[#allocation9 + $0xd8] sm:$0xf] %v5759_v42  ;;  %v5961_v21 = vrot.slane %v5959_v4, 7  ;;  %v11020_v18 = vpack.c.bf16 %v6049_v24, %v6049_v24  ;;  %v6921_v62 = vld [vmem:[#allocation2 + $0x362] sm:$0xff]  ;;  %v2148_v28 = vmax.f32 %v2146_v16, 0.0  ;;  %v6922_v26 = vld [vmem:[#allocation2 + $0x36a] sm:$0xff] }
 0x2a3   :  { %v6044_v11 = vld [vmem:[#allocation3] ss:$2 sm:$0xff]  ;;  %v5942_v25 = vmax.f32 %v5940_v32, 0.0  ;;  %v5962_v29 = vshll.u32 %v10984_v13, 16  ;;  %v6926_v0 = vmax.f32 %v6918_v57, %v6922_v26  ;;  %v6066_v24 = vld [vmem:[#allocation9 + $0xf8] sm:$0x3] }
 0x2a4   :  { %6137 = vst [vmem:[#allocation3] sm:$0xff] %v11424_v46  ;;  %6138 = vst [vmem:[#allocation3 + $0x8] sm:$0xff] %v11425_v51  ;;  %v6046_v39 = vadd.f32 %v10925_v1, %v6044_v11  ;;  %v6925_v10 = vmax.f32 %v6917_v55, %v6921_v62  ;;  %v11428_v22 = vld [vmem:[#allocation19_spill] sm:$0xff]  ;;  %v6058_v11 = vrot.slane %v11020_v18, 6  ;;  %v7432_v4 = vpack.c.bf16 %v2148_v28, %v2148_v28  ;;  %v6391_v46 = vld [vmem:[#allocation2 + $0x218] sm:$0x1f] }
 0x2a5   :  { %v3003_v8 = vadd.f32 %v10925_v1, %v11428_v22  ;;  %v6395_v51 = vld [vmem:[#allocation2 + $0x219] sm:$0x1f]  ;;  %v7468_v60 = vpack.c.bf16 %v5942_v25, %v5942_v25  ;;  %v5964_v13 = vor.u32 %v5962_v29, %v5961_v21  ;;  %v6930_v18 = vmax.f32 %v10948_v44, %v6926_v0  ;;  %v11430_v12 = vld [vmem:[#allocation25_spill] sm:$0xff] }
 0x2a6   :  { %v6048_v5 = vmax.f32 %v6046_v39, 0.0  ;;  %v11429_v16 = vld [vmem:[#allocation18_spill] sm:$0xff]  ;;  %v6929_v32 = vmax.f32 %v10942_v58, %v6925_v10  ;;  %v6060_v55 = vrot.slane %v6058_v11, 4  ;;  %2158 = vst [vmem:[#allocation9 + $0x14] sm:$0xf] %v7432_v4 }
 0x2a7   :  { %v6142_v52 = vld [vmem:[#allocation3 + $0x10] ss:$2 sm:$0x7f]  ;;  %v3005_v57 = vmax.f32 %v3003_v8, 0.0  ;;  %v5951_v26 = vshrl.u32 %v7468_v60, 16  ;;  %v5954_v22 = vshll.u32 %v7468_v60, 16  ;;  %v11040_v44 = vmax.f32 %v6930_v18, %v10907_v6 }
 0x2a8   :  { %v6144_v17 = vadd.f32 %v10925_v1, %v6142_v52  ;;  %6250 = vst [vmem:[#allocation3 + $0x10] sm:$0xff] %v11429_v16  ;;  %6251 = vst [vmem:[#allocation3 + $0x18] sm:$0x1f] %v6247_v59  ;;  %v7470_v42 = vpack.c.bf16 %v6048_v5, %v6048_v5  ;;  %v6435_v39 = vld [vmem:[#allocation2 + $0x258] sm:$0x1f]  ;;  %v11431_v59 = vld [vmem:[#allocation31_spill] sm:$0xff]  ;;  %v6067_v58 = vsel %vm11349_vm13, %v6060_v55, %v6066_v24 }
 0x2a9   :  { %v6439_v7 = vld [vmem:[#allocation2 + $0x259] sm:$0x1f]  ;;  %v11037_v21 = vmax.f32 %v6929_v32, %v10905_v61  ;;  %6068 = vst [vmem:[#allocation9 + $0xf8] sm:$0x3] %v6067_v58  ;;  %v5953_v0 = vrot.slane %v5951_v26, 7  ;;  %v6344_v24 = vmax.f32 %v6320_v2, %v11005_v19 }
 0x2aa   :  { %v6146_v28 = vmax.f32 %v6144_v17, 0.0  ;;  %v6056_v52 = vrot.slane %v7470_v42, 6  ;;  %v6501_v10 = vld [vmem:[#allocation2 + $0x278] sm:$0x1f]  ;;  %v6399_v17 = vmax.f32 %v6391_v46, %v6395_v51  ;;  %v6443_v61 = vmax.f32 %v6435_v39, %v6439_v7  ;;  %v11435_v7 = vld [vmem:[#allocation47_spill] sm:$0xff] }
 0x2ab   :  { %v6141_v62 = vld [vmem:[#allocation3] ss:$2 sm:$0xff]  ;;  %v6505_v8 = vld [vmem:[#allocation2 + $0x279] sm:$0x1f]  ;;  %v5956_v55 = vor.u32 %v5954_v22, %v5953_v0  ;;  %v5957_v18 = vrot.slane %v5953_v0, 4 }
 0x2ac   :  { %6248 = vst [vmem:[#allocation3] sm:$0xff] %v11430_v12  ;;  %6249 = vst [vmem:[#allocation3 + $0x8] sm:$0xff] %v11431_v59  ;;  %v6143_v5 = vadd.f32 %v10925_v1, %v6141_v62  ;;  %v7473_v29 = vpack.c.bf16 %v6146_v28, %v6146_v28  ;;  %v6057_v4 = vrot.slane %v6056_v52, 4  ;;  %v7448_v12 = vpack.c.bf16 %v3005_v57, %v3005_v57  ;;  %v6423_v16 = vld [vmem:[#allocation2 + $0x23a] sm:$0x1f] }
 0x2ad   :  { %6064 = vst [vmem:[#allocation9 + $0xf0] sm:$0xc] %v6056_v52  ;;  %v6481_v60 = vld [vmem:[#allocation2 + $0x258] sm:$0x1f]  ;;  %v5968_v62 = vld [vmem:[#allocation9 + $0xe8] sm:$0xf]  ;;  %v11433_v28 = vmax.f32 %v10987_v31, %v10989_v23  ;;  %v6509_v52 = vmax.f32 %v6501_v10, %v6505_v8  ;;  %v5965_v58 = vsel %vm10099_vm3, %v5957_v18, %v5964_v13 }
 0x2ae   :  { %v6145_v42 = vmax.f32 %v6143_v5, 0.0  ;;  %v6163_v6 = vshll.u32 %v7473_v29, 16  ;;  %v6167_v32 = vshrl.u32 %v7473_v29, 16  ;;  %3015 = vst [vmem:[#allocation9 + $0x60] sm:$0xf] %v7448_v12  ;;  %v6059_v49 = vsel %vm10136_vm6, %v6057_v4, %v6058_v11  ;;  %v11438_v13 = vld [vmem:[#allocation50_spill] sm:$0xff] }
 0x2af   :  { %v6427_v57 = vmax.f32 %v11433_v28, %v6423_v16  ;;  %v6485_v26 = vld [vmem:[#allocation2 + $0x259] sm:$0x1f]  ;;  %6065 = vst [vmem:[#allocation9 + $0xf4] sm:$0xf] %v6059_v49  ;;  %v5969_v8 = vsel %vm10121_vm9, %v5956_v55, %v5968_v62  ;;  %5971 = vst [vmem:[#allocation9 + $0xec] sm:$0xf] %v5965_v58 }
 0x2b0   :  { %v6253_v59 = vld [vmem:[#allocation3 + $0x10] ss:$2 sm:$0x7f]  ;;  %v7472_v2 = vpack.c.bf16 %v6145_v42, %v6145_v42  ;;  %v6165_v46 = vrot.slane %v6163_v6, 5  ;;  %v6169_v51 = vrot.slane %v6167_v32, 4  ;;  %v6489_v4 = vmax.f32 %v6481_v60, %v6485_v26 }
 0x2b1   :  { %v6403_v19 = vld [vmem:[#allocation2 + $0x21a] sm:$0x1f]  ;;  %v6255_v39 = vadd.f32 %v10925_v1, %v6253_v59  ;;  %6347 = vst [vmem:[#allocation3 + $0x10] sm:$0xff] %v11435_v7  ;;  %6348 = vst [vmem:[#allocation3 + $0x18] sm:$0x1f] %v6344_v24 }
 0x2b2   :  { %v6407_v31 = vmax.f32 %v6399_v17, %v6403_v19  ;;  %v6447_v23 = vld [vmem:[#allocation2 + $0x25a] sm:$0x1f]  ;;  %v6154_v11 = vshll.u32 %v7472_v2, 16  ;;  %v6157_v29 = vshrl.u32 %v7472_v2, 16  ;;  %v6170_v42 = vor.u32 %v6169_v51, %v6165_v46  ;;  %5970 = vst [vmem:[#allocation9 + $0xe8] sm:$0xf] %v5969_v8 }
 0x2b3   :  { %v6175_v5 = vld [vmem:[#allocation9 + $0xf8] sm:$0x8]  ;;  %v6451_v0 = vmax.f32 %v6443_v61, %v6447_v23  ;;  %v6252_v16 = vld [vmem:[#allocation3] ss:$2 sm:$0xff]  ;;  %v6257_v6 = vmax.f32 %v6255_v39, 0.0 }
 0x2b4   :  { %v6513_v12 = vld [vmem:[#allocation2 + $0x27a] sm:$0x1f]  ;;  %6345 = vst [vmem:[#allocation3] sm:$0xff] %v11438_v13  ;;  %v11439_v17 = vld [vmem:[#allocation51_spill] sm:$0xff]  ;;  %v6156_v18 = vrot.slane %v6154_v11, 5  ;;  %v6159_v28 = vrot.slane %v6157_v29, 4  ;;  %v6254_v55 = vadd.f32 %v10925_v1, %v6252_v16  ;;  %v6431_v62 = vmax.f32 %v6407_v31, %v6427_v57 }
 0x2b5   :  { %v6525_v24 = vld [vmem:[#allocation2 + $0x298] sm:$0x1f]  ;;  %6346 = vst [vmem:[#allocation3 + $0x8] sm:$0xff] %v11439_v17  ;;  %v6517_v59 = vmax.f32 %v6509_v52, %v6513_v12  ;;  %v6171_v49 = vrot.slane %v6170_v42, 4  ;;  %v7475_v61 = vpack.c.bf16 %v6257_v6, %v6257_v6  ;;  %v6274_v29 = vld [vmem:[#allocation9 + $0x10c] sm:$0x1] }
 0x2b6   :  { %v6529_v32 = vld [vmem:[#allocation2 + $0x299] sm:$0x1f]  ;;  %v6160_v26 = vor.u32 %v6159_v28, %v6156_v18  ;;  %v6176_v19 = vsel %vm11350_vm7, %v6156_v18, %v6175_v5  ;;  %v6256_v51 = vmax.f32 %v6254_v55, 0.0  ;;  %v6455_v58 = vmax.f32 %v6431_v62, %v6451_v0 }
 0x2b7   :  { %v6493_v60 = vld [vmem:[#allocation2 + $0x25a] sm:$0x1f]  ;;  %v6533_v8 = vmax.f32 %v6525_v24, %v6529_v32  ;;  %6179 = vst [vmem:[#allocation9 + $0x100] sm:$0x7] %v6171_v49  ;;  %v6266_v11 = vrot.slane %v7475_v61, 7 }
 0x2b8   :  { %v6592_v39 = vld [vmem:[#allocation2 + $0x298] sm:$0x1f]  ;;  %v6497_v23 = vmax.f32 %v6489_v4, %v6493_v60  ;;  %6177 = vst [vmem:[#allocation9 + $0xf8] sm:$0x8] %v6176_v19  ;;  %v6161_v52 = vrot.slane %v6160_v26, 4  ;;  %v7474_v31 = vpack.c.bf16 %v6256_v51, %v6256_v51 }
 0x2b9   :  { %v6596_v7 = vld [vmem:[#allocation2 + $0x299] sm:$0x1f]  ;;  %v6268_v6 = vrot.slane %v6266_v11, 4 }
 0x2ba   :  { %v6537_v13 = vld [vmem:[#allocation2 + $0x29a] sm:$0x1f]  ;;  %v6521_v42 = vmax.f32 %v6497_v23, %v6517_v59  ;;  %v6166_v4 = vsel %vm10173_vm12, %v6161_v52, %v6165_v46  ;;  %v6264_v24 = vrot.slane %v7474_v31, 7  ;;  %v6600_v62 = vmax.f32 %v6592_v39, %v6596_v7 }
 0x2bb   :  { %v6350_v57 = vld [vmem:[#allocation3 + $0x10] ss:$2 sm:$0x7f]  ;;  %v6541_v32 = vmax.f32 %v6533_v8, %v6537_v13  ;;  %v6275_v28 = vsel %vm10185_vm10, %v6268_v6, %v6274_v29  ;;  %6178 = vst [vmem:[#allocation9 + $0xfc] sm:$0xf] %v6166_v4 }
 0x2bc   :  { %v6612_v12 = vld [vmem:[#allocation2 + $0x2b8] sm:$0x1f]  ;;  %v6352_v5 = vadd.f32 %v10925_v1, %v6350_v57  ;;  %6458 = vst [vmem:[#allocation3 + $0x10] sm:$0xff] %v10745_v35  ;;  %6459 = vst [vmem:[#allocation3 + $0x18] sm:$0x1f] %v6455_v58  ;;  %v6265_v35 = vrot.slane %v6264_v24, 4 }
 0x2bd   :  { %v6616_v16 = vld [vmem:[#allocation2 + $0x2b9] sm:$0x1f]  ;;  %v6349_v17 = vld [vmem:[#allocation3] ss:$2 sm:$0xff]  ;;  %6276 = vst [vmem:[#allocation9 + $0x10c] sm:$0x1] %v6275_v28  ;;  %v6545_v19 = vmax.f32 %v6521_v42, %v6541_v32 }
 0x2be   :  { %v6354_v55 = vmax.f32 %v6352_v5, 0.0  ;;  %v6620_v49 = vmax.f32 %v6612_v12, %v6616_v16  ;;  %v6636_v59 = vld [vmem:[#allocation2 + $0x2d8] sm:$0x1f]  ;;  %6456 = vst [vmem:[#allocation3] sm:$0xff] %v10764_v14  ;;  %6457 = vst [vmem:[#allocation3 + $0x8] sm:$0xff] %v10770_v37  ;;  %v6351_v46 = vadd.f32 %v10925_v1, %v6349_v17  ;;  %v6267_v23 = vsel %vm10191_vm1, %v6265_v35, %v6266_v11 }
 0x2bf   :  { %v6640_v61 = vld [vmem:[#allocation2 + $0x2d9] sm:$0x1f]  ;;  %6272 = vst [vmem:[#allocation9 + $0x104] sm:$0xe] %v6264_v24  ;;  %6273 = vst [vmem:[#allocation9 + $0x108] sm:$0xf] %v6267_v23 }
 0x2c0   :  { %v6604_v60 = vld [vmem:[#allocation2 + $0x29a] sm:$0x1f]  ;;  %v7477_v51 = vpack.c.bf16 %v6354_v55, %v6354_v55  ;;  %v6353_v39 = vmax.f32 %v6351_v46, 0.0  ;;  %v6644_v7 = vmax.f32 %v6636_v59, %v6640_v61 }
 0x2c1   :  { %v6624_v26 = vld [vmem:[#allocation2 + $0x2ba] sm:$0x1f]  ;;  %v6608_v14 = vmax.f32 %v6600_v62, %v6604_v60 }
 0x2c2   :  { %v6371_v8 = vshrl.u32 %v7477_v51, 16  ;;  %v6374_v13 = vshll.u32 %v7477_v51, 16  ;;  %v6628_v29 = vmax.f32 %v6620_v49, %v6624_v26  ;;  %v6648_v37 = vld [vmem:[#allocation2 + $0x2da] sm:$0x1f]  ;;  %v7476_v52 = vpack.c.bf16 %v6353_v39, %v6353_v39  ;;  %v6383_v51 = vld [vmem:[#allocation9 + $0x10c] sm:$0xc] }
 0x2c3   :  { %v6461_v57 = vld [vmem:[#allocation3 + $0x10] ss:$2 sm:$0x7f]  ;;  %v6652_v32 = vmax.f32 %v6644_v7, %v6648_v37 }
 0x2c4   :  { %v6689_v31 = vld [vmem:[#allocation2 + $0x2d8] sm:$0x1f]  ;;  %v6373_v16 = vrot.slane %v6371_v8, 5  ;;  %v6376_v6 = vrot.slane %v6374_v13, 6  ;;  %v6463_v42 = vadd.f32 %v10925_v1, %v6461_v57  ;;  %6548 = vst [vmem:[#allocation3 + $0x10] sm:$0xff] %v10805_v50  ;;  %v6362_v4 = vshrl.u32 %v7476_v52, 16 }
 0x2c5   :  { %v6693_v12 = vld [vmem:[#allocation2 + $0x2d9] sm:$0x1f]  ;;  %6549 = vst [vmem:[#allocation3 + $0x18] sm:$0x1f] %v6545_v19  ;;  %v6365_v24 = vshll.u32 %v7476_v52, 16  ;;  %v6632_v49 = vmax.f32 %v6608_v14, %v6628_v29 }
 0x2c6   :  { %v6709_v11 = vld [vmem:[#allocation2 + $0x2f8] sm:$0x1f]  ;;  %v6460_v28 = vld [vmem:[#allocation3] ss:$2 sm:$0xff]  ;;  %v6377_v55 = vor.u32 %v6376_v6, %v6373_v16  ;;  %v6465_v62 = vmax.f32 %v6463_v42, 0.0  ;;  %v6364_v35 = vrot.slane %v6362_v4, 5  ;;  %v6697_v60 = vmax.f32 %v6689_v31, %v6693_v12 }
 0x2c7   :  { %v6713_v5 = vld [vmem:[#allocation2 + $0x2f9] sm:$0x1f]  ;;  %6546 = vst [vmem:[#allocation3] sm:$0xff] %v10817_v15  ;;  %6547 = vst [vmem:[#allocation3 + $0x8] sm:$0xff] %v10820_v40  ;;  %v6367_v46 = vrot.slane %v6365_v24, 6  ;;  %v6462_v50 = vadd.f32 %v10925_v1, %v6460_v28  ;;  %v6656_v14 = vmax.f32 %v6632_v49, %v6652_v32 }
 0x2c8   :  { %v6733_v17 = vld [vmem:[#allocation2 + $0x318] sm:$0x1f]  ;;  %v6717_v26 = vmax.f32 %v6709_v11, %v6713_v5  ;;  %v6379_v19 = vrot.slane %v6377_v55, 4  ;;  %v7479_v23 = vpack.c.bf16 %v6465_v62, %v6465_v62 }
 0x2c9   :  { %v6737_v59 = vld [vmem:[#allocation2 + $0x319] sm:$0x1f]  ;;  %v6368_v8 = vor.u32 %v6367_v46, %v6364_v35  ;;  %v6464_v13 = vmax.f32 %v6462_v50, 0.0 }
 0x2ca   :  { %v6475_v61 = vld [vmem:[#allocation9 + $0x11c] sm:$0xf]  ;;  %v6741_v29 = vmax.f32 %v6733_v17, %v6737_v59  ;;  %6387 = vst [vmem:[#allocation9 + $0x114] sm:$0x3] %v6379_v19 }
 0x2cb   :  { %v6701_v39 = vld [vmem:[#allocation2 + $0x2da] sm:$0x1f]  ;;  %v6476_v40 = vsel %vm10020_vm15, %v7479_v23, %v6475_v61  ;;  %v6369_v57 = vrot.slane %v6368_v8, 4  ;;  %v6384_v31 = vsel %vm10214_vm11, %v6368_v8, %v6383_v51  ;;  %v7478_v12 = vpack.c.bf16 %v6464_v13, %v6464_v13 }
 0x2cc   :  { %v6721_v7 = vld [vmem:[#allocation2 + $0x2fa] sm:$0x1f]  ;;  %6477 = vst [vmem:[#allocation9 + $0x11c] sm:$0xf] %v6476_v40  ;;  %v6705_v16 = vmax.f32 %v6697_v60, %v6701_v39  ;;  %6385 = vst [vmem:[#allocation9 + $0x10c] sm:$0xc] %v6384_v31 }
 0x2cd   :  { %v6551_v37 = vld [vmem:[#allocation3 + $0x10] ss:$2 sm:$0x7f]  ;;  %v6725_v6 = vmax.f32 %v6717_v26, %v6721_v7  ;;  %v6378_v17 = vsel %vm10231_vm14, %v6369_v57, %v6377_v55  ;;  %6474 = vst [vmem:[#allocation9 + $0x118] sm:$0xf] %v7478_v12 }
 0x2ce   :  { %v6815_v42 = vld [vmem:[#allocation2 + $0x338] sm:$0x1f]  ;;  %v6553_v5 = vadd.f32 %v10925_v1, %v6551_v37  ;;  %6659 = vst [vmem:[#allocation3 + $0x10] sm:$0xff] %v10755_v45  ;;  %6660 = vst [vmem:[#allocation3 + $0x18] sm:$0x1f] %v6656_v14 }
 0x2cf   :  { %v6819_v11 = vld [vmem:[#allocation2 + $0x339] sm:$0x1f]  ;;  %v6550_v49 = vld [vmem:[#allocation3] ss:$2 sm:$0xff]  ;;  %6386 = vst [vmem:[#allocation9 + $0x110] sm:$0xf] %v6378_v17  ;;  %v6729_v45 = vmax.f32 %v6705_v16, %v6725_v6 }
 0x2d0   :  { %v6745_v4 = vld [vmem:[#allocation2 + $0x31a] sm:$0x1f]  ;;  %v6555_v59 = vmax.f32 %v6553_v5, 0.0  ;;  %v6823_v61 = vmax.f32 %v6815_v42, %v6819_v11  ;;  %v6552_v50 = vadd.f32 %v10925_v1, %v6550_v49  ;;  %6657 = vst [vmem:[#allocation3] sm:$0xff] %v10784_v48  ;;  %6658 = vst [vmem:[#allocation3 + $0x8] sm:$0xff] %v10791_v53 }
 0x2d1   :  { %v6795_v24 = vld [vmem:[#allocation2 + $0x318] sm:$0x1f]  ;;  %v6749_v28 = vmax.f32 %v6741_v29, %v6745_v4 }
 0x2d2   :  { %v6799_v62 = vld [vmem:[#allocation2 + $0x319] sm:$0x1f]  ;;  %v7481_v60 = vpack.c.bf16 %v6555_v59, %v6555_v59  ;;  %v6554_v19 = vmax.f32 %v6552_v50, 0.0  ;;  %v6584_v50 = vld [vmem:[#allocation9 + $0x120] sm:$0xe] }
 0x2d3   :  { %v6839_v35 = vld [vmem:[#allocation2 + $0x358] sm:$0x1f]  ;;  %v6803_v26 = vmax.f32 %v6795_v24, %v6799_v62  ;;  %v6753_v23 = vmax.f32 %v6729_v45, %v6749_v28 }
 0x2d4   :  { %v6843_v46 = vld [vmem:[#allocation2 + $0x359] sm:$0x1f]  ;;  %v6572_v8 = vshrl.u32 %v7481_v60, 16  ;;  %v6575_v13 = vshll.u32 %v7481_v60, 16  ;;  %v7480_v15 = vpack.c.bf16 %v6554_v19, %v6554_v19 }
 0x2d5   :  { %v6912_v55 = vld [vmem:[#allocation2 + $0x378] sm:$0x1f]  ;;  %v6847_v7 = vmax.f32 %v6839_v35, %v6843_v46 }
 0x2d6   :  { %v6916_v51 = vld [vmem:[#allocation2 + $0x379] sm:$0x1f]  ;;  %v6574_v48 = vrot.slane %v6572_v8, 6  ;;  %v6577_v52 = vrot.slane %v6575_v13, 7  ;;  %v6563_v6 = vshrl.u32 %v7480_v15, 16  ;;  %v6566_v42 = vshll.u32 %v7480_v15, 16 }
 0x2d7   :  { %v6827_v39 = vld [vmem:[#allocation2 + $0x33a] sm:$0x1f]  ;;  %v6920_v31 = vmax.f32 %v6912_v55, %v6916_v51  ;;  %v6661_v5 = vld [vmem:[#allocation3] ss:$2 sm:$0xff] }
 0x2d8   :  { %v6892_v14 = vld [vmem:[#allocation2 + $0x358] sm:$0x1f]  ;;  %v6831_v29 = vmax.f32 %v6823_v61, %v6827_v39  ;;  %v6578_v4 = vor.u32 %v6577_v52, %v6574_v48  ;;  %v6565_v28 = vrot.slane %v6563_v6, 6  ;;  %v6568_v62 = vrot.slane %v6566_v42, 7  ;;  %6754 = vst [vmem:[#allocation3] sm:$0xff] %v10869_v3  ;;  %6755 = vst [vmem:[#allocation3 + $0x8] sm:$0xff] %v10872_v56 }
 0x2d9   :  { %v6662_v40 = vld [vmem:[#allocation3 + $0x10] ss:$2 sm:$0x7f]  ;;  %v6663_v49 = vadd.f32 %v10925_v1, %v6661_v5 }
 0x2da   :  { %v6896_v37 = vld [vmem:[#allocation2 + $0x359] sm:$0x1f]  ;;  %v6664_v53 = vadd.f32 %v10925_v1, %v6662_v40  ;;  %6756 = vst [vmem:[#allocation3 + $0x10] sm:$0xff] %v10851_v41  ;;  %6757 = vst [vmem:[#allocation3 + $0x18] sm:$0x1f] %v6753_v23  ;;  %v6580_v45 = vrot.slane %v6578_v4, 4  ;;  %v6569_v55 = vor.u32 %v6568_v62, %v6565_v28 }
 0x2db   :  { %v6807_v57 = vld [vmem:[#allocation2 + $0x31a] sm:$0x1f]  ;;  %v6900_v32 = vmax.f32 %v6892_v14, %v6896_v37  ;;  %v6665_v51 = vmax.f32 %v6663_v49, 0.0  ;;  %v6683_v3 = vld [vmem:[#allocation9 + $0x130] sm:$0x7] }
 0x2dc   :  { %v6811_v12 = vmax.f32 %v6803_v26, %v6807_v57  ;;  %v6851_v16 = vld [vmem:[#allocation2 + $0x35a] sm:$0x1f]  ;;  %v6666_v24 = vmax.f32 %v6664_v53, 0.0  ;;  %6588 = vst [vmem:[#allocation9 + $0x128] sm:$0x1] %v6580_v45  ;;  %v6570_v14 = vrot.slane %v6569_v55, 4 }
 0x2dd   :  { %v6855_v11 = vmax.f32 %v6847_v7, %v6851_v16  ;;  %v6924_v17 = vld [vmem:[#allocation2 + $0x37a] sm:$0x1f]  ;;  %v7482_v15 = vpack.c.bf16 %v6665_v51, %v6665_v51 }
 0x2de   :  { %v6936_v41 = vld [vmem:[#allocation2 + $0x398] sm:$0x1f]  ;;  %v6835_v61 = vmax.f32 %v6811_v12, %v6831_v29  ;;  %v7483_v60 = vpack.c.bf16 %v6666_v24, %v6666_v24  ;;  %v6928_v26 = vmax.f32 %v6920_v31, %v6924_v17  ;;  %v6585_v29 = vsel %vm10035_vm4, %v6569_v55, %v6584_v50 }
 0x2df   :  { %v6940_v59 = vld [vmem:[#allocation2 + $0x399] sm:$0x1f]  ;;  %6586 = vst [vmem:[#allocation9 + $0x120] sm:$0xe] %v6585_v29  ;;  %v6673_v12 = vrot.slane %v7482_v15, 5  ;;  %v6579_v16 = vsel %vm9371_vm2, %v6570_v14, %v6578_v4 }
 0x2e0   :  { %v7003_v35 = vld [vmem:[#allocation2 + $0x398] sm:$0x1f]  ;;  %v6859_v7 = vmax.f32 %v6835_v61, %v6855_v11  ;;  %v6675_v8 = vrot.slane %v7483_v60, 5  ;;  %v6944_v56 = vmax.f32 %v6936_v41, %v6940_v59  ;;  %v6758_v42 = vld [vmem:[#allocation3] ss:$2 sm:$0xff] }
 0x2e1   :  { %v7007_v46 = vld [vmem:[#allocation2 + $0x399] sm:$0x1f]  ;;  %6587 = vst [vmem:[#allocation9 + $0x124] sm:$0xf] %v6579_v16  ;;  %6681 = vst [vmem:[#allocation9 + $0x128] sm:$0x8] %v6673_v12  ;;  %v6760_v28 = vadd.f32 %v10925_v1, %v6758_v42 }
 0x2e2   :  { %v7023_v19 = vld [vmem:[#allocation2 + $0x3b8] sm:$0x1f]  ;;  %v6677_v57 = vrot.slane %v6675_v8, 4  ;;  %v7011_v53 = vmax.f32 %v7003_v35, %v7007_v46  ;;  %6860 = vst [vmem:[#allocation3] sm:$0xff] %v10954_v43  ;;  %6861 = vst [vmem:[#allocation3 + $0x8] sm:$0xff] %v10963_v30 }
 0x2e3   :  { %v6904_v23 = vld [vmem:[#allocation2 + $0x35a] sm:$0x1f]  ;;  %v6762_v62 = vmax.f32 %v6760_v28, 0.0 }
 0x2e4   :  { %v7027_v39 = vld [vmem:[#allocation2 + $0x3b9] sm:$0x1f]  ;;  %v6908_v13 = vmax.f32 %v6900_v32, %v6904_v23  ;;  %v6684_v11 = vsel %vm10073_vm8, %v6677_v57, %v6683_v3  ;;  %v6886_v57 = vld [vmem:[#allocation9 + $0x144] sm:$0x3] }
 0x2e5   :  { %v6759_v40 = vld [vmem:[#allocation3 + $0x10] ss:$2 sm:$0x7f]  ;;  %v7031_v6 = vmax.f32 %v7023_v19, %v7027_v39  ;;  %6685 = vst [vmem:[#allocation9 + $0x130] sm:$0x7] %v6684_v11  ;;  %v7484_v46 = vpack.c.bf16 %v6762_v62, %v6762_v62 }
 0x2e6   :  { %v6948_v37 = vld [vmem:[#allocation2 + $0x39a] sm:$0x1f]  ;;  %v6761_v48 = vadd.f32 %v10925_v1, %v6759_v40  ;;  %6862 = vst [vmem:[#allocation3 + $0x10] sm:$0xff] %v10934_v54  ;;  %6863 = vst [vmem:[#allocation3 + $0x18] sm:$0x1f] %v6859_v7  ;;  %v6932_v52 = vmax.f32 %v6908_v13, %v6928_v26  ;;  %v6674_v54 = vrot.slane %v6673_v12, 4 }
 0x2e7   :  { %v7015_v31 = vld [vmem:[#allocation2 + $0x39a] sm:$0x1f]  ;;  %v6952_v24 = vmax.f32 %v6944_v56, %v6948_v37  ;;  %v6771_v30 = vshrl.u32 %v7484_v46, 16  ;;  %v6774_v23 = vshll.u32 %v7484_v46, 16  ;;  %v7094_v46 = vld [vmem:[#allocation9 + $0x158] sm:$0x1] }
 0x2e8   :  { %v7035_v63 = vld [vmem:[#allocation2 + $0x3ba] sm:$0x1f]  ;;  %v6763_v5 = vmax.f32 %v6761_v48, 0.0  ;;  %v6676_v34 = vsel %vm9591_vm5, %v6674_v54, %v6675_v8  ;;  %v7019_v49 = vmax.f32 %v7011_v53, %v7015_v31  ;;  %v6788_v8 = vld [vmem:[#allocation9 + $0x134] sm:$0xf] }
 0x2e9   :  { %v7047_v32 = vld [vmem:[#allocation2 + $0x3d8] sm:$0x1f]  ;;  %v6956_v4 = vmax.f32 %v6932_v52, %v6952_v24  ;;  %v7039_v41 = vmax.f32 %v7031_v6, %v7035_v63  ;;  %6682 = vst [vmem:[#allocation9 + $0x12c] sm:$0xf] %v6676_v34  ;;  %v6864_v47 = vld [vmem:[#allocation3] ss:$2 sm:$0xff] }
 0x2ea   :  { %v7051_v17 = vld [vmem:[#allocation2 + $0x3d9] sm:$0x1f]  ;;  %v7485_v9 = vpack.c.bf16 %v6763_v5, %v6763_v5  ;;  %v6773_v51 = vrot.slane %v6771_v30, 7  ;;  %v6866_v39 = vadd.f32 %v10925_v1, %v6864_v47  ;;  %6957 = vst [vmem:[#allocation3] sm:$0xff] %v11037_v21  ;;  %6958 = vst [vmem:[#allocation3 + $0x8] sm:$0xff] %v11040_v44 }
 0x2eb   :  { %v7055_v59 = vmax.f32 %v7047_v32, %v7051_v17  ;;  %v7059_v35 = vld [vmem:[#allocation2 + $0x3da] sm:$0x1f]  ;;  %v7043_v26 = vmax.f32 %v7019_v49, %v7039_v41 }
 0x2ec   :  { %v6779_v61 = vshrl.u32 %v7485_v9, 16  ;;  %v6782_v60 = vshll.u32 %v7485_v9, 16  ;;  %v6776_v13 = vor.u32 %v6774_v23, %v6773_v51  ;;  %v6868_v56 = vmax.f32 %v6866_v39, 0.0  ;;  %v6995_v9 = vld [vmem:[#allocation9 + $0x144] sm:$0x8] }
 0x2ed   :  { %v6865_v50 = vld [vmem:[#allocation3 + $0x10] ss:$2 sm:$0x7f]  ;;  %v7063_v19 = vmax.f32 %v7055_v59, %v7059_v35 }
 0x2ee   :  { %v6781_v45 = vrot.slane %v6779_v61, 7  ;;  %v6867_v43 = vadd.f32 %v10925_v1, %v6865_v50  ;;  %6959 = vst [vmem:[#allocation3 + $0x10] sm:$0xff] %v11012_v20  ;;  %6960 = vst [vmem:[#allocation3 + $0x18] sm:$0x1f] %v6956_v4  ;;  %v6777_v20 = vrot.slane %v6773_v51, 4  ;;  %v6789_v15 = vsel %vm10121_vm9, %v6776_v13, %v6788_v8 }
 0x2ef   :  { %v7067_v14 = vmax.f32 %v7043_v26, %v7063_v19  ;;  %v7486_v40 = vpack.c.bf16 %v6868_v56, %v6868_v56  ;;  %6790 = vst [vmem:[#allocation9 + $0x134] sm:$0xf] %v6789_v15 }
 0x2f0   :  { %v6869_v55 = vmax.f32 %v6867_v43, 0.0  ;;  %v6784_v7 = vor.u32 %v6782_v60, %v6781_v45 }
 0x2f1   :  { %v6876_v52 = vrot.slane %v7486_v40, 6  ;;  %v6961_v31 = vld [vmem:[#allocation3] ss:$2 sm:$0xff] }
 0x2f2   :  { %v7487_v3 = vpack.c.bf16 %v6869_v55, %v6869_v55  ;;  %v6785_v37 = vsel %vm10099_vm3, %v6777_v20, %v6784_v7  ;;  %v6963_v22 = vadd.f32 %v10925_v1, %v6961_v31  ;;  %7068 = vst [vmem:[#allocation3] sm:$0xff] %v10968_v27  ;;  %7069 = vst [vmem:[#allocation3 + $0x8] sm:$0xff] %v10970_v33 }
 0x2f3   :  { %6791 = vst [vmem:[#allocation9 + $0x138] sm:$0xf] %v6785_v37  ;;  %v6877_v12 = vrot.slane %v6876_v52, 4  ;;  %6884 = vst [vmem:[#allocation9 + $0x13c] sm:$0xc] %v6876_v52 }
 0x2f4   :  { %v6878_v29 = vrot.slane %v7487_v3, 6  ;;  %v6965_v6 = vmax.f32 %v6963_v22, 0.0 }
 0x2f5   :  { %v6962_v48 = vld [vmem:[#allocation3 + $0x10] ss:$2 sm:$0x7f] }
 0x2f6   :  { %v6880_v21 = vrot.slane %v6878_v29, 4  ;;  %v6964_v44 = vadd.f32 %v10925_v1, %v6962_v48  ;;  %7070 = vst [vmem:[#allocation3 + $0x10] sm:$0xff] %v10944_v36  ;;  %7071 = vst [vmem:[#allocation3 + $0x18] sm:$0x1f] %v7067_v14  ;;  %v6879_v36 = vsel %vm10136_vm6, %v6877_v12, %v6878_v29  ;;  %v7488_v11 = vpack.c.bf16 %v6965_v6, %v6965_v6 }
 0x2f7   :  { %6885 = vst [vmem:[#allocation9 + $0x140] sm:$0xf] %v6879_v36 }
 0x2f8   :  { %v6887_v53 = vsel %vm11349_vm13, %v6880_v21, %v6886_v57  ;;  %v6966_v10 = vmax.f32 %v6964_v44, 0.0  ;;  %v6974_v17 = vshll.u32 %v7488_v11, 16  ;;  %v6977_v54 = vshrl.u32 %v7488_v11, 16 }
 0x2f9   :  { %6888 = vst [vmem:[#allocation9 + $0x144] sm:$0x3] %v6887_v53  ;;  %v7072_v33 = vld [vmem:[#allocation3] ss:$2 sm:$0xff] }
 0x2fa   :  { %v7489_v16 = vpack.c.bf16 %v6966_v10, %v6966_v10  ;;  %v6976_v4 = vrot.slane %v6974_v17, 5  ;;  %v6979_v62 = vrot.slane %v6977_v54, 4  ;;  %v7074_v38 = vadd.f32 %v10925_v1, %v7072_v33 }
 0x2fc   :  { %v6983_v63 = vshll.u32 %v7489_v16, 16  ;;  %v6987_v25 = vshrl.u32 %v7489_v16, 16  ;;  %v6980_v41 = vor.u32 %v6979_v62, %v6976_v4  ;;  %v6996_v59 = vsel %vm11350_vm7, %v6976_v4, %v6995_v9 }
 0x2fd   :  { %v7073_v42 = vld [vmem:[#allocation3 + $0x10] ss:$2 sm:$0x7f]  ;;  %v7076_v61 = vmax.f32 %v7074_v38, 0.0  ;;  %6997 = vst [vmem:[#allocation9 + $0x144] sm:$0x8] %v6996_v59 }
 0x2fe   :  { %v6985_v5 = vrot.slane %v6983_v63, 5  ;;  %v6989_v24 = vrot.slane %v6987_v25, 4  ;;  %v7075_v32 = vadd.f32 %v10925_v1, %v7073_v42  ;;  %v6981_v50 = vrot.slane %v6980_v41, 4 }
 0x2ff   :  { %v7490_v45 = vpack.c.bf16 %v7076_v61, %v7076_v61 }
 0x300   :  { %v6990_v28 = vor.u32 %v6989_v24, %v6985_v5  ;;  %v7077_v27 = vmax.f32 %v7075_v32, 0.0  ;;  %v6986_v30 = vsel %vm10173_vm12, %v6981_v50, %v6985_v5 }
 0x301   :  { %v7084_v60 = vrot.slane %v7490_v45, 7  ;;  %6998 = vst [vmem:[#allocation9 + $0x148] sm:$0xf] %v6986_v30 }
 0x302   :  { %v6991_v34 = vrot.slane %v6990_v28, 4  ;;  %v7491_v49 = vpack.c.bf16 %v7077_v27, %v7077_v27 }
 0x303   :  { %v7085_v2 = vrot.slane %v7084_v60, 4  ;;  %7092 = vst [vmem:[#allocation9 + $0x150] sm:$0xe] %v7084_v60 }
 0x304   :  { %6999 = vst [vmem:[#allocation9 + $0x14c] sm:$0x7] %v6991_v34  ;;  %v7086_v35 = vrot.slane %v7491_v49, 7 }
 0x306   :  { %v7088_v43 = vrot.slane %v7086_v35, 4  ;;  %v7087_v26 = vsel %vm10191_vm1, %v7085_v2, %v7086_v35 }
 0x307   :  { %7093 = vst [vmem:[#allocation9 + $0x154] sm:$0xf] %v7087_v26 }
 0x308   :  { %v7095_v1 = vsel %vm10185_vm10, %v7088_v43, %v7094_v46 }
 0x309   :  { %7096 = vst [vmem:[#allocation9 + $0x158] sm:$0x1] %v7095_v1 }
 0x30a   :  { %8580 = shalt.err (!%p8577_p6)
}
 0x30b   :  { %s8581_s21 = scalar_lea.hbm %s11153_s3, 5888 }
 0x30c   :  { %p8582_p7 = scmp.ne.s32.totalorder %s11153_s3, %s8581_s21  ;;  %p8585_p8 = scmp.lt.u32.totalorder %s8581_s21, %s11153_s3 }
 0x30e   :  { %p8587_p9 = pnand %p8585_p8, %p8582_p7 }
 0x310   :  { %8590 = shalt.err (!%p8587_p9)
}
 0x311   :  { %7108 = dma.vmem_to_hbm [thread:$0]  %s7103_s17, 5888, %s11153_s3, [#allocation6], %s8598_s22, %s8598_s22, %s8599_s23  }
 0x312   :  { %8595 = dma.done.wait [#allocation6], 5888  }
 0x313   :  { %8596 = vsyncadd [#allocation6], 4294961408 }
 0x314   :  { %7112 = vsyncpa [#allocation5], 1 }
 0x315   :  { %7113 = vsyncpa [#allocation8], 1 }
 0x316   :  { %7114 = vsyncpa [#allocation6], 1 }

</bundles_post_ra>
